<compile_context>
chip_gen: v5e
topology: v5e:2x2
jax: 0.10.0
libtpu: 0.0.40
codegen_flags: <defaults>
</compile_context>

<pallas_src>
import functools

import jax
import jax.numpy as jnp
from jax.experimental import pallas as pl
from jax.experimental.pallas import tpu as pltpu


def _lrelu(x, slope):
    # LeakyReLU(negative_slope=slope); valid for 0 < slope < 1.
    return jnp.maximum(x, slope * x)


def _sigmoid(x):
    return 1.0 / (1.0 + jnp.exp(-x))


def _tap_masks(H, W):
    """Boundary-validity masks for the 9 taps of a 3x3 'same' conv.

    mask[t][0, h*W+w] == 1  iff the input neighbour (h+dy, w+dx) is in-bounds
    (t = ky*3 + kx, dy = ky-1, dx = kx-1).  Shape (9, 1, H*W), float32.
    """
    rows = jnp.arange(H, dtype=jnp.int32)[:, None]
    cols = jnp.arange(W, dtype=jnp.int32)[None, :]
    ms = []
    for ky in range(3):
        for kx in range(3):
            dy, dx = ky - 1, kx - 1
            ok = ((rows + dy >= 0) & (rows + dy < H) &
                  (cols + dx >= 0) & (cols + dx < W))
            ms.append(ok.astype(jnp.float32).reshape(1, H * W))
    return jnp.stack(ms, axis=0)


# ----------------------------------------------------------------------------
# Fused whole-network kernel (one batch element per grid step).
# Activation layout: (channels, H*W)  -> channels on sublanes, pixels on lanes.
# ----------------------------------------------------------------------------
def _illumnet_kernel(ratio_ref, illum_ref, i_ref, masks_ref,
                     w_in_ref, b_in_ref,
                     rw1_ref, rb1_ref, rw2_ref, rb2_ref,
                     ca_wd_ref, ca_bd_ref, ca_wu_ref, ca_bu_ref,
                     bot_w_ref, bot_b_ref,
                     w_out_ref, b_out_ref, w_fuse_ref,
                     iout_ref, istd_ref,
                     *, H, W, filters, slope):
    F = filters
    HW = H * W
    Fr = ca_bd_ref.shape[1]
    inv_n = 1.0 / float(HW)
    inv_nm1 = 1.0 / float(HW - 1)

    ratio = ratio_ref[0]                 # (1, 1)
    w_param = illum_ref[:, 0:1]          # (1, 1)  Standard_Illum.w
    sigma = illum_ref[:, 1:2]            # (1, 1)  Standard_Illum.sigma
    img = i_ref[0]                       # (1, HW) pixels on the lane axis

    # ---------------- Standard_Illum (the torch.no_grad branch) ------------
    mean = jnp.sum(img, axis=1, keepdims=True) * inv_n
    var = jnp.sum((img - mean) * (img - mean), axis=1, keepdims=True) * inv_nm1
    std = jnp.sqrt(var)                                  # unbiased (torch.std)
    i_min = mean - sigma * std
    i_max = mean + sigma * std
    i_below = jnp.min(img, axis=1, keepdims=True)
    i_top = jnp.max(img, axis=1, keepdims=True)
    r_min = jnp.maximum(i_min, i_below)
    r_max = jnp.minimum(i_max, i_top)
    x01 = jnp.clip((img - r_min) / (r_max - r_min), 0.0, 1.0)
    p = 1.0 / (w_param * ratio) - 1.0                    # (1, 1) exponent
    # x ** p with torch.pow edge cases at x == 0 (0**p>0=0, 0**0=1, 0**p<0=inf)
    pow_pos = jnp.exp(p * jnp.log(jnp.maximum(x01, 1e-30)))
    zero_case = jnp.where(p > 0.0, 0.0, jnp.where(p == 0.0, 1.0, jnp.inf))
    i_standard = jnp.where(x01 > 0.0, pow_pos, zero_case)   # (1, HW)

    i_att = 1.0 - img                                        # (1, HW)

    # ---------------- conv_input: 1x1 conv (3 -> F) + LeakyReLU ------------
    # Cin=3 is pathological for the MXU (K=3): do 3 rank-1 VPU updates instead.
    feat = (w_in_ref[:, 0:1] * img + w_in_ref[:, 1:2] * i_standard
            + w_in_ref[:, 2:3] * i_att + b_in_ref[...])       # (F, HW)
    conv_input = _lrelu(feat, slope)

    masks = [masks_ref[t] for t in range(9)]                  # (1, HW) each

    def conv3x3(x, w_ref, r, b):
        # 3x3 'same' conv: 9 lane-rolled + boundary-masked MXU matmuls.
        # No HBM padding, no strided-slice relayouts; f32 acc stays in vregs.
        cout = b.shape[0]
        acc = jnp.zeros((cout, HW), jnp.float32)
        for ky in range(3):
            for kx in range(3):
                s = (ky - 1) * W + (kx - 1)
                if s == 0:
                    xs = x
                else:
                    xs = pltpu.roll(x, shift=(-s) % HW, axis=1) * masks[ky * 3 + kx]
                acc = acc + jnp.dot(w_ref[r * 9 + ky * 3 + kx], xs,
                                    preferred_element_type=jnp.float32)
        return acc + b

    def res_conv(x, r):
        # TODO(synk): ResConv's exact definition was not provided with the
        # spec; assumed x + lrelu(conv3x3(lrelu(conv3x3(x)))) with pad=1.
        h = _lrelu(conv3x3(x, rw1_ref, r, rb1_ref[r]), slope)
        h = _lrelu(conv3x3(h, rw2_ref, r, rb2_ref[r]), slope)
        return x + h

    def stage(x_a, x_b, r):
        # cat([x_a, x_b], channel) -> ChannelAttention -> scale -> 1x1
        # bottleneck, with the channel concat folded into split weights so no
        # concatenate op is ever materialized.
        # TODO(synk): ChannelAttention assumed SE-style (avg-pool -> 1x1 down
        # -> ReLU -> 1x1 up -> sigmoid); its definition was not in the spec.
        ha = jnp.dot(ca_wd_ref[r, :, 0:F], x_a,
                     preferred_element_type=jnp.float32)      # (Fr, HW)
        hb = jnp.dot(ca_wd_ref[r, :, F:2 * F], x_b,
                     preferred_element_type=jnp.float32)
        h = jnp.maximum(jnp.sum(ha + hb, axis=1, keepdims=True) * inv_n
                        + ca_bd_ref[r], 0.0)                  # (Fr, 1)
        att_pre = ca_bu_ref[r]                                # (2F, 1)
        for j in range(Fr):                                   # tiny, unrolled
            att_pre = att_pre + ca_wu_ref[r, :, j:j + 1] * h[j:j + 1, :]
        att = _sigmoid(att_pre)                               # (2F, 1)
        ya = x_a * att[0:F, :]
        yb = x_b * att[F:2 * F, :]
        return (jnp.dot(bot_w_ref[r, :, 0:F], ya,
                        preferred_element_type=jnp.float32)
                + jnp.dot(bot_w_ref[r, :, F:2 * F], yb,
                          preferred_element_type=jnp.float32)
                + bot_b_ref[r])                               # (F, HW)

    # ---------------- three residual / attention stages ---------------------
    # TODO(synk): MaskMul(1)(x, I_Att) assumed to be x * I_Att (broadcast).
    rb1 = res_conv(conv_input, 0)
    x = stage(rb1, rb1 * i_att, 0)
    rb2 = res_conv(x, 1)
    x = stage(rb2, rb2 * i_att, 1)
    rb3 = res_conv(x, 2)
    res_out = rb3 + conv_input
    x = stage(rb3, res_out * i_att, 2)

    # ---------------- output heads ------------------------------------------
    # conv_out: Conv2d(F, 1, 1) as a channel-weighted sublane reduction.
    conv_out = (jnp.sum(x * w_out_ref[...], axis=0, keepdims=True)
                + b_out_ref[...])                             # (1, HW)
    # fusion: Conv2d(2, 1, 1, bias=False) on cat([conv_out, I_standard]).
    fusion = conv_out * w_fuse_ref[:, 0:1] + i_standard * w_fuse_ref[:, 1:2]
    i_out = _sigmoid(fusion)

    iout_ref[0] = i_out
    istd_ref[0] = i_standard


# ----------------------------------------------------------------------------
# Parameter construction (deterministic; layouts as the kernel expects).
# ----------------------------------------------------------------------------
def init_illumnet_params(key, filters=16, ca_reduction=8, w=0.5, sigma=2.0):
    F = filters
    Fr = max(1, (2 * F) // ca_reduction)

    def u(k, shape, fan_in):
        bound = 1.0 / (float(fan_in) ** 0.5)
        return jax.random.uniform(k, shape, jnp.float32,
                                  minval=-bound, maxval=bound)

    ks = list(jax.random.split(key, 16))
    return {
        "illum": jnp.array([[w, sigma]], jnp.float32),            # (w, sigma)
        # conv_input: Conv2d(3, F, 1) as (Cout, Cin) + (Cout, 1)
        "w_in": u(ks[0], (F, 3), 3), "b_in": u(ks[1], (F, 1), 3),
        # ResConv r: two Conv2d(F, F, 3); taps flat as (3 blocks*9, Cout, Cin)
        "res_w1": u(ks[2], (27, F, F), 9 * F),
        "res_b1": u(ks[3], (3, F, 1), 9 * F),
        "res_w2": u(ks[4], (27, F, F), 9 * F),
        "res_b2": u(ks[5], (3, F, 1), 9 * F),
        # ChannelAttention(2F): down (2F -> Fr), up (Fr -> 2F)
        "ca_wd": u(ks[6], (3, Fr, 2 * F), 2 * F),
        "ca_bd": u(ks[7], (3, Fr, 1), 2 * F),
        "ca_wu": u(ks[8], (3, 2 * F, Fr), Fr),
        "ca_bu": u(ks[9], (3, 2 * F, 1), Fr),
        # bottleneck: Conv2d(2F, F, 1)
        "bot_w": u(ks[10], (3, F, 2 * F), 2 * F),
        "bot_b": u(ks[11], (3, F, 1), 2 * F),
        # conv_out: Conv2d(F, 1, 1)
        "w_out": u(ks[12], (F, 1), F), "b_out": u(ks[13], (1, 1), F),
        # fusion: Conv2d(2, 1, 1, bias=False)
        "w_fuse": u(ks[14], (1, 2), 2),
    }


# ----------------------------------------------------------------------------
# Forward pass (matches IllumNet_Custom.forward): returns (I_out, I_standard).
# ----------------------------------------------------------------------------
def illumnet_forward(I_nchw, ratio, params, *, slope=0.2):
    N, C, H, W = I_nchw.shape
    assert C == 1, "IllumNet_Custom takes a single-channel illumination map"
    HW = H * W
    F = params["w_in"].shape[0]
    Fr = params["ca_wd"].shape[1]

    i_flat = I_nchw.astype(jnp.float32).reshape(N, 1, HW)      # pixels -> lanes
    ratio_arr = jnp.broadcast_to(
        jnp.asarray(ratio, jnp.float32).reshape(-1, 1, 1), (N, 1, 1))
    masks = _tap_masks(H, W)

    def _full(shape):
        zeros = (0,) * len(shape)
        return pl.BlockSpec(shape, lambda n, _z=zeros: _z)

    kernel = functools.partial(_illumnet_kernel, H=H, W=W, filters=F,
                               slope=slope)

    in_specs = [
        pl.BlockSpec((1, 1, 1), lambda n: (n, 0, 0)),          # ratio
        _full((1, 2)),                                         # (w, sigma)
        pl.BlockSpec((1, 1, HW), lambda n: (n, 0, 0)),         # I
        _full((9, 1, HW)),                                     # boundary masks
        _full((F, 3)), _full((F, 1)),                          # conv_input
        _full((27, F, F)), _full((3, F, 1)),                   # ResConv conv1
        _full((27, F, F)), _full((3, F, 1)),                   # ResConv conv2
        _full((3, Fr, 2 * F)), _full((3, Fr, 1)),              # CA down
        _full((3, 2 * F, Fr)), _full((3, 2 * F, 1)),           # CA up
        _full((3, F, 2 * F)), _full((3, F, 1)),                # bottleneck
        _full((F, 1)), _full((1, 1)),                          # conv_out
        _full((1, 2)),                                         # fusion
    ]
    out_spec = pl.BlockSpec((1, 1, HW), lambda n: (n, 0, 0))
    out_shape = (jax.ShapeDtypeStruct((N, 1, HW), jnp.float32),
                 jax.ShapeDtypeStruct((N, 1, HW), jnp.float32))

    i_out, i_standard = pl.pallas_call(
        kernel,
        out_shape=out_shape,
        grid=(N,),
        in_specs=in_specs,
        out_specs=(out_spec, out_spec),
        compiler_params=pltpu.CompilerParams(
            dimension_semantics=("parallel",)),
    )(ratio_arr, params["illum"], i_flat, masks,
      params["w_in"], params["b_in"],
      params["res_w1"], params["res_b1"], params["res_w2"], params["res_b2"],
      params["ca_wd"], params["ca_bd"], params["ca_wu"], params["ca_bu"],
      params["bot_w"], params["bot_b"],
      params["w_out"], params["b_out"], params["w_fuse"])

    return (i_out.reshape(N, 1, H, W), i_standard.reshape(N, 1, H, W))


if __name__ == "__main__":
    key = jax.random.PRNGKey(0)
    k_x, k_p = jax.random.split(key)

    N, H, W = 2, 16, 16
    filters = 16

    # Single-channel illumination map in [0, 1) and a per-sample ratio.
    I = jax.random.uniform(k_x, (N, 1, H, W), jnp.float32)
    ratio = jnp.full((N,), 1.25, jnp.float32)

    params = init_illumnet_params(k_p, filters=filters, w=0.5, sigma=2.0)

    fwd = jax.jit(functools.partial(illumnet_forward, slope=0.2))
    i_out, i_standard = fwd(I, ratio, params)
    jax.block_until_ready((i_out, i_standard))

    assert i_out.shape == (N, 1, H, W), i_out.shape
    assert i_standard.shape == (N, 1, H, W), i_standard.shape
    assert i_out.dtype == jnp.float32 and i_standard.dtype == jnp.float32
    assert bool(jnp.all(jnp.isfinite(i_out)))
    assert bool(jnp.all(jnp.isfinite(i_standard)))
    print("KERNEL_OK")
</pallas_src>

<mosaic_0001>
module attributes {stable_mosaic.version = 11 : i64} {
  func.func @_illumnet_kernel(%arg0: i32, %arg1: memref<1x1x1xf32, #tpu.memory_space<vmem>>, %arg2: memref<1x2xf32, #tpu.memory_space<vmem>>, %arg3: memref<1x1x256xf32, #tpu.memory_space<vmem>>, %arg4: memref<9x1x256xf32, #tpu.memory_space<vmem>>, %arg5: memref<16x3xf32, #tpu.memory_space<vmem>>, %arg6: memref<16x1xf32, #tpu.memory_space<vmem>>, %arg7: memref<27x16x16xf32, #tpu.memory_space<vmem>>, %arg8: memref<3x16x1xf32, #tpu.memory_space<vmem>>, %arg9: memref<27x16x16xf32, #tpu.memory_space<vmem>>, %arg10: memref<3x16x1xf32, #tpu.memory_space<vmem>>, %arg11: memref<3x4x32xf32, #tpu.memory_space<vmem>>, %arg12: memref<3x4x1xf32, #tpu.memory_space<vmem>>, %arg13: memref<3x32x4xf32, #tpu.memory_space<vmem>>, %arg14: memref<3x32x1xf32, #tpu.memory_space<vmem>>, %arg15: memref<3x16x32xf32, #tpu.memory_space<vmem>>, %arg16: memref<3x16x1xf32, #tpu.memory_space<vmem>>, %arg17: memref<16x1xf32, #tpu.memory_space<vmem>>, %arg18: memref<1x1xf32, #tpu.memory_space<vmem>>, %arg19: memref<1x2xf32, #tpu.memory_space<vmem>>, %arg20: memref<1x1x256xf32, #tpu.memory_space<vmem>>, %arg21: memref<1x1x256xf32, #tpu.memory_space<vmem>>) attributes {dimension_semantics = [#tpu.dimension_semantics<parallel>], iteration_bounds = array<i64: 2>, scalar_prefetch = 0 : i64, scratch_operands = 0 : i64, tpu.core_type = #tpu.core_type<tc>, window_params = [{transform_indices = @transform_0, window_bounds = array<i64: 1, 1, 1>}, {pipeline_mode = #tpu.pipeline_mode<synchronous>, transform_indices = @transform_1, window_bounds = array<i64: 1, 2>}, {transform_indices = @transform_2, window_bounds = array<i64: 1, 1, 256>}, {pipeline_mode = #tpu.pipeline_mode<synchronous>, transform_indices = @transform_3, window_bounds = array<i64: 9, 1, 256>}, {pipeline_mode = #tpu.pipeline_mode<synchronous>, transform_indices = @transform_4, window_bounds = array<i64: 16, 3>}, {pipeline_mode = #tpu.pipeline_mode<synchronous>, transform_indices = @transform_5, window_bounds = array<i64: 16, 1>}, {pipeline_mode = #tpu.pipeline_mode<synchronous>, transform_indices = @transform_6, window_bounds = array<i64: 27, 16, 16>}, {pipeline_mode = #tpu.pipeline_mode<synchronous>, transform_indices = @transform_7, window_bounds = array<i64: 3, 16, 1>}, {pipeline_mode = #tpu.pipeline_mode<synchronous>, transform_indices = @transform_8, window_bounds = array<i64: 27, 16, 16>}, {pipeline_mode = #tpu.pipeline_mode<synchronous>, transform_indices = @transform_9, window_bounds = array<i64: 3, 16, 1>}, {pipeline_mode = #tpu.pipeline_mode<synchronous>, transform_indices = @transform_10, window_bounds = array<i64: 3, 4, 32>}, {pipeline_mode = #tpu.pipeline_mode<synchronous>, transform_indices = @transform_11, window_bounds = array<i64: 3, 4, 1>}, {pipeline_mode = #tpu.pipeline_mode<synchronous>, transform_indices = @transform_12, window_bounds = array<i64: 3, 32, 4>}, {pipeline_mode = #tpu.pipeline_mode<synchronous>, transform_indices = @transform_13, window_bounds = array<i64: 3, 32, 1>}, {pipeline_mode = #tpu.pipeline_mode<synchronous>, transform_indices = @transform_14, window_bounds = array<i64: 3, 16, 32>}, {pipeline_mode = #tpu.pipeline_mode<synchronous>, transform_indices = @transform_15, window_bounds = array<i64: 3, 16, 1>}, {pipeline_mode = #tpu.pipeline_mode<synchronous>, transform_indices = @transform_16, window_bounds = array<i64: 16, 1>}, {pipeline_mode = #tpu.pipeline_mode<synchronous>, transform_indices = @transform_17, window_bounds = array<i64: 1, 1>}, {pipeline_mode = #tpu.pipeline_mode<synchronous>, transform_indices = @transform_18, window_bounds = array<i64: 1, 2>}, {transform_indices = @transform_19, window_bounds = array<i64: 1, 1, 256>}, {transform_indices = @transform_20, window_bounds = array<i64: 1, 1, 256>}]} {
    %c0 = arith.constant 0 : index
    %c0_0 = arith.constant 0 : index
    %c0_1 = arith.constant 0 : index
    %0 = vector.load %arg1[%c0, %c0_0, %c0_1] : memref<1x1x1xf32, #tpu.memory_space<vmem>>, vector<1x1x1xf32>
    %1 = vector.shape_cast %0 : vector<1x1x1xf32> to vector<1x1xf32>
    %c0_2 = arith.constant 0 : index
    %c0_3 = arith.constant 0 : index
    %2 = vector.load %arg2[%c0_2, %c0_3] : memref<1x2xf32, #tpu.memory_space<vmem>>, vector<1x1xf32>
    %c0_4 = arith.constant 0 : index
    %c1 = arith.constant 1 : index
    %3 = vector.load %arg2[%c0_4, %c1] : memref<1x2xf32, #tpu.memory_space<vmem>>, vector<1x1xf32>
    %c0_5 = arith.constant 0 : index
    %c0_6 = arith.constant 0 : index
    %c0_7 = arith.constant 0 : index
    %4 = vector.load %arg3[%c0_5, %c0_6, %c0_7] : memref<1x1x256xf32, #tpu.memory_space<vmem>>, vector<1x1x256xf32>
    %5 = vector.shape_cast %4 : vector<1x1x256xf32> to vector<1x256xf32>
    %cst = arith.constant dense<0.000000e+00> : vector<1xf32>
    %6 = vector.multi_reduction <add>, %5, %cst [1] : vector<1x256xf32> to vector<1xf32>
    %7 = vector.shape_cast %6 : vector<1xf32> to vector<1x1xf32>
    %cst_8 = arith.constant 3.906250e-03 : f32
    %8 = vector.broadcast %cst_8 : f32 to vector<1x1xf32>
    %9 = arith.mulf %7, %8 : vector<1x1xf32>
    %10 = vector.broadcast %9 : vector<1x1xf32> to vector<1x256xf32>
    %11 = arith.subf %5, %10 : vector<1x256xf32>
    %12 = vector.broadcast %9 : vector<1x1xf32> to vector<1x256xf32>
    %13 = arith.subf %5, %12 : vector<1x256xf32>
    %14 = arith.mulf %11, %13 : vector<1x256xf32>
    %cst_9 = arith.constant dense<0.000000e+00> : vector<1xf32>
    %15 = vector.multi_reduction <add>, %14, %cst_9 [1] : vector<1x256xf32> to vector<1xf32>
    %16 = vector.shape_cast %15 : vector<1xf32> to vector<1x1xf32>
    %cst_10 = arith.constant 0.00392156886 : f32
    %17 = vector.broadcast %cst_10 : f32 to vector<1x1xf32>
    %18 = arith.mulf %16, %17 : vector<1x1xf32>
    %19 = math.sqrt %18 : vector<1x1xf32>
    %20 = arith.mulf %3, %19 : vector<1x1xf32>
    %21 = arith.subf %9, %20 : vector<1x1xf32>
    %22 = arith.mulf %3, %19 : vector<1x1xf32>
    %23 = arith.addf %9, %22 : vector<1x1xf32>
    %cst_11 = arith.constant dense<0x7F800000> : vector<1xf32>
    %24 = vector.multi_reduction <minimumf>, %5, %cst_11 [1] : vector<1x256xf32> to vector<1xf32>
    %25 = vector.shape_cast %24 : vector<1xf32> to vector<1x1xf32>
    %cst_12 = arith.constant dense<0xFF800000> : vector<1xf32>
    %26 = vector.multi_reduction <maximumf>, %5, %cst_12 [1] : vector<1x256xf32> to vector<1xf32>
    %27 = vector.shape_cast %26 : vector<1xf32> to vector<1x1xf32>
    %28 = arith.maximumf %21, %25 : vector<1x1xf32>
    %29 = arith.minimumf %23, %27 : vector<1x1xf32>
    %30 = vector.broadcast %28 : vector<1x1xf32> to vector<1x256xf32>
    %31 = arith.subf %5, %30 : vector<1x256xf32>
    %32 = arith.subf %29, %28 : vector<1x1xf32>
    %33 = vector.broadcast %32 : vector<1x1xf32> to vector<1x256xf32>
    %34 = arith.divf %31, %33 : vector<1x256xf32>
    %cst_13 = arith.constant 0.000000e+00 : f32
    %cst_14 = arith.constant 1.000000e+00 : f32
    %35 = vector.broadcast %cst_13 : f32 to vector<1x256xf32>
    %36 = arith.maximumf %35, %34 : vector<1x256xf32>
    %37 = vector.broadcast %cst_14 : f32 to vector<1x256xf32>
    %38 = arith.minimumf %37, %36 : vector<1x256xf32>
    %39 = arith.mulf %2, %1 : vector<1x1xf32>
    %cst_15 = arith.constant 1.000000e+00 : f32
    %40 = vector.broadcast %cst_15 : f32 to vector<1x1xf32>
    %41 = arith.divf %40, %39 : vector<1x1xf32>
    %cst_16 = arith.constant 1.000000e+00 : f32
    %42 = vector.broadcast %cst_16 : f32 to vector<1x1xf32>
    %43 = arith.subf %41, %42 : vector<1x1xf32>
    %cst_17 = arith.constant 1.000000e-30 : f32
    %44 = vector.broadcast %cst_17 : f32 to vector<1x256xf32>
    %45 = arith.maximumf %38, %44 : vector<1x256xf32>
    %46 = math.log %45 : vector<1x256xf32>
    %47 = vector.broadcast %43 : vector<1x1xf32> to vector<1x256xf32>
    %48 = arith.mulf %47, %46 : vector<1x256xf32>
    %49 = math.exp %48 : vector<1x256xf32>
    %cst_18 = arith.constant 0.000000e+00 : f32
    %50 = vector.broadcast %cst_18 : f32 to vector<1x1xf32>
    %51 = arith.cmpf ogt, %43, %50 : vector<1x1xf32>
    %cst_19 = arith.constant 0.000000e+00 : f32
    %52 = vector.broadcast %cst_19 : f32 to vector<1x1xf32>
    %53 = arith.cmpf oeq, %43, %52 : vector<1x1xf32>
    %cst_20 = arith.constant 1.000000e+00 : f32
    %cst_21 = arith.constant 0x7F800000 : f32
    %54 = vector.broadcast %cst_20 : f32 to vector<1x1xf32>
    %55 = vector.broadcast %cst_21 : f32 to vector<1x1xf32>
    %56 = arith.select %53, %54, %55 : vector<1x1xi1>, vector<1x1xf32>
    %cst_22 = arith.constant 0.000000e+00 : f32
    %57 = vector.broadcast %cst_22 : f32 to vector<1x1xf32>
    %58 = arith.select %51, %57, %56 : vector<1x1xi1>, vector<1x1xf32>
    %cst_23 = arith.constant 0.000000e+00 : f32
    %59 = vector.broadcast %cst_23 : f32 to vector<1x256xf32>
    %60 = arith.cmpf ogt, %38, %59 : vector<1x256xf32>
    %61 = vector.shape_cast %58 : vector<1x1xf32> to vector<1x1xf32>
    %62 = vector.broadcast %61 : vector<1x1xf32> to vector<1x256xf32>
    %63 = arith.select %60, %49, %62 : vector<1x256xi1>, vector<1x256xf32>
    %cst_24 = arith.constant 1.000000e+00 : f32
    %64 = vector.broadcast %cst_24 : f32 to vector<1x256xf32>
    %65 = arith.subf %64, %5 : vector<1x256xf32>
    %c0_25 = arith.constant 0 : index
    %c0_26 = arith.constant 0 : index
    %66 = vector.load %arg5[%c0_25, %c0_26] : memref<16x3xf32, #tpu.memory_space<vmem>>, vector<16x1xf32>
    %67 = vector.broadcast %66 : vector<16x1xf32> to vector<16x256xf32>
    %68 = vector.broadcast %5 : vector<1x256xf32> to vector<16x256xf32>
    %69 = arith.mulf %67, %68 : vector<16x256xf32>
    %c0_27 = arith.constant 0 : index
    %c1_28 = arith.constant 1 : index
    %70 = vector.load %arg5[%c0_27, %c1_28] : memref<16x3xf32, #tpu.memory_space<vmem>>, vector<16x1xf32>
    %71 = vector.broadcast %70 : vector<16x1xf32> to vector<16x256xf32>
    %72 = vector.broadcast %63 : vector<1x256xf32> to vector<16x256xf32>
    %73 = arith.mulf %71, %72 : vector<16x256xf32>
    %74 = arith.addf %69, %73 : vector<16x256xf32>
    %c0_29 = arith.constant 0 : index
    %c2 = arith.constant 2 : index
    %75 = vector.load %arg5[%c0_29, %c2] : memref<16x3xf32, #tpu.memory_space<vmem>>, vector<16x1xf32>
    %76 = vector.broadcast %75 : vector<16x1xf32> to vector<16x256xf32>
    %77 = vector.broadcast %65 : vector<1x256xf32> to vector<16x256xf32>
    %78 = arith.mulf %76, %77 : vector<16x256xf32>
    %79 = arith.addf %74, %78 : vector<16x256xf32>
    %c0_30 = arith.constant 0 : index
    %c0_31 = arith.constant 0 : index
    %80 = vector.load %arg6[%c0_30, %c0_31] : memref<16x1xf32, #tpu.memory_space<vmem>>, vector<16x1xf32>
    %81 = vector.broadcast %80 : vector<16x1xf32> to vector<16x256xf32>
    %82 = arith.addf %79, %81 : vector<16x256xf32>
    %cst_32 = arith.constant 2.000000e-01 : f32
    %83 = vector.broadcast %cst_32 : f32 to vector<16x256xf32>
    %84 = arith.mulf %83, %82 : vector<16x256xf32>
    %85 = arith.maximumf %82, %84 : vector<16x256xf32>
    %c0_33 = arith.constant 0 : index
    %c0_34 = arith.constant 0 : index
    %c0_35 = arith.constant 0 : index
    %86 = vector.load %arg4[%c0_33, %c0_34, %c0_35] : memref<9x1x256xf32, #tpu.memory_space<vmem>>, vector<1x1x256xf32>
    %87 = vector.shape_cast %86 : vector<1x1x256xf32> to vector<1x256xf32>
    %c1_36 = arith.constant 1 : index
    %c0_37 = arith.constant 0 : index
    %c0_38 = arith.constant 0 : index
    %88 = vector.load %arg4[%c1_36, %c0_37, %c0_38] : memref<9x1x256xf32, #tpu.memory_space<vmem>>, vector<1x1x256xf32>
    %89 = vector.shape_cast %88 : vector<1x1x256xf32> to vector<1x256xf32>
    %c2_39 = arith.constant 2 : index
    %c0_40 = arith.constant 0 : index
    %c0_41 = arith.constant 0 : index
    %90 = vector.load %arg4[%c2_39, %c0_40, %c0_41] : memref<9x1x256xf32, #tpu.memory_space<vmem>>, vector<1x1x256xf32>
    %91 = vector.shape_cast %90 : vector<1x1x256xf32> to vector<1x256xf32>
    %c3 = arith.constant 3 : index
    %c0_42 = arith.constant 0 : index
    %c0_43 = arith.constant 0 : index
    %92 = vector.load %arg4[%c3, %c0_42, %c0_43] : memref<9x1x256xf32, #tpu.memory_space<vmem>>, vector<1x1x256xf32>
    %93 = vector.shape_cast %92 : vector<1x1x256xf32> to vector<1x256xf32>
    %c5 = arith.constant 5 : index
    %c0_44 = arith.constant 0 : index
    %c0_45 = arith.constant 0 : index
    %94 = vector.load %arg4[%c5, %c0_44, %c0_45] : memref<9x1x256xf32, #tpu.memory_space<vmem>>, vector<1x1x256xf32>
    %95 = vector.shape_cast %94 : vector<1x1x256xf32> to vector<1x256xf32>
    %c6 = arith.constant 6 : index
    %c0_46 = arith.constant 0 : index
    %c0_47 = arith.constant 0 : index
    %96 = vector.load %arg4[%c6, %c0_46, %c0_47] : memref<9x1x256xf32, #tpu.memory_space<vmem>>, vector<1x1x256xf32>
    %97 = vector.shape_cast %96 : vector<1x1x256xf32> to vector<1x256xf32>
    %c7 = arith.constant 7 : index
    %c0_48 = arith.constant 0 : index
    %c0_49 = arith.constant 0 : index
    %98 = vector.load %arg4[%c7, %c0_48, %c0_49] : memref<9x1x256xf32, #tpu.memory_space<vmem>>, vector<1x1x256xf32>
    %99 = vector.shape_cast %98 : vector<1x1x256xf32> to vector<1x256xf32>
    %c8 = arith.constant 8 : index
    %c0_50 = arith.constant 0 : index
    %c0_51 = arith.constant 0 : index
    %100 = vector.load %arg4[%c8, %c0_50, %c0_51] : memref<9x1x256xf32, #tpu.memory_space<vmem>>, vector<1x1x256xf32>
    %101 = vector.shape_cast %100 : vector<1x1x256xf32> to vector<1x256xf32>
    %c0_52 = arith.constant 0 : index
    %c0_53 = arith.constant 0 : index
    %c0_54 = arith.constant 0 : index
    %102 = vector.load %arg8[%c0_52, %c0_53, %c0_54] : memref<3x16x1xf32, #tpu.memory_space<vmem>>, vector<1x16x1xf32>
    %103 = vector.shape_cast %102 : vector<1x16x1xf32> to vector<16x1xf32>
    %cst_55 = arith.constant 0.000000e+00 : f32
    %104 = vector.broadcast %cst_55 : f32 to vector<16x256xf32>
    %c17_i32 = arith.constant 17 : i32
    %105 = tpu.dynamic_rotate %85 by %c17_i32 dim 1 : vector<16x256xf32>, i32 -> vector<16x256xf32>
    %106 = vector.broadcast %87 : vector<1x256xf32> to vector<16x256xf32>
    %107 = arith.mulf %105, %106 : vector<16x256xf32>
    %c0_56 = arith.constant 0 : index
    %c0_57 = arith.constant 0 : index
    %c0_58 = arith.constant 0 : index
    %108 = vector.load %arg7[%c0_56, %c0_57, %c0_58] : memref<27x16x16xf32, #tpu.memory_space<vmem>>, vector<1x16x16xf32>
    %109 = vector.shape_cast %108 : vector<1x16x16xf32> to vector<16x16xf32>
    %cst_59 = arith.constant dense<0.000000e+00> : vector<16x256xf32>
    %110 = tpu.matmul %109, %107, %cst_59 {dimension_numbers = #tpu.dot_dimension_numbers<[1], [0], [0], [1], [0, 0, 1, 1], [], []>} : vector<16x16xf32>, vector<16x256xf32>, vector<16x256xf32> -> vector<16x256xf32>
    %111 = arith.addf %104, %110 : vector<16x256xf32>
    %c16_i32 = arith.constant 16 : i32
    %112 = tpu.dynamic_rotate %85 by %c16_i32 dim 1 : vector<16x256xf32>, i32 -> vector<16x256xf32>
    %113 = vector.broadcast %89 : vector<1x256xf32> to vector<16x256xf32>
    %114 = arith.mulf %112, %113 : vector<16x256xf32>
    %c1_60 = arith.constant 1 : index
    %c0_61 = arith.constant 0 : index
    %c0_62 = arith.constant 0 : index
    %115 = vector.load %arg7[%c1_60, %c0_61, %c0_62] : memref<27x16x16xf32, #tpu.memory_space<vmem>>, vector<1x16x16xf32>
    %116 = vector.shape_cast %115 : vector<1x16x16xf32> to vector<16x16xf32>
    %cst_63 = arith.constant dense<0.000000e+00> : vector<16x256xf32>
    %117 = tpu.matmul %116, %114, %cst_63 {dimension_numbers = #tpu.dot_dimension_numbers<[1], [0], [0], [1], [0, 0, 1, 1], [], []>} : vector<16x16xf32>, vector<16x256xf32>, vector<16x256xf32> -> vector<16x256xf32>
    %118 = arith.addf %111, %117 : vector<16x256xf32>
    %c15_i32 = arith.constant 15 : i32
    %119 = tpu.dynamic_rotate %85 by %c15_i32 dim 1 : vector<16x256xf32>, i32 -> vector<16x256xf32>
    %120 = vector.broadcast %91 : vector<1x256xf32> to vector<16x256xf32>
    %121 = arith.mulf %119, %120 : vector<16x256xf32>
    %c2_64 = arith.constant 2 : index
    %c0_65 = arith.constant 0 : index
    %c0_66 = arith.constant 0 : index
    %122 = vector.load %arg7[%c2_64, %c0_65, %c0_66] : memref<27x16x16xf32, #tpu.memory_space<vmem>>, vector<1x16x16xf32>
    %123 = vector.shape_cast %122 : vector<1x16x16xf32> to vector<16x16xf32>
    %cst_67 = arith.constant dense<0.000000e+00> : vector<16x256xf32>
    %124 = tpu.matmul %123, %121, %cst_67 {dimension_numbers = #tpu.dot_dimension_numbers<[1], [0], [0], [1], [0, 0, 1, 1], [], []>} : vector<16x16xf32>, vector<16x256xf32>, vector<16x256xf32> -> vector<16x256xf32>
    %125 = arith.addf %118, %124 : vector<16x256xf32>
    %c1_i32 = arith.constant 1 : i32
    %126 = tpu.dynamic_rotate %85 by %c1_i32 dim 1 : vector<16x256xf32>, i32 -> vector<16x256xf32>
    %127 = vector.broadcast %93 : vector<1x256xf32> to vector<16x256xf32>
    %128 = arith.mulf %126, %127 : vector<16x256xf32>
    %c3_68 = arith.constant 3 : index
    %c0_69 = arith.constant 0 : index
    %c0_70 = arith.constant 0 : index
    %129 = vector.load %arg7[%c3_68, %c0_69, %c0_70] : memref<27x16x16xf32, #tpu.memory_space<vmem>>, vector<1x16x16xf32>
    %130 = vector.shape_cast %129 : vector<1x16x16xf32> to vector<16x16xf32>
    %cst_71 = arith.constant dense<0.000000e+00> : vector<16x256xf32>
    %131 = tpu.matmul %130, %128, %cst_71 {dimension_numbers = #tpu.dot_dimension_numbers<[1], [0], [0], [1], [0, 0, 1, 1], [], []>} : vector<16x16xf32>, vector<16x256xf32>, vector<16x256xf32> -> vector<16x256xf32>
    %132 = arith.addf %125, %131 : vector<16x256xf32>
    %c4 = arith.constant 4 : index
    %c0_72 = arith.constant 0 : index
    %c0_73 = arith.constant 0 : index
    %133 = vector.load %arg7[%c4, %c0_72, %c0_73] : memref<27x16x16xf32, #tpu.memory_space<vmem>>, vector<1x16x16xf32>
    %134 = vector.shape_cast %133 : vector<1x16x16xf32> to vector<16x16xf32>
    %cst_74 = arith.constant dense<0.000000e+00> : vector<16x256xf32>
    %135 = tpu.matmul %134, %85, %cst_74 {dimension_numbers = #tpu.dot_dimension_numbers<[1], [0], [0], [1], [0, 0, 1, 1], [], []>} : vector<16x16xf32>, vector<16x256xf32>, vector<16x256xf32> -> vector<16x256xf32>
    %136 = arith.addf %132, %135 : vector<16x256xf32>
    %c255_i32 = arith.constant 255 : i32
    %137 = tpu.dynamic_rotate %85 by %c255_i32 dim 1 : vector<16x256xf32>, i32 -> vector<16x256xf32>
    %138 = vector.broadcast %95 : vector<1x256xf32> to vector<16x256xf32>
    %139 = arith.mulf %137, %138 : vector<16x256xf32>
    %c5_75 = arith.constant 5 : index
    %c0_76 = arith.constant 0 : index
    %c0_77 = arith.constant 0 : index
    %140 = vector.load %arg7[%c5_75, %c0_76, %c0_77] : memref<27x16x16xf32, #tpu.memory_space<vmem>>, vector<1x16x16xf32>
    %141 = vector.shape_cast %140 : vector<1x16x16xf32> to vector<16x16xf32>
    %cst_78 = arith.constant dense<0.000000e+00> : vector<16x256xf32>
    %142 = tpu.matmul %141, %139, %cst_78 {dimension_numbers = #tpu.dot_dimension_numbers<[1], [0], [0], [1], [0, 0, 1, 1], [], []>} : vector<16x16xf32>, vector<16x256xf32>, vector<16x256xf32> -> vector<16x256xf32>
    %143 = arith.addf %136, %142 : vector<16x256xf32>
    %c241_i32 = arith.constant 241 : i32
    %144 = tpu.dynamic_rotate %85 by %c241_i32 dim 1 : vector<16x256xf32>, i32 -> vector<16x256xf32>
    %145 = vector.broadcast %97 : vector<1x256xf32> to vector<16x256xf32>
    %146 = arith.mulf %144, %145 : vector<16x256xf32>
    %c6_79 = arith.constant 6 : index
    %c0_80 = arith.constant 0 : index
    %c0_81 = arith.constant 0 : index
    %147 = vector.load %arg7[%c6_79, %c0_80, %c0_81] : memref<27x16x16xf32, #tpu.memory_space<vmem>>, vector<1x16x16xf32>
    %148 = vector.shape_cast %147 : vector<1x16x16xf32> to vector<16x16xf32>
    %cst_82 = arith.constant dense<0.000000e+00> : vector<16x256xf32>
    %149 = tpu.matmul %148, %146, %cst_82 {dimension_numbers = #tpu.dot_dimension_numbers<[1], [0], [0], [1], [0, 0, 1, 1], [], []>} : vector<16x16xf32>, vector<16x256xf32>, vector<16x256xf32> -> vector<16x256xf32>
    %150 = arith.addf %143, %149 : vector<16x256xf32>
    %c240_i32 = arith.constant 240 : i32
    %151 = tpu.dynamic_rotate %85 by %c240_i32 dim 1 : vector<16x256xf32>, i32 -> vector<16x256xf32>
    %152 = vector.broadcast %99 : vector<1x256xf32> to vector<16x256xf32>
    %153 = arith.mulf %151, %152 : vector<16x256xf32>
    %c7_83 = arith.constant 7 : index
    %c0_84 = arith.constant 0 : index
    %c0_85 = arith.constant 0 : index
    %154 = vector.load %arg7[%c7_83, %c0_84, %c0_85] : memref<27x16x16xf32, #tpu.memory_space<vmem>>, vector<1x16x16xf32>
    %155 = vector.shape_cast %154 : vector<1x16x16xf32> to vector<16x16xf32>
    %cst_86 = arith.constant dense<0.000000e+00> : vector<16x256xf32>
    %156 = tpu.matmul %155, %153, %cst_86 {dimension_numbers = #tpu.dot_dimension_numbers<[1], [0], [0], [1], [0, 0, 1, 1], [], []>} : vector<16x16xf32>, vector<16x256xf32>, vector<16x256xf32> -> vector<16x256xf32>
    %157 = arith.addf %150, %156 : vector<16x256xf32>
    %c239_i32 = arith.constant 239 : i32
    %158 = tpu.dynamic_rotate %85 by %c239_i32 dim 1 : vector<16x256xf32>, i32 -> vector<16x256xf32>
    %159 = vector.broadcast %101 : vector<1x256xf32> to vector<16x256xf32>
    %160 = arith.mulf %158, %159 : vector<16x256xf32>
    %c8_87 = arith.constant 8 : index
    %c0_88 = arith.constant 0 : index
    %c0_89 = arith.constant 0 : index
    %161 = vector.load %arg7[%c8_87, %c0_88, %c0_89] : memref<27x16x16xf32, #tpu.memory_space<vmem>>, vector<1x16x16xf32>
    %162 = vector.shape_cast %161 : vector<1x16x16xf32> to vector<16x16xf32>
    %cst_90 = arith.constant dense<0.000000e+00> : vector<16x256xf32>
    %163 = tpu.matmul %162, %160, %cst_90 {dimension_numbers = #tpu.dot_dimension_numbers<[1], [0], [0], [1], [0, 0, 1, 1], [], []>} : vector<16x16xf32>, vector<16x256xf32>, vector<16x256xf32> -> vector<16x256xf32>
    %164 = arith.addf %157, %163 : vector<16x256xf32>
    %165 = vector.broadcast %103 : vector<16x1xf32> to vector<16x256xf32>
    %166 = arith.addf %164, %165 : vector<16x256xf32>
    %cst_91 = arith.constant 2.000000e-01 : f32
    %167 = vector.broadcast %cst_91 : f32 to vector<16x256xf32>
    %168 = arith.mulf %167, %166 : vector<16x256xf32>
    %169 = arith.maximumf %166, %168 : vector<16x256xf32>
    %c0_92 = arith.constant 0 : index
    %c0_93 = arith.constant 0 : index
    %c0_94 = arith.constant 0 : index
    %170 = vector.load %arg10[%c0_92, %c0_93, %c0_94] : memref<3x16x1xf32, #tpu.memory_space<vmem>>, vector<1x16x1xf32>
    %171 = vector.shape_cast %170 : vector<1x16x1xf32> to vector<16x1xf32>
    %cst_95 = arith.constant 0.000000e+00 : f32
    %172 = vector.broadcast %cst_95 : f32 to vector<16x256xf32>
    %c17_i32_96 = arith.constant 17 : i32
    %173 = tpu.dynamic_rotate %169 by %c17_i32_96 dim 1 : vector<16x256xf32>, i32 -> vector<16x256xf32>
    %174 = vector.broadcast %87 : vector<1x256xf32> to vector<16x256xf32>
    %175 = arith.mulf %173, %174 : vector<16x256xf32>
    %c0_97 = arith.constant 0 : index
    %c0_98 = arith.constant 0 : index
    %c0_99 = arith.constant 0 : index
    %176 = vector.load %arg9[%c0_97, %c0_98, %c0_99] : memref<27x16x16xf32, #tpu.memory_space<vmem>>, vector<1x16x16xf32>
    %177 = vector.shape_cast %176 : vector<1x16x16xf32> to vector<16x16xf32>
    %cst_100 = arith.constant dense<0.000000e+00> : vector<16x256xf32>
    %178 = tpu.matmul %177, %175, %cst_100 {dimension_numbers = #tpu.dot_dimension_numbers<[1], [0], [0], [1], [0, 0, 1, 1], [], []>} : vector<16x16xf32>, vector<16x256xf32>, vector<16x256xf32> -> vector<16x256xf32>
    %179 = arith.addf %172, %178 : vector<16x256xf32>
    %c16_i32_101 = arith.constant 16 : i32
    %180 = tpu.dynamic_rotate %169 by %c16_i32_101 dim 1 : vector<16x256xf32>, i32 -> vector<16x256xf32>
    %181 = vector.broadcast %89 : vector<1x256xf32> to vector<16x256xf32>
    %182 = arith.mulf %180, %181 : vector<16x256xf32>
    %c1_102 = arith.constant 1 : index
    %c0_103 = arith.constant 0 : index
    %c0_104 = arith.constant 0 : index
    %183 = vector.load %arg9[%c1_102, %c0_103, %c0_104] : memref<27x16x16xf32, #tpu.memory_space<vmem>>, vector<1x16x16xf32>
    %184 = vector.shape_cast %183 : vector<1x16x16xf32> to vector<16x16xf32>
    %cst_105 = arith.constant dense<0.000000e+00> : vector<16x256xf32>
    %185 = tpu.matmul %184, %182, %cst_105 {dimension_numbers = #tpu.dot_dimension_numbers<[1], [0], [0], [1], [0, 0, 1, 1], [], []>} : vector<16x16xf32>, vector<16x256xf32>, vector<16x256xf32> -> vector<16x256xf32>
    %186 = arith.addf %179, %185 : vector<16x256xf32>
    %c15_i32_106 = arith.constant 15 : i32
    %187 = tpu.dynamic_rotate %169 by %c15_i32_106 dim 1 : vector<16x256xf32>, i32 -> vector<16x256xf32>
    %188 = vector.broadcast %91 : vector<1x256xf32> to vector<16x256xf32>
    %189 = arith.mulf %187, %188 : vector<16x256xf32>
    %c2_107 = arith.constant 2 : index
    %c0_108 = arith.constant 0 : index
    %c0_109 = arith.constant 0 : index
    %190 = vector.load %arg9[%c2_107, %c0_108, %c0_109] : memref<27x16x16xf32, #tpu.memory_space<vmem>>, vector<1x16x16xf32>
    %191 = vector.shape_cast %190 : vector<1x16x16xf32> to vector<16x16xf32>
    %cst_110 = arith.constant dense<0.000000e+00> : vector<16x256xf32>
    %192 = tpu.matmul %191, %189, %cst_110 {dimension_numbers = #tpu.dot_dimension_numbers<[1], [0], [0], [1], [0, 0, 1, 1], [], []>} : vector<16x16xf32>, vector<16x256xf32>, vector<16x256xf32> -> vector<16x256xf32>
    %193 = arith.addf %186, %192 : vector<16x256xf32>
    %c1_i32_111 = arith.constant 1 : i32
    %194 = tpu.dynamic_rotate %169 by %c1_i32_111 dim 1 : vector<16x256xf32>, i32 -> vector<16x256xf32>
    %195 = vector.broadcast %93 : vector<1x256xf32> to vector<16x256xf32>
    %196 = arith.mulf %194, %195 : vector<16x256xf32>
    %c3_112 = arith.constant 3 : index
    %c0_113 = arith.constant 0 : index
    %c0_114 = arith.constant 0 : index
    %197 = vector.load %arg9[%c3_112, %c0_113, %c0_114] : memref<27x16x16xf32, #tpu.memory_space<vmem>>, vector<1x16x16xf32>
    %198 = vector.shape_cast %197 : vector<1x16x16xf32> to vector<16x16xf32>
    %cst_115 = arith.constant dense<0.000000e+00> : vector<16x256xf32>
    %199 = tpu.matmul %198, %196, %cst_115 {dimension_numbers = #tpu.dot_dimension_numbers<[1], [0], [0], [1], [0, 0, 1, 1], [], []>} : vector<16x16xf32>, vector<16x256xf32>, vector<16x256xf32> -> vector<16x256xf32>
    %200 = arith.addf %193, %199 : vector<16x256xf32>
    %c4_116 = arith.constant 4 : index
    %c0_117 = arith.constant 0 : index
    %c0_118 = arith.constant 0 : index
    %201 = vector.load %arg9[%c4_116, %c0_117, %c0_118] : memref<27x16x16xf32, #tpu.memory_space<vmem>>, vector<1x16x16xf32>
    %202 = vector.shape_cast %201 : vector<1x16x16xf32> to vector<16x16xf32>
    %cst_119 = arith.constant dense<0.000000e+00> : vector<16x256xf32>
    %203 = tpu.matmul %202, %169, %cst_119 {dimension_numbers = #tpu.dot_dimension_numbers<[1], [0], [0], [1], [0, 0, 1, 1], [], []>} : vector<16x16xf32>, vector<16x256xf32>, vector<16x256xf32> -> vector<16x256xf32>
    %204 = arith.addf %200, %203 : vector<16x256xf32>
    %c255_i32_120 = arith.constant 255 : i32
    %205 = tpu.dynamic_rotate %169 by %c255_i32_120 dim 1 : vector<16x256xf32>, i32 -> vector<16x256xf32>
    %206 = vector.broadcast %95 : vector<1x256xf32> to vector<16x256xf32>
    %207 = arith.mulf %205, %206 : vector<16x256xf32>
    %c5_121 = arith.constant 5 : index
    %c0_122 = arith.constant 0 : index
    %c0_123 = arith.constant 0 : index
    %208 = vector.load %arg9[%c5_121, %c0_122, %c0_123] : memref<27x16x16xf32, #tpu.memory_space<vmem>>, vector<1x16x16xf32>
    %209 = vector.shape_cast %208 : vector<1x16x16xf32> to vector<16x16xf32>
    %cst_124 = arith.constant dense<0.000000e+00> : vector<16x256xf32>
    %210 = tpu.matmul %209, %207, %cst_124 {dimension_numbers = #tpu.dot_dimension_numbers<[1], [0], [0], [1], [0, 0, 1, 1], [], []>} : vector<16x16xf32>, vector<16x256xf32>, vector<16x256xf32> -> vector<16x256xf32>
    %211 = arith.addf %204, %210 : vector<16x256xf32>
    %c241_i32_125 = arith.constant 241 : i32
    %212 = tpu.dynamic_rotate %169 by %c241_i32_125 dim 1 : vector<16x256xf32>, i32 -> vector<16x256xf32>
    %213 = vector.broadcast %97 : vector<1x256xf32> to vector<16x256xf32>
    %214 = arith.mulf %212, %213 : vector<16x256xf32>
    %c6_126 = arith.constant 6 : index
    %c0_127 = arith.constant 0 : index
    %c0_128 = arith.constant 0 : index
    %215 = vector.load %arg9[%c6_126, %c0_127, %c0_128] : memref<27x16x16xf32, #tpu.memory_space<vmem>>, vector<1x16x16xf32>
    %216 = vector.shape_cast %215 : vector<1x16x16xf32> to vector<16x16xf32>
    %cst_129 = arith.constant dense<0.000000e+00> : vector<16x256xf32>
    %217 = tpu.matmul %216, %214, %cst_129 {dimension_numbers = #tpu.dot_dimension_numbers<[1], [0], [0], [1], [0, 0, 1, 1], [], []>} : vector<16x16xf32>, vector<16x256xf32>, vector<16x256xf32> -> vector<16x256xf32>
    %218 = arith.addf %211, %217 : vector<16x256xf32>
    %c240_i32_130 = arith.constant 240 : i32
    %219 = tpu.dynamic_rotate %169 by %c240_i32_130 dim 1 : vector<16x256xf32>, i32 -> vector<16x256xf32>
    %220 = vector.broadcast %99 : vector<1x256xf32> to vector<16x256xf32>
    %221 = arith.mulf %219, %220 : vector<16x256xf32>
    %c7_131 = arith.constant 7 : index
    %c0_132 = arith.constant 0 : index
    %c0_133 = arith.constant 0 : index
    %222 = vector.load %arg9[%c7_131, %c0_132, %c0_133] : memref<27x16x16xf32, #tpu.memory_space<vmem>>, vector<1x16x16xf32>
    %223 = vector.shape_cast %222 : vector<1x16x16xf32> to vector<16x16xf32>
    %cst_134 = arith.constant dense<0.000000e+00> : vector<16x256xf32>
    %224 = tpu.matmul %223, %221, %cst_134 {dimension_numbers = #tpu.dot_dimension_numbers<[1], [0], [0], [1], [0, 0, 1, 1], [], []>} : vector<16x16xf32>, vector<16x256xf32>, vector<16x256xf32> -> vector<16x256xf32>
    %225 = arith.addf %218, %224 : vector<16x256xf32>
    %c239_i32_135 = arith.constant 239 : i32
    %226 = tpu.dynamic_rotate %169 by %c239_i32_135 dim 1 : vector<16x256xf32>, i32 -> vector<16x256xf32>
    %227 = vector.broadcast %101 : vector<1x256xf32> to vector<16x256xf32>
    %228 = arith.mulf %226, %227 : vector<16x256xf32>
    %c8_136 = arith.constant 8 : index
    %c0_137 = arith.constant 0 : index
    %c0_138 = arith.constant 0 : index
    %229 = vector.load %arg9[%c8_136, %c0_137, %c0_138] : memref<27x16x16xf32, #tpu.memory_space<vmem>>, vector<1x16x16xf32>
    %230 = vector.shape_cast %229 : vector<1x16x16xf32> to vector<16x16xf32>
    %cst_139 = arith.constant dense<0.000000e+00> : vector<16x256xf32>
    %231 = tpu.matmul %230, %228, %cst_139 {dimension_numbers = #tpu.dot_dimension_numbers<[1], [0], [0], [1], [0, 0, 1, 1], [], []>} : vector<16x16xf32>, vector<16x256xf32>, vector<16x256xf32> -> vector<16x256xf32>
    %232 = arith.addf %225, %231 : vector<16x256xf32>
    %233 = vector.broadcast %171 : vector<16x1xf32> to vector<16x256xf32>
    %234 = arith.addf %232, %233 : vector<16x256xf32>
    %cst_140 = arith.constant 2.000000e-01 : f32
    %235 = vector.broadcast %cst_140 : f32 to vector<16x256xf32>
    %236 = arith.mulf %235, %234 : vector<16x256xf32>
    %237 = arith.maximumf %234, %236 : vector<16x256xf32>
    %238 = arith.addf %85, %237 : vector<16x256xf32>
    %239 = vector.broadcast %65 : vector<1x256xf32> to vector<16x256xf32>
    %240 = arith.mulf %238, %239 : vector<16x256xf32>
    %c0_141 = arith.constant 0 : index
    %c0_142 = arith.constant 0 : index
    %c0_143 = arith.constant 0 : index
    %241 = vector.load %arg11[%c0_141, %c0_142, %c0_143] : memref<3x4x32xf32, #tpu.memory_space<vmem>>, vector<1x4x16xf32>
    %242 = vector.shape_cast %241 : vector<1x4x16xf32> to vector<4x16xf32>
    %cst_144 = arith.constant dense<0.000000e+00> : vector<4x256xf32>
    %243 = tpu.matmul %242, %238, %cst_144 {dimension_numbers = #tpu.dot_dimension_numbers<[1], [0], [0], [1], [0, 0, 1, 1], [], []>} : vector<4x16xf32>, vector<16x256xf32>, vector<4x256xf32> -> vector<4x256xf32>
    %c0_145 = arith.constant 0 : index
    %c0_146 = arith.constant 0 : index
    %c16 = arith.constant 16 : index
    %244 = vector.load %arg11[%c0_145, %c0_146, %c16] : memref<3x4x32xf32, #tpu.memory_space<vmem>>, vector<1x4x16xf32>
    %245 = vector.shape_cast %244 : vector<1x4x16xf32> to vector<4x16xf32>
    %cst_147 = arith.constant dense<0.000000e+00> : vector<4x256xf32>
    %246 = tpu.matmul %245, %240, %cst_147 {dimension_numbers = #tpu.dot_dimension_numbers<[1], [0], [0], [1], [0, 0, 1, 1], [], []>} : vector<4x16xf32>, vector<16x256xf32>, vector<4x256xf32> -> vector<4x256xf32>
    %247 = arith.addf %243, %246 : vector<4x256xf32>
    %cst_148 = arith.constant dense<0.000000e+00> : vector<4xf32>
    %248 = vector.multi_reduction <add>, %247, %cst_148 [1] : vector<4x256xf32> to vector<4xf32>
    %249 = vector.shape_cast %248 : vector<4xf32> to vector<4x1xf32>
    %cst_149 = arith.constant 3.906250e-03 : f32
    %250 = vector.broadcast %cst_149 : f32 to vector<4x1xf32>
    %251 = arith.mulf %249, %250 : vector<4x1xf32>
    %c0_150 = arith.constant 0 : index
    %c0_151 = arith.constant 0 : index
    %c0_152 = arith.constant 0 : index
    %252 = vector.load %arg12[%c0_150, %c0_151, %c0_152] : memref<3x4x1xf32, #tpu.memory_space<vmem>>, vector<1x4x1xf32>
    %253 = vector.shape_cast %252 : vector<1x4x1xf32> to vector<4x1xf32>
    %254 = arith.addf %251, %253 : vector<4x1xf32>
    %cst_153 = arith.constant 0.000000e+00 : f32
    %255 = vector.broadcast %cst_153 : f32 to vector<4x1xf32>
    %256 = arith.maximumf %254, %255 : vector<4x1xf32>
    %c0_154 = arith.constant 0 : index
    %c0_155 = arith.constant 0 : index
    %c0_156 = arith.constant 0 : index
    %257 = vector.load %arg14[%c0_154, %c0_155, %c0_156] : memref<3x32x1xf32, #tpu.memory_space<vmem>>, vector<1x32x1xf32>
    %258 = vector.shape_cast %257 : vector<1x32x1xf32> to vector<32x1xf32>
    %c0_157 = arith.constant 0 : index
    %c0_158 = arith.constant 0 : index
    %c0_159 = arith.constant 0 : index
    %259 = vector.load %arg13[%c0_157, %c0_158, %c0_159] : memref<3x32x4xf32, #tpu.memory_space<vmem>>, vector<1x32x1xf32>
    %260 = vector.shape_cast %259 : vector<1x32x1xf32> to vector<32x1xf32>
    %261 = vector.extract_strided_slice %256 {offsets = [0, 0], sizes = [1, 1], strides = [1, 1]} : vector<4x1xf32> to vector<1x1xf32>
    %262 = vector.broadcast %261 : vector<1x1xf32> to vector<32x1xf32>
    %263 = arith.mulf %260, %262 : vector<32x1xf32>
    %264 = arith.addf %258, %263 : vector<32x1xf32>
    %c0_160 = arith.constant 0 : index
    %c0_161 = arith.constant 0 : index
    %c1_162 = arith.constant 1 : index
    %265 = vector.load %arg13[%c0_160, %c0_161, %c1_162] : memref<3x32x4xf32, #tpu.memory_space<vmem>>, vector<1x32x1xf32>
    %266 = vector.shape_cast %265 : vector<1x32x1xf32> to vector<32x1xf32>
    %267 = vector.extract_strided_slice %256 {offsets = [1, 0], sizes = [1, 1], strides = [1, 1]} : vector<4x1xf32> to vector<1x1xf32>
    %268 = vector.broadcast %267 : vector<1x1xf32> to vector<32x1xf32>
    %269 = arith.mulf %266, %268 : vector<32x1xf32>
    %270 = arith.addf %264, %269 : vector<32x1xf32>
    %c0_163 = arith.constant 0 : index
    %c0_164 = arith.constant 0 : index
    %c2_165 = arith.constant 2 : index
    %271 = vector.load %arg13[%c0_163, %c0_164, %c2_165] : memref<3x32x4xf32, #tpu.memory_space<vmem>>, vector<1x32x1xf32>
    %272 = vector.shape_cast %271 : vector<1x32x1xf32> to vector<32x1xf32>
    %273 = vector.extract_strided_slice %256 {offsets = [2, 0], sizes = [1, 1], strides = [1, 1]} : vector<4x1xf32> to vector<1x1xf32>
    %274 = vector.broadcast %273 : vector<1x1xf32> to vector<32x1xf32>
    %275 = arith.mulf %272, %274 : vector<32x1xf32>
    %276 = arith.addf %270, %275 : vector<32x1xf32>
    %c0_166 = arith.constant 0 : index
    %c0_167 = arith.constant 0 : index
    %c3_168 = arith.constant 3 : index
    %277 = vector.load %arg13[%c0_166, %c0_167, %c3_168] : memref<3x32x4xf32, #tpu.memory_space<vmem>>, vector<1x32x1xf32>
    %278 = vector.shape_cast %277 : vector<1x32x1xf32> to vector<32x1xf32>
    %279 = vector.extract_strided_slice %256 {offsets = [3, 0], sizes = [1, 1], strides = [1, 1]} : vector<4x1xf32> to vector<1x1xf32>
    %280 = vector.broadcast %279 : vector<1x1xf32> to vector<32x1xf32>
    %281 = arith.mulf %278, %280 : vector<32x1xf32>
    %282 = arith.addf %276, %281 : vector<32x1xf32>
    %cst_169 = arith.constant 0.000000e+00 : f32
    %283 = vector.broadcast %cst_169 : f32 to vector<32x1xf32>
    %284 = arith.subf %283, %282 : vector<32x1xf32>
    %285 = math.exp %284 : vector<32x1xf32>
    %cst_170 = arith.constant 1.000000e+00 : f32
    %286 = vector.broadcast %cst_170 : f32 to vector<32x1xf32>
    %287 = arith.addf %286, %285 : vector<32x1xf32>
    %cst_171 = arith.constant 1.000000e+00 : f32
    %288 = vector.broadcast %cst_171 : f32 to vector<32x1xf32>
    %289 = arith.divf %288, %287 : vector<32x1xf32>
    %290 = vector.extract_strided_slice %289 {offsets = [0, 0], sizes = [16, 1], strides = [1, 1]} : vector<32x1xf32> to vector<16x1xf32>
    %291 = vector.broadcast %290 : vector<16x1xf32> to vector<16x256xf32>
    %292 = arith.mulf %238, %291 : vector<16x256xf32>
    %293 = vector.extract_strided_slice %289 {offsets = [16, 0], sizes = [16, 1], strides = [1, 1]} : vector<32x1xf32> to vector<16x1xf32>
    %294 = vector.broadcast %293 : vector<16x1xf32> to vector<16x256xf32>
    %295 = arith.mulf %240, %294 : vector<16x256xf32>
    %c0_172 = arith.constant 0 : index
    %c0_173 = arith.constant 0 : index
    %c0_174 = arith.constant 0 : index
    %296 = vector.load %arg15[%c0_172, %c0_173, %c0_174] : memref<3x16x32xf32, #tpu.memory_space<vmem>>, vector<1x16x16xf32>
    %297 = vector.shape_cast %296 : vector<1x16x16xf32> to vector<16x16xf32>
    %cst_175 = arith.constant dense<0.000000e+00> : vector<16x256xf32>
    %298 = tpu.matmul %297, %292, %cst_175 {dimension_numbers = #tpu.dot_dimension_numbers<[1], [0], [0], [1], [0, 0, 1, 1], [], []>} : vector<16x16xf32>, vector<16x256xf32>, vector<16x256xf32> -> vector<16x256xf32>
    %c0_176 = arith.constant 0 : index
    %c0_177 = arith.constant 0 : index
    %c16_178 = arith.constant 16 : index
    %299 = vector.load %arg15[%c0_176, %c0_177, %c16_178] : memref<3x16x32xf32, #tpu.memory_space<vmem>>, vector<1x16x16xf32>
    %300 = vector.shape_cast %299 : vector<1x16x16xf32> to vector<16x16xf32>
    %cst_179 = arith.constant dense<0.000000e+00> : vector<16x256xf32>
    %301 = tpu.matmul %300, %295, %cst_179 {dimension_numbers = #tpu.dot_dimension_numbers<[1], [0], [0], [1], [0, 0, 1, 1], [], []>} : vector<16x16xf32>, vector<16x256xf32>, vector<16x256xf32> -> vector<16x256xf32>
    %302 = arith.addf %298, %301 : vector<16x256xf32>
    %c0_180 = arith.constant 0 : index
    %c0_181 = arith.constant 0 : index
    %c0_182 = arith.constant 0 : index
    %303 = vector.load %arg16[%c0_180, %c0_181, %c0_182] : memref<3x16x1xf32, #tpu.memory_space<vmem>>, vector<1x16x1xf32>
    %304 = vector.shape_cast %303 : vector<1x16x1xf32> to vector<16x1xf32>
    %305 = vector.broadcast %304 : vector<16x1xf32> to vector<16x256xf32>
    %306 = arith.addf %302, %305 : vector<16x256xf32>
    %c1_183 = arith.constant 1 : index
    %c0_184 = arith.constant 0 : index
    %c0_185 = arith.constant 0 : index
    %307 = vector.load %arg8[%c1_183, %c0_184, %c0_185] : memref<3x16x1xf32, #tpu.memory_space<vmem>>, vector<1x16x1xf32>
    %308 = vector.shape_cast %307 : vector<1x16x1xf32> to vector<16x1xf32>
    %cst_186 = arith.constant 0.000000e+00 : f32
    %309 = vector.broadcast %cst_186 : f32 to vector<16x256xf32>
    %c17_i32_187 = arith.constant 17 : i32
    %310 = tpu.dynamic_rotate %306 by %c17_i32_187 dim 1 : vector<16x256xf32>, i32 -> vector<16x256xf32>
    %311 = vector.broadcast %87 : vector<1x256xf32> to vector<16x256xf32>
    %312 = arith.mulf %310, %311 : vector<16x256xf32>
    %c9 = arith.constant 9 : index
    %c0_188 = arith.constant 0 : index
    %c0_189 = arith.constant 0 : index
    %313 = vector.load %arg7[%c9, %c0_188, %c0_189] : memref<27x16x16xf32, #tpu.memory_space<vmem>>, vector<1x16x16xf32>
    %314 = vector.shape_cast %313 : vector<1x16x16xf32> to vector<16x16xf32>
    %cst_190 = arith.constant dense<0.000000e+00> : vector<16x256xf32>
    %315 = tpu.matmul %314, %312, %cst_190 {dimension_numbers = #tpu.dot_dimension_numbers<[1], [0], [0], [1], [0, 0, 1, 1], [], []>} : vector<16x16xf32>, vector<16x256xf32>, vector<16x256xf32> -> vector<16x256xf32>
    %316 = arith.addf %309, %315 : vector<16x256xf32>
    %c16_i32_191 = arith.constant 16 : i32
    %317 = tpu.dynamic_rotate %306 by %c16_i32_191 dim 1 : vector<16x256xf32>, i32 -> vector<16x256xf32>
    %318 = vector.broadcast %89 : vector<1x256xf32> to vector<16x256xf32>
    %319 = arith.mulf %317, %318 : vector<16x256xf32>
    %c10 = arith.constant 10 : index
    %c0_192 = arith.constant 0 : index
    %c0_193 = arith.constant 0 : index
    %320 = vector.load %arg7[%c10, %c0_192, %c0_193] : memref<27x16x16xf32, #tpu.memory_space<vmem>>, vector<1x16x16xf32>
    %321 = vector.shape_cast %320 : vector<1x16x16xf32> to vector<16x16xf32>
    %cst_194 = arith.constant dense<0.000000e+00> : vector<16x256xf32>
    %322 = tpu.matmul %321, %319, %cst_194 {dimension_numbers = #tpu.dot_dimension_numbers<[1], [0], [0], [1], [0, 0, 1, 1], [], []>} : vector<16x16xf32>, vector<16x256xf32>, vector<16x256xf32> -> vector<16x256xf32>
    %323 = arith.addf %316, %322 : vector<16x256xf32>
    %c15_i32_195 = arith.constant 15 : i32
    %324 = tpu.dynamic_rotate %306 by %c15_i32_195 dim 1 : vector<16x256xf32>, i32 -> vector<16x256xf32>
    %325 = vector.broadcast %91 : vector<1x256xf32> to vector<16x256xf32>
    %326 = arith.mulf %324, %325 : vector<16x256xf32>
    %c11 = arith.constant 11 : index
    %c0_196 = arith.constant 0 : index
    %c0_197 = arith.constant 0 : index
    %327 = vector.load %arg7[%c11, %c0_196, %c0_197] : memref<27x16x16xf32, #tpu.memory_space<vmem>>, vector<1x16x16xf32>
    %328 = vector.shape_cast %327 : vector<1x16x16xf32> to vector<16x16xf32>
    %cst_198 = arith.constant dense<0.000000e+00> : vector<16x256xf32>
    %329 = tpu.matmul %328, %326, %cst_198 {dimension_numbers = #tpu.dot_dimension_numbers<[1], [0], [0], [1], [0, 0, 1, 1], [], []>} : vector<16x16xf32>, vector<16x256xf32>, vector<16x256xf32> -> vector<16x256xf32>
    %330 = arith.addf %323, %329 : vector<16x256xf32>
    %c1_i32_199 = arith.constant 1 : i32
    %331 = tpu.dynamic_rotate %306 by %c1_i32_199 dim 1 : vector<16x256xf32>, i32 -> vector<16x256xf32>
    %332 = vector.broadcast %93 : vector<1x256xf32> to vector<16x256xf32>
    %333 = arith.mulf %331, %332 : vector<16x256xf32>
    %c12 = arith.constant 12 : index
    %c0_200 = arith.constant 0 : index
    %c0_201 = arith.constant 0 : index
    %334 = vector.load %arg7[%c12, %c0_200, %c0_201] : memref<27x16x16xf32, #tpu.memory_space<vmem>>, vector<1x16x16xf32>
    %335 = vector.shape_cast %334 : vector<1x16x16xf32> to vector<16x16xf32>
    %cst_202 = arith.constant dense<0.000000e+00> : vector<16x256xf32>
    %336 = tpu.matmul %335, %333, %cst_202 {dimension_numbers = #tpu.dot_dimension_numbers<[1], [0], [0], [1], [0, 0, 1, 1], [], []>} : vector<16x16xf32>, vector<16x256xf32>, vector<16x256xf32> -> vector<16x256xf32>
    %337 = arith.addf %330, %336 : vector<16x256xf32>
    %c13 = arith.constant 13 : index
    %c0_203 = arith.constant 0 : index
    %c0_204 = arith.constant 0 : index
    %338 = vector.load %arg7[%c13, %c0_203, %c0_204] : memref<27x16x16xf32, #tpu.memory_space<vmem>>, vector<1x16x16xf32>
    %339 = vector.shape_cast %338 : vector<1x16x16xf32> to vector<16x16xf32>
    %cst_205 = arith.constant dense<0.000000e+00> : vector<16x256xf32>
    %340 = tpu.matmul %339, %306, %cst_205 {dimension_numbers = #tpu.dot_dimension_numbers<[1], [0], [0], [1], [0, 0, 1, 1], [], []>} : vector<16x16xf32>, vector<16x256xf32>, vector<16x256xf32> -> vector<16x256xf32>
    %341 = arith.addf %337, %340 : vector<16x256xf32>
    %c255_i32_206 = arith.constant 255 : i32
    %342 = tpu.dynamic_rotate %306 by %c255_i32_206 dim 1 : vector<16x256xf32>, i32 -> vector<16x256xf32>
    %343 = vector.broadcast %95 : vector<1x256xf32> to vector<16x256xf32>
    %344 = arith.mulf %342, %343 : vector<16x256xf32>
    %c14 = arith.constant 14 : index
    %c0_207 = arith.constant 0 : index
    %c0_208 = arith.constant 0 : index
    %345 = vector.load %arg7[%c14, %c0_207, %c0_208] : memref<27x16x16xf32, #tpu.memory_space<vmem>>, vector<1x16x16xf32>
    %346 = vector.shape_cast %345 : vector<1x16x16xf32> to vector<16x16xf32>
    %cst_209 = arith.constant dense<0.000000e+00> : vector<16x256xf32>
    %347 = tpu.matmul %346, %344, %cst_209 {dimension_numbers = #tpu.dot_dimension_numbers<[1], [0], [0], [1], [0, 0, 1, 1], [], []>} : vector<16x16xf32>, vector<16x256xf32>, vector<16x256xf32> -> vector<16x256xf32>
    %348 = arith.addf %341, %347 : vector<16x256xf32>
    %c241_i32_210 = arith.constant 241 : i32
    %349 = tpu.dynamic_rotate %306 by %c241_i32_210 dim 1 : vector<16x256xf32>, i32 -> vector<16x256xf32>
    %350 = vector.broadcast %97 : vector<1x256xf32> to vector<16x256xf32>
    %351 = arith.mulf %349, %350 : vector<16x256xf32>
    %c15 = arith.constant 15 : index
    %c0_211 = arith.constant 0 : index
    %c0_212 = arith.constant 0 : index
    %352 = vector.load %arg7[%c15, %c0_211, %c0_212] : memref<27x16x16xf32, #tpu.memory_space<vmem>>, vector<1x16x16xf32>
    %353 = vector.shape_cast %352 : vector<1x16x16xf32> to vector<16x16xf32>
    %cst_213 = arith.constant dense<0.000000e+00> : vector<16x256xf32>
    %354 = tpu.matmul %353, %351, %cst_213 {dimension_numbers = #tpu.dot_dimension_numbers<[1], [0], [0], [1], [0, 0, 1, 1], [], []>} : vector<16x16xf32>, vector<16x256xf32>, vector<16x256xf32> -> vector<16x256xf32>
    %355 = arith.addf %348, %354 : vector<16x256xf32>
    %c240_i32_214 = arith.constant 240 : i32
    %356 = tpu.dynamic_rotate %306 by %c240_i32_214 dim 1 : vector<16x256xf32>, i32 -> vector<16x256xf32>
    %357 = vector.broadcast %99 : vector<1x256xf32> to vector<16x256xf32>
    %358 = arith.mulf %356, %357 : vector<16x256xf32>
    %c16_215 = arith.constant 16 : index
    %c0_216 = arith.constant 0 : index
    %c0_217 = arith.constant 0 : index
    %359 = vector.load %arg7[%c16_215, %c0_216, %c0_217] : memref<27x16x16xf32, #tpu.memory_space<vmem>>, vector<1x16x16xf32>
    %360 = vector.shape_cast %359 : vector<1x16x16xf32> to vector<16x16xf32>
    %cst_218 = arith.constant dense<0.000000e+00> : vector<16x256xf32>
    %361 = tpu.matmul %360, %358, %cst_218 {dimension_numbers = #tpu.dot_dimension_numbers<[1], [0], [0], [1], [0, 0, 1, 1], [], []>} : vector<16x16xf32>, vector<16x256xf32>, vector<16x256xf32> -> vector<16x256xf32>
    %362 = arith.addf %355, %361 : vector<16x256xf32>
    %c239_i32_219 = arith.constant 239 : i32
    %363 = tpu.dynamic_rotate %306 by %c239_i32_219 dim 1 : vector<16x256xf32>, i32 -> vector<16x256xf32>
    %364 = vector.broadcast %101 : vector<1x256xf32> to vector<16x256xf32>
    %365 = arith.mulf %363, %364 : vector<16x256xf32>
    %c17 = arith.constant 17 : index
    %c0_220 = arith.constant 0 : index
    %c0_221 = arith.constant 0 : index
    %366 = vector.load %arg7[%c17, %c0_220, %c0_221] : memref<27x16x16xf32, #tpu.memory_space<vmem>>, vector<1x16x16xf32>
    %367 = vector.shape_cast %366 : vector<1x16x16xf32> to vector<16x16xf32>
    %cst_222 = arith.constant dense<0.000000e+00> : vector<16x256xf32>
    %368 = tpu.matmul %367, %365, %cst_222 {dimension_numbers = #tpu.dot_dimension_numbers<[1], [0], [0], [1], [0, 0, 1, 1], [], []>} : vector<16x16xf32>, vector<16x256xf32>, vector<16x256xf32> -> vector<16x256xf32>
    %369 = arith.addf %362, %368 : vector<16x256xf32>
    %370 = vector.broadcast %308 : vector<16x1xf32> to vector<16x256xf32>
    %371 = arith.addf %369, %370 : vector<16x256xf32>
    %cst_223 = arith.constant 2.000000e-01 : f32
    %372 = vector.broadcast %cst_223 : f32 to vector<16x256xf32>
    %373 = arith.mulf %372, %371 : vector<16x256xf32>
    %374 = arith.maximumf %371, %373 : vector<16x256xf32>
    %c1_224 = arith.constant 1 : index
    %c0_225 = arith.constant 0 : index
    %c0_226 = arith.constant 0 : index
    %375 = vector.load %arg10[%c1_224, %c0_225, %c0_226] : memref<3x16x1xf32, #tpu.memory_space<vmem>>, vector<1x16x1xf32>
    %376 = vector.shape_cast %375 : vector<1x16x1xf32> to vector<16x1xf32>
    %cst_227 = arith.constant 0.000000e+00 : f32
    %377 = vector.broadcast %cst_227 : f32 to vector<16x256xf32>
    %c17_i32_228 = arith.constant 17 : i32
    %378 = tpu.dynamic_rotate %374 by %c17_i32_228 dim 1 : vector<16x256xf32>, i32 -> vector<16x256xf32>
    %379 = vector.broadcast %87 : vector<1x256xf32> to vector<16x256xf32>
    %380 = arith.mulf %378, %379 : vector<16x256xf32>
    %c9_229 = arith.constant 9 : index
    %c0_230 = arith.constant 0 : index
    %c0_231 = arith.constant 0 : index
    %381 = vector.load %arg9[%c9_229, %c0_230, %c0_231] : memref<27x16x16xf32, #tpu.memory_space<vmem>>, vector<1x16x16xf32>
    %382 = vector.shape_cast %381 : vector<1x16x16xf32> to vector<16x16xf32>
    %cst_232 = arith.constant dense<0.000000e+00> : vector<16x256xf32>
    %383 = tpu.matmul %382, %380, %cst_232 {dimension_numbers = #tpu.dot_dimension_numbers<[1], [0], [0], [1], [0, 0, 1, 1], [], []>} : vector<16x16xf32>, vector<16x256xf32>, vector<16x256xf32> -> vector<16x256xf32>
    %384 = arith.addf %377, %383 : vector<16x256xf32>
    %c16_i32_233 = arith.constant 16 : i32
    %385 = tpu.dynamic_rotate %374 by %c16_i32_233 dim 1 : vector<16x256xf32>, i32 -> vector<16x256xf32>
    %386 = vector.broadcast %89 : vector<1x256xf32> to vector<16x256xf32>
    %387 = arith.mulf %385, %386 : vector<16x256xf32>
    %c10_234 = arith.constant 10 : index
    %c0_235 = arith.constant 0 : index
    %c0_236 = arith.constant 0 : index
    %388 = vector.load %arg9[%c10_234, %c0_235, %c0_236] : memref<27x16x16xf32, #tpu.memory_space<vmem>>, vector<1x16x16xf32>
    %389 = vector.shape_cast %388 : vector<1x16x16xf32> to vector<16x16xf32>
    %cst_237 = arith.constant dense<0.000000e+00> : vector<16x256xf32>
    %390 = tpu.matmul %389, %387, %cst_237 {dimension_numbers = #tpu.dot_dimension_numbers<[1], [0], [0], [1], [0, 0, 1, 1], [], []>} : vector<16x16xf32>, vector<16x256xf32>, vector<16x256xf32> -> vector<16x256xf32>
    %391 = arith.addf %384, %390 : vector<16x256xf32>
    %c15_i32_238 = arith.constant 15 : i32
    %392 = tpu.dynamic_rotate %374 by %c15_i32_238 dim 1 : vector<16x256xf32>, i32 -> vector<16x256xf32>
    %393 = vector.broadcast %91 : vector<1x256xf32> to vector<16x256xf32>
    %394 = arith.mulf %392, %393 : vector<16x256xf32>
    %c11_239 = arith.constant 11 : index
    %c0_240 = arith.constant 0 : index
    %c0_241 = arith.constant 0 : index
    %395 = vector.load %arg9[%c11_239, %c0_240, %c0_241] : memref<27x16x16xf32, #tpu.memory_space<vmem>>, vector<1x16x16xf32>
    %396 = vector.shape_cast %395 : vector<1x16x16xf32> to vector<16x16xf32>
    %cst_242 = arith.constant dense<0.000000e+00> : vector<16x256xf32>
    %397 = tpu.matmul %396, %394, %cst_242 {dimension_numbers = #tpu.dot_dimension_numbers<[1], [0], [0], [1], [0, 0, 1, 1], [], []>} : vector<16x16xf32>, vector<16x256xf32>, vector<16x256xf32> -> vector<16x256xf32>
    %398 = arith.addf %391, %397 : vector<16x256xf32>
    %c1_i32_243 = arith.constant 1 : i32
    %399 = tpu.dynamic_rotate %374 by %c1_i32_243 dim 1 : vector<16x256xf32>, i32 -> vector<16x256xf32>
    %400 = vector.broadcast %93 : vector<1x256xf32> to vector<16x256xf32>
    %401 = arith.mulf %399, %400 : vector<16x256xf32>
    %c12_244 = arith.constant 12 : index
    %c0_245 = arith.constant 0 : index
    %c0_246 = arith.constant 0 : index
    %402 = vector.load %arg9[%c12_244, %c0_245, %c0_246] : memref<27x16x16xf32, #tpu.memory_space<vmem>>, vector<1x16x16xf32>
    %403 = vector.shape_cast %402 : vector<1x16x16xf32> to vector<16x16xf32>
    %cst_247 = arith.constant dense<0.000000e+00> : vector<16x256xf32>
    %404 = tpu.matmul %403, %401, %cst_247 {dimension_numbers = #tpu.dot_dimension_numbers<[1], [0], [0], [1], [0, 0, 1, 1], [], []>} : vector<16x16xf32>, vector<16x256xf32>, vector<16x256xf32> -> vector<16x256xf32>
    %405 = arith.addf %398, %404 : vector<16x256xf32>
    %c13_248 = arith.constant 13 : index
    %c0_249 = arith.constant 0 : index
    %c0_250 = arith.constant 0 : index
    %406 = vector.load %arg9[%c13_248, %c0_249, %c0_250] : memref<27x16x16xf32, #tpu.memory_space<vmem>>, vector<1x16x16xf32>
    %407 = vector.shape_cast %406 : vector<1x16x16xf32> to vector<16x16xf32>
    %cst_251 = arith.constant dense<0.000000e+00> : vector<16x256xf32>
    %408 = tpu.matmul %407, %374, %cst_251 {dimension_numbers = #tpu.dot_dimension_numbers<[1], [0], [0], [1], [0, 0, 1, 1], [], []>} : vector<16x16xf32>, vector<16x256xf32>, vector<16x256xf32> -> vector<16x256xf32>
    %409 = arith.addf %405, %408 : vector<16x256xf32>
    %c255_i32_252 = arith.constant 255 : i32
    %410 = tpu.dynamic_rotate %374 by %c255_i32_252 dim 1 : vector<16x256xf32>, i32 -> vector<16x256xf32>
    %411 = vector.broadcast %95 : vector<1x256xf32> to vector<16x256xf32>
    %412 = arith.mulf %410, %411 : vector<16x256xf32>
    %c14_253 = arith.constant 14 : index
    %c0_254 = arith.constant 0 : index
    %c0_255 = arith.constant 0 : index
    %413 = vector.load %arg9[%c14_253, %c0_254, %c0_255] : memref<27x16x16xf32, #tpu.memory_space<vmem>>, vector<1x16x16xf32>
    %414 = vector.shape_cast %413 : vector<1x16x16xf32> to vector<16x16xf32>
    %cst_256 = arith.constant dense<0.000000e+00> : vector<16x256xf32>
    %415 = tpu.matmul %414, %412, %cst_256 {dimension_numbers = #tpu.dot_dimension_numbers<[1], [0], [0], [1], [0, 0, 1, 1], [], []>} : vector<16x16xf32>, vector<16x256xf32>, vector<16x256xf32> -> vector<16x256xf32>
    %416 = arith.addf %409, %415 : vector<16x256xf32>
    %c241_i32_257 = arith.constant 241 : i32
    %417 = tpu.dynamic_rotate %374 by %c241_i32_257 dim 1 : vector<16x256xf32>, i32 -> vector<16x256xf32>
    %418 = vector.broadcast %97 : vector<1x256xf32> to vector<16x256xf32>
    %419 = arith.mulf %417, %418 : vector<16x256xf32>
    %c15_258 = arith.constant 15 : index
    %c0_259 = arith.constant 0 : index
    %c0_260 = arith.constant 0 : index
    %420 = vector.load %arg9[%c15_258, %c0_259, %c0_260] : memref<27x16x16xf32, #tpu.memory_space<vmem>>, vector<1x16x16xf32>
    %421 = vector.shape_cast %420 : vector<1x16x16xf32> to vector<16x16xf32>
    %cst_261 = arith.constant dense<0.000000e+00> : vector<16x256xf32>
    %422 = tpu.matmul %421, %419, %cst_261 {dimension_numbers = #tpu.dot_dimension_numbers<[1], [0], [0], [1], [0, 0, 1, 1], [], []>} : vector<16x16xf32>, vector<16x256xf32>, vector<16x256xf32> -> vector<16x256xf32>
    %423 = arith.addf %416, %422 : vector<16x256xf32>
    %c240_i32_262 = arith.constant 240 : i32
    %424 = tpu.dynamic_rotate %374 by %c240_i32_262 dim 1 : vector<16x256xf32>, i32 -> vector<16x256xf32>
    %425 = vector.broadcast %99 : vector<1x256xf32> to vector<16x256xf32>
    %426 = arith.mulf %424, %425 : vector<16x256xf32>
    %c16_263 = arith.constant 16 : index
    %c0_264 = arith.constant 0 : index
    %c0_265 = arith.constant 0 : index
    %427 = vector.load %arg9[%c16_263, %c0_264, %c0_265] : memref<27x16x16xf32, #tpu.memory_space<vmem>>, vector<1x16x16xf32>
    %428 = vector.shape_cast %427 : vector<1x16x16xf32> to vector<16x16xf32>
    %cst_266 = arith.constant dense<0.000000e+00> : vector<16x256xf32>
    %429 = tpu.matmul %428, %426, %cst_266 {dimension_numbers = #tpu.dot_dimension_numbers<[1], [0], [0], [1], [0, 0, 1, 1], [], []>} : vector<16x16xf32>, vector<16x256xf32>, vector<16x256xf32> -> vector<16x256xf32>
    %430 = arith.addf %423, %429 : vector<16x256xf32>
    %c239_i32_267 = arith.constant 239 : i32
    %431 = tpu.dynamic_rotate %374 by %c239_i32_267 dim 1 : vector<16x256xf32>, i32 -> vector<16x256xf32>
    %432 = vector.broadcast %101 : vector<1x256xf32> to vector<16x256xf32>
    %433 = arith.mulf %431, %432 : vector<16x256xf32>
    %c17_268 = arith.constant 17 : index
    %c0_269 = arith.constant 0 : index
    %c0_270 = arith.constant 0 : index
    %434 = vector.load %arg9[%c17_268, %c0_269, %c0_270] : memref<27x16x16xf32, #tpu.memory_space<vmem>>, vector<1x16x16xf32>
    %435 = vector.shape_cast %434 : vector<1x16x16xf32> to vector<16x16xf32>
    %cst_271 = arith.constant dense<0.000000e+00> : vector<16x256xf32>
    %436 = tpu.matmul %435, %433, %cst_271 {dimension_numbers = #tpu.dot_dimension_numbers<[1], [0], [0], [1], [0, 0, 1, 1], [], []>} : vector<16x16xf32>, vector<16x256xf32>, vector<16x256xf32> -> vector<16x256xf32>
    %437 = arith.addf %430, %436 : vector<16x256xf32>
    %438 = vector.broadcast %376 : vector<16x1xf32> to vector<16x256xf32>
    %439 = arith.addf %437, %438 : vector<16x256xf32>
    %cst_272 = arith.constant 2.000000e-01 : f32
    %440 = vector.broadcast %cst_272 : f32 to vector<16x256xf32>
    %441 = arith.mulf %440, %439 : vector<16x256xf32>
    %442 = arith.maximumf %439, %441 : vector<16x256xf32>
    %443 = arith.addf %306, %442 : vector<16x256xf32>
    %444 = vector.broadcast %65 : vector<1x256xf32> to vector<16x256xf32>
    %445 = arith.mulf %443, %444 : vector<16x256xf32>
    %c1_273 = arith.constant 1 : index
    %c0_274 = arith.constant 0 : index
    %c0_275 = arith.constant 0 : index
    %446 = vector.load %arg11[%c1_273, %c0_274, %c0_275] : memref<3x4x32xf32, #tpu.memory_space<vmem>>, vector<1x4x16xf32>
    %447 = vector.shape_cast %446 : vector<1x4x16xf32> to vector<4x16xf32>
    %cst_276 = arith.constant dense<0.000000e+00> : vector<4x256xf32>
    %448 = tpu.matmul %447, %443, %cst_276 {dimension_numbers = #tpu.dot_dimension_numbers<[1], [0], [0], [1], [0, 0, 1, 1], [], []>} : vector<4x16xf32>, vector<16x256xf32>, vector<4x256xf32> -> vector<4x256xf32>
    %c1_277 = arith.constant 1 : index
    %c0_278 = arith.constant 0 : index
    %c16_279 = arith.constant 16 : index
    %449 = vector.load %arg11[%c1_277, %c0_278, %c16_279] : memref<3x4x32xf32, #tpu.memory_space<vmem>>, vector<1x4x16xf32>
    %450 = vector.shape_cast %449 : vector<1x4x16xf32> to vector<4x16xf32>
    %cst_280 = arith.constant dense<0.000000e+00> : vector<4x256xf32>
    %451 = tpu.matmul %450, %445, %cst_280 {dimension_numbers = #tpu.dot_dimension_numbers<[1], [0], [0], [1], [0, 0, 1, 1], [], []>} : vector<4x16xf32>, vector<16x256xf32>, vector<4x256xf32> -> vector<4x256xf32>
    %452 = arith.addf %448, %451 : vector<4x256xf32>
    %cst_281 = arith.constant dense<0.000000e+00> : vector<4xf32>
    %453 = vector.multi_reduction <add>, %452, %cst_281 [1] : vector<4x256xf32> to vector<4xf32>
    %454 = vector.shape_cast %453 : vector<4xf32> to vector<4x1xf32>
    %cst_282 = arith.constant 3.906250e-03 : f32
    %455 = vector.broadcast %cst_282 : f32 to vector<4x1xf32>
    %456 = arith.mulf %454, %455 : vector<4x1xf32>
    %c1_283 = arith.constant 1 : index
    %c0_284 = arith.constant 0 : index
    %c0_285 = arith.constant 0 : index
    %457 = vector.load %arg12[%c1_283, %c0_284, %c0_285] : memref<3x4x1xf32, #tpu.memory_space<vmem>>, vector<1x4x1xf32>
    %458 = vector.shape_cast %457 : vector<1x4x1xf32> to vector<4x1xf32>
    %459 = arith.addf %456, %458 : vector<4x1xf32>
    %cst_286 = arith.constant 0.000000e+00 : f32
    %460 = vector.broadcast %cst_286 : f32 to vector<4x1xf32>
    %461 = arith.maximumf %459, %460 : vector<4x1xf32>
    %c1_287 = arith.constant 1 : index
    %c0_288 = arith.constant 0 : index
    %c0_289 = arith.constant 0 : index
    %462 = vector.load %arg14[%c1_287, %c0_288, %c0_289] : memref<3x32x1xf32, #tpu.memory_space<vmem>>, vector<1x32x1xf32>
    %463 = vector.shape_cast %462 : vector<1x32x1xf32> to vector<32x1xf32>
    %c1_290 = arith.constant 1 : index
    %c0_291 = arith.constant 0 : index
    %c0_292 = arith.constant 0 : index
    %464 = vector.load %arg13[%c1_290, %c0_291, %c0_292] : memref<3x32x4xf32, #tpu.memory_space<vmem>>, vector<1x32x1xf32>
    %465 = vector.shape_cast %464 : vector<1x32x1xf32> to vector<32x1xf32>
    %466 = vector.extract_strided_slice %461 {offsets = [0, 0], sizes = [1, 1], strides = [1, 1]} : vector<4x1xf32> to vector<1x1xf32>
    %467 = vector.broadcast %466 : vector<1x1xf32> to vector<32x1xf32>
    %468 = arith.mulf %465, %467 : vector<32x1xf32>
    %469 = arith.addf %463, %468 : vector<32x1xf32>
    %c1_293 = arith.constant 1 : index
    %c0_294 = arith.constant 0 : index
    %c1_295 = arith.constant 1 : index
    %470 = vector.load %arg13[%c1_293, %c0_294, %c1_295] : memref<3x32x4xf32, #tpu.memory_space<vmem>>, vector<1x32x1xf32>
    %471 = vector.shape_cast %470 : vector<1x32x1xf32> to vector<32x1xf32>
    %472 = vector.extract_strided_slice %461 {offsets = [1, 0], sizes = [1, 1], strides = [1, 1]} : vector<4x1xf32> to vector<1x1xf32>
    %473 = vector.broadcast %472 : vector<1x1xf32> to vector<32x1xf32>
    %474 = arith.mulf %471, %473 : vector<32x1xf32>
    %475 = arith.addf %469, %474 : vector<32x1xf32>
    %c1_296 = arith.constant 1 : index
    %c0_297 = arith.constant 0 : index
    %c2_298 = arith.constant 2 : index
    %476 = vector.load %arg13[%c1_296, %c0_297, %c2_298] : memref<3x32x4xf32, #tpu.memory_space<vmem>>, vector<1x32x1xf32>
    %477 = vector.shape_cast %476 : vector<1x32x1xf32> to vector<32x1xf32>
    %478 = vector.extract_strided_slice %461 {offsets = [2, 0], sizes = [1, 1], strides = [1, 1]} : vector<4x1xf32> to vector<1x1xf32>
    %479 = vector.broadcast %478 : vector<1x1xf32> to vector<32x1xf32>
    %480 = arith.mulf %477, %479 : vector<32x1xf32>
    %481 = arith.addf %475, %480 : vector<32x1xf32>
    %c1_299 = arith.constant 1 : index
    %c0_300 = arith.constant 0 : index
    %c3_301 = arith.constant 3 : index
    %482 = vector.load %arg13[%c1_299, %c0_300, %c3_301] : memref<3x32x4xf32, #tpu.memory_space<vmem>>, vector<1x32x1xf32>
    %483 = vector.shape_cast %482 : vector<1x32x1xf32> to vector<32x1xf32>
    %484 = vector.extract_strided_slice %461 {offsets = [3, 0], sizes = [1, 1], strides = [1, 1]} : vector<4x1xf32> to vector<1x1xf32>
    %485 = vector.broadcast %484 : vector<1x1xf32> to vector<32x1xf32>
    %486 = arith.mulf %483, %485 : vector<32x1xf32>
    %487 = arith.addf %481, %486 : vector<32x1xf32>
    %cst_302 = arith.constant 0.000000e+00 : f32
    %488 = vector.broadcast %cst_302 : f32 to vector<32x1xf32>
    %489 = arith.subf %488, %487 : vector<32x1xf32>
    %490 = math.exp %489 : vector<32x1xf32>
    %cst_303 = arith.constant 1.000000e+00 : f32
    %491 = vector.broadcast %cst_303 : f32 to vector<32x1xf32>
    %492 = arith.addf %491, %490 : vector<32x1xf32>
    %cst_304 = arith.constant 1.000000e+00 : f32
    %493 = vector.broadcast %cst_304 : f32 to vector<32x1xf32>
    %494 = arith.divf %493, %492 : vector<32x1xf32>
    %495 = vector.extract_strided_slice %494 {offsets = [0, 0], sizes = [16, 1], strides = [1, 1]} : vector<32x1xf32> to vector<16x1xf32>
    %496 = vector.broadcast %495 : vector<16x1xf32> to vector<16x256xf32>
    %497 = arith.mulf %443, %496 : vector<16x256xf32>
    %498 = vector.extract_strided_slice %494 {offsets = [16, 0], sizes = [16, 1], strides = [1, 1]} : vector<32x1xf32> to vector<16x1xf32>
    %499 = vector.broadcast %498 : vector<16x1xf32> to vector<16x256xf32>
    %500 = arith.mulf %445, %499 : vector<16x256xf32>
    %c1_305 = arith.constant 1 : index
    %c0_306 = arith.constant 0 : index
    %c0_307 = arith.constant 0 : index
    %501 = vector.load %arg15[%c1_305, %c0_306, %c0_307] : memref<3x16x32xf32, #tpu.memory_space<vmem>>, vector<1x16x16xf32>
    %502 = vector.shape_cast %501 : vector<1x16x16xf32> to vector<16x16xf32>
    %cst_308 = arith.constant dense<0.000000e+00> : vector<16x256xf32>
    %503 = tpu.matmul %502, %497, %cst_308 {dimension_numbers = #tpu.dot_dimension_numbers<[1], [0], [0], [1], [0, 0, 1, 1], [], []>} : vector<16x16xf32>, vector<16x256xf32>, vector<16x256xf32> -> vector<16x256xf32>
    %c1_309 = arith.constant 1 : index
    %c0_310 = arith.constant 0 : index
    %c16_311 = arith.constant 16 : index
    %504 = vector.load %arg15[%c1_309, %c0_310, %c16_311] : memref<3x16x32xf32, #tpu.memory_space<vmem>>, vector<1x16x16xf32>
    %505 = vector.shape_cast %504 : vector<1x16x16xf32> to vector<16x16xf32>
    %cst_312 = arith.constant dense<0.000000e+00> : vector<16x256xf32>
    %506 = tpu.matmul %505, %500, %cst_312 {dimension_numbers = #tpu.dot_dimension_numbers<[1], [0], [0], [1], [0, 0, 1, 1], [], []>} : vector<16x16xf32>, vector<16x256xf32>, vector<16x256xf32> -> vector<16x256xf32>
    %507 = arith.addf %503, %506 : vector<16x256xf32>
    %c1_313 = arith.constant 1 : index
    %c0_314 = arith.constant 0 : index
    %c0_315 = arith.constant 0 : index
    %508 = vector.load %arg16[%c1_313, %c0_314, %c0_315] : memref<3x16x1xf32, #tpu.memory_space<vmem>>, vector<1x16x1xf32>
    %509 = vector.shape_cast %508 : vector<1x16x1xf32> to vector<16x1xf32>
    %510 = vector.broadcast %509 : vector<16x1xf32> to vector<16x256xf32>
    %511 = arith.addf %507, %510 : vector<16x256xf32>
    %c2_316 = arith.constant 2 : index
    %c0_317 = arith.constant 0 : index
    %c0_318 = arith.constant 0 : index
    %512 = vector.load %arg8[%c2_316, %c0_317, %c0_318] : memref<3x16x1xf32, #tpu.memory_space<vmem>>, vector<1x16x1xf32>
    %513 = vector.shape_cast %512 : vector<1x16x1xf32> to vector<16x1xf32>
    %cst_319 = arith.constant 0.000000e+00 : f32
    %514 = vector.broadcast %cst_319 : f32 to vector<16x256xf32>
    %c17_i32_320 = arith.constant 17 : i32
    %515 = tpu.dynamic_rotate %511 by %c17_i32_320 dim 1 : vector<16x256xf32>, i32 -> vector<16x256xf32>
    %516 = vector.broadcast %87 : vector<1x256xf32> to vector<16x256xf32>
    %517 = arith.mulf %515, %516 : vector<16x256xf32>
    %c18 = arith.constant 18 : index
    %c0_321 = arith.constant 0 : index
    %c0_322 = arith.constant 0 : index
    %518 = vector.load %arg7[%c18, %c0_321, %c0_322] : memref<27x16x16xf32, #tpu.memory_space<vmem>>, vector<1x16x16xf32>
    %519 = vector.shape_cast %518 : vector<1x16x16xf32> to vector<16x16xf32>
    %cst_323 = arith.constant dense<0.000000e+00> : vector<16x256xf32>
    %520 = tpu.matmul %519, %517, %cst_323 {dimension_numbers = #tpu.dot_dimension_numbers<[1], [0], [0], [1], [0, 0, 1, 1], [], []>} : vector<16x16xf32>, vector<16x256xf32>, vector<16x256xf32> -> vector<16x256xf32>
    %521 = arith.addf %514, %520 : vector<16x256xf32>
    %c16_i32_324 = arith.constant 16 : i32
    %522 = tpu.dynamic_rotate %511 by %c16_i32_324 dim 1 : vector<16x256xf32>, i32 -> vector<16x256xf32>
    %523 = vector.broadcast %89 : vector<1x256xf32> to vector<16x256xf32>
    %524 = arith.mulf %522, %523 : vector<16x256xf32>
    %c19 = arith.constant 19 : index
    %c0_325 = arith.constant 0 : index
    %c0_326 = arith.constant 0 : index
    %525 = vector.load %arg7[%c19, %c0_325, %c0_326] : memref<27x16x16xf32, #tpu.memory_space<vmem>>, vector<1x16x16xf32>
    %526 = vector.shape_cast %525 : vector<1x16x16xf32> to vector<16x16xf32>
    %cst_327 = arith.constant dense<0.000000e+00> : vector<16x256xf32>
    %527 = tpu.matmul %526, %524, %cst_327 {dimension_numbers = #tpu.dot_dimension_numbers<[1], [0], [0], [1], [0, 0, 1, 1], [], []>} : vector<16x16xf32>, vector<16x256xf32>, vector<16x256xf32> -> vector<16x256xf32>
    %528 = arith.addf %521, %527 : vector<16x256xf32>
    %c15_i32_328 = arith.constant 15 : i32
    %529 = tpu.dynamic_rotate %511 by %c15_i32_328 dim 1 : vector<16x256xf32>, i32 -> vector<16x256xf32>
    %530 = vector.broadcast %91 : vector<1x256xf32> to vector<16x256xf32>
    %531 = arith.mulf %529, %530 : vector<16x256xf32>
    %c20 = arith.constant 20 : index
    %c0_329 = arith.constant 0 : index
    %c0_330 = arith.constant 0 : index
    %532 = vector.load %arg7[%c20, %c0_329, %c0_330] : memref<27x16x16xf32, #tpu.memory_space<vmem>>, vector<1x16x16xf32>
    %533 = vector.shape_cast %532 : vector<1x16x16xf32> to vector<16x16xf32>
    %cst_331 = arith.constant dense<0.000000e+00> : vector<16x256xf32>
    %534 = tpu.matmul %533, %531, %cst_331 {dimension_numbers = #tpu.dot_dimension_numbers<[1], [0], [0], [1], [0, 0, 1, 1], [], []>} : vector<16x16xf32>, vector<16x256xf32>, vector<16x256xf32> -> vector<16x256xf32>
    %535 = arith.addf %528, %534 : vector<16x256xf32>
    %c1_i32_332 = arith.constant 1 : i32
    %536 = tpu.dynamic_rotate %511 by %c1_i32_332 dim 1 : vector<16x256xf32>, i32 -> vector<16x256xf32>
    %537 = vector.broadcast %93 : vector<1x256xf32> to vector<16x256xf32>
    %538 = arith.mulf %536, %537 : vector<16x256xf32>
    %c21 = arith.constant 21 : index
    %c0_333 = arith.constant 0 : index
    %c0_334 = arith.constant 0 : index
    %539 = vector.load %arg7[%c21, %c0_333, %c0_334] : memref<27x16x16xf32, #tpu.memory_space<vmem>>, vector<1x16x16xf32>
    %540 = vector.shape_cast %539 : vector<1x16x16xf32> to vector<16x16xf32>
    %cst_335 = arith.constant dense<0.000000e+00> : vector<16x256xf32>
    %541 = tpu.matmul %540, %538, %cst_335 {dimension_numbers = #tpu.dot_dimension_numbers<[1], [0], [0], [1], [0, 0, 1, 1], [], []>} : vector<16x16xf32>, vector<16x256xf32>, vector<16x256xf32> -> vector<16x256xf32>
    %542 = arith.addf %535, %541 : vector<16x256xf32>
    %c22 = arith.constant 22 : index
    %c0_336 = arith.constant 0 : index
    %c0_337 = arith.constant 0 : index
    %543 = vector.load %arg7[%c22, %c0_336, %c0_337] : memref<27x16x16xf32, #tpu.memory_space<vmem>>, vector<1x16x16xf32>
    %544 = vector.shape_cast %543 : vector<1x16x16xf32> to vector<16x16xf32>
    %cst_338 = arith.constant dense<0.000000e+00> : vector<16x256xf32>
    %545 = tpu.matmul %544, %511, %cst_338 {dimension_numbers = #tpu.dot_dimension_numbers<[1], [0], [0], [1], [0, 0, 1, 1], [], []>} : vector<16x16xf32>, vector<16x256xf32>, vector<16x256xf32> -> vector<16x256xf32>
    %546 = arith.addf %542, %545 : vector<16x256xf32>
    %c255_i32_339 = arith.constant 255 : i32
    %547 = tpu.dynamic_rotate %511 by %c255_i32_339 dim 1 : vector<16x256xf32>, i32 -> vector<16x256xf32>
    %548 = vector.broadcast %95 : vector<1x256xf32> to vector<16x256xf32>
    %549 = arith.mulf %547, %548 : vector<16x256xf32>
    %c23 = arith.constant 23 : index
    %c0_340 = arith.constant 0 : index
    %c0_341 = arith.constant 0 : index
    %550 = vector.load %arg7[%c23, %c0_340, %c0_341] : memref<27x16x16xf32, #tpu.memory_space<vmem>>, vector<1x16x16xf32>
    %551 = vector.shape_cast %550 : vector<1x16x16xf32> to vector<16x16xf32>
    %cst_342 = arith.constant dense<0.000000e+00> : vector<16x256xf32>
    %552 = tpu.matmul %551, %549, %cst_342 {dimension_numbers = #tpu.dot_dimension_numbers<[1], [0], [0], [1], [0, 0, 1, 1], [], []>} : vector<16x16xf32>, vector<16x256xf32>, vector<16x256xf32> -> vector<16x256xf32>
    %553 = arith.addf %546, %552 : vector<16x256xf32>
    %c241_i32_343 = arith.constant 241 : i32
    %554 = tpu.dynamic_rotate %511 by %c241_i32_343 dim 1 : vector<16x256xf32>, i32 -> vector<16x256xf32>
    %555 = vector.broadcast %97 : vector<1x256xf32> to vector<16x256xf32>
    %556 = arith.mulf %554, %555 : vector<16x256xf32>
    %c24 = arith.constant 24 : index
    %c0_344 = arith.constant 0 : index
    %c0_345 = arith.constant 0 : index
    %557 = vector.load %arg7[%c24, %c0_344, %c0_345] : memref<27x16x16xf32, #tpu.memory_space<vmem>>, vector<1x16x16xf32>
    %558 = vector.shape_cast %557 : vector<1x16x16xf32> to vector<16x16xf32>
    %cst_346 = arith.constant dense<0.000000e+00> : vector<16x256xf32>
    %559 = tpu.matmul %558, %556, %cst_346 {dimension_numbers = #tpu.dot_dimension_numbers<[1], [0], [0], [1], [0, 0, 1, 1], [], []>} : vector<16x16xf32>, vector<16x256xf32>, vector<16x256xf32> -> vector<16x256xf32>
    %560 = arith.addf %553, %559 : vector<16x256xf32>
    %c240_i32_347 = arith.constant 240 : i32
    %561 = tpu.dynamic_rotate %511 by %c240_i32_347 dim 1 : vector<16x256xf32>, i32 -> vector<16x256xf32>
    %562 = vector.broadcast %99 : vector<1x256xf32> to vector<16x256xf32>
    %563 = arith.mulf %561, %562 : vector<16x256xf32>
    %c25 = arith.constant 25 : index
    %c0_348 = arith.constant 0 : index
    %c0_349 = arith.constant 0 : index
    %564 = vector.load %arg7[%c25, %c0_348, %c0_349] : memref<27x16x16xf32, #tpu.memory_space<vmem>>, vector<1x16x16xf32>
    %565 = vector.shape_cast %564 : vector<1x16x16xf32> to vector<16x16xf32>
    %cst_350 = arith.constant dense<0.000000e+00> : vector<16x256xf32>
    %566 = tpu.matmul %565, %563, %cst_350 {dimension_numbers = #tpu.dot_dimension_numbers<[1], [0], [0], [1], [0, 0, 1, 1], [], []>} : vector<16x16xf32>, vector<16x256xf32>, vector<16x256xf32> -> vector<16x256xf32>
    %567 = arith.addf %560, %566 : vector<16x256xf32>
    %c239_i32_351 = arith.constant 239 : i32
    %568 = tpu.dynamic_rotate %511 by %c239_i32_351 dim 1 : vector<16x256xf32>, i32 -> vector<16x256xf32>
    %569 = vector.broadcast %101 : vector<1x256xf32> to vector<16x256xf32>
    %570 = arith.mulf %568, %569 : vector<16x256xf32>
    %c26 = arith.constant 26 : index
    %c0_352 = arith.constant 0 : index
    %c0_353 = arith.constant 0 : index
    %571 = vector.load %arg7[%c26, %c0_352, %c0_353] : memref<27x16x16xf32, #tpu.memory_space<vmem>>, vector<1x16x16xf32>
    %572 = vector.shape_cast %571 : vector<1x16x16xf32> to vector<16x16xf32>
    %cst_354 = arith.constant dense<0.000000e+00> : vector<16x256xf32>
    %573 = tpu.matmul %572, %570, %cst_354 {dimension_numbers = #tpu.dot_dimension_numbers<[1], [0], [0], [1], [0, 0, 1, 1], [], []>} : vector<16x16xf32>, vector<16x256xf32>, vector<16x256xf32> -> vector<16x256xf32>
    %574 = arith.addf %567, %573 : vector<16x256xf32>
    %575 = vector.broadcast %513 : vector<16x1xf32> to vector<16x256xf32>
    %576 = arith.addf %574, %575 : vector<16x256xf32>
    %cst_355 = arith.constant 2.000000e-01 : f32
    %577 = vector.broadcast %cst_355 : f32 to vector<16x256xf32>
    %578 = arith.mulf %577, %576 : vector<16x256xf32>
    %579 = arith.maximumf %576, %578 : vector<16x256xf32>
    %c2_356 = arith.constant 2 : index
    %c0_357 = arith.constant 0 : index
    %c0_358 = arith.constant 0 : index
    %580 = vector.load %arg10[%c2_356, %c0_357, %c0_358] : memref<3x16x1xf32, #tpu.memory_space<vmem>>, vector<1x16x1xf32>
    %581 = vector.shape_cast %580 : vector<1x16x1xf32> to vector<16x1xf32>
    %cst_359 = arith.constant 0.000000e+00 : f32
    %582 = vector.broadcast %cst_359 : f32 to vector<16x256xf32>
    %c17_i32_360 = arith.constant 17 : i32
    %583 = tpu.dynamic_rotate %579 by %c17_i32_360 dim 1 : vector<16x256xf32>, i32 -> vector<16x256xf32>
    %584 = vector.broadcast %87 : vector<1x256xf32> to vector<16x256xf32>
    %585 = arith.mulf %583, %584 : vector<16x256xf32>
    %c18_361 = arith.constant 18 : index
    %c0_362 = arith.constant 0 : index
    %c0_363 = arith.constant 0 : index
    %586 = vector.load %arg9[%c18_361, %c0_362, %c0_363] : memref<27x16x16xf32, #tpu.memory_space<vmem>>, vector<1x16x16xf32>
    %587 = vector.shape_cast %586 : vector<1x16x16xf32> to vector<16x16xf32>
    %cst_364 = arith.constant dense<0.000000e+00> : vector<16x256xf32>
    %588 = tpu.matmul %587, %585, %cst_364 {dimension_numbers = #tpu.dot_dimension_numbers<[1], [0], [0], [1], [0, 0, 1, 1], [], []>} : vector<16x16xf32>, vector<16x256xf32>, vector<16x256xf32> -> vector<16x256xf32>
    %589 = arith.addf %582, %588 : vector<16x256xf32>
    %c16_i32_365 = arith.constant 16 : i32
    %590 = tpu.dynamic_rotate %579 by %c16_i32_365 dim 1 : vector<16x256xf32>, i32 -> vector<16x256xf32>
    %591 = vector.broadcast %89 : vector<1x256xf32> to vector<16x256xf32>
    %592 = arith.mulf %590, %591 : vector<16x256xf32>
    %c19_366 = arith.constant 19 : index
    %c0_367 = arith.constant 0 : index
    %c0_368 = arith.constant 0 : index
    %593 = vector.load %arg9[%c19_366, %c0_367, %c0_368] : memref<27x16x16xf32, #tpu.memory_space<vmem>>, vector<1x16x16xf32>
    %594 = vector.shape_cast %593 : vector<1x16x16xf32> to vector<16x16xf32>
    %cst_369 = arith.constant dense<0.000000e+00> : vector<16x256xf32>
    %595 = tpu.matmul %594, %592, %cst_369 {dimension_numbers = #tpu.dot_dimension_numbers<[1], [0], [0], [1], [0, 0, 1, 1], [], []>} : vector<16x16xf32>, vector<16x256xf32>, vector<16x256xf32> -> vector<16x256xf32>
    %596 = arith.addf %589, %595 : vector<16x256xf32>
    %c15_i32_370 = arith.constant 15 : i32
    %597 = tpu.dynamic_rotate %579 by %c15_i32_370 dim 1 : vector<16x256xf32>, i32 -> vector<16x256xf32>
    %598 = vector.broadcast %91 : vector<1x256xf32> to vector<16x256xf32>
    %599 = arith.mulf %597, %598 : vector<16x256xf32>
    %c20_371 = arith.constant 20 : index
    %c0_372 = arith.constant 0 : index
    %c0_373 = arith.constant 0 : index
    %600 = vector.load %arg9[%c20_371, %c0_372, %c0_373] : memref<27x16x16xf32, #tpu.memory_space<vmem>>, vector<1x16x16xf32>
    %601 = vector.shape_cast %600 : vector<1x16x16xf32> to vector<16x16xf32>
    %cst_374 = arith.constant dense<0.000000e+00> : vector<16x256xf32>
    %602 = tpu.matmul %601, %599, %cst_374 {dimension_numbers = #tpu.dot_dimension_numbers<[1], [0], [0], [1], [0, 0, 1, 1], [], []>} : vector<16x16xf32>, vector<16x256xf32>, vector<16x256xf32> -> vector<16x256xf32>
    %603 = arith.addf %596, %602 : vector<16x256xf32>
    %c1_i32_375 = arith.constant 1 : i32
    %604 = tpu.dynamic_rotate %579 by %c1_i32_375 dim 1 : vector<16x256xf32>, i32 -> vector<16x256xf32>
    %605 = vector.broadcast %93 : vector<1x256xf32> to vector<16x256xf32>
    %606 = arith.mulf %604, %605 : vector<16x256xf32>
    %c21_376 = arith.constant 21 : index
    %c0_377 = arith.constant 0 : index
    %c0_378 = arith.constant 0 : index
    %607 = vector.load %arg9[%c21_376, %c0_377, %c0_378] : memref<27x16x16xf32, #tpu.memory_space<vmem>>, vector<1x16x16xf32>
    %608 = vector.shape_cast %607 : vector<1x16x16xf32> to vector<16x16xf32>
    %cst_379 = arith.constant dense<0.000000e+00> : vector<16x256xf32>
    %609 = tpu.matmul %608, %606, %cst_379 {dimension_numbers = #tpu.dot_dimension_numbers<[1], [0], [0], [1], [0, 0, 1, 1], [], []>} : vector<16x16xf32>, vector<16x256xf32>, vector<16x256xf32> -> vector<16x256xf32>
    %610 = arith.addf %603, %609 : vector<16x256xf32>
    %c22_380 = arith.constant 22 : index
    %c0_381 = arith.constant 0 : index
    %c0_382 = arith.constant 0 : index
    %611 = vector.load %arg9[%c22_380, %c0_381, %c0_382] : memref<27x16x16xf32, #tpu.memory_space<vmem>>, vector<1x16x16xf32>
    %612 = vector.shape_cast %611 : vector<1x16x16xf32> to vector<16x16xf32>
    %cst_383 = arith.constant dense<0.000000e+00> : vector<16x256xf32>
    %613 = tpu.matmul %612, %579, %cst_383 {dimension_numbers = #tpu.dot_dimension_numbers<[1], [0], [0], [1], [0, 0, 1, 1], [], []>} : vector<16x16xf32>, vector<16x256xf32>, vector<16x256xf32> -> vector<16x256xf32>
    %614 = arith.addf %610, %613 : vector<16x256xf32>
    %c255_i32_384 = arith.constant 255 : i32
    %615 = tpu.dynamic_rotate %579 by %c255_i32_384 dim 1 : vector<16x256xf32>, i32 -> vector<16x256xf32>
    %616 = vector.broadcast %95 : vector<1x256xf32> to vector<16x256xf32>
    %617 = arith.mulf %615, %616 : vector<16x256xf32>
    %c23_385 = arith.constant 23 : index
    %c0_386 = arith.constant 0 : index
    %c0_387 = arith.constant 0 : index
    %618 = vector.load %arg9[%c23_385, %c0_386, %c0_387] : memref<27x16x16xf32, #tpu.memory_space<vmem>>, vector<1x16x16xf32>
    %619 = vector.shape_cast %618 : vector<1x16x16xf32> to vector<16x16xf32>
    %cst_388 = arith.constant dense<0.000000e+00> : vector<16x256xf32>
    %620 = tpu.matmul %619, %617, %cst_388 {dimension_numbers = #tpu.dot_dimension_numbers<[1], [0], [0], [1], [0, 0, 1, 1], [], []>} : vector<16x16xf32>, vector<16x256xf32>, vector<16x256xf32> -> vector<16x256xf32>
    %621 = arith.addf %614, %620 : vector<16x256xf32>
    %c241_i32_389 = arith.constant 241 : i32
    %622 = tpu.dynamic_rotate %579 by %c241_i32_389 dim 1 : vector<16x256xf32>, i32 -> vector<16x256xf32>
    %623 = vector.broadcast %97 : vector<1x256xf32> to vector<16x256xf32>
    %624 = arith.mulf %622, %623 : vector<16x256xf32>
    %c24_390 = arith.constant 24 : index
    %c0_391 = arith.constant 0 : index
    %c0_392 = arith.constant 0 : index
    %625 = vector.load %arg9[%c24_390, %c0_391, %c0_392] : memref<27x16x16xf32, #tpu.memory_space<vmem>>, vector<1x16x16xf32>
    %626 = vector.shape_cast %625 : vector<1x16x16xf32> to vector<16x16xf32>
    %cst_393 = arith.constant dense<0.000000e+00> : vector<16x256xf32>
    %627 = tpu.matmul %626, %624, %cst_393 {dimension_numbers = #tpu.dot_dimension_numbers<[1], [0], [0], [1], [0, 0, 1, 1], [], []>} : vector<16x16xf32>, vector<16x256xf32>, vector<16x256xf32> -> vector<16x256xf32>
    %628 = arith.addf %621, %627 : vector<16x256xf32>
    %c240_i32_394 = arith.constant 240 : i32
    %629 = tpu.dynamic_rotate %579 by %c240_i32_394 dim 1 : vector<16x256xf32>, i32 -> vector<16x256xf32>
    %630 = vector.broadcast %99 : vector<1x256xf32> to vector<16x256xf32>
    %631 = arith.mulf %629, %630 : vector<16x256xf32>
    %c25_395 = arith.constant 25 : index
    %c0_396 = arith.constant 0 : index
    %c0_397 = arith.constant 0 : index
    %632 = vector.load %arg9[%c25_395, %c0_396, %c0_397] : memref<27x16x16xf32, #tpu.memory_space<vmem>>, vector<1x16x16xf32>
    %633 = vector.shape_cast %632 : vector<1x16x16xf32> to vector<16x16xf32>
    %cst_398 = arith.constant dense<0.000000e+00> : vector<16x256xf32>
    %634 = tpu.matmul %633, %631, %cst_398 {dimension_numbers = #tpu.dot_dimension_numbers<[1], [0], [0], [1], [0, 0, 1, 1], [], []>} : vector<16x16xf32>, vector<16x256xf32>, vector<16x256xf32> -> vector<16x256xf32>
    %635 = arith.addf %628, %634 : vector<16x256xf32>
    %c239_i32_399 = arith.constant 239 : i32
    %636 = tpu.dynamic_rotate %579 by %c239_i32_399 dim 1 : vector<16x256xf32>, i32 -> vector<16x256xf32>
    %637 = vector.broadcast %101 : vector<1x256xf32> to vector<16x256xf32>
    %638 = arith.mulf %636, %637 : vector<16x256xf32>
    %c26_400 = arith.constant 26 : index
    %c0_401 = arith.constant 0 : index
    %c0_402 = arith.constant 0 : index
    %639 = vector.load %arg9[%c26_400, %c0_401, %c0_402] : memref<27x16x16xf32, #tpu.memory_space<vmem>>, vector<1x16x16xf32>
    %640 = vector.shape_cast %639 : vector<1x16x16xf32> to vector<16x16xf32>
    %cst_403 = arith.constant dense<0.000000e+00> : vector<16x256xf32>
    %641 = tpu.matmul %640, %638, %cst_403 {dimension_numbers = #tpu.dot_dimension_numbers<[1], [0], [0], [1], [0, 0, 1, 1], [], []>} : vector<16x16xf32>, vector<16x256xf32>, vector<16x256xf32> -> vector<16x256xf32>
    %642 = arith.addf %635, %641 : vector<16x256xf32>
    %643 = vector.broadcast %581 : vector<16x1xf32> to vector<16x256xf32>
    %644 = arith.addf %642, %643 : vector<16x256xf32>
    %cst_404 = arith.constant 2.000000e-01 : f32
    %645 = vector.broadcast %cst_404 : f32 to vector<16x256xf32>
    %646 = arith.mulf %645, %644 : vector<16x256xf32>
    %647 = arith.maximumf %644, %646 : vector<16x256xf32>
    %648 = arith.addf %511, %647 : vector<16x256xf32>
    %649 = arith.addf %648, %85 : vector<16x256xf32>
    %650 = vector.broadcast %65 : vector<1x256xf32> to vector<16x256xf32>
    %651 = arith.mulf %649, %650 : vector<16x256xf32>
    %c2_405 = arith.constant 2 : index
    %c0_406 = arith.constant 0 : index
    %c0_407 = arith.constant 0 : index
    %652 = vector.load %arg11[%c2_405, %c0_406, %c0_407] : memref<3x4x32xf32, #tpu.memory_space<vmem>>, vector<1x4x16xf32>
    %653 = vector.shape_cast %652 : vector<1x4x16xf32> to vector<4x16xf32>
    %cst_408 = arith.constant dense<0.000000e+00> : vector<4x256xf32>
    %654 = tpu.matmul %653, %648, %cst_408 {dimension_numbers = #tpu.dot_dimension_numbers<[1], [0], [0], [1], [0, 0, 1, 1], [], []>} : vector<4x16xf32>, vector<16x256xf32>, vector<4x256xf32> -> vector<4x256xf32>
    %c2_409 = arith.constant 2 : index
    %c0_410 = arith.constant 0 : index
    %c16_411 = arith.constant 16 : index
    %655 = vector.load %arg11[%c2_409, %c0_410, %c16_411] : memref<3x4x32xf32, #tpu.memory_space<vmem>>, vector<1x4x16xf32>
    %656 = vector.shape_cast %655 : vector<1x4x16xf32> to vector<4x16xf32>
    %cst_412 = arith.constant dense<0.000000e+00> : vector<4x256xf32>
    %657 = tpu.matmul %656, %651, %cst_412 {dimension_numbers = #tpu.dot_dimension_numbers<[1], [0], [0], [1], [0, 0, 1, 1], [], []>} : vector<4x16xf32>, vector<16x256xf32>, vector<4x256xf32> -> vector<4x256xf32>
    %658 = arith.addf %654, %657 : vector<4x256xf32>
    %cst_413 = arith.constant dense<0.000000e+00> : vector<4xf32>
    %659 = vector.multi_reduction <add>, %658, %cst_413 [1] : vector<4x256xf32> to vector<4xf32>
    %660 = vector.shape_cast %659 : vector<4xf32> to vector<4x1xf32>
    %cst_414 = arith.constant 3.906250e-03 : f32
    %661 = vector.broadcast %cst_414 : f32 to vector<4x1xf32>
    %662 = arith.mulf %660, %661 : vector<4x1xf32>
    %c2_415 = arith.constant 2 : index
    %c0_416 = arith.constant 0 : index
    %c0_417 = arith.constant 0 : index
    %663 = vector.load %arg12[%c2_415, %c0_416, %c0_417] : memref<3x4x1xf32, #tpu.memory_space<vmem>>, vector<1x4x1xf32>
    %664 = vector.shape_cast %663 : vector<1x4x1xf32> to vector<4x1xf32>
    %665 = arith.addf %662, %664 : vector<4x1xf32>
    %cst_418 = arith.constant 0.000000e+00 : f32
    %666 = vector.broadcast %cst_418 : f32 to vector<4x1xf32>
    %667 = arith.maximumf %665, %666 : vector<4x1xf32>
    %c2_419 = arith.constant 2 : index
    %c0_420 = arith.constant 0 : index
    %c0_421 = arith.constant 0 : index
    %668 = vector.load %arg14[%c2_419, %c0_420, %c0_421] : memref<3x32x1xf32, #tpu.memory_space<vmem>>, vector<1x32x1xf32>
    %669 = vector.shape_cast %668 : vector<1x32x1xf32> to vector<32x1xf32>
    %c2_422 = arith.constant 2 : index
    %c0_423 = arith.constant 0 : index
    %c0_424 = arith.constant 0 : index
    %670 = vector.load %arg13[%c2_422, %c0_423, %c0_424] : memref<3x32x4xf32, #tpu.memory_space<vmem>>, vector<1x32x1xf32>
    %671 = vector.shape_cast %670 : vector<1x32x1xf32> to vector<32x1xf32>
    %672 = vector.extract_strided_slice %667 {offsets = [0, 0], sizes = [1, 1], strides = [1, 1]} : vector<4x1xf32> to vector<1x1xf32>
    %673 = vector.broadcast %672 : vector<1x1xf32> to vector<32x1xf32>
    %674 = arith.mulf %671, %673 : vector<32x1xf32>
    %675 = arith.addf %669, %674 : vector<32x1xf32>
    %c2_425 = arith.constant 2 : index
    %c0_426 = arith.constant 0 : index
    %c1_427 = arith.constant 1 : index
    %676 = vector.load %arg13[%c2_425, %c0_426, %c1_427] : memref<3x32x4xf32, #tpu.memory_space<vmem>>, vector<1x32x1xf32>
    %677 = vector.shape_cast %676 : vector<1x32x1xf32> to vector<32x1xf32>
    %678 = vector.extract_strided_slice %667 {offsets = [1, 0], sizes = [1, 1], strides = [1, 1]} : vector<4x1xf32> to vector<1x1xf32>
    %679 = vector.broadcast %678 : vector<1x1xf32> to vector<32x1xf32>
    %680 = arith.mulf %677, %679 : vector<32x1xf32>
    %681 = arith.addf %675, %680 : vector<32x1xf32>
    %c2_428 = arith.constant 2 : index
    %c0_429 = arith.constant 0 : index
    %c2_430 = arith.constant 2 : index
    %682 = vector.load %arg13[%c2_428, %c0_429, %c2_430] : memref<3x32x4xf32, #tpu.memory_space<vmem>>, vector<1x32x1xf32>
    %683 = vector.shape_cast %682 : vector<1x32x1xf32> to vector<32x1xf32>
    %684 = vector.extract_strided_slice %667 {offsets = [2, 0], sizes = [1, 1], strides = [1, 1]} : vector<4x1xf32> to vector<1x1xf32>
    %685 = vector.broadcast %684 : vector<1x1xf32> to vector<32x1xf32>
    %686 = arith.mulf %683, %685 : vector<32x1xf32>
    %687 = arith.addf %681, %686 : vector<32x1xf32>
    %c2_431 = arith.constant 2 : index
    %c0_432 = arith.constant 0 : index
    %c3_433 = arith.constant 3 : index
    %688 = vector.load %arg13[%c2_431, %c0_432, %c3_433] : memref<3x32x4xf32, #tpu.memory_space<vmem>>, vector<1x32x1xf32>
    %689 = vector.shape_cast %688 : vector<1x32x1xf32> to vector<32x1xf32>
    %690 = vector.extract_strided_slice %667 {offsets = [3, 0], sizes = [1, 1], strides = [1, 1]} : vector<4x1xf32> to vector<1x1xf32>
    %691 = vector.broadcast %690 : vector<1x1xf32> to vector<32x1xf32>
    %692 = arith.mulf %689, %691 : vector<32x1xf32>
    %693 = arith.addf %687, %692 : vector<32x1xf32>
    %cst_434 = arith.constant 0.000000e+00 : f32
    %694 = vector.broadcast %cst_434 : f32 to vector<32x1xf32>
    %695 = arith.subf %694, %693 : vector<32x1xf32>
    %696 = math.exp %695 : vector<32x1xf32>
    %cst_435 = arith.constant 1.000000e+00 : f32
    %697 = vector.broadcast %cst_435 : f32 to vector<32x1xf32>
    %698 = arith.addf %697, %696 : vector<32x1xf32>
    %cst_436 = arith.constant 1.000000e+00 : f32
    %699 = vector.broadcast %cst_436 : f32 to vector<32x1xf32>
    %700 = arith.divf %699, %698 : vector<32x1xf32>
    %701 = vector.extract_strided_slice %700 {offsets = [0, 0], sizes = [16, 1], strides = [1, 1]} : vector<32x1xf32> to vector<16x1xf32>
    %702 = vector.broadcast %701 : vector<16x1xf32> to vector<16x256xf32>
    %703 = arith.mulf %648, %702 : vector<16x256xf32>
    %704 = vector.extract_strided_slice %700 {offsets = [16, 0], sizes = [16, 1], strides = [1, 1]} : vector<32x1xf32> to vector<16x1xf32>
    %705 = vector.broadcast %704 : vector<16x1xf32> to vector<16x256xf32>
    %706 = arith.mulf %651, %705 : vector<16x256xf32>
    %c2_437 = arith.constant 2 : index
    %c0_438 = arith.constant 0 : index
    %c0_439 = arith.constant 0 : index
    %707 = vector.load %arg15[%c2_437, %c0_438, %c0_439] : memref<3x16x32xf32, #tpu.memory_space<vmem>>, vector<1x16x16xf32>
    %708 = vector.shape_cast %707 : vector<1x16x16xf32> to vector<16x16xf32>
    %cst_440 = arith.constant dense<0.000000e+00> : vector<16x256xf32>
    %709 = tpu.matmul %708, %703, %cst_440 {dimension_numbers = #tpu.dot_dimension_numbers<[1], [0], [0], [1], [0, 0, 1, 1], [], []>} : vector<16x16xf32>, vector<16x256xf32>, vector<16x256xf32> -> vector<16x256xf32>
    %c2_441 = arith.constant 2 : index
    %c0_442 = arith.constant 0 : index
    %c16_443 = arith.constant 16 : index
    %710 = vector.load %arg15[%c2_441, %c0_442, %c16_443] : memref<3x16x32xf32, #tpu.memory_space<vmem>>, vector<1x16x16xf32>
    %711 = vector.shape_cast %710 : vector<1x16x16xf32> to vector<16x16xf32>
    %cst_444 = arith.constant dense<0.000000e+00> : vector<16x256xf32>
    %712 = tpu.matmul %711, %706, %cst_444 {dimension_numbers = #tpu.dot_dimension_numbers<[1], [0], [0], [1], [0, 0, 1, 1], [], []>} : vector<16x16xf32>, vector<16x256xf32>, vector<16x256xf32> -> vector<16x256xf32>
    %713 = arith.addf %709, %712 : vector<16x256xf32>
    %c2_445 = arith.constant 2 : index
    %c0_446 = arith.constant 0 : index
    %c0_447 = arith.constant 0 : index
    %714 = vector.load %arg16[%c2_445, %c0_446, %c0_447] : memref<3x16x1xf32, #tpu.memory_space<vmem>>, vector<1x16x1xf32>
    %715 = vector.shape_cast %714 : vector<1x16x1xf32> to vector<16x1xf32>
    %716 = vector.broadcast %715 : vector<16x1xf32> to vector<16x256xf32>
    %717 = arith.addf %713, %716 : vector<16x256xf32>
    %c0_448 = arith.constant 0 : index
    %c0_449 = arith.constant 0 : index
    %718 = vector.load %arg17[%c0_448, %c0_449] : memref<16x1xf32, #tpu.memory_space<vmem>>, vector<16x1xf32>
    %719 = vector.broadcast %718 : vector<16x1xf32> to vector<16x256xf32>
    %720 = arith.mulf %717, %719 : vector<16x256xf32>
    %cst_450 = arith.constant dense<0.000000e+00> : vector<256xf32>
    %721 = vector.multi_reduction <add>, %720, %cst_450 [0] : vector<16x256xf32> to vector<256xf32>
    %722 = vector.shape_cast %721 : vector<256xf32> to vector<1x256xf32>
    %c0_451 = arith.constant 0 : index
    %c0_452 = arith.constant 0 : index
    %723 = vector.load %arg18[%c0_451, %c0_452] : memref<1x1xf32, #tpu.memory_space<vmem>>, vector<1x1xf32>
    %724 = vector.broadcast %723 : vector<1x1xf32> to vector<1x256xf32>
    %725 = arith.addf %722, %724 : vector<1x256xf32>
    %c0_453 = arith.constant 0 : index
    %c0_454 = arith.constant 0 : index
    %726 = vector.load %arg19[%c0_453, %c0_454] : memref<1x2xf32, #tpu.memory_space<vmem>>, vector<1x1xf32>
    %727 = vector.broadcast %726 : vector<1x1xf32> to vector<1x256xf32>
    %728 = arith.mulf %725, %727 : vector<1x256xf32>
    %c0_455 = arith.constant 0 : index
    %c1_456 = arith.constant 1 : index
    %729 = vector.load %arg19[%c0_455, %c1_456] : memref<1x2xf32, #tpu.memory_space<vmem>>, vector<1x1xf32>
    %730 = vector.broadcast %729 : vector<1x1xf32> to vector<1x256xf32>
    %731 = arith.mulf %63, %730 : vector<1x256xf32>
    %732 = arith.addf %728, %731 : vector<1x256xf32>
    %cst_457 = arith.constant 0.000000e+00 : f32
    %733 = vector.broadcast %cst_457 : f32 to vector<1x256xf32>
    %734 = arith.subf %733, %732 : vector<1x256xf32>
    %735 = math.exp %734 : vector<1x256xf32>
    %cst_458 = arith.constant 1.000000e+00 : f32
    %736 = vector.broadcast %cst_458 : f32 to vector<1x256xf32>
    %737 = arith.addf %736, %735 : vector<1x256xf32>
    %cst_459 = arith.constant 1.000000e+00 : f32
    %738 = vector.broadcast %cst_459 : f32 to vector<1x256xf32>
    %739 = arith.divf %738, %737 : vector<1x256xf32>
    %c0_460 = arith.constant 0 : index
    %c0_461 = arith.constant 0 : index
    %c0_462 = arith.constant 0 : index
    %740 = vector.load %arg20[%c0_460, %c0_461, %c0_462] : memref<1x1x256xf32, #tpu.memory_space<vmem>>, vector<1x1x256xf32>
    %741 = vector.shape_cast %740 : vector<1x1x256xf32> to vector<1x256xf32>
    %742 = vector.shape_cast %739 : vector<1x256xf32> to vector<1x1x256xf32>
    tpu.vector_store %arg20[%c0_460, %c0_461, %c0_462], %742 {strides = array<i32>} : memref<1x1x256xf32, #tpu.memory_space<vmem>>, vector<1x1x256xf32>,
    %c0_463 = arith.constant 0 : index
    %c0_464 = arith.constant 0 : index
    %c0_465 = arith.constant 0 : index
    %743 = vector.load %arg21[%c0_463, %c0_464, %c0_465] : memref<1x1x256xf32, #tpu.memory_space<vmem>>, vector<1x1x256xf32>
    %744 = vector.shape_cast %743 : vector<1x1x256xf32> to vector<1x256xf32>
    %745 = vector.shape_cast %63 : vector<1x256xf32> to vector<1x1x256xf32>
    tpu.vector_store %arg21[%c0_463, %c0_464, %c0_465], %745 {strides = array<i32>} : memref<1x1x256xf32, #tpu.memory_space<vmem>>, vector<1x1x256xf32>,
    return
  }
  func.func @transform_0(%arg0: i32) -> (i32, i32, i32) {
    %c0_i32 = arith.constant 0 : i32
    %c0_i32_0 = arith.constant 0 : i32
    %c0_i32_1 = arith.constant 0 : i32
    return %arg0, %c0_i32, %c0_i32_0 : i32, i32, i32
  }
  func.func @transform_1(%arg0: i32) -> (i32, i32) {
    %c0_i32 = arith.constant 0 : i32
    %c0_i32_0 = arith.constant 0 : i32
    %c0_i32_1 = arith.constant 0 : i32
    return %c0_i32, %c0_i32_0 : i32, i32
  }
  func.func @transform_2(%arg0: i32) -> (i32, i32, i32) {
    %c0_i32 = arith.constant 0 : i32
    %c0_i32_0 = arith.constant 0 : i32
    %c0_i32_1 = arith.constant 0 : i32
    return %arg0, %c0_i32, %c0_i32_0 : i32, i32, i32
  }
  func.func @transform_3(%arg0: i32) -> (i32, i32, i32) {
    %c0_i32 = arith.constant 0 : i32
    %c0_i32_0 = arith.constant 0 : i32
    %c0_i32_1 = arith.constant 0 : i32
    %c0_i32_2 = arith.constant 0 : i32
    return %c0_i32, %c0_i32_0, %c0_i32_1 : i32, i32, i32
  }
  func.func @transform_4(%arg0: i32) -> (i32, i32) {
    %c0_i32 = arith.constant 0 : i32
    %c0_i32_0 = arith.constant 0 : i32
    %c0_i32_1 = arith.constant 0 : i32
    return %c0_i32, %c0_i32_0 : i32, i32
  }
  func.func @transform_5(%arg0: i32) -> (i32, i32) {
    %c0_i32 = arith.constant 0 : i32
    %c0_i32_0 = arith.constant 0 : i32
    %c0_i32_1 = arith.constant 0 : i32
    return %c0_i32, %c0_i32_0 : i32, i32
  }
  func.func @transform_6(%arg0: i32) -> (i32, i32, i32) {
    %c0_i32 = arith.constant 0 : i32
    %c0_i32_0 = arith.constant 0 : i32
    %c0_i32_1 = arith.constant 0 : i32
    %c0_i32_2 = arith.constant 0 : i32
    return %c0_i32, %c0_i32_0, %c0_i32_1 : i32, i32, i32
  }
  func.func @transform_7(%arg0: i32) -> (i32, i32, i32) {
    %c0_i32 = arith.constant 0 : i32
    %c0_i32_0 = arith.constant 0 : i32
    %c0_i32_1 = arith.constant 0 : i32
    %c0_i32_2 = arith.constant 0 : i32
    return %c0_i32, %c0_i32_0, %c0_i32_1 : i32, i32, i32
  }
  func.func @transform_8(%arg0: i32) -> (i32, i32, i32) {
    %c0_i32 = arith.constant 0 : i32
    %c0_i32_0 = arith.constant 0 : i32
    %c0_i32_1 = arith.constant 0 : i32
    %c0_i32_2 = arith.constant 0 : i32
    return %c0_i32, %c0_i32_0, %c0_i32_1 : i32, i32, i32
  }
  func.func @transform_9(%arg0: i32) -> (i32, i32, i32) {
    %c0_i32 = arith.constant 0 : i32
    %c0_i32_0 = arith.constant 0 : i32
    %c0_i32_1 = arith.constant 0 : i32
    %c0_i32_2 = arith.constant 0 : i32
    return %c0_i32, %c0_i32_0, %c0_i32_1 : i32, i32, i32
  }
  func.func @transform_10(%arg0: i32) -> (i32, i32, i32) {
    %c0_i32 = arith.constant 0 : i32
    %c0_i32_0 = arith.constant 0 : i32
    %c0_i32_1 = arith.constant 0 : i32
    %c0_i32_2 = arith.constant 0 : i32
    return %c0_i32, %c0_i32_0, %c0_i32_1 : i32, i32, i32
  }
  func.func @transform_11(%arg0: i32) -> (i32, i32, i32) {
    %c0_i32 = arith.constant 0 : i32
    %c0_i32_0 = arith.constant 0 : i32
    %c0_i32_1 = arith.constant 0 : i32
    %c0_i32_2 = arith.constant 0 : i32
    return %c0_i32, %c0_i32_0, %c0_i32_1 : i32, i32, i32
  }
  func.func @transform_12(%arg0: i32) -> (i32, i32, i32) {
    %c0_i32 = arith.constant 0 : i32
    %c0_i32_0 = arith.constant 0 : i32
    %c0_i32_1 = arith.constant 0 : i32
    %c0_i32_2 = arith.constant 0 : i32
    return %c0_i32, %c0_i32_0, %c0_i32_1 : i32, i32, i32
  }
  func.func @transform_13(%arg0: i32) -> (i32, i32, i32) {
    %c0_i32 = arith.constant 0 : i32
    %c0_i32_0 = arith.constant 0 : i32
    %c0_i32_1 = arith.constant 0 : i32
    %c0_i32_2 = arith.constant 0 : i32
    return %c0_i32, %c0_i32_0, %c0_i32_1 : i32, i32, i32
  }
  func.func @transform_14(%arg0: i32) -> (i32, i32, i32) {
    %c0_i32 = arith.constant 0 : i32
    %c0_i32_0 = arith.constant 0 : i32
    %c0_i32_1 = arith.constant 0 : i32
    %c0_i32_2 = arith.constant 0 : i32
    return %c0_i32, %c0_i32_0, %c0_i32_1 : i32, i32, i32
  }
  func.func @transform_15(%arg0: i32) -> (i32, i32, i32) {
    %c0_i32 = arith.constant 0 : i32
    %c0_i32_0 = arith.constant 0 : i32
    %c0_i32_1 = arith.constant 0 : i32
    %c0_i32_2 = arith.constant 0 : i32
    return %c0_i32, %c0_i32_0, %c0_i32_1 : i32, i32, i32
  }
  func.func @transform_16(%arg0: i32) -> (i32, i32) {
    %c0_i32 = arith.constant 0 : i32
    %c0_i32_0 = arith.constant 0 : i32
    %c0_i32_1 = arith.constant 0 : i32
    return %c0_i32, %c0_i32_0 : i32, i32
  }
  func.func @transform_17(%arg0: i32) -> (i32, i32) {
    %c0_i32 = arith.constant 0 : i32
    %c0_i32_0 = arith.constant 0 : i32
    %c0_i32_1 = arith.constant 0 : i32
    return %c0_i32, %c0_i32_0 : i32, i32
  }
  func.func @transform_18(%arg0: i32) -> (i32, i32) {
    %c0_i32 = arith.constant 0 : i32
    %c0_i32_0 = arith.constant 0 : i32
    %c0_i32_1 = arith.constant 0 : i32
    return %c0_i32, %c0_i32_0 : i32, i32
  }
  func.func @transform_19(%arg0: i32) -> (i32, i32, i32) {
    %c0_i32 = arith.constant 0 : i32
    %c0_i32_0 = arith.constant 0 : i32
    %c0_i32_1 = arith.constant 0 : i32
    return %arg0, %c0_i32, %c0_i32_0 : i32, i32, i32
  }
  func.func @transform_20(%arg0: i32) -> (i32, i32, i32) {
    %c0_i32 = arith.constant 0 : i32
    %c0_i32_0 = arith.constant 0 : i32
    %c0_i32_1 = arith.constant 0 : i32
    return %arg0, %c0_i32, %c0_i32_0 : i32, i32, i32
  }
}

</mosaic_0001>

<bundles_post_ra>
// kernel: illumnet_forward.1
= control target key start
LH: loop header
LB: loop body
LE: loop exit
PB: predicated region body
PF: predicated region fallthrough
CT: control target
= control target key end

     0   :  { %s7162_s23 = smov 0   ;;  %s9339_s0 = inlined_call_operand.vmem [shape: f32[2,1,1], index: 0, kind: input, shape index: {}]   ;;  %s9340_s1 = inlined_call_operand.vmem [shape: f32[1,2], index: 1, kind: input, shape index: {}]   ;;  %s9341_s2 = inlined_call_operand.vmem [shape: f32[2,1,256], index: 2, kind: input, shape index: {}]   ;;  %s9342_s3 = inlined_call_operand.vmem [shape: f32[9,1,256], index: 3, kind: input, shape index: {}]   ;;  %s9343_s4 = inlined_call_operand.vmem [shape: f32[16,3], index: 4, kind: input, shape index: {}]   ;;  %s9344_s5 = inlined_call_operand.vmem [shape: f32[16,1], index: 5, kind: input, shape index: {}]   ;;  %s9345_s6 = inlined_call_operand.vmem [shape: f32[27,16,16], index: 6, kind: input, shape index: {}]   ;;  %s9346_s7 = inlined_call_operand.vmem [shape: f32[3,16,1], index: 7, kind: input, shape index: {}]   ;;  %s9347_s8 = inlined_call_operand.vmem [shape: f32[27,16,16], index: 8, kind: input, shape index: {}]   ;;  %s9348_s9 = inlined_call_operand.vmem [shape: f32[3,16,1], index: 9, kind: input, shape index: {}]   ;;  %s9349_s10 = inlined_call_operand.vmem [shape: f32[3,4,32], index: 10, kind: input, shape index: {}]   ;;  %s9350_s11 = inlined_call_operand.vmem [shape: f32[3,4,1], index: 11, kind: input, shape index: {}]   ;;  %s9351_s12 = inlined_call_operand.vmem [shape: f32[3,32,4], index: 12, kind: input, shape index: {}]   ;;  %s9352_s13 = inlined_call_operand.vmem [shape: f32[3,32,1], index: 13, kind: input, shape index: {}]   ;;  %s9353_s14 = inlined_call_operand.vmem [shape: f32[3,16,32], index: 14, kind: input, shape index: {}]   ;;  %s9354_s15 = inlined_call_operand.vmem [shape: f32[3,16,1], index: 15, kind: input, shape index: {}]   ;;  %s9355_s16 = inlined_call_operand.vmem [shape: f32[16,1], index: 16, kind: input, shape index: {}]   ;;  %s9356_s17 = inlined_call_operand.<no memory space> [shape: f32[1,1], index: 17, kind: input, shape index: {}]   ;;  %s9357_s18 = inlined_call_operand.vmem [shape: f32[1,2], index: 18, kind: input, shape index: {}]   ;;  %s9358_s19 = inlined_call_operand.vmem [shape: f32[2,1,256], index: 19, kind: output, shape index: {0}]   ;;  %s9359_s20 = inlined_call_operand.vmem [shape: f32[2,1,256], index: 20, kind: output, shape index: {1}]  }
   0x1   :  { %9414 = sst [smem:[#allocation15_spill]] %s9339_s0  ;;  %v26_v0 = vstv %s9356_s17 }
   0x2   :  { %9415 = sst [smem:[#allocation16_spill]] %s9340_s1  ;;  %27 = vst [vmem:[#allocation2] sm:$0x1] %v26_v0 }
   0x3   :  { %9416 = sst [smem:[#allocation17_spill]] %s9341_s2 }
   0x4   :  { %9417 = sst [smem:[#allocation18_spill]] %s9342_s3 }
   0x5   :  { %9418 = sst [smem:[#allocation19_spill]] %s9343_s4 }
   0x6   :  { %9419 = sst [smem:[#allocation20_spill]] %s9344_s5 }
   0x7   :  { %9420 = sst [smem:[#allocation21_spill]] %s9358_s19 }
   0x8   :  { %9421 = sst [smem:[#allocation22_spill]] %s9359_s20 }
   0x9 LB: > { %9422 = sst [smem:[#allocation3_spill]] %s7036_s23  ;;  %s6519_s24 = sadd.s32 4294967295, %s7036_s23   ;;  %s7036_s23 = sphi %s7162_s23, %s33_s23  }
   0xa   : > { %p6523_p0 = scmp.ge.s32.totalorder %s7036_s23, 1  ;;  %p574_p1 = scmp.lt.s32.totalorder %s7036_s23, 3 }
   0xc   : > { %p575_p2 = pnand %p6523_p0, %p574_p1 }
   0xe   : > { %578 = sbr.rel (%p575_p2) target bundleno = 5170 (0x1432), region = 96 }
  0x13   : > { %p637_p3 = scmp.lt.s32.totalorder %s6519_s24, 1  ;;  %s9423_s3 = sld [smem:[#allocation17_spill]]  ;;  %vm9386_vm0 = vcmask 1040384   ;;  %v7039_v38 = vmov 0   ;;  %v9366_v50 = vmov 1   ;;  %v7041_v0 = vmov inf  }
  0x14   : > { %s9424_s4 = sld [smem:[#allocation16_spill]]  ;;  %s9397_s29 = smov 127   ;;  %6954 = vset.pattern.permute.xlu0 %v7039_v38  ;;  %6953 = vset.pattern.permute.xlu2 %v7039_v38 }
  0x15   : > { %s9495_s24 = smov (!%p637_p3, %s6519_s24), 1  ;;  %s9425_s21 = sld [smem:[#allocation15_spill]]  ;;  %6955 = vset.pattern.permute.xlu1 %v9366_v50 }
  0x16   : > { %s7173_s17 = sshll.u32 %s9495_s24, 1  ;;  %s9427_s5 = sld [smem:[#allocation20_spill]] }
  0x17   : > { %s9428_s20 = sld [smem:[#allocation22_spill]]  ;;  %s9384_s22 = smov 17  }
  0x18   : > { %s9376_s2 = smov 15   ;;  %s9404_s25 = smov 1  }
  0x19   : > { %s643_s26 = scalar_lea.vmem %s9423_s3, %s7173_s17  ;;  %s9374_s3 = smov 113  }
  0x1a   : > { %v7179_v1 = vld [vmem:[%s643_s26] sm:$0x3]  ;;  %s9362_s26 = smov 112   ;;  %s9364_s27 = smov 111  }
  0x1b   : > { %v7182_v2 = vperm.slane %v7179_v1, 0  ;;  %v7185_v3 = vperm.slane %v7179_v1, 1  ;;  %v653_v29 = vld [vmem:[%s9424_s4] sm:$0x1]  ;;  %s639_s1 = scalar_lea.vmem %s9425_s21, %s9495_s24  ;;  %s9426_s24 = sld [smem:[#allocation19_spill]] }
  0x1c   : > { %v652_v39 = vld [vmem:[%s639_s1] sm:$0x1]  ;;  %s9382_s1 = smov 16   ;;  %s9395_s30 = smov 2  }
  0x1d   : > { %v661_v4 = vsel %vm9386_vm0, %v7182_v2, 0.0  ;;  %v662_v5 = vsel %vm9386_vm0, %v7185_v3, 0.0  ;;  %v708_v17 = vsel %vm9386_vm0, %v7182_v2, -inf  ;;  %v709_v18 = vsel %vm9386_vm0, %v7185_v3, -inf  ;;  %v846_v60 = vld [vmem:[%s9427_s5] sm:$0xff]  ;;  %s651_s21 = scalar_lea.vmem %s9428_s20, %s7173_s17  ;;  %s9391_s0 = smov 126  }
  0x1e   : > { %v663_v6 = vadd.f32 %v662_v5, %v661_v4  ;;  %v710_v19 = vmax.f32 %v708_v17, %v709_v18  ;;  %v703_v35 = vsel %vm9386_vm0, %v7182_v2, inf  ;;  %v704_v36 = vsel %vm9386_vm0, %v7185_v3, inf  ;;  %s9389_s28 = smov 125   ;;  %s9457_s4 = smov 127  }
  0x1f   : > { %v705_v37 = vmin.f32 %v703_v35, %v704_v36  ;;  %v746_v40 = vmul.f32 %v653_v29, %v652_v39  ;;  %s9468_s20 = smov 126   ;;  %s9490_s23 = sld [smem:[#allocation21_spill]] }
  0x20   : > { %664 = vadd.xlane.f32.xlu0 %v663_v6  ;;  %711 = vmax.xlane.f32.xlu2 %v710_v19  ;;  %v7042_v6 = vmov 2  }
  0x21   : > { %vm752_vm3 = vweird.f32 %v746_v40  ;;  %v758_v48 = vand.u32 2147483648, %v746_v40  ;;  %v789_v49 = vld [vmem:[%s9426_s24 + $0x8] sm:$0xff]  ;;  %v756_v53 = vand.u32 2147483647, %v746_v40  ;;  %v788_v62 = vld [vmem:[%s9426_s24] sm:$0xff] }
  0x23   : > { %v759_v57 = vor.u32 1.1754944e-38, %v758_v48  ;;  %vm757_vm6 = vcmp.eq.f32.partialorder %v756_v53, 8.507059e+37 }
  0x93   : > { %v665_v7 = vpop.xlane.xlu0 %664  ;;  %v712_v47 = vpop.xlane.xlu2 %711 }
  0x94   : > { %v7191_v8 = vmul.f32 0.00390625, %v665_v7  ;;  %v847_v7 = vld [vmem:[%s9427_s5 + $0x8] sm:$0xff] }
  0x96   : > { %v668_v9 = vperm.slane %v7191_v8, 0 }
  0x98   : > { %v670_v10 = vsub.f32 %v7179_v1, %v668_v9 }
  0x9a   : > { %v671_v11 = vmul.f32 %v670_v10, %v670_v10 }
  0x9c   : > { %v673_v12 = vperm.slane %v671_v11, 0  ;;  %v674_v13 = vperm.slane %v671_v11, 1 }
  0x9e   : > { %v677_v14 = vsel %vm9386_vm0, %v673_v12, 0.0  ;;  %v678_v15 = vsel %vm9386_vm0, %v674_v13, 0.0 }
  0x9f   : > { %v679_v16 = vadd.f32 %v678_v15, %v677_v14 }
  0xa1   : > { %680 = vadd.xlane.f32.xlu0 %v679_v16 }
 0x114   : > { %v681_v20 = vpop.xlane.xlu0 %680 }
 0x115   : > { %v682_v21 = vmul.f32 0.003921569, %v681_v20 }
 0x117   : > { %6964 = vrsqrt.f32 %v682_v21  ;;  %vm690_vm1 = vcmp.eq.f32.partialorder %v682_v21, inf  ;;  %v693_v30 = vand.u32 2147483648, %v682_v21  ;;  %vm692_vm2 = vcmp.eq.f32.partialorder %v682_v21, 0.0 }
 0x118   : > { %6966 = vrcp.f32 %v746_v40 }
 0x11d   : > { %v6965_v22 = vpop.eup %6964 }
 0x11e   : > { %v684_v23 = vmul.f32 %v6965_v22, %v682_v21  ;;  %v6967_v41 = vpop.eup %6966 }
 0x11f   : > { %v748_v42 = vmul.f32 %v6967_v41, %v746_v40  ;;  %vm753_vm4 = vweird.f32 %v6967_v41 }
 0x120   : > { %v685_v24 = vmul.f32 %v6965_v22, %v684_v23  ;;  %vm754_vm5 = vmor %vm752_vm3, %vm753_vm4 }
 0x121   : > { %v749_v43 = vsub.f32 1.0, %v748_v42  ;;  %v9429_v42 = vmov 0 }
 0x122   : > { %v686_v25 = vmul.f32 0.5, %v685_v24 }
 0x123   : > { %v750_v45 = vmul.f32 %v6967_v41, %v749_v43 }
 0x124   : > { %v687_v26 = vsub.f32 1.5, %v686_v25 }
 0x125   : > { %v751_v52 = vadd.f32 %v6967_v41, %v750_v45 }
 0x126   : > { %v688_v27 = vmul.f32 %v6965_v22, %v687_v26 }
 0x127   : > { %v755_v59 = vsel %vm754_vm5, %v6967_v41, %v751_v52 }
 0x128   : > { %v689_v28 = vmul.f32 %v688_v27, %v682_v21  ;;  %v760_v61 = vsel %vm757_vm6, %v759_v57, %v755_v59 }
 0x129   : > { %v6527_v63 = vadd.f32 -1.0, %v760_v61 }
 0x12a   : > { %v691_v31 = vsel %vm690_vm1, %v682_v21, %v689_v28 }
 0x12b   : > { %v694_v32 = vsel %vm692_vm2, %v693_v30, %v691_v31  ;;  %vm776_vm7 = vcmp.eq.f32.partialorder %v6527_v63, 0.0  ;;  %vm775_vm8 = vcmp.gt.f32.partialorder %v6527_v63, 0.0  ;;  %vm938_vm2 = vcmask 130048  }
 0x12c   : > { %v695_v33 = vmul.f32 %v694_v32, %v653_v29  ;;  %v777_v4 = vsel %vm776_vm7, 1.0, %v7041_v0 }
 0x12d   : > { %v778_v5 = vsel %vm775_vm8, 0.0, %v777_v4 }
 0x12e   : > { %v697_v34 = vperm.slane %v695_v33, 0 }
 0x130   : > { %698 = vrot.lane.b32.xlu1 %v697_v34, %s9397_s29 }
 0x15a   : > { %706 = vmin.xlane.f32.xlu1 %v705_v37  ;;  %v895_v37 = vlaneseq }
 0x15c   : > { %vm7236_vm13 = vcmp.lt.s32.totalorder %v895_v37, 256 }
 0x15d   : > { %v9430_v42 = vsel %vm7236_vm13, 4294967295, %v9429_v42 }
 0x15e   : > { %9431 = vst [vmem:[#allocation4_spill] sm:$0xff] %v9430_v42 }
 0x173   : > { %809 = vperm.xlu1 %6955, %v789_v49  }
 0x17b   : > { %6960 = vset.pattern.permute.xlu1 %v7039_v38 }
 0x17c   : > { %850 = vperm.xlu1 %6960, %v846_v60  }
 0x1a2   : > { %v699_v44 = vpop.permute.xlu1 %698 }
 0x1a3   : > { %v702_v46 = vadd.f32 %v699_v44, %v7191_v8  ;;  %v701_v51 = vsub.f32 %v7191_v8, %v699_v44 }
 0x1a5   : > { %v714_v55 = vmin.f32 %v702_v46, %v712_v47 }
 0x1cd   : > { %v707_v54 = vpop.xlane.xlu1 %706 }
 0x1ce   : > { %v713_v56 = vmax.f32 %v701_v51, %v707_v54 }
 0x1d0   : > { %v722_v58 = vsub.f32 %v714_v55, %v713_v56  ;;  %717 = vperm.xlu0 %6954, %v713_v56  }
 0x1d2   : > { %725 = vperm.xlu2 %6953, %v722_v58  }
 0x1d8   : > { %792 = vperm.xlu0 %6954, %v788_v62  }
 0x1da   : > { %768 = vperm.xlu2 %6953, %v6527_v63  }
 0x1e0   : > { %6957 = vset.pattern.permute.xlu0 %v7042_v6 }
 0x1e1   : > { %830 = vperm.xlu0 %6957, %v789_v49  }
 0x1e2   : > { %782 = vperm.xlu2 %6953, %v778_v5  }
 0x1e5   : > { %v810_v40 = vpop.permute.xlu1 %809 }
 0x1e9   : > { %6961 = vset.pattern.permute.xlu0 %v7039_v38 }
 0x1ea   : > { %797 = vperm.xlu2 %6953, %v789_v49  }
 0x1ee   : > { %v851_v4 = vpop.permute.xlu1 %850 }
 0x1f2   : > { %6956 = vset.pattern.permute.xlu2 %v9366_v50 }
 0x1f3   : > { %805 = vperm.xlu2 %6956, %v788_v62  }
 0x1fb   : > { %6958 = vset.pattern.permute.xlu2 %v7042_v6 }
 0x1fc   : > { %826 = vperm.xlu2 %6958, %v788_v62  }
 0x204   : > { %6959 = vset.pattern.permute.xlu2 %v7039_v38  ;;  %v787_v38 = vsub.f32 1.0, %v7179_v1 }
 0x205   : > { %855 = vperm.xlu2 %6959, %v847_v7  }
 0x206   : > { %v7240_v45 = vperm.slane %v787_v38, 0  ;;  %v7242_v46 = vperm.slane %v787_v38, 1 }
 0x208   : > { %9432 = vst [vmem:[#allocation5_spill] sm:$0xff] %v7240_v45 }
 0x209   : > { %9433 = vst [vmem:[#allocation6_spill] sm:$0xff] %v7242_v46 }
 0x22c   : > { %v726_v8 = vpop.permute.xlu2 %725 }
 0x22d   : > { %v727_v9 = vperm.slane %v726_v8, 0 }
 0x22f   : > { %6968 = vrcp.f32 %v727_v9  ;;  %v740_v16 = vand.u32 2147483648, %v727_v9  ;;  %vm734_vm10 = vweird.f32 %v727_v9  ;;  %v738_v17 = vand.u32 2147483647, %v727_v9 }
 0x231   : > { %v741_v22 = vor.u32 1.1754944e-38, %v740_v16  ;;  %vm739_vm12 = vcmp.eq.f32.partialorder %v738_v17, 8.507059e+37 }
 0x234   : > { %v769_v13 = vpop.permute.xlu2 %768 }
 0x235   : > { %v6969_v10 = vpop.eup %6968  ;;  %v771_v32 = vperm.slane %v769_v13, 0 }
 0x236   : > { %v730_v11 = vmul.f32 %v6969_v10, %v727_v9  ;;  %vm735_vm9 = vweird.f32 %v6969_v10 }
 0x237   : > { %vm736_vm11 = vmor %vm734_vm10, %vm735_vm9  ;;  %vm9387_vm9 = vcmask 1043456  }
 0x238   : > { %v731_v12 = vsub.f32 1.0, %v730_v11 }
 0x23a   : > { %v732_v14 = vmul.f32 %v6969_v10, %v731_v12 }
 0x23c   : > { %v733_v15 = vadd.f32 %v6969_v10, %v732_v14  ;;  %v783_v19 = vpop.permute.xlu2 %782 }
 0x23d   : > { %v785_v41 = vperm.slane %v783_v19, 0 }
 0x23e   : > { %v737_v21 = vsel %vm736_vm11, %v6969_v10, %v733_v15 }
 0x23f   : > { %v742_v24 = vsel %vm739_vm12, %v741_v22, %v737_v21  ;;  %v886_v21 = vld [vmem:[%s9346_s7 + $0x8] sm:$0xff] }
 0x242   : > { %v718_v18 = vpop.permute.xlu0 %717 }
 0x243   : > { %v719_v20 = vperm.slane %v718_v18, 0 }
 0x244   : > { %v798_v29 = vpop.permute.xlu2 %797 }
 0x245   : > { %v721_v23 = vsub.f32 %v7179_v1, %v719_v20  ;;  %v802_v47 = vmul.f32 %v798_v29, %v7182_v2  ;;  %v803_v48 = vmul.f32 %v798_v29, %v7185_v3 }
 0x247   : > { %v743_v25 = vmul.f32 %v742_v24, %v721_v23  ;;  %v7335_v24 = vand.u32 127, %v895_v37 }
 0x249   : > { %v744_v26 = vmax.f32 %v743_v25, 0.0  ;;  %vm921_vm15 = vcmp.lt.s32.totalorder %v7335_v24, 16  ;;  %vm897_vm1 = vcmp.lt.s32.totalorder %v7335_v24, 17  ;;  %vm1051_vm3 = vcmp.lt.s32.totalorder %v7335_v24, 15 }
 0x24a   : > { %v793_v36 = vpop.permute.xlu0 %792  ;;  %vm1132_vm4 = vcmp.lt.s32.totalorder %v7335_v24, 1  ;;  %vm1272_vm5 = vcmp.lt.s32.totalorder %v7335_v24, 127  ;;  %vm1353_vm6 = vcmp.lt.s32.totalorder %v7335_v24, 113  ;;  %vm1434_vm7 = vcmp.lt.s32.totalorder %v7335_v24, 112 }
 0x24b   : > { %v745_v27 = vmin.f32 %v744_v26, 1.0  ;;  %v800_v52 = vmul.f32 %v793_v36, %v7182_v2  ;;  %v801_v53 = vmul.f32 %v793_v36, %v7185_v3  ;;  %vm9388_vm8 = vcmp.lt.s32.totalorder %v7335_v24, 111 }
 0x24d   : > { %v763_v28 = vmax.f32 %v745_v27, 1e-30  ;;  %v806_v31 = vpop.permute.xlu2 %805  ;;  %vm779_vm14 = vcmp.gt.f32.partialorder %v745_v27, 0.0 }
 0x24f   : > { %6970 = vlog2.f32 %v763_v28 }
 0x253   : > { %v831_v44 = vpop.permute.xlu0 %830 }
 0x254   : > { %v840_v54 = vmul.f32 %v7240_v45, %v831_v44  ;;  %v841_v55 = vmul.f32 %v7242_v46, %v831_v44 }
 0x255   : > { %v6971_v30 = vpop.eup %6970 }
 0x256   : > { %v765_v33 = vmul.f32 0.6931472, %v6971_v30  ;;  %v827_v39 = vpop.permute.xlu2 %826 }
 0x257   : > { %v838_v60 = vmul.f32 %v7240_v45, %v827_v39  ;;  %v839_v2 = vmul.f32 %v7242_v46, %v827_v39 }
 0x258   : > { %v772_v34 = vmul.f32 %v771_v32, %v765_v33 }
 0x25a   : > { %v773_v35 = vmul.f32 1.442695, %v772_v34 }
 0x25c   : > { %6972 = vpow2.f32 %v773_v35 }
 0x25f   : > { %v856_v5 = vpop.permute.xlu2 %855 }
 0x262   : > { %v6973_v43 = vpop.eup %6972 }
 0x263   : > { %v7244_v1 = vsel %vm779_vm14, %v6973_v43, %v785_v41 }
 0x264   : > { %9434 = vst [vmem:[#allocation7_spill] sm:$0xff] %v7244_v1  ;;  %v813_v49 = vperm.slane %v7244_v1, 0  ;;  %v814_v51 = vperm.slane %v7244_v1, 1 }
 0x265   : > { %6425 = vst.msk [vmem:[%s651_s21] sm:$0x3] %vm7236_vm13, %v7244_v1  ;;  %s9439_s21 = sld [smem:[#allocation18_spill]] }
 0x266   : > { %v817_v56 = vmul.f32 %v813_v49, %v806_v31  ;;  %v818_v57 = vmul.f32 %v814_v51, %v806_v31  ;;  %v819_v58 = vmul.f32 %v813_v49, %v810_v40  ;;  %v820_v59 = vmul.f32 %v814_v51, %v810_v40 }
 0x268   : > { %v821_v61 = vadd.f32 %v817_v56, %v800_v52  ;;  %v822_v62 = vadd.f32 %v818_v57, %v801_v53  ;;  %v823_v63 = vadd.f32 %v819_v58, %v802_v47  ;;  %v824_v0 = vadd.f32 %v820_v59, %v803_v48  ;;  %v6535_v53 = vld [vmem:[%s9345_s6 + $0x10] sm:$0xff] }
 0x26a   : > { %v842_v6 = vadd.f32 %v838_v60, %v821_v61  ;;  %v844_v3 = vadd.f32 %v840_v54, %v823_v63  ;;  %v845_v7 = vadd.f32 %v841_v55, %v824_v0  ;;  %v843_v8 = vadd.f32 %v839_v2, %v822_v62  ;;  %v911_v60 = vld [vmem:[%s9345_s6] sm:$0xff]  ;;  %v6536_v62 = vld [vmem:[%s9345_s6 + $0x18] sm:$0xff] }
 0x26b   : > { %v6528_v25 = vld [vmem:[%s9439_s21 + $0x2] sm:$0x3]  ;;  %v870_v35 = vld [vmem:[%s9439_s21] sm:$0x3]  ;;  %v6529_v63 = vld [vmem:[%s9439_s21 + $0x4] sm:$0x3] }
 0x26c   : > { %v858_v9 = vadd.f32 %v851_v4, %v842_v6  ;;  %v860_v10 = vadd.f32 %v856_v5, %v844_v3  ;;  %v861_v11 = vadd.f32 %v856_v5, %v845_v7  ;;  %v859_v15 = vadd.f32 %v851_v4, %v843_v8 }
 0x26d   : > { %v7341_v26 = vperm.slane %v6528_v25, 0  ;;  %v7343_v27 = vperm.slane %v6528_v25, 1  ;;  %v7355_v36 = vperm.slane %v870_v35, 0  ;;  %v7357_v37 = vperm.slane %v870_v35, 1 }
 0x26e   : > { %v862_v12 = vmul.f32 0.2, %v858_v9  ;;  %v864_v13 = vmul.f32 0.2, %v860_v10  ;;  %v865_v14 = vmul.f32 0.2, %v861_v11 }
 0x26f   : > { %v863_v19 = vmul.f32 0.2, %v859_v15  ;;  %v7395_v0 = vperm.slane %v6529_v63, 0  ;;  %v7397_v4 = vperm.slane %v6529_v63, 1  ;;  %v6532_v63 = vld [vmem:[%s9439_s21 + $0xc] sm:$0x3] }
 0x270   : > { %v7259_v16 = vmax.f32 %v858_v9, %v862_v12  ;;  %v7261_v17 = vmax.f32 %v860_v10, %v864_v13  ;;  %v7263_v18 = vmax.f32 %v861_v11, %v865_v14  ;;  %v912_v11 = vld [vmem:[%s9345_s6 + $0x8] sm:$0xff]  ;;  %v6530_v12 = vld [vmem:[%s9439_s21 + $0x6] sm:$0x3] }
 0x271   : > { %v7271_v20 = vmax.f32 %v859_v15, %v863_v19  ;;  %v6545_v15 = vld [vmem:[%s9345_s6 + $0x20] sm:$0xff] }
 0x272   : > { %9435 = vst [vmem:[#allocation8_spill] sm:$0xff] %v7259_v16  ;;  %913 = vrot.lane.b32.xlu1 %v7259_v16, %s9382_s1  ;;  %915 = vrot.lane.b32.xlu0 %v7261_v17, %s9382_s1 }
 0x273   : > { %9436 = vst [vmem:[#allocation9_spill] sm:$0xff] %v7261_v17  ;;  %919 = vrot.lane.b32.xlu2 %v7263_v18, %s9382_s1 }
 0x274   : > { %9437 = vst [vmem:[#allocation10_spill] sm:$0xff] %v7263_v18 }
 0x275   : > { %9438 = vst [vmem:[#allocation11_spill] sm:$0xff] %v7271_v20 }
 0x27a   : > { %893 = vrot.lane.b32.xlu1 %v7263_v18, %s9384_s22  ;;  %917 = vrot.lane.b32.xlu0 %v7271_v20, %s9382_s1 }
 0x27b   : > { %889 = vrot.lane.b32.xlu2 %v7261_v17, %s9384_s22 }
 0x282   : > { %1045 = vrot.lane.b32.xlu1 %v7261_v17, %s9376_s2  ;;  %887 = vrot.lane.b32.xlu0 %v7259_v16, %s9384_s22 }
 0x283   : > { %891 = vrot.lane.b32.xlu2 %v7271_v20, %s9384_s22 }
 0x28a   : > { %1047 = vrot.lane.b32.xlu1 %v7271_v20, %s9376_s2  ;;  %1049 = vrot.lane.b32.xlu0 %v7263_v18, %s9376_s2 }
 0x28b   : > { %1043 = vrot.lane.b32.xlu2 %v7259_v16, %s9376_s2 }
 0x292   : > { %1124 = vrot.lane.b32.xlu1 %v7259_v16, %s9404_s25  ;;  %1126 = vrot.lane.b32.xlu0 %v7261_v17, %s9404_s25 }
 0x293   : > { %1130 = vrot.lane.b32.xlu2 %v7263_v18, %s9404_s25 }
 0x29a   : > { %1270 = vrot.lane.b32.xlu1 %v7263_v18, %s9397_s29  ;;  %1128 = vrot.lane.b32.xlu0 %v7271_v20, %s9404_s25 }
 0x29b   : > { %1266 = vrot.lane.b32.xlu2 %v7261_v17, %s9397_s29 }
 0x2a2   : > { %1347 = vrot.lane.b32.xlu1 %v7261_v17, %s9374_s3  ;;  %1264 = vrot.lane.b32.xlu0 %v7259_v16, %s9397_s29 }
 0x2a3   : > { %1268 = vrot.lane.b32.xlu2 %v7271_v20, %s9397_s29 }
 0x2aa   : > { %1349 = vrot.lane.b32.xlu1 %v7271_v20, %s9374_s3  ;;  %1351 = vrot.lane.b32.xlu0 %v7263_v18, %s9374_s3 }
 0x2ab   : > { %1345 = vrot.lane.b32.xlu2 %v7259_v16, %s9374_s3 }
 0x2b2   : > { %1426 = vrot.lane.b32.xlu1 %v7259_v16, %s9362_s26  ;;  %1428 = vrot.lane.b32.xlu0 %v7261_v17, %s9362_s26 }
 0x2b3   : > { %1432 = vrot.lane.b32.xlu2 %v7263_v18, %s9362_s26 }
 0x2ba   : > { %1513 = vrot.lane.b32.xlu1 %v7263_v18, %s9364_s27  ;;  %1430 = vrot.lane.b32.xlu0 %v7271_v20, %s9362_s26  ;;  %s9443_s26 = smov 111  }
 0x2bb   : > { %1509 = vrot.lane.b32.xlu2 %v7261_v17, %s9364_s27 }
 0x2c2   : > { %1595 = vperm.xlu1 %6960, %v886_v21   ;;  %1507 = vrot.lane.b32.xlu0 %v7259_v16, %s9364_s27  ;;  %v7424_v21 = vperm.slane %v6530_v12, 0 }
 0x2c3   : > { %1511 = vrot.lane.b32.xlu2 %v7271_v20, %s9364_s27  ;;  %s9444_s27 = smov 112  }
 0x2cd   : > { %v920_v22 = vpop.permute.xlu2 %919 }
 0x2d5   : > { %v890_v23 = vpop.permute.xlu2 %889 }
 0x2dd   : > { %v892_v28 = vpop.permute.xlu2 %891 }
 0x2e4   : > { %v914_v29 = vpop.permute.xlu1 %913  ;;  %v916_v30 = vpop.permute.xlu0 %915 }
 0x2e5   : > { %v925_v31 = vsel %vm921_vm15, %v920_v22, %v916_v30  ;;  %v923_v32 = vsel %vm921_vm15, %v916_v30, %v920_v22  ;;  %v1044_v40 = vpop.permute.xlu2 %1043  ;;  %v7426_v22 = vperm.slane %v6530_v12, 1 }
 0x2e6   : > { %v933_v33 = vmul.f32 %v7341_v26, %v925_v31  ;;  %v934_v34 = vmul.f32 %v7343_v27, %v923_v32  ;;  %v6531_v32 = vld [vmem:[%s9439_s21 + $0xa] sm:$0x3] }
 0x2e7   : > { %v7449_v35 = vperm.slane %v6531_v32, 1 }
 0x2e8   : > { %959 = vmatpush.msra.mxu0 %v933_v33  ;;  %982 = vmatpush.msra.mxu1 %v934_v34  ;;  %v6546_v33 = vld [vmem:[%s9345_s6 + $0x28] sm:$0xff]  ;;  %v7447_v34 = vperm.slane %v6531_v32, 0 }
 0x2ec   : > { %v894_v38 = vpop.permute.xlu1 %893  ;;  %v918_v39 = vpop.permute.xlu0 %917 }
 0x2ed   : > { %v924_v41 = vsel %vm921_vm15, %v918_v39, %v914_v29  ;;  %v922_v43 = vsel %vm921_vm15, %v914_v29, %v918_v39  ;;  %v901_v44 = vsel %vm897_vm1, %v894_v38, %v890_v23  ;;  %v899_v47 = vsel %vm897_vm1, %v890_v23, %v894_v38  ;;  %v1131_v61 = vpop.permute.xlu2 %1130 }
 0x2ee   : > { %v931_v48 = vmul.f32 %v7341_v26, %v924_v41  ;;  %v932_v49 = vmul.f32 %v7343_v27, %v922_v43  ;;  %v909_v51 = vmul.f32 %v7355_v36, %v901_v44  ;;  %v910_v52 = vmul.f32 %v7357_v37, %v899_v47 }
 0x2f0   : > { %960 = vmatpush.msra.mxu0 %v931_v48  ;;  %983 = vmatpush.msra.mxu1 %v932_v49 }
 0x2f1   : > { %1011 = vmatpush.msra.mxu2 %v909_v51  ;;  %1034 = vmatpush.msra.mxu3 %v910_v52 }
 0x2f2   : > { %6539 = vmatmul.msk.f32.vlgmr.msra.gmra.mxu1 %vm938_vm2, %v6535_v53  ;;  %6537 = vmatmul.msk.f32.vlgmr.msra.gmra.mxu0 %vm938_vm2, %v6535_v53  ;;  %v6551_v53 = vld [vmem:[%s9345_s6 + $0x30] sm:$0xff] }
 0x2f4   : > { %v1046_v54 = vpop.permute.xlu1 %1045  ;;  %v888_v55 = vpop.permute.xlu0 %887 }
 0x2f5   : > { %v900_v56 = vsel %vm897_vm1, %v892_v28, %v888_v55  ;;  %v898_v57 = vsel %vm897_vm1, %v888_v55, %v892_v28  ;;  %v1267_v19 = vpop.permute.xlu2 %1266 }
 0x2f6   : > { %v907_v58 = vmul.f32 %v7355_v36, %v900_v56  ;;  %v908_v59 = vmul.f32 %v7357_v37, %v898_v57 }
 0x2f8   : > { %1012 = vmatpush.msra.mxu2 %v907_v58  ;;  %1035 = vmatpush.msra.mxu3 %v908_v59 }
 0x2f9   : > { %6543 = vmatmul.msk.f32.vlgmr.msra.gmra.mxu3 %vm938_vm2, %v911_v60  ;;  %6541 = vmatmul.msk.f32.vlgmr.msra.gmra.mxu2 %vm938_vm2, %v911_v60 }
 0x2fa   : > { %6540 = vmatmul.msk.f32.gmra.mxu1 %vm938_vm2, %v6536_v62  ;;  %6538 = vmatmul.msk.f32.gmra.mxu0 %vm938_vm2, %v6536_v62  ;;  %v6552_v62 = vld [vmem:[%s9345_s6 + $0x38] sm:$0xff] }
 0x2fc   : > { %v1048_v5 = vpop.permute.xlu1 %1047  ;;  %v1050_v2 = vpop.permute.xlu0 %1049 }
 0x2fd   : > { %v1055_v6 = vsel %vm1051_vm3, %v1050_v2, %v1046_v54  ;;  %v1053_v3 = vsel %vm1051_vm3, %v1046_v54, %v1050_v2  ;;  %v1054_v7 = vsel %vm1051_vm3, %v1048_v5, %v1044_v40  ;;  %v1052_v8 = vsel %vm1051_vm3, %v1044_v40, %v1048_v5  ;;  %v1269_v38 = vpop.permute.xlu2 %1268  ;;  %v6557_v54 = vld [vmem:[%s9345_s6 + $0x40] sm:$0xff]  ;;  %v6558_v5 = vld [vmem:[%s9345_s6 + $0x48] sm:$0xff] }
 0x2fe   : > { %v1063_v9 = vmul.f32 %v7395_v0, %v1055_v6  ;;  %v1064_v10 = vmul.f32 %v7397_v4, %v1053_v3  ;;  %v1061_v13 = vmul.f32 %v7395_v0, %v1054_v7  ;;  %v1062_v14 = vmul.f32 %v7397_v4, %v1052_v8 }
 0x2ff   : > { %v7493_v2 = vperm.slane %v6532_v63, 0  ;;  %v7495_v6 = vperm.slane %v6532_v63, 1 }
 0x300   : > { %1088 = vmatpush.msrb.mxu0 %v1063_v9  ;;  %1111 = vmatpush.msrb.mxu1 %v1064_v10 }
 0x301   : > { %6544 = vmatmul.msk.f32.gmra.mxu3 %vm938_vm2, %v912_v11  ;;  %6542 = vmatmul.msk.f32.gmra.mxu2 %vm938_vm2, %v912_v11 }
 0x302   : > { %1089 = vmatpush.msrb.mxu0 %v1061_v13  ;;  %1112 = vmatpush.msrb.mxu1 %v1062_v14  ;;  %v6563_v14 = vld [vmem:[%s9345_s6 + $0x50] sm:$0xff] }
 0x303   : > { %6549 = vmatmul.msk.f32.vlgmr.msrb.gmra.mxu1 %vm938_vm2, %v6545_v15  ;;  %6547 = vmatmul.msk.f32.vlgmr.msrb.gmra.mxu0 %vm938_vm2, %v6545_v15  ;;  %v6533_v15 = vld [vmem:[%s9439_s21 + $0xe] sm:$0x3] }
 0x304   : > { %1228 = vmatpush.msra.mxu0 %v7261_v17  ;;  %1251 = vmatpush.msra.mxu1 %v7263_v18  ;;  %v1125_v23 = vpop.permute.xlu1 %1124  ;;  %v1127_v25 = vpop.permute.xlu0 %1126 }
 0x305   : > { %v1136_v28 = vsel %vm1132_vm4, %v1131_v61, %v1127_v25  ;;  %v1134_v29 = vsel %vm1132_vm4, %v1127_v25, %v1131_v61  ;;  %v1346_v59 = vpop.permute.xlu2 %1345 }
 0x306   : > { %1229 = vmatpush.msra.mxu0 %v7259_v16  ;;  %1252 = vmatpush.msra.mxu1 %v7271_v20  ;;  %v1144_v30 = vmul.f32 %v7424_v21, %v1136_v28  ;;  %v1145_v31 = vmul.f32 %v7426_v22, %v1134_v29  ;;  %v6569_v28 = vld [vmem:[%s9345_s6 + $0x60] sm:$0xff] }
 0x307   : > { %v885_v29 = vld [vmem:[%s9346_s7] sm:$0xff] }
 0x308   : > { %1169 = vmatpush.msrb.mxu2 %v1144_v30  ;;  %1192 = vmatpush.msrb.mxu3 %v1145_v31  ;;  %v7526_v30 = vperm.slane %v6533_v15, 0  ;;  %v7528_v31 = vperm.slane %v6533_v15, 1 }
 0x309   : > { %1590 = vperm.xlu0 %6961, %v885_v29  }
 0x30a   : > { %9440 = vst [vmem:[#allocation12_spill] sm:$0xff] %v7528_v31 }
 0x30b   : > { %6550 = vmatmul.msk.f32.gmra.mxu1 %vm938_vm2, %v6546_v33  ;;  %6548 = vmatmul.msk.f32.gmra.mxu0 %vm938_vm2, %v6546_v33 }
 0x30c   : > { %v1271_v39 = vpop.permute.xlu1 %1270  ;;  %v1129_v40 = vpop.permute.xlu0 %1128 }
 0x30d   : > { %v1274_v41 = vsel %vm1272_vm5, %v1267_v19, %v1271_v39  ;;  %v1276_v43 = vsel %vm1272_vm5, %v1271_v39, %v1267_v19  ;;  %v1135_v44 = vsel %vm1132_vm4, %v1129_v40, %v1125_v23  ;;  %v1133_v47 = vsel %vm1132_vm4, %v1125_v23, %v1129_v40  ;;  %v1433_v19 = vpop.permute.xlu2 %1432 }
 0x30e   : > { %v1284_v48 = vmul.f32 %v7447_v34, %v1274_v41  ;;  %v1285_v49 = vmul.f32 %v7449_v35, %v1276_v43  ;;  %v1142_v51 = vmul.f32 %v7424_v21, %v1135_v44  ;;  %v1143_v52 = vmul.f32 %v7426_v22, %v1133_v47  ;;  %v6564_v43 = vld [vmem:[%s9345_s6 + $0x58] sm:$0xff]  ;;  %v6534_v44 = vld [vmem:[%s9439_s21 + $0x10] sm:$0x3]  ;;  %v6570_v47 = vld [vmem:[%s9345_s6 + $0x68] sm:$0xff]  ;;  %s9469_s21 = smov 125  }
 0x310   : > { %1170 = vmatpush.msrb.mxu2 %v1142_v51  ;;  %1193 = vmatpush.msrb.mxu3 %v1143_v52  ;;  %v7552_v51 = vperm.slane %v6534_v44, 1 }
 0x311   : > { %6553 = vmatmul.msk.f32.vlgmr.msrb.gmra.mxu2 %vm938_vm2, %v6551_v53  ;;  %6555 = vmatmul.msk.f32.vlgmr.msrb.gmra.mxu3 %vm938_vm2, %v6551_v53 }
 0x312   : > { %1309 = vmatpush.msra.mxu2 %v1284_v48  ;;  %1332 = vmatpush.msra.mxu3 %v1285_v49  ;;  %v7550_v49 = vperm.slane %v6534_v44, 0  ;;  %9442 = vst [vmem:[#allocation14_spill] sm:$0xff] %v7552_v51 }
 0x313   : > { %6561 = vmatmul.msk.f32.vlgmr.msra.gmra.mxu1 %vm938_vm2, %v6557_v54  ;;  %6559 = vmatmul.msk.f32.vlgmr.msra.gmra.mxu0 %vm938_vm2, %v6557_v54 }
 0x314   : > { %v1348_v55 = vpop.permute.xlu1 %1347  ;;  %v1265_v56 = vpop.permute.xlu0 %1264  ;;  %9441 = vst [vmem:[#allocation13_spill] sm:$0xff] %v7550_v49 }
 0x315   : > { %v1273_v57 = vsel %vm1272_vm5, %v1265_v56, %v1269_v38  ;;  %v1275_v58 = vsel %vm1272_vm5, %v1269_v38, %v1265_v56  ;;  %v1510_v48 = vpop.permute.xlu2 %1509 }
 0x316   : > { %v1282_v60 = vmul.f32 %v7447_v34, %v1273_v57  ;;  %v1283_v61 = vmul.f32 %v7449_v35, %v1275_v58 }
 0x318   : > { %1310 = vmatpush.msra.mxu2 %v1282_v60  ;;  %1333 = vmatpush.msra.mxu3 %v1283_v61 }
 0x319   : > { %6554 = vmatmul.msk.f32.gmra.mxu2 %vm938_vm2, %v6552_v62  ;;  %6556 = vmatmul.msk.f32.gmra.mxu3 %vm938_vm2, %v6552_v62  ;;  %v6575_v62 = vld [vmem:[%s9345_s6 + $0x70] sm:$0xff] }
 0x31b   : > { %6562 = vmatmul.msk.f32.gmra.mxu1 %vm938_vm2, %v6558_v5  ;;  %6560 = vmatmul.msk.f32.gmra.mxu0 %vm938_vm2, %v6558_v5 }
 0x31c   : > { %v1350_v3 = vpop.permute.xlu1 %1349  ;;  %v1352_v7 = vpop.permute.xlu0 %1351 }
 0x31d   : > { %v1354_v8 = vsel %vm1353_vm6, %v1346_v59, %v1350_v3  ;;  %v1356_v9 = vsel %vm1353_vm6, %v1350_v3, %v1346_v59  ;;  %v1355_v10 = vsel %vm1353_vm6, %v1348_v55, %v1352_v7  ;;  %v1357_v11 = vsel %vm1353_vm6, %v1352_v7, %v1348_v55  ;;  %v1512_v63 = vpop.permute.xlu2 %1511 }
 0x31e   : > { %v1365_v12 = vmul.f32 %v7493_v2, %v1355_v10  ;;  %v1366_v13 = vmul.f32 %v7495_v6, %v1357_v11  ;;  %v1363_v23 = vmul.f32 %v7493_v2, %v1354_v8  ;;  %v1364_v25 = vmul.f32 %v7495_v6, %v1356_v9  ;;  %v6581_v10 = vld [vmem:[%s9345_s6 + $0x80] sm:$0xff]  ;;  %v6576_v11 = vld [vmem:[%s9345_s6 + $0x78] sm:$0xff] }
 0x320   : > { %1390 = vmatpush.msrb.mxu0 %v1365_v12  ;;  %1413 = vmatpush.msrb.mxu1 %v1366_v13  ;;  %v6582_v12 = vld [vmem:[%s9345_s6 + $0x88] sm:$0xff] }
 0x321   : > { %6565 = vmatmul.msk.f32.vlgmr.msra.gmra.mxu2 %vm938_vm2, %v6563_v14  ;;  %6567 = vmatmul.msk.f32.vlgmr.msra.gmra.mxu3 %vm938_vm2, %v6563_v14 }
 0x322   : > { %1391 = vmatpush.msrb.mxu0 %v1363_v23  ;;  %1414 = vmatpush.msrb.mxu1 %v1364_v25 }
 0x323   : > { %6573 = vmatmul.msk.f32.vlgmr.msrb.gmra.mxu1 %vm938_vm2, %v6569_v28  ;;  %6571 = vmatmul.msk.f32.vlgmr.msrb.gmra.mxu0 %vm938_vm2, %v6569_v28 }
 0x324   : > { %v1427_v32 = vpop.permute.xlu1 %1426  ;;  %v1429_v33 = vpop.permute.xlu0 %1428 }
 0x325   : > { %v1436_v38 = vsel %vm1434_vm7, %v1429_v33, %v1433_v19  ;;  %v1438_v39 = vsel %vm1434_vm7, %v1433_v19, %v1429_v33 }
 0x326   : > { %v1446_v40 = vmul.f32 %v7526_v30, %v1436_v38  ;;  %v1447_v41 = vmul.f32 %v7528_v31, %v1438_v39 }
 0x328   : > { %1471 = vmatpush.msrb.mxu2 %v1446_v40  ;;  %1494 = vmatpush.msrb.mxu3 %v1447_v41 }
 0x329   : > { %6566 = vmatmul.msk.f32.gmra.mxu2 %vm938_vm2, %v6564_v43  ;;  %6568 = vmatmul.msk.f32.gmra.mxu3 %vm938_vm2, %v6564_v43 }
 0x32b   : > { %6574 = vmatmul.msk.f32.gmra.mxu1 %vm938_vm2, %v6570_v47  ;;  %6572 = vmatmul.msk.f32.gmra.mxu0 %vm938_vm2, %v6570_v47 }
 0x32c   : > { %v1514_v52 = vpop.permute.xlu1 %1513  ;;  %v1431_v53 = vpop.permute.xlu0 %1430 }
 0x32d   : > { %v1517_v54 = vsel %vm9388_vm8, %v1510_v48, %v1514_v52  ;;  %v1519_v55 = vsel %vm9388_vm8, %v1514_v52, %v1510_v48  ;;  %v1435_v56 = vsel %vm1434_vm7, %v1427_v32, %v1431_v53  ;;  %v1437_v57 = vsel %vm1434_vm7, %v1431_v53, %v1427_v32 }
 0x32e   : > { %v1527_v58 = vmul.f32 %v7550_v49, %v1517_v54  ;;  %v1528_v59 = vmul.f32 %v7552_v51, %v1519_v55  ;;  %v1444_v60 = vmul.f32 %v7526_v30, %v1435_v56  ;;  %v1445_v61 = vmul.f32 %v7528_v31, %v1437_v57 }
 0x330   : > { %1472 = vmatpush.msrb.mxu2 %v1444_v60  ;;  %1495 = vmatpush.msrb.mxu3 %v1445_v61 }
 0x331   : > { %1552 = vmatpush.msra.mxu0 %v1527_v58  ;;  %1575 = vmatpush.msra.mxu1 %v1528_v59 }
 0x332   : > { %6577 = vmatmul.msk.f32.vlgmr.msrb.gmra.mxu2 %vm938_vm2, %v6575_v62  ;;  %6579 = vmatmul.msk.f32.vlgmr.msrb.gmra.mxu3 %vm938_vm2, %v6575_v62 }
 0x334   : > { %v1508_v5 = vpop.permute.xlu0 %1507 }
 0x335   : > { %v1516_v3 = vsel %vm9388_vm8, %v1508_v5, %v1512_v63  ;;  %v1518_v7 = vsel %vm9388_vm8, %v1512_v63, %v1508_v5 }
 0x336   : > { %v1525_v8 = vmul.f32 %v7550_v49, %v1516_v3  ;;  %v1526_v9 = vmul.f32 %v7552_v51, %v1518_v7 }
 0x338   : > { %1553 = vmatpush.msra.mxu0 %v1525_v8  ;;  %1576 = vmatpush.msra.mxu1 %v1526_v9 }
 0x339   : > { %6583 = vmatmul.msk.f32.vlgmr.msra.gmra.mxu0 %vm938_vm2, %v6581_v10  ;;  %6585 = vmatmul.msk.f32.vlgmr.msra.gmra.mxu1 %vm938_vm2, %v6581_v10 }
 0x33a   : > { %6578 = vmatmul.msk.f32.gmra.mxu2 %vm938_vm2, %v6576_v11  ;;  %6580 = vmatmul.msk.f32.gmra.mxu3 %vm938_vm2, %v6576_v11 }
 0x341   : > { %6584 = vmatmul.msk.f32.gmra.mxu0 %vm938_vm2, %v6582_v12  ;;  %6586 = vmatmul.msk.f32.gmra.mxu1 %vm938_vm2, %v6582_v12 }
 0x36f   : > { %v985_v13 = vpop.f32.mrf.mxu1  ;;  %v962_v14 = vpop.f32.mrf.mxu0 }
 0x377   : > { %v988_v15 = vpop.f32.mrf.mxu1  ;;  %v965_v19 = vpop.f32.mrf.mxu0 }
 0x37c   : > { %v1014_v25 = vpop.f32.mrf.mxu2  ;;  %v1037_v29 = vpop.f32.mrf.mxu3 }
 0x37d   : > { %v1015_v56 = vadd.f32 %v1014_v25, %v962_v14  ;;  %v1038_v59 = vadd.f32 %v1037_v29, %v985_v13 }
 0x380   : > { %v1114_v23 = vpop.f32.mrf.mxu1  ;;  %v1091_v28 = vpop.f32.mrf.mxu0 }
 0x381   : > { %v1121_v60 = vadd.f32 %v1114_v23, %v1038_v59  ;;  %v1120_v61 = vadd.f32 %v1091_v28, %v1015_v56  ;;  %v1591_v59 = vpop.permute.xlu0 %1590 }
 0x384   : > { %v1017_v38 = vpop.f32.mrf.mxu2  ;;  %v1040_v39 = vpop.f32.mrf.mxu3 }
 0x385   : > { %v1018_v7 = vadd.f32 %v1017_v38, %v965_v19  ;;  %v1041_v10 = vadd.f32 %v1040_v39, %v988_v15 }
 0x388   : > { %v1117_v32 = vpop.f32.mrf.mxu1  ;;  %v1094_v33 = vpop.f32.mrf.mxu0 }
 0x389   : > { %v1123_v50 = vadd.f32 %v1117_v32, %v1041_v10  ;;  %v1122_v42 = vadd.f32 %v1094_v33, %v1018_v7  ;;  %v1611_v10 = vld [vmem:[%s9348_s9 + $0x8] sm:$0xff] }
 0x390   : > { %v1254_v40 = vpop.f32.mrf.mxu1  ;;  %v1231_v41 = vpop.f32.mrf.mxu0 }
 0x394   : > { %v1172_v43 = vpop.f32.mrf.mxu2  ;;  %v1195_v44 = vpop.f32.mrf.mxu3 }
 0x395   : > { %v1201_v62 = vadd.f32 %v1172_v43, %v1120_v61  ;;  %v1202_v63 = vadd.f32 %v1195_v44, %v1121_v60  ;;  %v1596_v61 = vpop.permute.xlu1 %1595 }
 0x397   : > { %v1260_v11 = vadd.f32 %v1231_v41, %v1201_v62  ;;  %v1261_v12 = vadd.f32 %v1254_v40, %v1202_v63 }
 0x398   : > { %v1257_v47 = vpop.f32.mrf.mxu1  ;;  %v1234_v48 = vpop.f32.mrf.mxu0 }
 0x39c   : > { %v1175_v52 = vpop.f32.mrf.mxu2  ;;  %v1198_v53 = vpop.f32.mrf.mxu3 }
 0x39d   : > { %v1203_v14 = vadd.f32 %v1175_v52, %v1122_v42  ;;  %v1204_v25 = vadd.f32 %v1198_v53, %v1123_v50 }
 0x39f   : > { %v1262_v29 = vadd.f32 %v1234_v48, %v1203_v14  ;;  %v1263_v43 = vadd.f32 %v1257_v47, %v1204_v25 }
 0x3a0   : > { %v1393_v54 = vpop.f32.mrf.mxu0  ;;  %v1416_v55 = vpop.f32.mrf.mxu1 }
 0x3a4   : > { %v1312_v57 = vpop.f32.mrf.mxu2  ;;  %v1335_v58 = vpop.f32.mrf.mxu3 }
 0x3a5   : > { %v1341_v1 = vadd.f32 %v1312_v57, %v1260_v11  ;;  %v1342_v46 = vadd.f32 %v1335_v58, %v1261_v12 }
 0x3a7   : > { %v1422_v45 = vadd.f32 %v1393_v54, %v1341_v1  ;;  %v1423_v13 = vadd.f32 %v1416_v55, %v1342_v46 }
 0x3a8   : > { %v1396_v5 = vpop.f32.mrf.mxu0  ;;  %v1419_v3 = vpop.f32.mrf.mxu1 }
 0x3ac   : > { %v1315_v8 = vpop.f32.mrf.mxu2  ;;  %v1338_v9 = vpop.f32.mrf.mxu3 }
 0x3ad   : > { %v1343_v15 = vadd.f32 %v1315_v8, %v1262_v29  ;;  %v1344_v39 = vadd.f32 %v1338_v9, %v1263_v43  ;;  %v1610_v9 = vld [vmem:[%s9348_s9] sm:$0xff] }
 0x3af   : > { %v1424_v57 = vadd.f32 %v1396_v5, %v1343_v15  ;;  %v1425_v42 = vadd.f32 %v1419_v3, %v1344_v39 }
 0x3b5   : > { %v1474_v23 = vpop.f32.mrf.mxu2  ;;  %v1497_v28 = vpop.f32.mrf.mxu3 }
 0x3b6   : > { %v1503_v44 = vadd.f32 %v1474_v23, %v1422_v45  ;;  %v1504_v56 = vadd.f32 %v1497_v28, %v1423_v13  ;;  %v1555_v19 = vpop.f32.mrf.mxu0  ;;  %v1578_v38 = vpop.f32.mrf.mxu1 }
 0x3b8   : > { %v1584_v40 = vadd.f32 %v1555_v19, %v1503_v44  ;;  %v1585_v32 = vadd.f32 %v1578_v38, %v1504_v56 }
 0x3ba   : > { %v1598_v33 = vadd.f32 %v1591_v59, %v1584_v40  ;;  %v1599_v41 = vadd.f32 %v1591_v59, %v1585_v32  ;;  %v6587_v32 = vld [vmem:[%s9347_s8 + $0x10] sm:$0xff] }
 0x3bc   : > { %v1602_v50 = vmul.f32 0.2, %v1598_v33  ;;  %v1603_v1 = vmul.f32 0.2, %v1599_v41 }
 0x3bd   : > { %v1477_v46 = vpop.f32.mrf.mxu2  ;;  %v1500_v52 = vpop.f32.mrf.mxu3 }
 0x3be   : > { %v7594_v53 = vmax.f32 %v1598_v33, %v1602_v50  ;;  %v7596_v47 = vmax.f32 %v1599_v41, %v1603_v1  ;;  %v1505_v45 = vadd.f32 %v1477_v46, %v1424_v57  ;;  %v1506_v48 = vadd.f32 %v1500_v52, %v1425_v42  ;;  %v1558_v54 = vpop.f32.mrf.mxu0  ;;  %v1581_v55 = vpop.f32.mrf.mxu1 }
 0x3c0   : > { %v1586_v58 = vadd.f32 %v1558_v54, %v1505_v45  ;;  %v1587_v60 = vadd.f32 %v1581_v55, %v1506_v48  ;;  %1757 = vrot.lane.b32.xlu0 %v7596_v47, %s9376_s2  ;;  %1634 = vrot.lane.b32.xlu1 %v7596_v47, %s9382_s1  ;;  %v6588_v55 = vld [vmem:[%s9347_s8 + $0x18] sm:$0xff] }
 0x3c1   : > { %1630 = vrot.lane.b32.xlu2 %v7594_v53, %s9382_s1 }
 0x3c2   : > { %v1600_v62 = vadd.f32 %v1596_v61, %v1586_v58  ;;  %v1601_v63 = vadd.f32 %v1596_v61, %v1587_v60 }
 0x3c4   : > { %v1604_v5 = vmul.f32 0.2, %v1600_v62  ;;  %v1605_v3 = vmul.f32 0.2, %v1601_v63 }
 0x3c6   : > { %v7604_v7 = vmax.f32 %v1600_v62, %v1604_v5  ;;  %v7606_v8 = vmax.f32 %v1601_v63, %v1605_v3 }
 0x3c8   : > { %1636 = vrot.lane.b32.xlu1 %v7606_v8, %s9382_s1  ;;  %1612 = vrot.lane.b32.xlu0 %v7594_v53, %s9384_s22 }
 0x3c9   : > { %1632 = vrot.lane.b32.xlu2 %v7604_v7, %s9382_s1  ;;  %s9449_s1 = smov 15  }
 0x3d0   : > { %1755 = vrot.lane.b32.xlu0 %v7604_v7, %s9376_s2  ;;  %1753 = vrot.lane.b32.xlu1 %v7594_v53, %s9376_s2 }
 0x3d1   : > { %1616 = vrot.lane.b32.xlu2 %v7596_v47, %s9384_s22 }
 0x3d8   : > { %2041 = vrot.lane.b32.xlu0 %v7596_v47, %s9374_s3  ;;  %1618 = vrot.lane.b32.xlu1 %v7606_v8, %s9384_s22 }
 0x3d9   : > { %1759 = vrot.lane.b32.xlu2 %v7606_v8, %s9376_s2  ;;  %s9466_s2 = smov 1  }
 0x3e0   : > { %1834 = vrot.lane.b32.xlu0 %v7606_v8, %s9404_s25  ;;  %1832 = vrot.lane.b32.xlu1 %v7596_v47, %s9404_s25 }
 0x3e1   : > { %1614 = vrot.lane.b32.xlu2 %v7604_v7, %s9384_s22  ;;  %s9450_s22 = smov 113  }
 0x3e8   : > { %1962 = vrot.lane.b32.xlu0 %v7594_v53, %s9397_s29  ;;  %1830 = vrot.lane.b32.xlu1 %v7604_v7, %s9404_s25 }
 0x3e9   : > { %1828 = vrot.lane.b32.xlu2 %v7594_v53, %s9404_s25 }
 0x3f0   : > { %2039 = vrot.lane.b32.xlu0 %v7604_v7, %s9374_s3  ;;  %2037 = vrot.lane.b32.xlu1 %v7594_v53, %s9374_s3 }
 0x3f1   : > { %1966 = vrot.lane.b32.xlu2 %v7596_v47, %s9397_s29 }
 0x3f8   : > { %2193 = vrot.lane.b32.xlu0 %v7606_v8, %s9443_s26  ;;  %1968 = vrot.lane.b32.xlu1 %v7606_v8, %s9397_s29 }
 0x3f9   : > { %2043 = vrot.lane.b32.xlu2 %v7606_v8, %s9374_s3  ;;  %s9393_s3 = smov 3  }
 0x400   : > { %2114 = vrot.lane.b32.xlu0 %v7604_v7, %s9444_s27  ;;  %2191 = vrot.lane.b32.xlu1 %v7596_v47, %s9443_s26 }
 0x401   : > { %1964 = vrot.lane.b32.xlu2 %v7604_v7, %s9397_s29 }
 0x408   : > { %2116 = vrot.lane.b32.xlu0 %v7596_v47, %s9444_s27  ;;  %2189 = vrot.lane.b32.xlu1 %v7604_v7, %s9443_s26 }
 0x409   : > { %2187 = vrot.lane.b32.xlu2 %v7594_v53, %s9443_s26 }
 0x410   : > { %2112 = vrot.lane.b32.xlu1 %v7594_v53, %s9444_s27 }
 0x411   : > { %2118 = vrot.lane.b32.xlu2 %v7606_v8, %s9444_s27 }
 0x418   : > { %2264 = vperm.xlu1 %6960, %v1610_v9  }
 0x419   : > { %2269 = vperm.xlu2 %6959, %v1611_v10  }
 0x41b   : > { %v1631_v11 = vpop.permute.xlu2 %1630 }
 0x423   : > { %v1633_v12 = vpop.permute.xlu2 %1632 }
 0x42b   : > { %v1617_v14 = vpop.permute.xlu2 %1616 }
 0x432   : > { %v1758_v25 = vpop.permute.xlu0 %1757  ;;  %v1635_v13 = vpop.permute.xlu1 %1634 }
 0x433   : > { %v1760_v23 = vpop.permute.xlu2 %1759  ;;  %v1638_v43 = vsel %vm921_vm15, %v1631_v11, %v1635_v13  ;;  %v1640_v44 = vsel %vm921_vm15, %v1635_v13, %v1631_v11  ;;  %v1628_v11 = vld [vmem:[%s9347_s8] sm:$0xff]  ;;  %v6598_v13 = vld [vmem:[%s9347_s8 + $0x28] sm:$0xff] }
 0x434   : > { %v1642_v39 = vmul.f32 %v1640_v44, %v7341_v26  ;;  %v1643_v40 = vmul.f32 %v1638_v43, %v7343_v27 }
 0x43a   : > { %v1637_v28 = vpop.permute.xlu1 %1636  ;;  %v1613_v29 = vpop.permute.xlu0 %1612 }
 0x43b   : > { %v1639_v56 = vsel %vm921_vm15, %v1633_v12, %v1637_v28  ;;  %v1641_v19 = vsel %vm921_vm15, %v1637_v28, %v1633_v12  ;;  %v1615_v38 = vpop.permute.xlu2 %1614  ;;  %v1620_v61 = vsel %vm897_vm1, %v1613_v29, %v1617_v14  ;;  %v1622_v62 = vsel %vm897_vm1, %v1617_v14, %v1613_v29  ;;  %v6597_v12 = vld [vmem:[%s9347_s8 + $0x20] sm:$0xff] }
 0x43c   : > { %v1644_v59 = vmul.f32 %v1641_v19, %v7341_v26  ;;  %v1645_v15 = vmul.f32 %v1639_v56, %v7343_v27  ;;  %v1624_v9 = vmul.f32 %v1622_v62, %v7355_v36  ;;  %v1625_v10 = vmul.f32 %v1620_v61, %v7357_v37 }
 0x43e   : > { %1669 = vmatpush.msra.mxu2 %v1644_v59  ;;  %1692 = vmatpush.msra.mxu3 %v1645_v15 }
 0x440   : > { %1670 = vmatpush.msra.mxu2 %v1642_v39  ;;  %1693 = vmatpush.msra.mxu3 %v1643_v40  ;;  %v6603_v40 = vld [vmem:[%s9347_s8 + $0x30] sm:$0xff] }
 0x441   : > { %6589 = vmatmul.msk.f32.vlgmr.msra.gmra.mxu2 %vm938_vm2, %v6587_v32  ;;  %6591 = vmatmul.msk.f32.vlgmr.msra.gmra.mxu3 %vm938_vm2, %v6587_v32  ;;  %v6609_v32 = vld [vmem:[%s9347_s8 + $0x40] sm:$0xff] }
 0x442   : > { %v1756_v33 = vpop.permute.xlu0 %1755  ;;  %v1754_v41 = vpop.permute.xlu1 %1753 }
 0x443   : > { %v1762_v57 = vsel %vm1051_vm3, %v1756_v33, %v1760_v23  ;;  %v1764_v42 = vsel %vm1051_vm3, %v1760_v23, %v1756_v33  ;;  %v1761_v50 = vsel %vm1051_vm3, %v1754_v41, %v1758_v25  ;;  %v1763_v1 = vsel %vm1051_vm3, %v1758_v25, %v1754_v41  ;;  %v1829_v46 = vpop.permute.xlu2 %1828  ;;  %v1629_v25 = vld [vmem:[%s9347_s8 + $0x8] sm:$0xff] }
 0x444   : > { %v1767_v52 = vmul.f32 %v1764_v42, %v7395_v0  ;;  %v1768_v45 = vmul.f32 %v1762_v57, %v7397_v4  ;;  %v1765_v48 = vmul.f32 %v1763_v1, %v7395_v0  ;;  %v1766_v54 = vmul.f32 %v1761_v50, %v7397_v4 }
 0x446   : > { %1792 = vmatpush.msrb.mxu2 %v1767_v52  ;;  %1815 = vmatpush.msrb.mxu3 %v1768_v45 }
 0x448   : > { %1793 = vmatpush.msrb.mxu2 %v1765_v48  ;;  %1816 = vmatpush.msrb.mxu3 %v1766_v54  ;;  %v6604_v54 = vld [vmem:[%s9347_s8 + $0x38] sm:$0xff] }
 0x449   : > { %6590 = vmatmul.msk.f32.gmra.mxu2 %vm938_vm2, %v6588_v55  ;;  %6592 = vmatmul.msk.f32.gmra.mxu3 %vm938_vm2, %v6588_v55 }
 0x44a   : > { %1926 = vmatpush.msra.mxu2 %v7604_v7  ;;  %1949 = vmatpush.msra.mxu3 %v7606_v8  ;;  %v2042_v58 = vpop.permute.xlu0 %2041  ;;  %v1619_v60 = vpop.permute.xlu1 %1618 }
 0x44b   : > { %v1621_v63 = vsel %vm897_vm1, %v1615_v38, %v1619_v60  ;;  %v1623_v5 = vsel %vm897_vm1, %v1619_v60, %v1615_v38  ;;  %v7716_v3 = vpop.permute.xlu2 %1966  ;;  %v6610_v60 = vld [vmem:[%s9347_s8 + $0x48] sm:$0xff] }
 0x44c   : > { %v1626_v7 = vmul.f32 %v1623_v5, %v7355_v36  ;;  %v1627_v8 = vmul.f32 %v1621_v63, %v7357_v37  ;;  %1927 = vmatpush.msra.mxu2 %v7594_v53  ;;  %1950 = vmatpush.msra.mxu3 %v7596_v47 }
 0x44e   : > { %1721 = vmatpush.msrb.mxu0 %v1626_v7  ;;  %1744 = vmatpush.msrb.mxu1 %v1627_v8 }
 0x450   : > { %1722 = vmatpush.msrb.mxu0 %v1624_v9  ;;  %1745 = vmatpush.msrb.mxu1 %v1625_v10 }
 0x451   : > { %6593 = vmatmul.msk.f32.vlgmr.msrb.gmra.mxu0 %vm938_vm2, %v1628_v11  ;;  %6595 = vmatmul.msk.f32.vlgmr.msrb.gmra.mxu1 %vm938_vm2, %v1628_v11 }
 0x452   : > { %6599 = vmatmul.msk.f32.vlgmr.msrb.gmra.mxu2 %vm938_vm2, %v6597_v12  ;;  %6601 = vmatmul.msk.f32.vlgmr.msrb.gmra.mxu3 %vm938_vm2, %v6597_v12  ;;  %v1835_v53 = vpop.permute.xlu0 %1834  ;;  %v1833_v47 = vpop.permute.xlu1 %1832  ;;  %v6621_v12 = vld [vmem:[%s9347_s8 + $0x60] sm:$0xff] }
 0x453   : > { %v2044_v14 = vpop.permute.xlu2 %2043  ;;  %v1836_v29 = vsel %vm1132_vm4, %v1829_v46, %v1833_v47  ;;  %v1838_v43 = vsel %vm1132_vm4, %v1833_v47, %v1829_v46 }
 0x454   : > { %v1840_v15 = vmul.f32 %v1838_v43, %v7424_v21  ;;  %v1841_v39 = vmul.f32 %v1836_v29, %v7426_v22  ;;  %v6616_v43 = vld [vmem:[%s9347_s8 + $0x58] sm:$0xff] }
 0x459   : > { %6594 = vmatmul.msk.f32.gmra.mxu0 %vm938_vm2, %v1629_v25  ;;  %6596 = vmatmul.msk.f32.gmra.mxu1 %vm938_vm2, %v1629_v25 }
 0x45a   : > { %6600 = vmatmul.msk.f32.gmra.mxu2 %vm938_vm2, %v6598_v13  ;;  %6602 = vmatmul.msk.f32.gmra.mxu3 %vm938_vm2, %v6598_v13  ;;  %v1963_v23 = vpop.permute.xlu0 %1962  ;;  %v1831_v28 = vpop.permute.xlu1 %1830 }
 0x45b   : > { %v1837_v44 = vsel %vm1132_vm4, %v1831_v28, %v1835_v53  ;;  %v1839_v56 = vsel %vm1132_vm4, %v1835_v53, %v1831_v28  ;;  %v1965_v59 = vpop.permute.xlu2 %1964  ;;  %v1970_v62 = vsel %vm1272_vm5, %v1963_v23, %v7716_v3  ;;  %v1972_v63 = vsel %vm1272_vm5, %v7716_v3, %v1963_v23  ;;  %v6615_v3 = vld [vmem:[%s9347_s8 + $0x50] sm:$0xff]  ;;  %v7811_v53 = vld [vmem:[%s9349_s10] sm:$0xf] }
 0x45c   : > { %v1842_v19 = vmul.f32 %v1839_v56, %v7424_v21  ;;  %v1843_v38 = vmul.f32 %v1837_v44, %v7426_v22  ;;  %v1974_v10 = vmul.f32 %v1970_v62, %v7447_v34  ;;  %v1975_v11 = vmul.f32 %v1972_v63, %v7449_v35  ;;  %2294 = vrot.lane.b32.xlu0 %v7811_v53, %s9444_s27  ;;  %v6622_v44 = vld [vmem:[%s9347_s8 + $0x68] sm:$0xff] }
 0x45e   : > { %1867 = vmatpush.msra.mxu0 %v1842_v19  ;;  %1890 = vmatpush.msra.mxu1 %v1843_v38 }
 0x460   : > { %1868 = vmatpush.msra.mxu0 %v1840_v15  ;;  %1891 = vmatpush.msra.mxu1 %v1841_v39 }
 0x461   : > { %6605 = vmatmul.msk.f32.vlgmr.msra.gmra.mxu0 %vm938_vm2, %v6603_v40  ;;  %6607 = vmatmul.msk.f32.vlgmr.msra.gmra.mxu1 %vm938_vm2, %v6603_v40 }
 0x462   : > { %6611 = vmatmul.msk.f32.vlgmr.msra.gmra.mxu2 %vm938_vm2, %v6609_v32  ;;  %6613 = vmatmul.msk.f32.vlgmr.msra.gmra.mxu3 %vm938_vm2, %v6609_v32  ;;  %v2040_v33 = vpop.permute.xlu0 %2039  ;;  %v2038_v41 = vpop.permute.xlu1 %2037 }
 0x463   : > { %v2046_v57 = vsel %vm1353_vm6, %v2040_v33, %v2044_v14  ;;  %v2048_v42 = vsel %vm1353_vm6, %v2044_v14, %v2040_v33  ;;  %v2045_v50 = vsel %vm1353_vm6, %v2038_v41, %v2042_v58  ;;  %v2047_v1 = vsel %vm1353_vm6, %v2042_v58, %v2038_v41  ;;  %v2188_v55 = vpop.permute.xlu2 %2187  ;;  %v6633_v41 = vld [vmem:[%s9347_s8 + $0x80] sm:$0xff] }
 0x464   : > { %v2051_v46 = vmul.f32 %v2046_v57, %v7493_v2  ;;  %v2052_v52 = vmul.f32 %v2048_v42, %v7495_v6  ;;  %v2049_v45 = vmul.f32 %v2045_v50, %v7493_v2  ;;  %v2050_v48 = vmul.f32 %v2047_v1, %v7495_v6 }
 0x466   : > { %2076 = vmatpush.msrb.mxu2 %v2051_v46  ;;  %2099 = vmatpush.msrb.mxu3 %v2052_v52 }
 0x468   : > { %2077 = vmatpush.msrb.mxu2 %v2049_v45  ;;  %2100 = vmatpush.msrb.mxu3 %v2050_v48  ;;  %v6627_v45 = vld [vmem:[%s9347_s8 + $0x70] sm:$0xff]  ;;  %v6634_v48 = vld [vmem:[%s9347_s8 + $0x88] sm:$0xff] }
 0x469   : > { %6606 = vmatmul.msk.f32.gmra.mxu0 %vm938_vm2, %v6604_v54  ;;  %6608 = vmatmul.msk.f32.gmra.mxu1 %vm938_vm2, %v6604_v54  ;;  %v6628_v54 = vld [vmem:[%s9347_s8 + $0x78] sm:$0xff] }
 0x46a   : > { %6612 = vmatmul.msk.f32.gmra.mxu2 %vm938_vm2, %v6610_v60  ;;  %6614 = vmatmul.msk.f32.gmra.mxu3 %vm938_vm2, %v6610_v60  ;;  %v2194_v58 = vpop.permute.xlu0 %2193  ;;  %v1969_v61 = vpop.permute.xlu1 %1968 }
 0x46b   : > { %v1971_v5 = vsel %vm1272_vm5, %v1965_v59, %v1969_v61  ;;  %v1973_v7 = vsel %vm1272_vm5, %v1969_v61, %v1965_v59  ;;  %v2119_v47 = vpop.permute.xlu2 %2118 }
 0x46c   : > { %v1976_v8 = vmul.f32 %v1971_v5, %v7447_v34  ;;  %v1977_v9 = vmul.f32 %v1973_v7, %v7449_v35 }
 0x46e   : > { %2001 = vmatpush.msrb.mxu0 %v1976_v8  ;;  %2024 = vmatpush.msrb.mxu1 %v1977_v9 }
 0x470   : > { %2002 = vmatpush.msrb.mxu0 %v1974_v10  ;;  %2025 = vmatpush.msrb.mxu1 %v1975_v11 }
 0x471   : > { %6617 = vmatmul.msk.f32.vlgmr.msrb.gmra.mxu0 %vm938_vm2, %v6615_v3  ;;  %6619 = vmatmul.msk.f32.vlgmr.msrb.gmra.mxu1 %vm938_vm2, %v6615_v3 }
 0x472   : > { %6623 = vmatmul.msk.f32.vlgmr.msrb.gmra.mxu2 %vm938_vm2, %v6621_v12  ;;  %6625 = vmatmul.msk.f32.vlgmr.msrb.gmra.mxu3 %vm938_vm2, %v6621_v12  ;;  %v2115_v14 = vpop.permute.xlu0 %2114  ;;  %v2192_v25 = vpop.permute.xlu1 %2191 }
 0x473   : > { %v2121_v13 = vsel %vm1434_vm7, %v2115_v14, %v2119_v47  ;;  %v2123_v23 = vsel %vm1434_vm7, %v2119_v47, %v2115_v14  ;;  %v2195_v19 = vsel %vm9388_vm8, %v2188_v55, %v2192_v25  ;;  %v2197_v38 = vsel %vm9388_vm8, %v2192_v25, %v2188_v55 }
 0x474   : > { %v2126_v28 = vmul.f32 %v2121_v13, %v7526_v30  ;;  %v2127_v29 = vmul.f32 %v2123_v23, %v7528_v31  ;;  %v2199_v32 = vmul.f32 %v2195_v19, %v7550_v49  ;;  %v2200_v33 = vmul.f32 %v2197_v38, %v7552_v51 }
 0x476   : > { %2151 = vmatpush.msra.mxu0 %v2126_v28  ;;  %2174 = vmatpush.msra.mxu1 %v2127_v29 }
 0x479   : > { %6618 = vmatmul.msk.f32.gmra.mxu0 %vm938_vm2, %v6616_v43  ;;  %6620 = vmatmul.msk.f32.gmra.mxu1 %vm938_vm2, %v6616_v43 }
 0x47a   : > { %6624 = vmatmul.msk.f32.gmra.mxu2 %vm938_vm2, %v6622_v44  ;;  %6626 = vmatmul.msk.f32.gmra.mxu3 %vm938_vm2, %v6622_v44  ;;  %v2190_v56 = vpop.permute.xlu1 %2189  ;;  %v2117_v57 = vpop.permute.xlu0 %2116 }
 0x47b   : > { %v2196_v59 = vsel %vm9388_vm8, %v2190_v56, %v2194_v58  ;;  %v2198_v15 = vsel %vm9388_vm8, %v2194_v58, %v2190_v56 }
 0x47c   : > { %v2201_v39 = vmul.f32 %v2196_v59, %v7550_v49  ;;  %v2202_v40 = vmul.f32 %v2198_v15, %v7552_v51 }
 0x47e   : > { %2226 = vmatpush.msra.mxu2 %v2201_v39  ;;  %2249 = vmatpush.msra.mxu3 %v2202_v40 }
 0x480   : > { %2227 = vmatpush.msra.mxu2 %v2199_v32  ;;  %2250 = vmatpush.msra.mxu3 %v2200_v33 }
 0x482   : > { %v2113_v42 = vpop.permute.xlu1 %2112  ;;  %6635 = vmatmul.msk.f32.vlgmr.msra.gmra.mxu2 %vm938_vm2, %v6633_v41  ;;  %6637 = vmatmul.msk.f32.vlgmr.msra.gmra.mxu3 %vm938_vm2, %v6633_v41 }
 0x483   : > { %v2120_v50 = vsel %vm1434_vm7, %v2113_v42, %v2117_v57  ;;  %v2122_v1 = vsel %vm1434_vm7, %v2117_v57, %v2113_v42 }
 0x484   : > { %v2124_v46 = vmul.f32 %v2120_v50, %v7526_v30  ;;  %v2125_v52 = vmul.f32 %v2122_v1, %v7528_v31 }
 0x486   : > { %2152 = vmatpush.msra.mxu0 %v2124_v46  ;;  %2175 = vmatpush.msra.mxu1 %v2125_v52 }
 0x487   : > { %6629 = vmatmul.msk.f32.vlgmr.msra.gmra.mxu0 %vm938_vm2, %v6627_v45  ;;  %6631 = vmatmul.msk.f32.vlgmr.msra.gmra.mxu1 %vm938_vm2, %v6627_v45 }
 0x48a   : > { %6636 = vmatmul.msk.f32.gmra.mxu2 %vm938_vm2, %v6634_v48  ;;  %6638 = vmatmul.msk.f32.gmra.mxu3 %vm938_vm2, %v6634_v48 }
 0x48f   : > { %6630 = vmatmul.msk.f32.gmra.mxu0 %vm938_vm2, %v6628_v54  ;;  %6632 = vmatmul.msk.f32.gmra.mxu1 %vm938_vm2, %v6628_v54 }
 0x4c4   : > { %v1672_v55 = vpop.f32.mrf.mxu2  ;;  %v1695_v60 = vpop.f32.mrf.mxu3 }
 0x4cc   : > { %v1675_v58 = vpop.f32.mrf.mxu2  ;;  %v1698_v61 = vpop.f32.mrf.mxu3 }
 0x4ce   : > { %v1724_v62 = vpop.f32.mrf.mxu0  ;;  %v1747_v63 = vpop.f32.mrf.mxu1 }
 0x4cf   : > { %v1725_v19 = vadd.f32 %v1724_v62, %v1672_v55  ;;  %v1748_v38 = vadd.f32 %v1747_v63, %v1695_v60 }
 0x4d5   : > { %v1795_v5 = vpop.f32.mrf.mxu2  ;;  %v1818_v7 = vpop.f32.mrf.mxu3 }
 0x4d6   : > { %v1727_v8 = vpop.f32.mrf.mxu0  ;;  %v1750_v9 = vpop.f32.mrf.mxu1  ;;  %v1824_v59 = vadd.f32 %v1795_v5, %v1725_v19  ;;  %v1825_v15 = vadd.f32 %v1818_v7, %v1748_v38 }
 0x4d7   : > { %v1728_v1 = vadd.f32 %v1727_v8, %v1675_v58  ;;  %v1751_v46 = vadd.f32 %v1750_v9, %v1698_v61  ;;  %v2265_v8 = vpop.permute.xlu1 %2264 }
 0x4dd   : > { %v1798_v10 = vpop.f32.mrf.mxu2  ;;  %v1821_v11 = vpop.f32.mrf.mxu3 }
 0x4de   : > { %v1870_v3 = vpop.f32.mrf.mxu0  ;;  %v1893_v12 = vpop.f32.mrf.mxu1  ;;  %v1826_v48 = vadd.f32 %v1798_v10, %v1728_v1  ;;  %v1827_v54 = vadd.f32 %v1821_v11, %v1751_v46 }
 0x4df   : > { %v1899_v32 = vadd.f32 %v1870_v3, %v1824_v59  ;;  %v1900_v33 = vadd.f32 %v1893_v12, %v1825_v15  ;;  %v2270_v15 = vpop.permute.xlu2 %2269 }
 0x4e5   : > { %v1929_v47 = vpop.f32.mrf.mxu2  ;;  %v1952_v14 = vpop.f32.mrf.mxu3 }
 0x4e6   : > { %v1873_v25 = vpop.f32.mrf.mxu0  ;;  %v1896_v13 = vpop.f32.mrf.mxu1  ;;  %v1958_v42 = vadd.f32 %v1929_v47, %v1899_v32  ;;  %v1959_v50 = vadd.f32 %v1952_v14, %v1900_v33 }
 0x4e7   : > { %v1901_v62 = vadd.f32 %v1873_v25, %v1826_v48  ;;  %v1902_v63 = vadd.f32 %v1896_v13, %v1827_v54  ;;  %v9445_v48 = vld [vmem:[#allocation5_spill] sm:$0xff] }
 0x4ed   : > { %v1932_v23 = vpop.f32.mrf.mxu2  ;;  %v1955_v28 = vpop.f32.mrf.mxu3 }
 0x4ee   : > { %v2004_v29 = vpop.f32.mrf.mxu0  ;;  %v2027_v43 = vpop.f32.mrf.mxu1  ;;  %v1960_v19 = vadd.f32 %v1932_v23, %v1901_v62  ;;  %v1961_v38 = vadd.f32 %v1955_v28, %v1902_v63 }
 0x4ef   : > { %v2033_v52 = vadd.f32 %v2004_v29, %v1958_v42  ;;  %v2034_v45 = vadd.f32 %v2027_v43, %v1959_v50 }
 0x4f5   : > { %v2079_v44 = vpop.f32.mrf.mxu2  ;;  %v2102_v56 = vpop.f32.mrf.mxu3 }
 0x4f6   : > { %v2007_v39 = vpop.f32.mrf.mxu0  ;;  %v2030_v40 = vpop.f32.mrf.mxu1  ;;  %v2108_v51 = vadd.f32 %v2079_v44, %v2033_v52  ;;  %v2109_v49 = vadd.f32 %v2102_v56, %v2034_v45 }
 0x4f7   : > { %v2035_v58 = vadd.f32 %v2007_v39, %v1960_v19  ;;  %v2036_v61 = vadd.f32 %v2030_v40, %v1961_v38 }
 0x4fd   : > { %v2082_v41 = vpop.f32.mrf.mxu2  ;;  %v2105_v57 = vpop.f32.mrf.mxu3 }
 0x4fe   : > { %v2110_v9 = vadd.f32 %v2082_v41, %v2035_v58  ;;  %v2111_v10 = vadd.f32 %v2105_v57, %v2036_v61  ;;  %v2387_v61 = vld [vmem:[%s9350_s11] sm:$0xf] }
 0x504   : > { %v2154_v55 = vpop.f32.mrf.mxu0  ;;  %v2177_v60 = vpop.f32.mrf.mxu1 }
 0x505   : > { %v2183_v5 = vadd.f32 %v2154_v55, %v2108_v51  ;;  %v2184_v7 = vadd.f32 %v2177_v60, %v2109_v49  ;;  %v2229_v3 = vpop.f32.mrf.mxu2  ;;  %v2252_v12 = vpop.f32.mrf.mxu3  ;;  %v9446_v55 = vld [vmem:[#allocation6_spill] sm:$0xff] }
 0x507   : > { %v2258_v47 = vadd.f32 %v2229_v3, %v2183_v5  ;;  %v2259_v14 = vadd.f32 %v2252_v12, %v2184_v7  ;;  %v2295_v5 = vpop.permute.xlu0 %2294 }
 0x509   : > { %v2272_v11 = vadd.f32 %v2265_v8, %v2258_v47  ;;  %v2273_v29 = vadd.f32 %v2265_v8, %v2259_v14 }
 0x50b   : > { %v2276_v23 = vmul.f32 0.2, %v2272_v11  ;;  %v2277_v28 = vmul.f32 0.2, %v2273_v29 }
 0x50c   : > { %v2157_v43 = vpop.f32.mrf.mxu0  ;;  %v2180_v44 = vpop.f32.mrf.mxu1 }
 0x50d   : > { %v2185_v56 = vadd.f32 %v2157_v43, %v2110_v9  ;;  %v2186_v25 = vadd.f32 %v2180_v44, %v2111_v10  ;;  %v2232_v13 = vpop.f32.mrf.mxu2  ;;  %v2255_v51 = vpop.f32.mrf.mxu3  ;;  %v2280_v42 = vmax.f32 %v2272_v11, %v2276_v23  ;;  %v2281_v41 = vmax.f32 %v2273_v29, %v2277_v28 }
 0x50f   : > { %v2260_v49 = vadd.f32 %v2232_v13, %v2185_v56  ;;  %v2261_v59 = vadd.f32 %v2255_v51, %v2186_v25  ;;  %v7880_v52 = vadd.f32 %v2280_v42, %v7259_v16  ;;  %v7883_v45 = vadd.f32 %v2281_v41, %v7271_v20  ;;  %v7926_v25 = vld [vmem:[%s9351_s12 + $0x10] sm:$0xff]  ;;  %v2395_v13 = vld [vmem:[%s9351_s12 + $0x8] sm:$0xff]  ;;  %v2394_v51 = vld [vmem:[%s9351_s12] sm:$0xff] }
 0x511   : > { %v2274_v32 = vadd.f32 %v2270_v15, %v2260_v49  ;;  %v2275_v33 = vadd.f32 %v2270_v15, %v2261_v59  ;;  %v7901_v62 = vmul.f32 %v7880_v52, %v9445_v48  ;;  %v7905_v63 = vmul.f32 %v7883_v45, %v9446_v55 }
 0x513   : > { %v2278_v39 = vmul.f32 0.2, %v2274_v32  ;;  %v2279_v40 = vmul.f32 0.2, %v2275_v33 }
 0x515   : > { %v2282_v57 = vmax.f32 %v2274_v32, %v2278_v39  ;;  %v2283_v50 = vmax.f32 %v2275_v33, %v2279_v40  ;;  %v2397_v39 = vld [vmem:[%s9351_s12 + $0x18] sm:$0xff] }
 0x517   : > { %v7874_v1 = vadd.f32 %v2282_v57, %v7261_v17  ;;  %v7877_v46 = vadd.f32 %v2283_v50, %v7263_v18 }
 0x519   : > { %2354 = vmatpush.msrb.mxu2 %v7874_v1  ;;  %2374 = vmatpush.msrb.mxu3 %v7877_v46  ;;  %v7889_v54 = vmul.f32 %v7874_v1, %v9445_v48  ;;  %v7893_v60 = vmul.f32 %v7877_v46, %v9446_v55 }
 0x51b   : > { %2312 = vmatpush.msrb.mxu0 %v7889_v54  ;;  %2332 = vmatpush.msrb.mxu1 %v7893_v60 }
 0x51c   : > { %2355 = vmatpush.msrb.mxu2 %v7880_v52  ;;  %2375 = vmatpush.msrb.mxu3 %v7883_v45 }
 0x51d   : > { %6641 = vmatmul.msk.f32.vlgmr.msrb.gmra.mxu2 %vm938_vm2, %v7811_v53  ;;  %6642 = vmatmul.msk.f32.vlgmr.msrb.gmra.mxu3 %vm938_vm2, %v7811_v53 }
 0x51e   : > { %2313 = vmatpush.msrb.mxu0 %v7901_v62  ;;  %2333 = vmatpush.msrb.mxu1 %v7905_v63 }
 0x51f   : > { %6639 = vmatmul.msk.f32.vlgmr.msrb.gmra.mxu0 %vm938_vm2, %v2295_v5  ;;  %6640 = vmatmul.msk.f32.vlgmr.msrb.gmra.mxu1 %vm938_vm2, %v2295_v5 }
 0x59c   : > { %v2315_v7 = vpop.f32.mrf.mxu0  ;;  %v2335_v3 = vpop.f32.mrf.mxu1 }
 0x5a0   : > { %v2357_v12 = vpop.f32.mrf.mxu2  ;;  %v2377_v19 = vpop.f32.mrf.mxu3 }
 0x5a1   : > { %v2358_v38 = vadd.f32 %v2357_v12, %v2315_v7  ;;  %v2378_v47 = vadd.f32 %v2377_v19, %v2335_v3 }
 0x5a3   : > { %v2381_v14 = vsel %vm9387_vm9, %v2358_v38, 0.0  ;;  %v2382_v58 = vsel %vm9387_vm9, %v2378_v47, 0.0  ;;  %v2391_v47 = vld [vmem:[%s9352_s13 + $0x8] sm:$0xff] }
 0x5a4   : > { %v2383_v53 = vadd.f32 %v2382_v58, %v2381_v14 }
 0x5a6   : > { %2384 = vadd.xlane.f32.xlu2 %v2383_v53 }
 0x619   : > { %v2385_v8 = vpop.xlane.xlu2 %2384 }
 0x61a   : > { %v2386_v9 = vmul.f32 0.00390625, %v2385_v8 }
 0x61c   : > { %v2388_v10 = vadd.f32 %v2387_v61, %v2386_v9 }
 0x61e   : > { %v2389_v11 = vmax.f32 %v2388_v10, 0.0  ;;  %v2390_v10 = vld [vmem:[%s9352_s13] sm:$0xff] }
 0x620   : > { %v2436_v29 = vperm.slane %v2389_v11, 2  ;;  %v2407_v43 = vperm.slane %v2389_v11, 1  ;;  %v2465_v44 = vperm.slane %v2389_v11, 3  ;;  %v2398_v19 = vperm.slane %v2389_v11, 0 }
 0x622   : > { %2438 = vrot.lane.b32.xlu0 %v2436_v29, %s9395_s30  ;;  %2409 = vrot.lane.b32.xlu1 %v2407_v43, %s9404_s25  ;;  %v2400_v38 = vmul.f32 %v2398_v19, %v2395_v13  ;;  %v2399_v8 = vmul.f32 %v2398_v19, %v2394_v51  ;;  %s9467_s30 = smov 3  }
 0x624   : > { %v2404_v53 = vadd.f32 %v2400_v38, %v2391_v47 }
 0x62a   : > { %2467 = vrot.lane.b32.xlu1 %v2465_v44, %s9393_s3  ;;  %s9465_s3 = smov 2  }
 0x694   : > { %v2410_v56 = vpop.permute.xlu1 %2409  ;;  %v2439_v23 = vpop.permute.xlu0 %2438 }
 0x695   : > { %v2414_v49 = vmul.f32 %v2410_v56, %v7926_v25  ;;  %v2413_v59 = vmul.f32 %v2410_v56, %v2395_v13  ;;  %v2412_v15 = vmul.f32 %v2410_v56, %v2394_v51  ;;  %v2442_v28 = vmul.f32 %v2439_v23, %v2395_v13 }
 0x696   : > { %v2441_v32 = vmul.f32 %v2439_v23, %v2394_v51  ;;  %v2415_v42 = vmul.f32 %v2410_v56, %v2397_v39  ;;  %v2444_v57 = vmul.f32 %v2439_v23, %v2397_v39  ;;  %v2443_v50 = vmul.f32 %v2439_v23, %v7926_v25 }
 0x697   : > { %2424 = vrot.lane.b32.xlu2 %v2414_v49, %s9397_s29  ;;  %2422 = vrot.lane.b32.xlu0 %v2413_v59, %s9397_s29  ;;  %v2403_v56 = vadd.f32 %v2399_v8, %v2390_v10 }
 0x698   : > { %2420 = vrot.lane.b32.xlu1 %v2412_v15, %s9397_s29  ;;  %v2402_v15 = vmul.f32 %v2398_v19, %v2397_v39 }
 0x69c   : > { %v2468_v33 = vpop.permute.xlu1 %2467 }
 0x69d   : > { %v2471_v40 = vmul.f32 %v2468_v33, %v2395_v13  ;;  %v2470_v41 = vmul.f32 %v2468_v33, %v2394_v51  ;;  %v2473_v5 = vmul.f32 %v2468_v33, %v2397_v39  ;;  %v2472_v7 = vmul.f32 %v2468_v33, %v7926_v25  ;;  %v2393_v51 = vld [vmem:[%s9352_s13 + $0x18] sm:$0xff]  ;;  %v2392_v39 = vld [vmem:[%s9352_s13 + $0x10] sm:$0xff] }
 0x69f   : > { %2451 = vrot.lane.b32.xlu0 %v2442_v28, %s9391_s0 }
 0x6a0   : > { %2449 = vrot.lane.b32.xlu1 %v2441_v32, %s9391_s0 }
 0x6a7   : > { %2480 = vrot.lane.b32.xlu0 %v2471_v40, %s9389_s28  ;;  %v2406_v40 = vadd.f32 %v2402_v15, %v2393_v51 }
 0x6a8   : > { %2426 = vrot.lane.b32.xlu1 %v2415_v42, %s9397_s29 }
 0x6af   : > { %2478 = vrot.lane.b32.xlu0 %v2470_v41, %s9389_s28 }
 0x6b0   : > { %2455 = vrot.lane.b32.xlu1 %v2444_v57, %s9391_s0 }
 0x6b7   : > { %2453 = vrot.lane.b32.xlu0 %v2443_v50, %s9391_s0  ;;  %s9447_s0 = smov 17  }
 0x6b8   : > { %2484 = vrot.lane.b32.xlu1 %v2473_v5, %s9389_s28  ;;  %v2401_v5 = vmul.f32 %v2398_v19, %v7926_v25 }
 0x6bf   : > { %2482 = vrot.lane.b32.xlu0 %v2472_v7, %s9389_s28  ;;  %s9448_s28 = smov 16  }
 0x6f1   : > { %v2425_v38 = vpop.permute.xlu2 %2424 }
 0x709   : > { %v2423_v3 = vpop.permute.xlu0 %2422 }
 0x70a   : > { %v2421_v12 = vpop.permute.xlu1 %2420  ;;  %v2433_v61 = vadd.f32 %v2423_v3, %v2404_v53 }
 0x70b   : > { %v2432_v13 = vadd.f32 %v2421_v12, %v2403_v56 }
 0x711   : > { %v2452_v14 = vpop.permute.xlu0 %2451 }
 0x712   : > { %v2450_v58 = vpop.permute.xlu1 %2449  ;;  %v2462_v9 = vadd.f32 %v2452_v14, %v2433_v61  ;;  %v2405_v14 = vadd.f32 %v2401_v5, %v2392_v39 }
 0x713   : > { %v2461_v59 = vadd.f32 %v2450_v58, %v2432_v13 }
 0x714   : > { %v2434_v61 = vadd.f32 %v2425_v38, %v2405_v14 }
 0x719   : > { %v2481_v29 = vpop.permute.xlu0 %2480 }
 0x71a   : > { %v2491_v43 = vadd.f32 %v2481_v29, %v2462_v9  ;;  %v2427_v44 = vpop.permute.xlu1 %2426 }
 0x71b   : > { %v2435_v50 = vadd.f32 %v2427_v44, %v2406_v40 }
 0x71c   : > { %v2495_v11 = vsub.f32 0.0, %v2491_v43 }
 0x71e   : > { %v2500_v49 = vmul.f32 1.442695, %v2495_v11 }
 0x720   : > { %6974 = vpow2.f32 %v2500_v49 }
 0x721   : > { %v2479_v23 = vpop.permute.xlu0 %2478 }
 0x722   : > { %v2490_v28 = vadd.f32 %v2479_v23, %v2461_v59  ;;  %v2456_v32 = vpop.permute.xlu1 %2455 }
 0x723   : > { %v2464_v7 = vadd.f32 %v2456_v32, %v2435_v50 }
 0x724   : > { %v2494_v33 = vsub.f32 0.0, %v2490_v28 }
 0x726   : > { %v6975_v42 = vpop.eup %6974  ;;  %v2498_v41 = vmul.f32 1.442695, %v2494_v33 }
 0x727   : > { %v2507_v57 = vadd.f32 1.0, %v6975_v42 }
 0x728   : > { %6976 = vpow2.f32 %v2498_v41 }
 0x729   : > { %6978 = vrcp.f32 %v2507_v57  ;;  %v2454_v3 = vpop.permute.xlu0 %2453  ;;  %v2536_v56 = vand.u32 2147483648, %v2507_v57  ;;  %v2534_v49 = vand.u32 2147483647, %v2507_v57  ;;  %vm2530_vm11 = vweird.f32 %v2507_v57 }
 0x72a   : > { %v2485_v12 = vpop.permute.xlu1 %2484  ;;  %v2463_v29 = vadd.f32 %v2454_v3, %v2434_v61 }
 0x72b   : > { %v2493_v47 = vadd.f32 %v2485_v12, %v2464_v7  ;;  %v2537_v51 = vor.u32 1.1754944e-38, %v2536_v56  ;;  %vm2535_vm14 = vcmp.eq.f32.partialorder %v2534_v49, 8.507059e+37 }
 0x72d   : > { %v2497_v58 = vsub.f32 0.0, %v2493_v47 }
 0x72e   : > { %v6977_v53 = vpop.eup %6976 }
 0x72f   : > { %v6979_v8 = vpop.eup %6978  ;;  %v2506_v9 = vadd.f32 1.0, %v6977_v53  ;;  %v2504_v10 = vmul.f32 1.442695, %v2497_v58 }
 0x730   : > { %v2526_v25 = vmul.f32 %v6979_v8, %v2507_v57  ;;  %vm2531_vm10 = vweird.f32 %v6979_v8 }
 0x731   : > { %6980 = vrcp.f32 %v2506_v9  ;;  %v2483_v19 = vpop.permute.xlu0 %2482  ;;  %vm2532_vm12 = vmor %vm2530_vm11, %vm2531_vm10  ;;  %v2521_v50 = vand.u32 2147483648, %v2506_v9  ;;  %v2519_v39 = vand.u32 2147483647, %v2506_v9  ;;  %vm2515_vm9 = vweird.f32 %v2506_v9 }
 0x732   : > { %6982 = vpow2.f32 %v2504_v10  ;;  %v2492_v43 = vadd.f32 %v2483_v19, %v2463_v29  ;;  %v2527_v44 = vsub.f32 1.0, %v2526_v25 }
 0x733   : > { %v2522_v12 = vor.u32 1.1754944e-38, %v2521_v50  ;;  %vm2520_vm11 = vcmp.eq.f32.partialorder %v2519_v39, 8.507059e+37 }
 0x734   : > { %v2496_v11 = vsub.f32 0.0, %v2492_v43  ;;  %v2528_v13 = vmul.f32 %v6979_v8, %v2527_v44 }
 0x736   : > { %v2502_v59 = vmul.f32 1.442695, %v2496_v11  ;;  %v2529_v15 = vadd.f32 %v6979_v8, %v2528_v13 }
 0x737   : > { %v6981_v23 = vpop.eup %6980 }
 0x738   : > { %v6983_v28 = vpop.eup %6982  ;;  %6984 = vpow2.f32 %v2502_v59  ;;  %v2533_v32 = vsel %vm2532_vm12, %v6979_v8, %v2529_v15  ;;  %v2511_v33 = vmul.f32 %v6981_v23, %v2506_v9  ;;  %vm2516_vm0 = vweird.f32 %v6981_v23  ;;  %v2598_v9 = vld [vmem:[%s9353_s14] sm:$0xff] }
 0x739   : > { %v2509_v40 = vadd.f32 1.0, %v6983_v28  ;;  %v2538_v42 = vsel %vm2535_vm14, %v2537_v51, %v2533_v32  ;;  %vm2517_vm10 = vmor %vm2515_vm9, %vm2516_vm0  ;;  %v2706_v51 = vld [vmem:[%s9354_s15] sm:$0xff] }
 0x73a   : > { %2577 = vperm.xlu1 %6960, %v2538_v42   ;;  %v2512_v41 = vsub.f32 1.0, %v2511_v33  ;;  %v2599_v33 = vld [vmem:[%s9353_s14 + $0x8] sm:$0xff] }
 0x73b   : > { %6986 = vrcp.f32 %v2509_v40  ;;  %v2566_v61 = vand.u32 2147483648, %v2509_v40  ;;  %v2564_v10 = vand.u32 2147483647, %v2509_v40  ;;  %vm2560_vm0 = vweird.f32 %v2509_v40 }
 0x73c   : > { %v2513_v5 = vmul.f32 %v6981_v23, %v2512_v41 }
 0x73d   : > { %v2567_v43 = vor.u32 1.1754944e-38, %v2566_v61  ;;  %vm2565_vm14 = vcmp.eq.f32.partialorder %v2564_v10, 8.507059e+37 }
 0x73e   : > { %v6985_v7 = vpop.eup %6984  ;;  %v2514_v3 = vadd.f32 %v6981_v23, %v2513_v5 }
 0x73f   : > { %v2508_v57 = vadd.f32 1.0, %v6985_v7 }
 0x740   : > { %v2518_v38 = vsel %vm2517_vm10, %v6981_v23, %v2514_v3 }
 0x741   : > { %v6987_v47 = vpop.eup %6986  ;;  %6988 = vrcp.f32 %v2508_v57  ;;  %v2523_v14 = vsel %vm2520_vm11, %v2522_v12, %v2518_v38  ;;  %v2551_v13 = vand.u32 2147483648, %v2508_v57  ;;  %v2549_v59 = vand.u32 2147483647, %v2508_v57 }
 0x742   : > { %2572 = vperm.xlu0 %6961, %v2523_v14   ;;  %v2556_v58 = vmul.f32 %v6987_v47, %v2509_v40  ;;  %vm2561_vm12 = vweird.f32 %v6987_v47  ;;  %vm2545_vm11 = vweird.f32 %v2508_v57  ;;  %v2707_v40 = vld [vmem:[%s9354_s15 + $0x8] sm:$0xff] }
 0x743   : > { %vm2562_vm9 = vmor %vm2560_vm0, %vm2561_vm12  ;;  %v2552_v23 = vor.u32 1.1754944e-38, %v2551_v13  ;;  %vm2550_vm12 = vcmp.eq.f32.partialorder %v2549_v59, 8.507059e+37  ;;  %v6651_v13 = vld [vmem:[%s9346_s7 + $0x10] sm:$0xff] }
 0x744   : > { %v2557_v53 = vsub.f32 1.0, %v2556_v58 }
 0x746   : > { %v2558_v8 = vmul.f32 %v6987_v47, %v2557_v53 }
 0x747   : > { %v6989_v29 = vpop.eup %6988 }
 0x748   : > { %v2559_v25 = vadd.f32 %v6987_v47, %v2558_v8  ;;  %v2541_v19 = vmul.f32 %v6989_v29, %v2508_v57  ;;  %vm2546_vm10 = vweird.f32 %v6989_v29 }
 0x749   : > { %vm2547_vm8 = vmor %vm2545_vm11, %vm2546_vm10 }
 0x74a   : > { %v2563_v44 = vsel %vm2562_vm9, %v6987_v47, %v2559_v25  ;;  %2602 = vrot.lane.b32.xlu0 %v2598_v9, %s9444_s27  ;;  %v2542_v56 = vsub.f32 1.0, %v2541_v19 }
 0x74b   : > { %v2568_v11 = vsel %vm2565_vm14, %v2567_v43, %v2563_v44 }
 0x74c   : > { %2591 = vperm.xlu2 %6959, %v2568_v11   ;;  %v2543_v49 = vmul.f32 %v6989_v29, %v2542_v56  ;;  %v6652_v11 = vld [vmem:[%s9346_s7 + $0x18] sm:$0xff] }
 0x74e   : > { %v2544_v15 = vadd.f32 %v6989_v29, %v2543_v49 }
 0x750   : > { %v2548_v28 = vsel %vm2547_vm8, %v6989_v29, %v2544_v15  ;;  %vm9451_vm8 = vcmp.lt.s32.totalorder %v7335_v24, 111 }
 0x751   : > { %v2553_v32 = vsel %vm2550_vm12, %v2552_v23, %v2548_v28  ;;  %vm9452_vm0 = vmmov %vm9451_vm8 }
 0x752   : > { %2586 = vperm.xlu1 %6960, %v2553_v32   ;;  %2710 = vperm.xlu0 %6961, %v2706_v51   ;;  %vm9455_vm9 = vmmov %vm9452_vm0 }
 0x753   : > { %vm9456_vm14 = vmmov %vm9452_vm0 }
 0x754   : > { %2604 = vrot.lane.b32.xlu2 %v2599_v33, %s9444_s27  ;;  %vm9458_vm10 = vmmov %vm9452_vm0 }
 0x755   : > { %vm9459_vm11 = vmmov %vm9452_vm0 }
 0x756   : > { %vm9460_vm12 = vmmov %vm9452_vm0 }
 0x75a   : > { %2715 = vperm.xlu1 %6960, %v2707_v40  }
 0x7a6   : > { %v2592_v42 = vpop.permute.xlu2 %2591 }
 0x7a7   : > { %v2596_v41 = vmul.f32 %v2592_v42, %v7889_v54  ;;  %v2597_v50 = vmul.f32 %v2592_v42, %v7893_v60 }
 0x7a9   : > { %2624 = vmatpush.msra.mxu0 %v2596_v41  ;;  %2647 = vmatpush.msra.mxu1 %v2597_v50 }
 0x7ac   : > { %v2578_v5 = vpop.permute.xlu1 %2577 }
 0x7ad   : > { %v2582_v39 = vmul.f32 %v2578_v5, %v7874_v1  ;;  %v2583_v7 = vmul.f32 %v2578_v5, %v7877_v46 }
 0x7af   : > { %2674 = vmatpush.msra.mxu2 %v2582_v39  ;;  %2697 = vmatpush.msra.mxu3 %v2583_v7 }
 0x7b4   : > { %v2573_v3 = vpop.permute.xlu0 %2572 }
 0x7b5   : > { %v2580_v57 = vmul.f32 %v2573_v3, %v7880_v52  ;;  %v2581_v12 = vmul.f32 %v2573_v3, %v7883_v45  ;;  %v2605_v52 = vpop.permute.xlu2 %2604 }
 0x7b7   : > { %2675 = vmatpush.msra.mxu2 %v2580_v57  ;;  %2698 = vmatpush.msra.mxu3 %v2581_v12  ;;  %v6655_v57 = vld [vmem:[%s9345_s6 + $0xa0] sm:$0xff] }
 0x7b8   : > { %6647 = vmatmul.msk.f32.vlgmr.msra.gmra.mxu2 %vm938_vm2, %v2598_v9  ;;  %6649 = vmatmul.msk.f32.vlgmr.msra.gmra.mxu3 %vm938_vm2, %v2598_v9 }
 0x7bc   : > { %v2603_v60 = vpop.permute.xlu0 %2602 }
 0x7c0   : > { %6648 = vmatmul.msk.f32.gmra.mxu2 %vm938_vm2, %v2599_v33  ;;  %6650 = vmatmul.msk.f32.gmra.mxu3 %vm938_vm2, %v2599_v33 }
 0x7c4   : > { %v2587_v1 = vpop.permute.xlu1 %2586  ;;  %v2711_v53 = vpop.permute.xlu0 %2710 }
 0x7c5   : > { %v2594_v46 = vmul.f32 %v2587_v1, %v7901_v62  ;;  %v2595_v54 = vmul.f32 %v2587_v1, %v7905_v63 }
 0x7c7   : > { %2625 = vmatpush.msra.mxu0 %v2594_v46  ;;  %2648 = vmatpush.msra.mxu1 %v2595_v54 }
 0x7c8   : > { %6643 = vmatmul.msk.f32.vlgmr.msra.gmra.mxu0 %vm938_vm2, %v2603_v60  ;;  %6645 = vmatmul.msk.f32.vlgmr.msra.gmra.mxu1 %vm938_vm2, %v2603_v60 }
 0x7cc   : > { %v2716_v43 = vpop.permute.xlu1 %2715 }
 0x7d0   : > { %6644 = vmatmul.msk.f32.gmra.mxu0 %vm938_vm2, %v2605_v52  ;;  %6646 = vmatmul.msk.f32.gmra.mxu1 %vm938_vm2, %v2605_v52 }
 0x83b   : > { %v2677_v45 = vpop.f32.mrf.mxu2  ;;  %v2700_v38 = vpop.f32.mrf.mxu3 }
 0x843   : > { %v2680_v8 = vpop.f32.mrf.mxu2  ;;  %v2703_v10 = vpop.f32.mrf.mxu3 }
 0x845   : > { %v2627_v47 = vpop.f32.mrf.mxu0  ;;  %v2650_v14 = vpop.f32.mrf.mxu1 }
 0x846   : > { %v2678_v58 = vadd.f32 %v2677_v45, %v2627_v47  ;;  %v2701_v62 = vadd.f32 %v2700_v38, %v2650_v14 }
 0x848   : > { %v7995_v63 = vadd.f32 %v2711_v53, %v2678_v58  ;;  %v7997_v61 = vadd.f32 %v2711_v53, %v2701_v62  ;;  %v6656_v62 = vld [vmem:[%s9345_s6 + $0xa8] sm:$0xff]  ;;  %v6653_v53 = vld [vmem:[%s9345_s6 + $0x90] sm:$0xff] }
 0x84a   : > { %2729 = vrot.lane.b32.xlu1 %v7997_v61, %s9447_s0  ;;  %2748 = vrot.lane.b32.xlu2 %v7997_v61, %s9448_s28 }
 0x84b   : > { %2744 = vrot.lane.b32.xlu0 %v7995_v63, %s9448_s28 }
 0x84d   : > { %v2630_v29 = vpop.f32.mrf.mxu0  ;;  %v2653_v9 = vpop.f32.mrf.mxu1 }
 0x84e   : > { %v2681_v25 = vadd.f32 %v2680_v8, %v2630_v29  ;;  %v2704_v19 = vadd.f32 %v2703_v10, %v2653_v9 }
 0x850   : > { %v8005_v44 = vadd.f32 %v2716_v43, %v2681_v25  ;;  %v8007_v56 = vadd.f32 %v2716_v43, %v2704_v19 }
 0x852   : > { %2750 = vrot.lane.b32.xlu1 %v8007_v56, %s9448_s28  ;;  %2746 = vrot.lane.b32.xlu2 %v8005_v44, %s9448_s28 }
 0x853   : > { %2871 = vrot.lane.b32.xlu0 %v7997_v61, %s9449_s1 }
 0x85a   : > { %2727 = vrot.lane.b32.xlu1 %v8005_v44, %s9447_s0  ;;  %2725 = vrot.lane.b32.xlu2 %v7995_v63, %s9447_s0 }
 0x85b   : > { %2731 = vrot.lane.b32.xlu0 %v8007_v56, %s9447_s0 }
 0x862   : > { %2867 = vrot.lane.b32.xlu1 %v7995_v63, %s9449_s1  ;;  %2873 = vrot.lane.b32.xlu2 %v8007_v56, %s9449_s1 }
 0x863   : > { %2869 = vrot.lane.b32.xlu0 %v8005_v44, %s9449_s1 }
 0x86a   : > { %2948 = vrot.lane.b32.xlu1 %v8007_v56, %s9404_s25  ;;  %2944 = vrot.lane.b32.xlu2 %v8005_v44, %s9404_s25 }
 0x86b   : > { %2942 = vrot.lane.b32.xlu0 %v7995_v63, %s9404_s25 }
 0x872   : > { %3080 = vrot.lane.b32.xlu1 %v7997_v61, %s9397_s29  ;;  %2946 = vrot.lane.b32.xlu2 %v7997_v61, %s9404_s25 }
 0x873   : > { %3155 = vrot.lane.b32.xlu0 %v7997_v61, %s9450_s22 }
 0x87a   : > { %3078 = vrot.lane.b32.xlu1 %v8005_v44, %s9397_s29  ;;  %3076 = vrot.lane.b32.xlu2 %v7995_v63, %s9397_s29 }
 0x87b   : > { %3082 = vrot.lane.b32.xlu0 %v8007_v56, %s9397_s29  ;;  %s647_s29 = scalar_lea.vmem %s9490_s23, %s7173_s17 }
 0x882   : > { %3151 = vrot.lane.b32.xlu1 %v7995_v63, %s9450_s22  ;;  %3157 = vrot.lane.b32.xlu2 %v8007_v56, %s9450_s22 }
 0x883   : > { %3153 = vrot.lane.b32.xlu0 %v8005_v44, %s9450_s22 }
 0x88a   : > { %3232 = vrot.lane.b32.xlu1 %v8007_v56, %s9444_s27  ;;  %3228 = vrot.lane.b32.xlu2 %v8005_v44, %s9444_s27 }
 0x88b   : > { %3226 = vrot.lane.b32.xlu0 %v7995_v63, %s9444_s27 }
 0x892   : > { %3303 = vrot.lane.b32.xlu1 %v8005_v44, %s9443_s26  ;;  %3230 = vrot.lane.b32.xlu2 %v7997_v61, %s9444_s27 }
 0x893   : > { %3307 = vrot.lane.b32.xlu0 %v8007_v56, %s9443_s26 }
 0x89a   : > { %3305 = vrot.lane.b32.xlu1 %v7997_v61, %s9443_s26  ;;  %3301 = vrot.lane.b32.xlu2 %v7995_v63, %s9443_s26 }
 0x89b   : > { %3383 = vperm.xlu0 %6961, %v6652_v11  }
 0x8a2   : > { %3378 = vperm.xlu2 %6959, %v6651_v13  }
 0x8a4   : > { %v2749_v49 = vpop.permute.xlu2 %2748 }
 0x8ac   : > { %v2747_v59 = vpop.permute.xlu2 %2746 }
 0x8b4   : > { %v2726_v15 = vpop.permute.xlu2 %2725 }
 0x8bc   : > { %v2730_v23 = vpop.permute.xlu1 %2729  ;;  %v2874_v28 = vpop.permute.xlu2 %2873 }
 0x8bd   : > { %v2745_v51 = vpop.permute.xlu0 %2744  ;;  %v2733_v54 = vsel %vm897_vm1, %v2726_v15, %v2730_v23  ;;  %v2735_v60 = vsel %vm897_vm1, %v2730_v23, %v2726_v15  ;;  %v6665_v15 = vld [vmem:[%s9345_s6 + $0xb0] sm:$0xff]  ;;  %v6654_v23 = vld [vmem:[%s9345_s6 + $0x98] sm:$0xff] }
 0x8be   : > { %v2752_v33 = vsel %vm921_vm15, %v2745_v51, %v2749_v49  ;;  %v2754_v40 = vsel %vm921_vm15, %v2749_v49, %v2745_v51  ;;  %v2737_v14 = vmul.f32 %v2735_v60, %v7355_v36  ;;  %v2738_v58 = vmul.f32 %v2733_v54, %v7357_v37  ;;  %v6677_v54 = vld [vmem:[%s9345_s6 + $0xd0] sm:$0xff]  ;;  %v6672_v60 = vld [vmem:[%s9345_s6 + $0xc8] sm:$0xff] }
 0x8bf   : > { %v2756_v7 = vmul.f32 %v2754_v40, %v7341_v26  ;;  %v2757_v3 = vmul.f32 %v2752_v33, %v7343_v27 }
 0x8c4   : > { %v2751_v32 = vpop.permute.xlu1 %2750  ;;  %v2945_v12 = vpop.permute.xlu2 %2944 }
 0x8c5   : > { %v2753_v42 = vsel %vm921_vm15, %v2747_v59, %v2751_v32  ;;  %v2755_v41 = vsel %vm921_vm15, %v2751_v32, %v2747_v59  ;;  %v2872_v50 = vpop.permute.xlu0 %2871 }
 0x8c6   : > { %v2758_v5 = vmul.f32 %v2755_v41, %v7341_v26  ;;  %v2759_v39 = vmul.f32 %v2753_v42, %v7343_v27 }
 0x8c8   : > { %2783 = vmatpush.msrb.mxu0 %v2758_v5  ;;  %2806 = vmatpush.msrb.mxu1 %v2759_v39 }
 0x8ca   : > { %2784 = vmatpush.msrb.mxu0 %v2756_v7  ;;  %2807 = vmatpush.msrb.mxu1 %v2757_v3  ;;  %v6666_v3 = vld [vmem:[%s9345_s6 + $0xb8] sm:$0xff] }
 0x8cb   : > { %6657 = vmatmul.msk.f32.vlgmr.msrb.gmra.mxu0 %vm938_vm2, %v6655_v57  ;;  %6659 = vmatmul.msk.f32.vlgmr.msrb.gmra.mxu1 %vm938_vm2, %v6655_v57  ;;  %v6671_v57 = vld [vmem:[%s9345_s6 + $0xc0] sm:$0xff] }
 0x8cc   : > { %v2728_v1 = vpop.permute.xlu1 %2727  ;;  %v2947_v10 = vpop.permute.xlu2 %2946 }
 0x8cd   : > { %v2732_v46 = vpop.permute.xlu0 %2731 }
 0x8ce   : > { %v2734_v52 = vsel %vm897_vm1, %v2728_v1, %v2732_v46  ;;  %v2736_v45 = vsel %vm897_vm1, %v2732_v46, %v2728_v1 }
 0x8cf   : > { %v2739_v38 = vmul.f32 %v2736_v45, %v7355_v36  ;;  %v2740_v47 = vmul.f32 %v2734_v52, %v7357_v37 }
 0x8d1   : > { %2835 = vmatpush.msrb.mxu2 %v2739_v38  ;;  %2858 = vmatpush.msrb.mxu3 %v2740_v47 }
 0x8d3   : > { %2836 = vmatpush.msrb.mxu2 %v2737_v14  ;;  %2859 = vmatpush.msrb.mxu3 %v2738_v58 }
 0x8d4   : > { %6658 = vmatmul.msk.f32.gmra.mxu0 %vm938_vm2, %v6656_v62  ;;  %6660 = vmatmul.msk.f32.gmra.mxu1 %vm938_vm2, %v6656_v62  ;;  %v2868_v8 = vpop.permute.xlu1 %2867 }
 0x8d5   : > { %6661 = vmatmul.msk.f32.vlgmr.msrb.gmra.mxu2 %vm938_vm2, %v6653_v53  ;;  %6663 = vmatmul.msk.f32.vlgmr.msrb.gmra.mxu3 %vm938_vm2, %v6653_v53  ;;  %v2870_v29 = vpop.permute.xlu0 %2869  ;;  %v2875_v9 = vsel %vm1051_vm3, %v2868_v8, %v2872_v50  ;;  %v2877_v25 = vsel %vm1051_vm3, %v2872_v50, %v2868_v8  ;;  %v3077_v50 = vpop.permute.xlu2 %3076 }
 0x8d6   : > { %v2876_v19 = vsel %vm1051_vm3, %v2870_v29, %v2874_v28  ;;  %v2878_v43 = vsel %vm1051_vm3, %v2874_v28, %v2870_v29  ;;  %v2879_v49 = vmul.f32 %v2877_v25, %v7395_v0  ;;  %v2880_v59 = vmul.f32 %v2875_v9, %v7397_v4  ;;  %v6678_v29 = vld [vmem:[%s9345_s6 + $0xd8] sm:$0xff]  ;;  %v6683_v9 = vld [vmem:[%s9345_s6 + $0xe0] sm:$0xff] }
 0x8d7   : > { %v2881_v11 = vmul.f32 %v2878_v43, %v7395_v0  ;;  %v2882_v13 = vmul.f32 %v2876_v19, %v7397_v4 }
 0x8d9   : > { %2906 = vmatpush.msra.mxu0 %v2881_v11  ;;  %2929 = vmatpush.msra.mxu1 %v2882_v13 }
 0x8db   : > { %2907 = vmatpush.msra.mxu0 %v2879_v49  ;;  %2930 = vmatpush.msra.mxu1 %v2880_v59 }
 0x8dc   : > { %6667 = vmatmul.msk.f32.vlgmr.msra.gmra.mxu0 %vm938_vm2, %v6665_v15  ;;  %6669 = vmatmul.msk.f32.vlgmr.msra.gmra.mxu1 %vm938_vm2, %v6665_v15  ;;  %v2949_v51 = vpop.permute.xlu1 %2948 }
 0x8dd   : > { %6662 = vmatmul.msk.f32.gmra.mxu2 %vm938_vm2, %v6654_v23  ;;  %6664 = vmatmul.msk.f32.gmra.mxu3 %vm938_vm2, %v6654_v23  ;;  %v2951_v28 = vsel %vm1132_vm4, %v2945_v12, %v2949_v51  ;;  %v2953_v32 = vsel %vm1132_vm4, %v2949_v51, %v2945_v12  ;;  %v2943_v33 = vpop.permute.xlu0 %2942  ;;  %v3158_v46 = vpop.permute.xlu2 %3157 }
 0x8de   : > { %3040 = vmatpush.msrb.mxu0 %v8005_v44  ;;  %3063 = vmatpush.msrb.mxu1 %v8007_v56  ;;  %v2956_v40 = vmul.f32 %v2953_v32, %v7424_v21  ;;  %v2957_v42 = vmul.f32 %v2951_v28, %v7426_v22  ;;  %v2950_v41 = vsel %vm1132_vm4, %v2943_v33, %v2947_v10  ;;  %v6689_v32 = vld [vmem:[%s9345_s6 + $0xf0] sm:$0xff] }
 0x8df   : > { %v2952_v5 = vsel %vm1132_vm4, %v2947_v10, %v2943_v33  ;;  %v2955_v7 = vmul.f32 %v2950_v41, %v7426_v22  ;;  %v6684_v33 = vld [vmem:[%s9345_s6 + $0xe8] sm:$0xff] }
 0x8e0   : > { %3041 = vmatpush.msrb.mxu0 %v7995_v63  ;;  %3064 = vmatpush.msrb.mxu1 %v7997_v61  ;;  %v2954_v39 = vmul.f32 %v2952_v5, %v7424_v21 }
 0x8e1   : > { %2981 = vmatpush.msra.mxu2 %v2956_v40  ;;  %3004 = vmatpush.msra.mxu3 %v2957_v42 }
 0x8e3   : > { %2982 = vmatpush.msra.mxu2 %v2954_v39  ;;  %3005 = vmatpush.msra.mxu3 %v2955_v7 }
 0x8e4   : > { %6668 = vmatmul.msk.f32.gmra.mxu0 %vm938_vm2, %v6666_v3  ;;  %6670 = vmatmul.msk.f32.gmra.mxu1 %vm938_vm2, %v6666_v3  ;;  %v3081_v12 = vpop.permute.xlu1 %3080 }
 0x8e5   : > { %6673 = vmatmul.msk.f32.vlgmr.msra.gmra.mxu2 %vm938_vm2, %v6671_v57  ;;  %6675 = vmatmul.msk.f32.vlgmr.msra.gmra.mxu3 %vm938_vm2, %v6671_v57  ;;  %v3156_v1 = vpop.permute.xlu0 %3155  ;;  %v3084_v38 = vsel %vm1272_vm5, %v3077_v50, %v3081_v12  ;;  %v3086_v47 = vsel %vm1272_vm5, %v3081_v12, %v3077_v50  ;;  %v3229_v25 = vpop.permute.xlu2 %3228 }
 0x8e6   : > { %v3088_v8 = vmul.f32 %v3084_v38, %v7447_v34  ;;  %v3089_v10 = vmul.f32 %v3086_v47, %v7449_v35  ;;  %v9453_v47 = vld [vmem:[#allocation13_spill] sm:$0xff] }
 0x8ec   : > { %6679 = vmatmul.msk.f32.vlgmr.msrb.gmra.mxu0 %vm938_vm2, %v6677_v54  ;;  %6681 = vmatmul.msk.f32.vlgmr.msrb.gmra.mxu1 %vm938_vm2, %v6677_v54  ;;  %v3079_v52 = vpop.permute.xlu1 %3078  ;;  %v6695_v54 = vld [vmem:[%s9345_s6 + $0x100] sm:$0xff] }
 0x8ed   : > { %6674 = vmatmul.msk.f32.gmra.mxu2 %vm938_vm2, %v6672_v60  ;;  %6676 = vmatmul.msk.f32.gmra.mxu3 %vm938_vm2, %v6672_v60  ;;  %v3083_v45 = vpop.permute.xlu0 %3082  ;;  %v3231_v42 = vpop.permute.xlu2 %3230 }
 0x8ee   : > { %v3085_v14 = vsel %vm1272_vm5, %v3079_v52, %v3083_v45  ;;  %v3087_v58 = vsel %vm1272_vm5, %v3083_v45, %v3079_v52 }
 0x8ef   : > { %v3090_v62 = vmul.f32 %v3085_v14, %v7447_v34  ;;  %v3091_v53 = vmul.f32 %v3087_v58, %v7449_v35  ;;  %v9454_v58 = vld [vmem:[#allocation14_spill] sm:$0xff] }
 0x8f1   : > { %3115 = vmatpush.msrb.mxu2 %v3090_v62  ;;  %3138 = vmatpush.msrb.mxu3 %v3091_v53  ;;  %v6696_v53 = vld [vmem:[%s9345_s6 + $0x108] sm:$0xff] }
 0x8f3   : > { %3116 = vmatpush.msrb.mxu2 %v3088_v8  ;;  %3139 = vmatpush.msrb.mxu3 %v3089_v10 }
 0x8f4   : > { %6680 = vmatmul.msk.f32.gmra.mxu0 %vm938_vm2, %v6678_v29  ;;  %6682 = vmatmul.msk.f32.gmra.mxu1 %vm938_vm2, %v6678_v29  ;;  %v3152_v19 = vpop.permute.xlu1 %3151 }
 0x8f5   : > { %6685 = vmatmul.msk.f32.vlgmr.msrb.gmra.mxu2 %vm938_vm2, %v6683_v9  ;;  %6687 = vmatmul.msk.f32.vlgmr.msrb.gmra.mxu3 %vm938_vm2, %v6683_v9  ;;  %v3154_v43 = vpop.permute.xlu0 %3153  ;;  %v3159_v11 = vsel %vm1353_vm6, %v3152_v19, %v3156_v1  ;;  %v3161_v13 = vsel %vm1353_vm6, %v3156_v1, %v3152_v19  ;;  %v3302_v8 = vpop.permute.xlu2 %3301 }
 0x8f6   : > { %v3160_v49 = vsel %vm1353_vm6, %v3154_v43, %v3158_v46  ;;  %v3162_v59 = vsel %vm1353_vm6, %v3158_v46, %v3154_v43  ;;  %v3163_v51 = vmul.f32 %v3159_v11, %v7493_v2  ;;  %v3164_v28 = vmul.f32 %v3161_v13, %v7495_v6  ;;  %v6690_v46 = vld [vmem:[%s9345_s6 + $0xf8] sm:$0xff]  ;;  %v6701_v43 = vld [vmem:[%s9345_s6 + $0x110] sm:$0xff] }
 0x8f7   : > { %v3165_v15 = vmul.f32 %v3160_v49, %v7493_v2  ;;  %v3166_v23 = vmul.f32 %v3162_v59, %v7495_v6  ;;  %v6702_v11 = vld [vmem:[%s9345_s6 + $0x118] sm:$0xff] }
 0x8f9   : > { %3190 = vmatpush.msra.mxu0 %v3165_v15  ;;  %3213 = vmatpush.msra.mxu1 %v3166_v23 }
 0x8fb   : > { %3191 = vmatpush.msra.mxu0 %v3163_v51  ;;  %3214 = vmatpush.msra.mxu1 %v3164_v28 }
 0x8fc   : > { %6691 = vmatmul.msk.f32.vlgmr.msra.gmra.mxu0 %vm938_vm2, %v6689_v32  ;;  %6693 = vmatmul.msk.f32.vlgmr.msra.gmra.mxu1 %vm938_vm2, %v6689_v32  ;;  %v3233_v40 = vpop.permute.xlu1 %3232 }
 0x8fd   : > { %6686 = vmatmul.msk.f32.gmra.mxu2 %vm938_vm2, %v6684_v33  ;;  %6688 = vmatmul.msk.f32.gmra.mxu3 %vm938_vm2, %v6684_v33  ;;  %v3235_v41 = vsel %vm1434_vm7, %v3229_v25, %v3233_v40  ;;  %v3237_v50 = vsel %vm1434_vm7, %v3233_v40, %v3229_v25  ;;  %v3227_v5 = vpop.permute.xlu0 %3226 }
 0x8fe   : > { %v3240_v39 = vmul.f32 %v3235_v41, %v7526_v30  ;;  %v3241_v7 = vmul.f32 %v3237_v50, %v7528_v31  ;;  %v3234_v3 = vsel %vm1434_vm7, %v3227_v5, %v3231_v42  ;;  %v3236_v57 = vsel %vm1434_vm7, %v3231_v42, %v3227_v5 }
 0x8ff   : > { %v3238_v12 = vmul.f32 %v3234_v3, %v7526_v30  ;;  %v3239_v1 = vmul.f32 %v3236_v57, %v7528_v31 }
 0x900   : > { %3265 = vmatpush.msra.mxu2 %v3240_v39  ;;  %3288 = vmatpush.msra.mxu3 %v3241_v7 }
 0x902   : > { %3266 = vmatpush.msra.mxu2 %v3238_v12  ;;  %3289 = vmatpush.msra.mxu3 %v3239_v1 }
 0x904   : > { %6692 = vmatmul.msk.f32.gmra.mxu0 %vm938_vm2, %v6690_v46  ;;  %6694 = vmatmul.msk.f32.gmra.mxu1 %vm938_vm2, %v6690_v46  ;;  %v3304_v60 = vpop.permute.xlu1 %3303 }
 0x905   : > { %6697 = vmatmul.msk.f32.vlgmr.msra.gmra.mxu2 %vm938_vm2, %v6695_v54  ;;  %6699 = vmatmul.msk.f32.vlgmr.msra.gmra.mxu3 %vm938_vm2, %v6695_v54  ;;  %v3308_v52 = vpop.permute.xlu0 %3307 }
 0x906   : > { %v3310_v45 = vsel %vm9451_vm8, %v3304_v60, %v3308_v52  ;;  %v3312_v38 = vsel %vm9452_vm0, %v3308_v52, %v3304_v60  ;;  %vm9461_vm8 = vmmov %vm9452_vm0  ;;  %vm9463_vm0 = vcmask 1043456  }
 0x907   : > { %v3315_v14 = vmul.f32 %v3310_v45, %v9453_v47  ;;  %v3316_v62 = vmul.f32 %v3312_v38, %v9454_v58 }
 0x909   : > { %3340 = vmatpush.msrb.mxu0 %v3315_v14  ;;  %3363 = vmatpush.msrb.mxu1 %v3316_v62 }
 0x90c   : > { %v3306_v10 = vpop.permute.xlu1 %3305 }
 0x90d   : > { %6698 = vmatmul.msk.f32.gmra.mxu2 %vm938_vm2, %v6696_v53  ;;  %6700 = vmatmul.msk.f32.gmra.mxu3 %vm938_vm2, %v6696_v53  ;;  %v3309_v29 = vsel %vm9455_vm9, %v3302_v8, %v3306_v10  ;;  %v3311_v9 = vsel %vm9456_vm14, %v3306_v10, %v3302_v8  ;;  %vm9464_vm9 = vmmov %vm9463_vm0 }
 0x90e   : > { %v3313_v25 = vmul.f32 %v3309_v29, %v9453_v47  ;;  %v3314_v19 = vmul.f32 %v3311_v9, %v9454_v58 }
 0x910   : > { %3341 = vmatpush.msrb.mxu0 %v3313_v25  ;;  %3364 = vmatpush.msrb.mxu1 %v3314_v19 }
 0x911   : > { %6703 = vmatmul.msk.f32.vlgmr.msrb.gmra.mxu0 %vm938_vm2, %v6701_v43  ;;  %6705 = vmatmul.msk.f32.vlgmr.msrb.gmra.mxu1 %vm938_vm2, %v6701_v43 }
 0x919   : > { %6704 = vmatmul.msk.f32.gmra.mxu0 %vm938_vm2, %v6702_v11  ;;  %6706 = vmatmul.msk.f32.gmra.mxu1 %vm938_vm2, %v6702_v11 }
 0x948   : > { %v2786_v13 = vpop.f32.mrf.mxu0  ;;  %v2809_v49 = vpop.f32.mrf.mxu1 }
 0x951   : > { %v2789_v59 = vpop.f32.mrf.mxu0  ;;  %v2812_v15 = vpop.f32.mrf.mxu1 }
 0x958   : > { %v2838_v23 = vpop.f32.mrf.mxu2  ;;  %v2861_v51 = vpop.f32.mrf.mxu3 }
 0x959   : > { %v2909_v28 = vpop.f32.mrf.mxu0  ;;  %v2932_v32 = vpop.f32.mrf.mxu1  ;;  %v2839_v60 = vadd.f32 %v2838_v23, %v2786_v13  ;;  %v2862_v52 = vadd.f32 %v2861_v51, %v2809_v49 }
 0x95b   : > { %v2938_v14 = vadd.f32 %v2909_v28, %v2839_v60  ;;  %v2939_v62 = vadd.f32 %v2932_v32, %v2862_v52 }
 0x960   : > { %v2841_v33 = vpop.f32.mrf.mxu2  ;;  %v2864_v40 = vpop.f32.mrf.mxu3 }
 0x961   : > { %v2912_v42 = vpop.f32.mrf.mxu0  ;;  %v2935_v41 = vpop.f32.mrf.mxu1  ;;  %v2842_v9 = vadd.f32 %v2841_v33, %v2789_v59  ;;  %v2865_v25 = vadd.f32 %v2864_v40, %v2812_v15 }
 0x963   : > { %v2940_v18 = vadd.f32 %v2912_v42, %v2842_v9  ;;  %v2941_v17 = vadd.f32 %v2935_v41, %v2865_v25  ;;  %v3379_v42 = vpop.permute.xlu2 %3378 }
 0x968   : > { %v2984_v50 = vpop.f32.mrf.mxu2  ;;  %v3007_v5 = vpop.f32.mrf.mxu3 }
 0x969   : > { %v3043_v39 = vpop.f32.mrf.mxu0  ;;  %v3066_v7 = vpop.f32.mrf.mxu1  ;;  %v3013_v10 = vadd.f32 %v2984_v50, %v2938_v14  ;;  %v3014_v29 = vadd.f32 %v3007_v5, %v2939_v62 }
 0x96b   : > { %v3072_v19 = vadd.f32 %v3043_v39, %v3013_v10  ;;  %v3073_v43 = vadd.f32 %v3066_v7, %v3014_v29 }
 0x970   : > { %v2987_v3 = vpop.f32.mrf.mxu2  ;;  %v3010_v57 = vpop.f32.mrf.mxu3 }
 0x971   : > { %v3046_v12 = vpop.f32.mrf.mxu0  ;;  %v3069_v1 = vpop.f32.mrf.mxu1  ;;  %v3015_v23 = vadd.f32 %v2987_v3, %v2940_v18  ;;  %v3016_v51 = vadd.f32 %v3010_v57, %v2941_v17 }
 0x973   : > { %v3074_v60 = vadd.f32 %v3046_v12, %v3015_v23  ;;  %v3075_v52 = vadd.f32 %v3069_v1, %v3016_v51 }
 0x978   : > { %v3118_v46 = vpop.f32.mrf.mxu2  ;;  %v3141_v54 = vpop.f32.mrf.mxu3 }
 0x979   : > { %v3193_v45 = vpop.f32.mrf.mxu0  ;;  %v3216_v38 = vpop.f32.mrf.mxu1  ;;  %v3147_v16 = vadd.f32 %v3118_v46, %v3072_v19  ;;  %v3148_v55 = vadd.f32 %v3141_v54, %v3073_v43  ;;  %v6708_v43 = vld [vmem:[%s9348_s9 + $0x18] sm:$0xff] }
 0x97b   : > { %v3222_v28 = vadd.f32 %v3193_v45, %v3147_v16  ;;  %v3223_v32 = vadd.f32 %v3216_v38, %v3148_v55 }
 0x980   : > { %v3121_v53 = vpop.f32.mrf.mxu2  ;;  %v3144_v8 = vpop.f32.mrf.mxu3 }
 0x981   : > { %v3196_v11 = vpop.f32.mrf.mxu0  ;;  %v3219_v20 = vpop.f32.mrf.mxu1  ;;  %v3149_v33 = vadd.f32 %v3121_v53, %v3074_v60  ;;  %v3150_v40 = vadd.f32 %v3144_v8, %v3075_v52 }
 0x982   : > { %v3384_v8 = vpop.permute.xlu0 %3383 }
 0x983   : > { %v3224_v62 = vadd.f32 %v3196_v11, %v3149_v33  ;;  %v3225_v18 = vadd.f32 %v3219_v20, %v3150_v40  ;;  %v6707_v11 = vld [vmem:[%s9348_s9 + $0x10] sm:$0xff] }
 0x988   : > { %v3268_v13 = vpop.f32.mrf.mxu2  ;;  %v3291_v49 = vpop.f32.mrf.mxu3 }
 0x989   : > { %v3297_v50 = vadd.f32 %v3268_v13, %v3222_v28  ;;  %v3298_v5 = vadd.f32 %v3291_v49, %v3223_v32 }
 0x98e   : > { %v3343_v59 = vpop.f32.mrf.mxu0  ;;  %v3366_v15 = vpop.f32.mrf.mxu1 }
 0x98f   : > { %v3372_v39 = vadd.f32 %v3343_v59, %v3297_v50  ;;  %v3373_v7 = vadd.f32 %v3366_v15, %v3298_v5 }
 0x990   : > { %v3271_v54 = vpop.f32.mrf.mxu2  ;;  %v3294_v14 = vpop.f32.mrf.mxu3 }
 0x991   : > { %v3386_v41 = vadd.f32 %v3379_v42, %v3372_v39  ;;  %v3387_v46 = vadd.f32 %v3379_v42, %v3373_v7  ;;  %v3299_v55 = vadd.f32 %v3271_v54, %v3224_v62  ;;  %v3300_v3 = vadd.f32 %v3294_v14, %v3225_v18  ;;  %v6711_v42 = vld [vmem:[%s9347_s8 + $0xa0] sm:$0xff]  ;;  %v6712_v54 = vld [vmem:[%s9347_s8 + $0xa8] sm:$0xff] }
 0x993   : > { %v3390_v17 = vmul.f32 0.2, %v3386_v41  ;;  %v3391_v16 = vmul.f32 0.2, %v3387_v46 }
 0x995   : > { %v8263_v57 = vmax.f32 %v3386_v41, %v3390_v17  ;;  %v8265_v12 = vmax.f32 %v3387_v46, %v3391_v16 }
 0x996   : > { %v3346_v1 = vpop.f32.mrf.mxu0  ;;  %v3369_v45 = vpop.f32.mrf.mxu1 }
 0x997   : > { %v3374_v38 = vadd.f32 %v3346_v1, %v3299_v55  ;;  %v3375_v53 = vadd.f32 %v3369_v45, %v3300_v3  ;;  %3547 = vrot.lane.b32.xlu0 %v8265_v12, %s9449_s1  ;;  %3424 = vrot.lane.b32.xlu1 %v8265_v12, %s9448_s28 }
 0x998   : > { %3420 = vrot.lane.b32.xlu2 %v8263_v57, %s9448_s28 }
 0x999   : > { %v3388_v20 = vadd.f32 %v3384_v8, %v3374_v38  ;;  %v3389_v10 = vadd.f32 %v3384_v8, %v3375_v53 }
 0x99b   : > { %v3392_v29 = vmul.f32 0.2, %v3388_v20  ;;  %v3393_v9 = vmul.f32 0.2, %v3389_v10 }
 0x99d   : > { %v8273_v25 = vmax.f32 %v3388_v20, %v3392_v29  ;;  %v8275_v19 = vmax.f32 %v3389_v10, %v3393_v9 }
 0x99f   : > { %3426 = vrot.lane.b32.xlu0 %v8275_v19, %s9448_s28  ;;  %3422 = vrot.lane.b32.xlu1 %v8273_v25, %s9448_s28 }
 0x9a0   : > { %3405 = vrot.lane.b32.xlu2 %v8265_v12, %s9447_s0 }
 0x9a7   : > { %3401 = vrot.lane.b32.xlu0 %v8263_v57, %s9447_s0  ;;  %3543 = vrot.lane.b32.xlu1 %v8263_v57, %s9449_s1 }
 0x9a8   : > { %3549 = vrot.lane.b32.xlu2 %v8275_v19, %s9449_s1 }
 0x9af   : > { %3545 = vrot.lane.b32.xlu0 %v8273_v25, %s9449_s1  ;;  %3407 = vrot.lane.b32.xlu1 %v8275_v19, %s9447_s0 }
 0x9b0   : > { %3403 = vrot.lane.b32.xlu2 %v8273_v25, %s9447_s0 }
 0x9b7   : > { %3831 = vrot.lane.b32.xlu0 %v8265_v12, %s9450_s22  ;;  %3622 = vrot.lane.b32.xlu1 %v8265_v12, %s9404_s25 }
 0x9b8   : > { %3618 = vrot.lane.b32.xlu2 %v8263_v57, %s9404_s25 }
 0x9bf   : > { %3624 = vrot.lane.b32.xlu0 %v8275_v19, %s9404_s25  ;;  %3620 = vrot.lane.b32.xlu1 %v8273_v25, %s9404_s25 }
 0x9c0   : > { %3756 = vrot.lane.b32.xlu2 %v8265_v12, %s9457_s4 }
 0x9c7   : > { %3752 = vrot.lane.b32.xlu0 %v8263_v57, %s9457_s4  ;;  %3827 = vrot.lane.b32.xlu1 %v8263_v57, %s9450_s22 }
 0x9c8   : > { %3833 = vrot.lane.b32.xlu2 %v8275_v19, %s9450_s22 }
 0x9cf   : > { %3829 = vrot.lane.b32.xlu0 %v8273_v25, %s9450_s22  ;;  %3758 = vrot.lane.b32.xlu1 %v8275_v19, %s9457_s4 }
 0x9d0   : > { %3754 = vrot.lane.b32.xlu2 %v8273_v25, %s9457_s4 }
 0x9d7   : > { %3983 = vrot.lane.b32.xlu0 %v8275_v19, %s9443_s26  ;;  %3981 = vrot.lane.b32.xlu1 %v8265_v12, %s9443_s26 }
 0x9d8   : > { %3977 = vrot.lane.b32.xlu2 %v8263_v57, %s9443_s26 }
 0x9df   : > { %3904 = vrot.lane.b32.xlu0 %v8273_v25, %s9444_s27  ;;  %3979 = vrot.lane.b32.xlu1 %v8273_v25, %s9443_s26 }
 0x9e0   : > { %3908 = vrot.lane.b32.xlu2 %v8275_v19, %s9444_s27 }
 0x9e7   : > { %3906 = vrot.lane.b32.xlu0 %v8265_v12, %s9444_s27  ;;  %3902 = vrot.lane.b32.xlu1 %v8263_v57, %s9444_s27 }
 0x9e8   : > { %4059 = vperm.xlu2 %6959, %v6708_v43  }
 0x9ef   : > { %4054 = vperm.xlu1 %6960, %v6707_v11  }
 0x9f2   : > { %v3421_v13 = vpop.permute.xlu2 %3420 }
 0x9fa   : > { %v3406_v49 = vpop.permute.xlu2 %3405 }
 0xa02   : > { %v3550_v28 = vpop.permute.xlu2 %3549 }
 0xa09   : > { %v3425_v23 = vpop.permute.xlu1 %3424  ;;  %v3548_v51 = vpop.permute.xlu0 %3547 }
 0xa0a   : > { %v3428_v52 = vsel %vm921_vm15, %v3421_v13, %v3425_v23  ;;  %v3430_v50 = vsel %vm921_vm15, %v3425_v23, %v3421_v13  ;;  %v3404_v40 = vpop.permute.xlu2 %3403  ;;  %v6721_v23 = vld [vmem:[%s9347_s8 + $0xb0] sm:$0xff] }
 0xa0b   : > { %v3432_v39 = vmul.f32 %v3430_v50, %v7341_v26  ;;  %v3433_v7 = vmul.f32 %v3428_v52, %v7343_v27  ;;  %v6722_v52 = vld [vmem:[%s9347_s8 + $0xb8] sm:$0xff] }
 0xa11   : > { %v3423_v32 = vpop.permute.xlu1 %3422  ;;  %v3427_v60 = vpop.permute.xlu0 %3426 }
 0xa12   : > { %v3429_v5 = vsel %vm921_vm15, %v3423_v32, %v3427_v60  ;;  %v3431_v59 = vsel %vm921_vm15, %v3427_v60, %v3423_v32  ;;  %v3619_v14 = vpop.permute.xlu2 %3618  ;;  %v6710_v60 = vld [vmem:[%s9347_s8 + $0x98] sm:$0xff] }
 0xa13   : > { %v3434_v15 = vmul.f32 %v3431_v59, %v7341_v26  ;;  %v3435_v33 = vmul.f32 %v3429_v5, %v7343_v27 }
 0xa15   : > { %3459 = vmatpush.msrb.mxu2 %v3434_v15  ;;  %3482 = vmatpush.msrb.mxu3 %v3435_v33 }
 0xa17   : > { %3460 = vmatpush.msrb.mxu2 %v3432_v39  ;;  %3483 = vmatpush.msrb.mxu3 %v3433_v7  ;;  %v6727_v7 = vld [vmem:[%s9347_s8 + $0xc0] sm:$0xff] }
 0xa18   : > { %6713 = vmatmul.msk.f32.vlgmr.msrb.gmra.mxu2 %vm938_vm2, %v6711_v42  ;;  %6715 = vmatmul.msk.f32.vlgmr.msrb.gmra.mxu3 %vm938_vm2, %v6711_v42  ;;  %v6733_v42 = vld [vmem:[%s9347_s8 + $0xd0] sm:$0xff] }
 0xa19   : > { %v3544_v41 = vpop.permute.xlu1 %3543  ;;  %v3402_v46 = vpop.permute.xlu0 %3401 }
 0xa1a   : > { %v3551_v62 = vsel %vm1051_vm3, %v3544_v41, %v3548_v51  ;;  %v3553_v18 = vsel %vm1051_vm3, %v3548_v51, %v3544_v41  ;;  %v3409_v17 = vsel %vm897_vm1, %v3402_v46, %v3406_v49  ;;  %v3411_v16 = vsel %vm897_vm1, %v3406_v49, %v3402_v46  ;;  %v6709_v49 = vld [vmem:[%s9347_s8 + $0x90] sm:$0xff]  ;;  %v3757_v51 = vpop.permute.xlu2 %3756 }
 0xa1b   : > { %v3413_v9 = vmul.f32 %v3411_v16, %v7355_v36  ;;  %v3414_v43 = vmul.f32 %v3409_v17, %v7357_v37  ;;  %v3555_v11 = vmul.f32 %v3553_v18, %v7395_v0  ;;  %v3556_v13 = vmul.f32 %v3551_v62, %v7397_v4  ;;  %v6734_v62 = vld [vmem:[%s9347_s8 + $0xd8] sm:$0xff] }
 0xa20   : > { %6714 = vmatmul.msk.f32.gmra.mxu2 %vm938_vm2, %v6712_v54  ;;  %6716 = vmatmul.msk.f32.gmra.mxu3 %vm938_vm2, %v6712_v54 }
 0xa21   : > { %v3408_v55 = vpop.permute.xlu1 %3407  ;;  %v3546_v3 = vpop.permute.xlu0 %3545 }
 0xa22   : > { %v3410_v1 = vsel %vm897_vm1, %v3404_v40, %v3408_v55  ;;  %v3412_v45 = vsel %vm897_vm1, %v3408_v55, %v3404_v40  ;;  %v3552_v38 = vsel %vm1051_vm3, %v3546_v3, %v3550_v28  ;;  %v3554_v53 = vsel %vm1051_vm3, %v3550_v28, %v3546_v3 }
 0xa23   : > { %v3415_v8 = vmul.f32 %v3412_v45, %v7355_v36  ;;  %v3416_v20 = vmul.f32 %v3410_v1, %v7357_v37  ;;  %v3557_v10 = vmul.f32 %v3554_v53, %v7395_v0  ;;  %v3558_v29 = vmul.f32 %v3552_v38, %v7397_v4 }
 0xa25   : > { %3511 = vmatpush.msra.mxu0 %v3415_v8  ;;  %3534 = vmatpush.msra.mxu1 %v3416_v20 }
 0xa26   : > { %3582 = vmatpush.msra.mxu2 %v3557_v10  ;;  %3605 = vmatpush.msra.mxu3 %v3558_v29 }
 0xa27   : > { %3512 = vmatpush.msra.mxu0 %v3413_v9  ;;  %3535 = vmatpush.msra.mxu1 %v3414_v43 }
 0xa28   : > { %3583 = vmatpush.msra.mxu2 %v3555_v11  ;;  %3606 = vmatpush.msra.mxu3 %v3556_v13 }
 0xa29   : > { %6717 = vmatmul.msk.f32.vlgmr.msra.gmra.mxu0 %vm938_vm2, %v6709_v49  ;;  %6719 = vmatmul.msk.f32.vlgmr.msra.gmra.mxu1 %vm938_vm2, %v6709_v49  ;;  %v3623_v28 = vpop.permute.xlu1 %3622  ;;  %v3832_v32 = vpop.permute.xlu0 %3831 }
 0xa2a   : > { %6723 = vmatmul.msk.f32.vlgmr.msra.gmra.mxu2 %vm938_vm2, %v6721_v23  ;;  %6725 = vmatmul.msk.f32.vlgmr.msra.gmra.mxu3 %vm938_vm2, %v6721_v23  ;;  %v3626_v50 = vsel %vm1132_vm4, %v3619_v14, %v3623_v28 }
 0xa2b   : > { %3716 = vmatpush.msrb.mxu2 %v8273_v25  ;;  %3739 = vmatpush.msrb.mxu3 %v8275_v19  ;;  %v3631_v39 = vmul.f32 %v3626_v50, %v7426_v22  ;;  %v6740_v50 = vld [vmem:[%s9347_s8 + $0xe8] sm:$0xff] }
 0xa2d   : > { %3717 = vmatpush.msrb.mxu2 %v8263_v57  ;;  %3740 = vmatpush.msrb.mxu3 %v8265_v12  ;;  %v3834_v57 = vpop.permute.xlu2 %3833  ;;  %v3628_v12 = vsel %vm1132_vm4, %v3623_v28, %v3619_v14  ;;  %v6728_v14 = vld [vmem:[%s9347_s8 + $0xc8] sm:$0xff]  ;;  %v6745_v28 = vld [vmem:[%s9347_s8 + $0xf0] sm:$0xff] }
 0xa2e   : > { %v3630_v40 = vmul.f32 %v3628_v12, %v7424_v21 }
 0xa31   : > { %6718 = vmatmul.msk.f32.gmra.mxu0 %vm938_vm2, %v6710_v60  ;;  %6720 = vmatmul.msk.f32.gmra.mxu1 %vm938_vm2, %v6710_v60  ;;  %v3621_v25 = vpop.permute.xlu1 %3620  ;;  %v3625_v19 = vpop.permute.xlu0 %3624 }
 0xa32   : > { %6724 = vmatmul.msk.f32.gmra.mxu2 %vm938_vm2, %v6722_v52  ;;  %6726 = vmatmul.msk.f32.gmra.mxu3 %vm938_vm2, %v6722_v52  ;;  %v3627_v5 = vsel %vm1132_vm4, %v3621_v25, %v3625_v19  ;;  %v3629_v59 = vsel %vm1132_vm4, %v3625_v19, %v3621_v25  ;;  %v6746_v25 = vld [vmem:[%s9347_s8 + $0xf8] sm:$0xff] }
 0xa33   : > { %v3632_v15 = vmul.f32 %v3629_v59, %v7424_v21  ;;  %v3633_v33 = vmul.f32 %v3627_v5, %v7426_v22 }
 0xa35   : > { %3657 = vmatpush.msrb.mxu0 %v3632_v15  ;;  %3680 = vmatpush.msrb.mxu1 %v3633_v33  ;;  %v3755_v54 = vpop.permute.xlu2 %3754 }
 0xa37   : > { %3658 = vmatpush.msrb.mxu0 %v3630_v40  ;;  %3681 = vmatpush.msrb.mxu1 %v3631_v39 }
 0xa39   : > { %6729 = vmatmul.msk.f32.vlgmr.msrb.gmra.mxu0 %vm938_vm2, %v6727_v7  ;;  %6731 = vmatmul.msk.f32.vlgmr.msrb.gmra.mxu1 %vm938_vm2, %v6727_v7  ;;  %v3828_v41 = vpop.permute.xlu1 %3827  ;;  %v3753_v46 = vpop.permute.xlu0 %3752 }
 0xa3a   : > { %6735 = vmatmul.msk.f32.vlgmr.msrb.gmra.mxu2 %vm938_vm2, %v6733_v42  ;;  %6737 = vmatmul.msk.f32.vlgmr.msrb.gmra.mxu3 %vm938_vm2, %v6733_v42  ;;  %v3835_v18 = vsel %vm1353_vm6, %v3828_v41, %v3832_v32  ;;  %v3837_v17 = vsel %vm1353_vm6, %v3832_v32, %v3828_v41  ;;  %v3760_v16 = vsel %vm1272_vm5, %v3753_v46, %v3757_v51  ;;  %v8476_v32 = vld [vmem:[%s9349_s10 + $0x4] sm:$0xf] }
 0xa3b   : > { %v3762_v55 = vsel %vm1272_vm5, %v3757_v51, %v3753_v46  ;;  %v3764_v43 = vmul.f32 %v3760_v16, %v7447_v34  ;;  %v3839_v49 = vmul.f32 %v3835_v18, %v7493_v2  ;;  %v3840_v23 = vmul.f32 %v3837_v17, %v7495_v6  ;;  %v6739_v51 = vld [vmem:[%s9347_s8 + $0xe0] sm:$0xff]  ;;  %4085 = vrot.lane.b32.xlu0 %v8476_v32, %s9444_s27 }
 0xa3c   : > { %v3765_v11 = vmul.f32 %v3762_v55, %v7449_v35 }
 0xa3d   : > { %v3978_v13 = vpop.permute.xlu2 %3977 }
 0xa41   : > { %6730 = vmatmul.msk.f32.gmra.mxu0 %vm938_vm2, %v6728_v14  ;;  %6732 = vmatmul.msk.f32.gmra.mxu1 %vm938_vm2, %v6728_v14  ;;  %v3759_v3 = vpop.permute.xlu1 %3758  ;;  %v3830_v1 = vpop.permute.xlu0 %3829 }
 0xa42   : > { %6736 = vmatmul.msk.f32.gmra.mxu2 %vm938_vm2, %v6734_v62  ;;  %6738 = vmatmul.msk.f32.gmra.mxu3 %vm938_vm2, %v6734_v62  ;;  %v3761_v45 = vsel %vm1272_vm5, %v3755_v54, %v3759_v3  ;;  %v3763_v38 = vsel %vm1272_vm5, %v3759_v3, %v3755_v54  ;;  %v3836_v53 = vsel %vm1353_vm6, %v3830_v1, %v3834_v57  ;;  %v6757_v62 = vld [vmem:[%s9347_s8 + $0x110] sm:$0xff] }
 0xa43   : > { %v3766_v8 = vmul.f32 %v3761_v45, %v7447_v34  ;;  %v3767_v20 = vmul.f32 %v3763_v38, %v7449_v35  ;;  %v3838_v10 = vsel %vm1353_vm6, %v3834_v57, %v3830_v1  ;;  %v3841_v29 = vmul.f32 %v3836_v53, %v7493_v2  ;;  %v6751_v45 = vld [vmem:[%s9347_s8 + $0x100] sm:$0xff]  ;;  %v6758_v38 = vld [vmem:[%s9347_s8 + $0x118] sm:$0xff]  ;;  %v6752_v53 = vld [vmem:[%s9347_s8 + $0x108] sm:$0xff] }
 0xa44   : > { %v3842_v9 = vmul.f32 %v3838_v10, %v7495_v6 }
 0xa45   : > { %3791 = vmatpush.msra.mxu0 %v3766_v8  ;;  %3814 = vmatpush.msra.mxu1 %v3767_v20  ;;  %v3909_v19 = vpop.permute.xlu2 %3908 }
 0xa46   : > { %3866 = vmatpush.msra.mxu2 %v3841_v29  ;;  %3889 = vmatpush.msra.mxu3 %v3842_v9 }
 0xa47   : > { %3792 = vmatpush.msra.mxu0 %v3764_v43  ;;  %3815 = vmatpush.msra.mxu1 %v3765_v11 }
 0xa48   : > { %3867 = vmatpush.msra.mxu2 %v3839_v49  ;;  %3890 = vmatpush.msra.mxu3 %v3840_v23 }
 0xa49   : > { %6741 = vmatmul.msk.f32.vlgmr.msra.gmra.mxu0 %vm938_vm2, %v6739_v51  ;;  %6743 = vmatmul.msk.f32.vlgmr.msra.gmra.mxu1 %vm938_vm2, %v6739_v51  ;;  %v3982_v60 = vpop.permute.xlu1 %3981  ;;  %v3984_v52 = vpop.permute.xlu0 %3983 }
 0xa4a   : > { %6747 = vmatmul.msk.f32.vlgmr.msra.gmra.mxu2 %vm938_vm2, %v6745_v28  ;;  %6749 = vmatmul.msk.f32.vlgmr.msra.gmra.mxu3 %vm938_vm2, %v6745_v28  ;;  %v3985_v57 = vsel %vm9458_vm10, %v3978_v13, %v3982_v60  ;;  %v3987_v12 = vsel %vm9459_vm11, %v3982_v60, %v3978_v13 }
 0xa4b   : > { %v3989_v54 = vmul.f32 %v3985_v57, %v9453_v47  ;;  %v3990_v14 = vmul.f32 %v3987_v12, %v9454_v58 }
 0xa51   : > { %6742 = vmatmul.msk.f32.gmra.mxu0 %vm938_vm2, %v6740_v50  ;;  %6744 = vmatmul.msk.f32.gmra.mxu1 %vm938_vm2, %v6740_v50  ;;  %v3980_v5 = vpop.permute.xlu1 %3979  ;;  %v3905_v59 = vpop.permute.xlu0 %3904 }
 0xa52   : > { %6748 = vmatmul.msk.f32.gmra.mxu2 %vm938_vm2, %v6746_v25  ;;  %6750 = vmatmul.msk.f32.gmra.mxu3 %vm938_vm2, %v6746_v25  ;;  %v3986_v15 = vsel %vm9460_vm12, %v3980_v5, %v3984_v52  ;;  %v3988_v33 = vsel %vm9461_vm8, %v3984_v52, %v3980_v5  ;;  %v3911_v40 = vsel %vm1434_vm7, %v3905_v59, %v3909_v19 }
 0xa53   : > { %v3991_v39 = vmul.f32 %v3986_v15, %v9453_v47  ;;  %v3992_v7 = vmul.f32 %v3988_v33, %v9454_v58  ;;  %v3913_v42 = vsel %vm1434_vm7, %v3909_v19, %v3905_v59  ;;  %v3916_v41 = vmul.f32 %v3911_v40, %v7526_v30 }
 0xa54   : > { %v3917_v46 = vmul.f32 %v3913_v42, %v7528_v31 }
 0xa55   : > { %3941 = vmatpush.msrb.mxu0 %v3916_v41  ;;  %4016 = vmatpush.msrb.mxu2 %v3991_v39 }
 0xa56   : > { %3964 = vmatpush.msrb.mxu1 %v3917_v46  ;;  %4039 = vmatpush.msrb.mxu3 %v3992_v7 }
 0xa57   : > { %4017 = vmatpush.msrb.mxu2 %v3989_v54 }
 0xa58   : > { %4040 = vmatpush.msrb.mxu3 %v3990_v14 }
 0xa59   : > { %v3903_v18 = vpop.permute.xlu1 %3902  ;;  %v3907_v17 = vpop.permute.xlu0 %3906 }
 0xa5a   : > { %v3910_v16 = vsel %vm1434_vm7, %v3903_v18, %v3907_v17  ;;  %v3912_v55 = vsel %vm1434_vm7, %v3907_v17, %v3903_v18  ;;  %6759 = vmatmul.msk.f32.vlgmr.msrb.gmra.mxu2 %vm938_vm2, %v6757_v62  ;;  %6761 = vmatmul.msk.f32.vlgmr.msrb.gmra.mxu3 %vm938_vm2, %v6757_v62 }
 0xa5b   : > { %v3914_v3 = vmul.f32 %v3910_v16, %v7526_v30  ;;  %v3915_v1 = vmul.f32 %v3912_v55, %v7528_v31 }
 0xa5d   : > { %3942 = vmatpush.msrb.mxu0 %v3914_v3  ;;  %3965 = vmatpush.msrb.mxu1 %v3915_v1 }
 0xa5e   : > { %6753 = vmatmul.msk.f32.vlgmr.msrb.gmra.mxu0 %vm938_vm2, %v6751_v45  ;;  %6755 = vmatmul.msk.f32.vlgmr.msrb.gmra.mxu1 %vm938_vm2, %v6751_v45 }
 0xa62   : > { %6760 = vmatmul.msk.f32.gmra.mxu2 %vm938_vm2, %v6758_v38  ;;  %6762 = vmatmul.msk.f32.gmra.mxu3 %vm938_vm2, %v6758_v38 }
 0xa66   : > { %6754 = vmatmul.msk.f32.gmra.mxu0 %vm938_vm2, %v6752_v53  ;;  %6756 = vmatmul.msk.f32.gmra.mxu1 %vm938_vm2, %v6752_v53 }
 0xa9b   : > { %v3462_v8 = vpop.f32.mrf.mxu2  ;;  %v3485_v20 = vpop.f32.mrf.mxu3 }
 0xaa3   : > { %v3465_v10 = vpop.f32.mrf.mxu2  ;;  %v3488_v29 = vpop.f32.mrf.mxu3 }
 0xaa6   : > { %v3514_v9 = vpop.f32.mrf.mxu0  ;;  %v3537_v43 = vpop.f32.mrf.mxu1 }
 0xaa7   : > { %v3515_v39 = vadd.f32 %v3514_v9, %v3462_v8  ;;  %v3538_v7 = vadd.f32 %v3537_v43, %v3485_v20 }
 0xaad   : > { %v3585_v11 = vpop.f32.mrf.mxu2  ;;  %v3608_v13 = vpop.f32.mrf.mxu3 }
 0xaae   : > { %v3517_v49 = vpop.f32.mrf.mxu0  ;;  %v3540_v23 = vpop.f32.mrf.mxu1  ;;  %v3614_v42 = vadd.f32 %v3585_v11, %v3515_v39  ;;  %v3615_v41 = vadd.f32 %v3608_v13, %v3538_v7 }
 0xaaf   : > { %v3518_v3 = vadd.f32 %v3517_v49, %v3465_v10  ;;  %v3541_v1 = vadd.f32 %v3540_v23, %v3488_v29  ;;  %v4055_v49 = vpop.permute.xlu1 %4054 }
 0xab5   : > { %v3588_v51 = vpop.f32.mrf.mxu2  ;;  %v3611_v28 = vpop.f32.mrf.mxu3 }
 0xab6   : > { %v3660_v60 = vpop.f32.mrf.mxu0  ;;  %v3683_v52 = vpop.f32.mrf.mxu1  ;;  %v3616_v53 = vadd.f32 %v3588_v51, %v3518_v3  ;;  %v3617_v58 = vadd.f32 %v3611_v28, %v3541_v1 }
 0xab7   : > { %v3689_v14 = vadd.f32 %v3660_v60, %v3614_v42  ;;  %v3690_v62 = vadd.f32 %v3683_v52, %v3615_v41  ;;  %v4060_v42 = vpop.permute.xlu2 %4059 }
 0xabd   : > { %v3719_v50 = vpop.f32.mrf.mxu2  ;;  %v3742_v25 = vpop.f32.mrf.mxu3 }
 0xabe   : > { %v3663_v19 = vpop.f32.mrf.mxu0  ;;  %v3686_v57 = vpop.f32.mrf.mxu1  ;;  %v3748_v16 = vadd.f32 %v3719_v50, %v3689_v14  ;;  %v3749_v55 = vadd.f32 %v3742_v25, %v3690_v62 }
 0xabf   : > { %v3691_v9 = vadd.f32 %v3663_v19, %v3616_v53  ;;  %v3692_v43 = vadd.f32 %v3686_v57, %v3617_v58  ;;  %v9462_v53 = vld [vmem:[#allocation6_spill] sm:$0xff] }
 0xac5   : > { %v3722_v12 = vpop.f32.mrf.mxu2  ;;  %v3745_v5 = vpop.f32.mrf.mxu3 }
 0xac6   : > { %v3794_v59 = vpop.f32.mrf.mxu0  ;;  %v3817_v15 = vpop.f32.mrf.mxu1  ;;  %v3750_v39 = vadd.f32 %v3722_v12, %v3691_v9  ;;  %v3751_v7 = vadd.f32 %v3745_v5, %v3692_v43 }
 0xac7   : > { %v3823_v45 = vadd.f32 %v3794_v59, %v3748_v16  ;;  %v3824_v38 = vadd.f32 %v3817_v15, %v3749_v55 }
 0xacd   : > { %v3869_v33 = vpop.f32.mrf.mxu2  ;;  %v3892_v40 = vpop.f32.mrf.mxu3 }
 0xace   : > { %v3797_v46 = vpop.f32.mrf.mxu0  ;;  %v3820_v54 = vpop.f32.mrf.mxu1  ;;  %v3898_v47 = vadd.f32 %v3869_v33, %v3823_v45  ;;  %v3899_v31 = vadd.f32 %v3892_v40, %v3824_v38 }
 0xacf   : > { %v3825_v10 = vadd.f32 %v3797_v46, %v3750_v39  ;;  %v3826_v29 = vadd.f32 %v3820_v54, %v3751_v7 }
 0xad5   : > { %v3872_v18 = vpop.f32.mrf.mxu2  ;;  %v3895_v17 = vpop.f32.mrf.mxu3 }
 0xad6   : > { %v3900_v23 = vadd.f32 %v3872_v18, %v3825_v10  ;;  %v3901_v51 = vadd.f32 %v3895_v17, %v3826_v29 }
 0xadb   : > { %v3944_v8 = vpop.f32.mrf.mxu0  ;;  %v3967_v20 = vpop.f32.mrf.mxu1 }
 0xadc   : > { %v3973_v11 = vadd.f32 %v3944_v8, %v3898_v47  ;;  %v3974_v13 = vadd.f32 %v3967_v20, %v3899_v31 }
 0xadd   : > { %v4019_v60 = vpop.f32.mrf.mxu2  ;;  %v4042_v52 = vpop.f32.mrf.mxu3 }
 0xade   : > { %v4048_v50 = vadd.f32 %v4019_v60, %v3973_v11  ;;  %v4049_v25 = vadd.f32 %v4042_v52, %v3974_v13 }
 0xae0   : > { %v4062_v28 = vadd.f32 %v4055_v49, %v4048_v50  ;;  %v4063_v59 = vadd.f32 %v4055_v49, %v4049_v25 }
 0xae2   : > { %v4066_v12 = vmul.f32 0.2, %v4062_v28  ;;  %v4067_v5 = vmul.f32 0.2, %v4063_v59 }
 0xae3   : > { %v3947_v15 = vpop.f32.mrf.mxu0  ;;  %v3970_v33 = vpop.f32.mrf.mxu1 }
 0xae4   : > { %v3975_v40 = vadd.f32 %v3947_v15, %v3900_v23  ;;  %v3976_v19 = vadd.f32 %v3970_v33, %v3901_v51  ;;  %v4070_v62 = vmax.f32 %v4062_v28, %v4066_v12  ;;  %v4071_v18 = vmax.f32 %v4063_v59, %v4067_v5  ;;  %v6773_v28 = vld [vmem:[%s9351_s12 + $0x20] sm:$0xff]  ;;  %v6774_v59 = vld [vmem:[%s9351_s12 + $0x28] sm:$0xff]  ;;  %v6775_v15 = vld [vmem:[%s9351_s12 + $0x30] sm:$0xff] }
 0xae5   : > { %v4022_v58 = vpop.f32.mrf.mxu2  ;;  %v4045_v47 = vpop.f32.mrf.mxu3 }
 0xae6   : > { %v4050_v31 = vadd.f32 %v4022_v58, %v3975_v40  ;;  %v4051_v57 = vadd.f32 %v4045_v47, %v3976_v19  ;;  %v8545_v1 = vadd.f32 %v4070_v62, %v7995_v63  ;;  %v8548_v45 = vadd.f32 %v4071_v18, %v7997_v61 }
 0xae8   : > { %v4064_v41 = vadd.f32 %v4060_v42, %v4050_v31  ;;  %v4065_v14 = vadd.f32 %v4060_v42, %v4051_v57  ;;  %v8566_v63 = vmul.f32 %v8545_v1, %v9445_v48  ;;  %v8570_v61 = vmul.f32 %v8548_v45, %v9462_v53  ;;  %v6776_v42 = vld [vmem:[%s9351_s12 + $0x38] sm:$0xff] }
 0xaea   : > { %v4068_v46 = vmul.f32 0.2, %v4064_v41  ;;  %v4069_v54 = vmul.f32 0.2, %v4065_v14 }
 0xaec   : > { %v4072_v17 = vmax.f32 %v4064_v41, %v4068_v46  ;;  %v4073_v16 = vmax.f32 %v4065_v14, %v4069_v54 }
 0xaee   : > { %v8539_v55 = vadd.f32 %v4072_v17, %v8005_v44  ;;  %v8542_v3 = vadd.f32 %v4073_v16, %v8007_v56  ;;  %v4086_v56 = vpop.permute.xlu0 %4085 }
 0xaf0   : > { %4145 = vmatpush.msra.mxu2 %v8539_v55  ;;  %4165 = vmatpush.msra.mxu3 %v8542_v3  ;;  %v8554_v38 = vmul.f32 %v8539_v55, %v9445_v48  ;;  %v8558_v44 = vmul.f32 %v8542_v3, %v9462_v53 }
 0xaf2   : > { %4103 = vmatpush.msra.mxu0 %v8554_v38  ;;  %4123 = vmatpush.msra.mxu1 %v8558_v44 }
 0xaf3   : > { %4146 = vmatpush.msra.mxu2 %v8545_v1  ;;  %4166 = vmatpush.msra.mxu3 %v8548_v45 }
 0xaf4   : > { %6766 = vmatmul.msk.f32.vlgmr.msra.gmra.mxu2 %vm938_vm2, %v8476_v32  ;;  %6767 = vmatmul.msk.f32.vlgmr.msra.gmra.mxu3 %vm938_vm2, %v8476_v32  ;;  %v6768_v32 = vld [vmem:[%s9350_s11 + $0x4] sm:$0xf] }
 0xaf5   : > { %4104 = vmatpush.msra.mxu0 %v8566_v63  ;;  %4124 = vmatpush.msra.mxu1 %v8570_v61 }
 0xaf6   : > { %6764 = vmatmul.msk.f32.vlgmr.msra.gmra.mxu0 %vm938_vm2, %v4086_v56  ;;  %6765 = vmatmul.msk.f32.vlgmr.msra.gmra.mxu1 %vm938_vm2, %v4086_v56 }
 0xb73   : > { %v4106_v8 = vpop.f32.mrf.mxu0  ;;  %v4126_v20 = vpop.f32.mrf.mxu1 }
 0xb77   : > { %v4148_v9 = vpop.f32.mrf.mxu2  ;;  %v4168_v43 = vpop.f32.mrf.mxu3 }
 0xb78   : > { %v4149_v11 = vadd.f32 %v4148_v9, %v4106_v8  ;;  %v4169_v13 = vadd.f32 %v4168_v43, %v4126_v20  ;;  %v6770_v8 = vld [vmem:[%s9352_s13 + $0x28] sm:$0xff] }
 0xb7a   : > { %v4171_v60 = vsel %vm9463_vm0, %v4149_v11, 0.0  ;;  %v4172_v52 = vsel %vm9464_vm9, %v4169_v13, 0.0 }
 0xb7b   : > { %v4173_v39 = vadd.f32 %v4172_v52, %v4171_v60  ;;  %v6769_v52 = vld [vmem:[%s9352_s13 + $0x20] sm:$0xff] }
 0xb7d   : > { %4174 = vadd.xlane.f32.xlu2 %v4173_v39 }
 0xbf0   : > { %v4175_v7 = vpop.xlane.xlu2 %4174 }
 0xbf1   : > { %v4176_v50 = vmul.f32 0.00390625, %v4175_v7 }
 0xbf3   : > { %v4179_v25 = vadd.f32 %v6768_v32, %v4176_v50 }
 0xbf5   : > { %v4180_v10 = vmax.f32 %v4179_v25, 0.0 }
 0xbf7   : > { %v4229_v29 = vperm.slane %v4180_v10, 2  ;;  %v4200_v49 = vperm.slane %v4180_v10, 1  ;;  %v4258_v23 = vperm.slane %v4180_v10, 3  ;;  %v4191_v16 = vperm.slane %v4180_v10, 0 }
 0xbf9   : > { %4231 = vrot.lane.b32.xlu0 %v4229_v29, %s9465_s3  ;;  %4202 = vrot.lane.b32.xlu1 %v4200_v49, %s9466_s2  ;;  %v4193_v56 = vmul.f32 %v6774_v59, %v4191_v16  ;;  %v4192_v13 = vmul.f32 %v6773_v28, %v4191_v16 }
 0xbfb   : > { %v4197_v43 = vadd.f32 %v6770_v8, %v4193_v56  ;;  %v4196_v50 = vadd.f32 %v6769_v52, %v4192_v13 }
 0xc01   : > { %4260 = vrot.lane.b32.xlu1 %v4258_v23, %s9467_s30  ;;  %v4195_v23 = vmul.f32 %v6776_v42, %v4191_v16 }
 0xc6b   : > { %v4203_v51 = vpop.permute.xlu1 %4202  ;;  %v4232_v58 = vpop.permute.xlu0 %4231 }
 0xc6c   : > { %v4205_v33 = vmul.f32 %v6773_v28, %v4203_v51  ;;  %v4206_v40 = vmul.f32 %v6774_v59, %v4203_v51  ;;  %v4207_v19 = vmul.f32 %v6775_v15, %v4203_v51  ;;  %v4235_v47 = vmul.f32 %v6774_v59, %v4232_v58 }
 0xc6d   : > { %v4234_v31 = vmul.f32 %v6773_v28, %v4232_v58  ;;  %v4208_v5 = vmul.f32 %v6776_v42, %v4203_v51  ;;  %v4237_v14 = vmul.f32 %v6776_v42, %v4232_v58  ;;  %v4236_v46 = vmul.f32 %v6775_v15, %v4232_v58 }
 0xc6e   : > { %4217 = vrot.lane.b32.xlu2 %v4207_v19, %s9457_s4  ;;  %4215 = vrot.lane.b32.xlu0 %v4206_v40, %s9457_s4 }
 0xc6f   : > { %4213 = vrot.lane.b32.xlu1 %v4205_v33, %s9457_s4 }
 0xc73   : > { %v4261_v57 = vpop.permute.xlu1 %4260 }
 0xc74   : > { %v4264_v12 = vmul.f32 %v6774_v59, %v4261_v57  ;;  %v4263_v41 = vmul.f32 %v6773_v28, %v4261_v57  ;;  %v4266_v54 = vmul.f32 %v6776_v42, %v4261_v57  ;;  %v4265_v62 = vmul.f32 %v6775_v15, %v4261_v57  ;;  %v6772_v28 = vld [vmem:[%s9352_s13 + $0x38] sm:$0xff] }
 0xc75   : > { %v4199_v19 = vadd.f32 %v6772_v28, %v4195_v23 }
 0xc76   : > { %4244 = vrot.lane.b32.xlu0 %v4235_v47, %s9468_s20 }
 0xc77   : > { %4242 = vrot.lane.b32.xlu1 %v4234_v31, %s9468_s20 }
 0xc7e   : > { %4273 = vrot.lane.b32.xlu0 %v4264_v12, %s9469_s21  ;;  %v4194_v12 = vmul.f32 %v6775_v15, %v4191_v16 }
 0xc7f   : > { %4219 = vrot.lane.b32.xlu1 %v4208_v5, %s9457_s4  ;;  %v6771_v5 = vld [vmem:[%s9352_s13 + $0x30] sm:$0xff] }
 0xc86   : > { %4271 = vrot.lane.b32.xlu0 %v4263_v41, %s9469_s21 }
 0xc87   : > { %4248 = vrot.lane.b32.xlu1 %v4237_v14, %s9468_s20 }
 0xc8e   : > { %4246 = vrot.lane.b32.xlu0 %v4236_v46, %s9468_s20 }
 0xc8f   : > { %4277 = vrot.lane.b32.xlu1 %v4266_v54, %s9469_s21 }
 0xc96   : > { %4275 = vrot.lane.b32.xlu0 %v4265_v62, %s9469_s21  ;;  %v4198_v62 = vadd.f32 %v6771_v5, %v4194_v12 }
 0xcc8   : > { %v4218_v46 = vpop.permute.xlu2 %4217 }
 0xcc9   : > { %v4227_v56 = vadd.f32 %v4218_v46, %v4198_v62 }
 0xce0   : > { %v4216_v18 = vpop.permute.xlu0 %4215 }
 0xce1   : > { %v4214_v17 = vpop.permute.xlu1 %4213  ;;  %v4226_v11 = vadd.f32 %v4216_v18, %v4197_v43 }
 0xce2   : > { %v4225_v10 = vadd.f32 %v4214_v17, %v4196_v50 }
 0xce8   : > { %v4245_v20 = vpop.permute.xlu0 %4244 }
 0xce9   : > { %v4243_v9 = vpop.permute.xlu1 %4242  ;;  %v4255_v60 = vadd.f32 %v4245_v20, %v4226_v11 }
 0xcea   : > { %v4254_v49 = vadd.f32 %v4243_v9, %v4225_v10 }
 0xcf0   : > { %v4274_v39 = vpop.permute.xlu0 %4273 }
 0xcf1   : > { %v4284_v32 = vadd.f32 %v4274_v39, %v4255_v60  ;;  %v4220_v7 = vpop.permute.xlu1 %4219 }
 0xcf2   : > { %v4228_v57 = vadd.f32 %v4220_v7, %v4199_v19 }
 0xcf3   : > { %v4288_v25 = vsub.f32 0.0, %v4284_v32 }
 0xcf5   : > { %v4293_v29 = vmul.f32 1.442695, %v4288_v25 }
 0xcf7   : > { %6990 = vpow2.f32 %v4293_v29 }
 0xcf8   : > { %v4272_v51 = vpop.permute.xlu0 %4271 }
 0xcf9   : > { %v4283_v59 = vadd.f32 %v4272_v51, %v4254_v49  ;;  %v4249_v33 = vpop.permute.xlu1 %4248 }
 0xcfa   : > { %v4257_v42 = vadd.f32 %v4249_v33, %v4228_v57 }
 0xcfb   : > { %v4287_v40 = vsub.f32 0.0, %v4283_v59 }
 0xcfd   : > { %v6991_v58 = vpop.eup %6990  ;;  %v4291_v47 = vmul.f32 1.442695, %v4287_v40 }
 0xcfe   : > { %v4300_v31 = vadd.f32 1.0, %v6991_v58 }
 0xcff   : > { %6992 = vpow2.f32 %v4291_v47 }
 0xd00   : > { %6994 = vrcp.f32 %v4300_v31  ;;  %v4247_v41 = vpop.permute.xlu0 %4246  ;;  %v4329_v60 = vand.u32 2147483648, %v4300_v31  ;;  %v4327_v32 = vand.u32 2147483647, %v4300_v31  ;;  %vm4323_vm10 = vweird.f32 %v4300_v31 }
 0xd01   : > { %v4278_v14 = vpop.permute.xlu1 %4277  ;;  %v4256_v43 = vadd.f32 %v4247_v41, %v4227_v56 }
 0xd02   : > { %v4286_v54 = vadd.f32 %v4278_v14, %v4257_v42  ;;  %v4330_v10 = vor.u32 1.1754944e-38, %v4329_v60  ;;  %vm4328_vm12 = vcmp.eq.f32.partialorder %v4327_v32, 8.507059e+37 }
 0xd04   : > { %v4290_v18 = vsub.f32 0.0, %v4286_v54 }
 0xd05   : > { %v6993_v17 = vpop.eup %6992 }
 0xd06   : > { %v6995_v8 = vpop.eup %6994  ;;  %v4299_v20 = vadd.f32 1.0, %v6993_v17  ;;  %v4297_v9 = vmul.f32 1.442695, %v4290_v18  ;;  %v6777_v17 = vld [vmem:[%s9353_s14 + $0x10] sm:$0xff] }
 0xd07   : > { %v4319_v15 = vmul.f32 %v6995_v8, %v4300_v31  ;;  %vm4324_vm14 = vweird.f32 %v6995_v8 }
 0xd08   : > { %6996 = vrcp.f32 %v4299_v20  ;;  %v4276_v16 = vpop.permute.xlu0 %4275  ;;  %vm4325_vm11 = vmor %vm4323_vm10, %vm4324_vm14  ;;  %v4314_v33 = vand.u32 2147483648, %v4299_v20  ;;  %v4312_v19 = vand.u32 2147483647, %v4299_v20  ;;  %vm4308_vm0 = vweird.f32 %v4299_v20 }
 0xd09   : > { %6998 = vpow2.f32 %v4297_v9  ;;  %v4285_v11 = vadd.f32 %v4276_v16, %v4256_v43  ;;  %v4320_v13 = vsub.f32 1.0, %v4319_v15 }
 0xd0a   : > { %v4315_v57 = vor.u32 1.1754944e-38, %v4314_v33  ;;  %vm4313_vm14 = vcmp.eq.f32.partialorder %v4312_v19, 8.507059e+37 }
 0xd0b   : > { %v4289_v52 = vsub.f32 0.0, %v4285_v11  ;;  %v4321_v39 = vmul.f32 %v6995_v8, %v4320_v13 }
 0xd0d   : > { %v4295_v7 = vmul.f32 1.442695, %v4289_v52  ;;  %v4322_v50 = vadd.f32 %v6995_v8, %v4321_v39  ;;  %v6787_v39 = vld [vmem:[%s9354_s15 + $0x10] sm:$0xff] }
 0xd0e   : > { %v6997_v25 = vpop.eup %6996 }
 0xd0f   : > { %v6999_v29 = vpop.eup %6998  ;;  %7000 = vpow2.f32 %v4295_v7  ;;  %v4326_v49 = vsel %vm4325_vm11, %v6995_v8, %v4322_v50  ;;  %v4304_v23 = vmul.f32 %v6997_v25, %v4299_v20  ;;  %vm4309_vm8 = vweird.f32 %v6997_v25  ;;  %v6778_v50 = vld [vmem:[%s9353_s14 + $0x18] sm:$0xff] }
 0xd10   : > { %v4302_v51 = vadd.f32 1.0, %v6999_v29  ;;  %v4331_v28 = vsel %vm4328_vm12, %v4330_v10, %v4326_v49  ;;  %vm4310_vm9 = vmor %vm4308_vm0, %vm4309_vm8 }
 0xd11   : > { %4370 = vperm.xlu1 %6960, %v4331_v28   ;;  %v4305_v59 = vsub.f32 1.0, %v4304_v23 }
 0xd12   : > { %7002 = vrcp.f32 %v4302_v51  ;;  %v4359_v46 = vand.u32 2147483648, %v4302_v51  ;;  %v4357_v62 = vand.u32 2147483647, %v4302_v51  ;;  %vm4353_vm11 = vweird.f32 %v4302_v51 }
 0xd13   : > { %v4306_v40 = vmul.f32 %v6997_v25, %v4305_v59 }
 0xd14   : > { %v4360_v20 = vor.u32 1.1754944e-38, %v4359_v46  ;;  %vm4358_vm8 = vcmp.eq.f32.partialorder %v4357_v62, 8.507059e+37 }
 0xd15   : > { %v7001_v58 = vpop.eup %7000  ;;  %v4307_v47 = vadd.f32 %v6997_v25, %v4306_v40 }
 0xd16   : > { %v4301_v31 = vadd.f32 1.0, %v7001_v58 }
 0xd17   : > { %v4311_v12 = vsel %vm4310_vm9, %v6997_v25, %v4307_v47  ;;  %v6788_v25 = vld [vmem:[%s9354_s15 + $0x18] sm:$0xff] }
 0xd18   : > { %v7003_v5 = vpop.eup %7002  ;;  %7004 = vrcp.f32 %v4301_v31  ;;  %v4316_v42 = vsel %vm4313_vm14, %v4315_v57, %v4311_v12  ;;  %v4344_v16 = vand.u32 2147483648, %v4301_v31  ;;  %v4342_v13 = vand.u32 2147483647, %v4301_v31 }
 0xd19   : > { %4365 = vperm.xlu0 %6961, %v4316_v42   ;;  %v4349_v41 = vmul.f32 %v7003_v5, %v4302_v51  ;;  %vm4354_vm10 = vweird.f32 %v7003_v5  ;;  %vm4338_vm9 = vweird.f32 %v4301_v31 }
 0xd1a   : > { %vm4355_vm12 = vmor %vm4353_vm11, %vm4354_vm10  ;;  %v4345_v52 = vor.u32 1.1754944e-38, %v4344_v16  ;;  %vm4343_vm10 = vcmp.eq.f32.partialorder %v4342_v13, 8.507059e+37  ;;  %vm9471_vm11 = vcmp.lt.s32.totalorder %v7335_v24, 111  ;;  %v6896_v24 = vld [vmem:[%s9347_s8 + $0x1a8] sm:$0xff] }
 0xd1b   : > { %v4350_v14 = vsub.f32 1.0, %v4349_v41 }
 0xd1d   : > { %v4351_v54 = vmul.f32 %v7003_v5, %v4350_v14 }
 0xd1e   : > { %v7005_v18 = vpop.eup %7004 }
 0xd1f   : > { %v4352_v56 = vadd.f32 %v7003_v5, %v4351_v54  ;;  %v4334_v8 = vmul.f32 %v7005_v18, %v4301_v31  ;;  %vm4339_vm0 = vweird.f32 %v7005_v18 }
 0xd20   : > { %vm4340_vm14 = vmor %vm4338_vm9, %vm4339_vm0 }
 0xd21   : > { %v4356_v9 = vsel %vm4355_vm12, %v7003_v5, %v4352_v56  ;;  %4396 = vrot.lane.b32.xlu0 %v6777_v17, %s9444_s27  ;;  %v4335_v43 = vsub.f32 1.0, %v4334_v8  ;;  %v6790_v56 = vld [vmem:[%s9346_s7 + $0x28] sm:$0xff]  ;;  %v6789_v8 = vld [vmem:[%s9346_s7 + $0x20] sm:$0xff]  ;;  %vm9472_vm12 = vmmov %vm9471_vm11 }
 0xd22   : > { %v4361_v15 = vsel %vm4358_vm8, %v4360_v20, %v4356_v9  ;;  %vm9475_vm8 = vmmov %vm9471_vm11 }
 0xd23   : > { %4384 = vperm.xlu2 %6959, %v4361_v15   ;;  %v4336_v11 = vmul.f32 %v7005_v18, %v4335_v43  ;;  %vm9476_vm0 = vmmov %vm9475_vm8 }
 0xd25   : > { %v4337_v60 = vadd.f32 %v7005_v18, %v4336_v11 }
 0xd27   : > { %v4341_v32 = vsel %vm4340_vm14, %v7005_v18, %v4337_v60 }
 0xd28   : > { %v4346_v7 = vsel %vm4343_vm10, %v4345_v52, %v4341_v32 }
 0xd29   : > { %4379 = vperm.xlu1 %6960, %v4346_v7   ;;  %4505 = vperm.xlu0 %6961, %v6787_v39  }
 0xd2b   : > { %4398 = vrot.lane.b32.xlu2 %v6778_v50, %s9444_s27 }
 0xd31   : > { %4510 = vperm.xlu1 %6960, %v6788_v25  }
 0xd7d   : > { %v4385_v10 = vpop.permute.xlu2 %4384 }
 0xd7e   : > { %v4389_v29 = vmul.f32 %v4385_v10, %v8554_v38  ;;  %v4390_v49 = vmul.f32 %v4385_v10, %v8558_v44 }
 0xd80   : > { %4418 = vmatpush.msrb.mxu0 %v4389_v29  ;;  %4441 = vmatpush.msrb.mxu1 %v4390_v49  ;;  %v6793_v49 = vld [vmem:[%s9345_s6 + $0x130] sm:$0xff] }
 0xd83   : > { %v4371_v23 = vpop.permute.xlu1 %4370 }
 0xd84   : > { %v4375_v51 = vmul.f32 %v4371_v23, %v8539_v55  ;;  %v4376_v28 = vmul.f32 %v4371_v23, %v8542_v3 }
 0xd86   : > { %4468 = vmatpush.msrb.mxu2 %v4375_v51  ;;  %4491 = vmatpush.msrb.mxu3 %v4376_v28 }
 0xd8b   : > { %v4366_v59 = vpop.permute.xlu0 %4365 }
 0xd8c   : > { %v4373_v33 = vmul.f32 %v4366_v59, %v8545_v1  ;;  %v4374_v40 = vmul.f32 %v4366_v59, %v8548_v45  ;;  %v4399_v1 = vpop.permute.xlu2 %4398 }
 0xd8e   : > { %4469 = vmatpush.msrb.mxu2 %v4373_v33  ;;  %4492 = vmatpush.msrb.mxu3 %v4374_v40 }
 0xd8f   : > { %6783 = vmatmul.msk.f32.vlgmr.msrb.gmra.mxu2 %vm938_vm2, %v6777_v17  ;;  %6785 = vmatmul.msk.f32.vlgmr.msrb.gmra.mxu3 %vm938_vm2, %v6777_v17 }
 0xd93   : > { %v4397_v44 = vpop.permute.xlu0 %4396 }
 0xd97   : > { %6784 = vmatmul.msk.f32.gmra.mxu2 %vm938_vm2, %v6778_v50  ;;  %6786 = vmatmul.msk.f32.gmra.mxu3 %vm938_vm2, %v6778_v50 }
 0xd9b   : > { %v4380_v55 = vpop.permute.xlu1 %4379  ;;  %v4506_v57 = vpop.permute.xlu0 %4505 }
 0xd9c   : > { %v4387_v3 = vmul.f32 %v4380_v55, %v8566_v63  ;;  %v4388_v38 = vmul.f32 %v4380_v55, %v8570_v61 }
 0xd9e   : > { %4419 = vmatpush.msrb.mxu0 %v4387_v3  ;;  %4442 = vmatpush.msrb.mxu1 %v4388_v38 }
 0xd9f   : > { %6779 = vmatmul.msk.f32.vlgmr.msrb.gmra.mxu0 %vm938_vm2, %v4397_v44  ;;  %6781 = vmatmul.msk.f32.vlgmr.msrb.gmra.mxu1 %vm938_vm2, %v4397_v44 }
 0xda3   : > { %v4511_v62 = vpop.permute.xlu1 %4510 }
 0xda7   : > { %6780 = vmatmul.msk.f32.gmra.mxu0 %vm938_vm2, %v4399_v1  ;;  %6782 = vmatmul.msk.f32.gmra.mxu1 %vm938_vm2, %v4399_v1 }
 0xe12   : > { %v4471_v45 = vpop.f32.mrf.mxu2  ;;  %v4494_v19 = vpop.f32.mrf.mxu3 }
 0xe1a   : > { %v4474_v5 = vpop.f32.mrf.mxu2  ;;  %v4497_v42 = vpop.f32.mrf.mxu3 }
 0xe1c   : > { %v4421_v58 = vpop.f32.mrf.mxu0  ;;  %v4444_v47 = vpop.f32.mrf.mxu1 }
 0xe1d   : > { %v4472_v31 = vadd.f32 %v4471_v45, %v4421_v58  ;;  %v4495_v63 = vadd.f32 %v4494_v19, %v4444_v47  ;;  %v6794_v45 = vld [vmem:[%s9345_s6 + $0x138] sm:$0xff]  ;;  %v6791_v19 = vld [vmem:[%s9345_s6 + $0x120] sm:$0xff] }
 0xe1f   : > { %v8654_v61 = vadd.f32 %v4506_v57, %v4472_v31  ;;  %v8656_v12 = vadd.f32 %v4506_v57, %v4495_v63 }
 0xe21   : > { %4524 = vrot.lane.b32.xlu1 %v8656_v12, %s9447_s0  ;;  %4543 = vrot.lane.b32.xlu2 %v8656_v12, %s9448_s28 }
 0xe22   : > { %4539 = vrot.lane.b32.xlu0 %v8654_v61, %s9448_s28 }
 0xe24   : > { %v4424_v41 = vpop.f32.mrf.mxu0  ;;  %v4447_v14 = vpop.f32.mrf.mxu1 }
 0xe25   : > { %v4475_v46 = vadd.f32 %v4474_v5, %v4424_v41  ;;  %v4498_v54 = vadd.f32 %v4497_v42, %v4447_v14 }
 0xe27   : > { %v8664_v18 = vadd.f32 %v4511_v62, %v4475_v46  ;;  %v8666_v17 = vadd.f32 %v4511_v62, %v4498_v54  ;;  %v6803_v62 = vld [vmem:[%s9345_s6 + $0x140] sm:$0xff] }
 0xe29   : > { %4545 = vrot.lane.b32.xlu1 %v8666_v17, %s9448_s28  ;;  %4541 = vrot.lane.b32.xlu2 %v8664_v18, %s9448_s28 }
 0xe2a   : > { %4666 = vrot.lane.b32.xlu0 %v8656_v12, %s9449_s1 }
 0xe31   : > { %4522 = vrot.lane.b32.xlu1 %v8664_v18, %s9447_s0  ;;  %4520 = vrot.lane.b32.xlu2 %v8654_v61, %s9447_s0 }
 0xe32   : > { %4526 = vrot.lane.b32.xlu0 %v8666_v17, %s9447_s0 }
 0xe39   : > { %4662 = vrot.lane.b32.xlu1 %v8654_v61, %s9449_s1  ;;  %4668 = vrot.lane.b32.xlu2 %v8666_v17, %s9449_s1 }
 0xe3a   : > { %4664 = vrot.lane.b32.xlu0 %v8664_v18, %s9449_s1 }
 0xe41   : > { %4743 = vrot.lane.b32.xlu1 %v8666_v17, %s9466_s2  ;;  %4739 = vrot.lane.b32.xlu2 %v8664_v18, %s9466_s2 }
 0xe42   : > { %4737 = vrot.lane.b32.xlu0 %v8654_v61, %s9466_s2 }
 0xe49   : > { %4875 = vrot.lane.b32.xlu1 %v8656_v12, %s9457_s4  ;;  %4741 = vrot.lane.b32.xlu2 %v8656_v12, %s9466_s2 }
 0xe4a   : > { %4950 = vrot.lane.b32.xlu0 %v8656_v12, %s9450_s22 }
 0xe51   : > { %4873 = vrot.lane.b32.xlu1 %v8664_v18, %s9457_s4  ;;  %4871 = vrot.lane.b32.xlu2 %v8654_v61, %s9457_s4 }
 0xe52   : > { %4877 = vrot.lane.b32.xlu0 %v8666_v17, %s9457_s4 }
 0xe59   : > { %4946 = vrot.lane.b32.xlu1 %v8654_v61, %s9450_s22  ;;  %4952 = vrot.lane.b32.xlu2 %v8666_v17, %s9450_s22 }
 0xe5a   : > { %4948 = vrot.lane.b32.xlu0 %v8664_v18, %s9450_s22 }
 0xe61   : > { %5027 = vrot.lane.b32.xlu1 %v8666_v17, %s9444_s27  ;;  %5023 = vrot.lane.b32.xlu2 %v8664_v18, %s9444_s27 }
 0xe62   : > { %5021 = vrot.lane.b32.xlu0 %v8654_v61, %s9444_s27 }
 0xe69   : > { %5098 = vrot.lane.b32.xlu1 %v8664_v18, %s9443_s26  ;;  %5025 = vrot.lane.b32.xlu2 %v8656_v12, %s9444_s27 }
 0xe6a   : > { %5102 = vrot.lane.b32.xlu0 %v8666_v17, %s9443_s26 }
 0xe71   : > { %5100 = vrot.lane.b32.xlu1 %v8656_v12, %s9443_s26  ;;  %5096 = vrot.lane.b32.xlu2 %v8654_v61, %s9443_s26 }
 0xe72   : > { %5178 = vperm.xlu0 %6961, %v6790_v56   ;;  %v6792_v56 = vld [vmem:[%s9345_s6 + $0x128] sm:$0xff] }
 0xe79   : > { %5173 = vperm.xlu2 %6959, %v6789_v8  }
 0xe7b   : > { %v4544_v20 = vpop.permute.xlu2 %4543 }
 0xe83   : > { %v4542_v9 = vpop.permute.xlu2 %4541 }
 0xe8b   : > { %v4521_v43 = vpop.permute.xlu2 %4520 }
 0xe93   : > { %v4525_v15 = vpop.permute.xlu1 %4524  ;;  %v4669_v11 = vpop.permute.xlu2 %4668 }
 0xe94   : > { %v4540_v16 = vpop.permute.xlu0 %4539  ;;  %v4528_v59 = vsel %vm897_vm1, %v4521_v43, %v4525_v15  ;;  %v4530_v33 = vsel %vm897_vm1, %v4525_v15, %v4521_v43 }
 0xe95   : > { %v4547_v60 = vsel %vm921_vm15, %v4540_v16, %v4544_v20  ;;  %v4549_v52 = vsel %vm921_vm15, %v4544_v20, %v4540_v16  ;;  %v4532_v44 = vmul.f32 %v4530_v33, %v7355_v36  ;;  %v4533_v1 = vmul.f32 %v4528_v59, %v7357_v37 }
 0xe96   : > { %v4551_v10 = vmul.f32 %v4549_v52, %v7341_v26  ;;  %v4552_v29 = vmul.f32 %v4547_v60, %v7343_v27 }
 0xe9b   : > { %v4546_v13 = vpop.permute.xlu1 %4545  ;;  %v4740_v23 = vpop.permute.xlu2 %4739 }
 0xe9c   : > { %v4548_v39 = vsel %vm921_vm15, %v4542_v9, %v4546_v13  ;;  %v4550_v32 = vsel %vm921_vm15, %v4546_v13, %v4542_v9  ;;  %v4667_v7 = vpop.permute.xlu0 %4666 }
 0xe9d   : > { %v4553_v50 = vmul.f32 %v4550_v32, %v7341_v26  ;;  %v4554_v25 = vmul.f32 %v4548_v39, %v7343_v27  ;;  %v6804_v32 = vld [vmem:[%s9345_s6 + $0x148] sm:$0xff] }
 0xe9f   : > { %4578 = vmatpush.msra.mxu0 %v4553_v50  ;;  %4601 = vmatpush.msra.mxu1 %v4554_v25 }
 0xea1   : > { %4579 = vmatpush.msra.mxu0 %v4551_v10  ;;  %4602 = vmatpush.msra.mxu1 %v4552_v29  ;;  %v6815_v29 = vld [vmem:[%s9345_s6 + $0x160] sm:$0xff] }
 0xea2   : > { %6795 = vmatmul.msk.f32.vlgmr.msra.gmra.mxu0 %vm938_vm2, %v6793_v49  ;;  %6797 = vmatmul.msk.f32.vlgmr.msra.gmra.mxu1 %vm938_vm2, %v6793_v49  ;;  %v6810_v49 = vld [vmem:[%s9345_s6 + $0x158] sm:$0xff] }
 0xea3   : > { %v4523_v51 = vpop.permute.xlu1 %4522  ;;  %v4742_v47 = vpop.permute.xlu2 %4741 }
 0xea4   : > { %v4527_v28 = vpop.permute.xlu0 %4526 }
 0xea5   : > { %v4529_v40 = vsel %vm897_vm1, %v4523_v51, %v4527_v28  ;;  %v4531_v55 = vsel %vm897_vm1, %v4527_v28, %v4523_v51 }
 0xea6   : > { %v4534_v3 = vmul.f32 %v4531_v55, %v7355_v36  ;;  %v4535_v38 = vmul.f32 %v4529_v40, %v7357_v37 }
 0xea8   : > { %4630 = vmatpush.msra.mxu2 %v4534_v3  ;;  %4653 = vmatpush.msra.mxu3 %v4535_v38 }
 0xeaa   : > { %4631 = vmatpush.msra.mxu2 %v4532_v44  ;;  %4654 = vmatpush.msra.mxu3 %v4533_v1  ;;  %v6816_v1 = vld [vmem:[%s9345_s6 + $0x168] sm:$0xff] }
 0xeab   : > { %6796 = vmatmul.msk.f32.gmra.mxu0 %vm938_vm2, %v6794_v45  ;;  %6798 = vmatmul.msk.f32.gmra.mxu1 %vm938_vm2, %v6794_v45  ;;  %v4663_v58 = vpop.permute.xlu1 %4662  ;;  %v4872_v13 = vpop.permute.xlu2 %4871  ;;  %v6821_v45 = vld [vmem:[%s9345_s6 + $0x170] sm:$0xff] }
 0xeac   : > { %6799 = vmatmul.msk.f32.vlgmr.msra.gmra.mxu2 %vm938_vm2, %v6791_v19  ;;  %6801 = vmatmul.msk.f32.vlgmr.msra.gmra.mxu3 %vm938_vm2, %v6791_v19  ;;  %v4665_v31 = vpop.permute.xlu0 %4664  ;;  %v4670_v63 = vsel %vm1051_vm3, %v4663_v58, %v4667_v7  ;;  %v4672_v57 = vsel %vm1051_vm3, %v4667_v7, %v4663_v58  ;;  %v6809_v7 = vld [vmem:[%s9345_s6 + $0x150] sm:$0xff] }
 0xead   : > { %v4671_v5 = vsel %vm1051_vm3, %v4665_v31, %v4669_v11  ;;  %v4673_v42 = vsel %vm1051_vm3, %v4669_v11, %v4665_v31  ;;  %v4674_v46 = vmul.f32 %v4672_v57, %v7395_v0  ;;  %v4675_v54 = vmul.f32 %v4670_v63, %v7397_v4 }
 0xeae   : > { %v4676_v41 = vmul.f32 %v4673_v42, %v7395_v0  ;;  %v4677_v14 = vmul.f32 %v4671_v5, %v7397_v4 }
 0xeb0   : > { %4701 = vmatpush.msrb.mxu0 %v4676_v41  ;;  %4724 = vmatpush.msrb.mxu1 %v4677_v14 }
 0xeb2   : > { %4702 = vmatpush.msrb.mxu0 %v4674_v46  ;;  %4725 = vmatpush.msrb.mxu1 %v4675_v54  ;;  %v6827_v54 = vld [vmem:[%s9345_s6 + $0x180] sm:$0xff] }
 0xeb3   : > { %6805 = vmatmul.msk.f32.vlgmr.msrb.gmra.mxu0 %vm938_vm2, %v6803_v62  ;;  %6807 = vmatmul.msk.f32.vlgmr.msrb.gmra.mxu1 %vm938_vm2, %v6803_v62  ;;  %v4744_v8 = vpop.permute.xlu1 %4743  ;;  %v4953_v10 = vpop.permute.xlu2 %4952  ;;  %v6822_v62 = vld [vmem:[%s9345_s6 + $0x178] sm:$0xff] }
 0xeb4   : > { %6800 = vmatmul.msk.f32.gmra.mxu2 %vm938_vm2, %v6792_v56  ;;  %6802 = vmatmul.msk.f32.gmra.mxu3 %vm938_vm2, %v6792_v56  ;;  %v4746_v20 = vsel %vm1132_vm4, %v4740_v23, %v4744_v8  ;;  %v4748_v9 = vsel %vm1132_vm4, %v4744_v8, %v4740_v23  ;;  %v4738_v43 = vpop.permute.xlu0 %4737 }
 0xeb5   : > { %4835 = vmatpush.msra.mxu0 %v8664_v18  ;;  %4858 = vmatpush.msra.mxu1 %v8666_v17  ;;  %v4751_v15 = vmul.f32 %v4748_v9, %v7424_v21  ;;  %v4752_v16 = vmul.f32 %v4746_v20, %v7426_v22  ;;  %v4745_v11 = vsel %vm1132_vm4, %v4738_v43, %v4742_v47 }
 0xeb6   : > { %v4747_v60 = vsel %vm1132_vm4, %v4742_v47, %v4738_v43  ;;  %v4750_v39 = vmul.f32 %v4745_v11, %v7426_v22 }
 0xeb7   : > { %4836 = vmatpush.msra.mxu0 %v8654_v61  ;;  %4859 = vmatpush.msra.mxu1 %v8656_v12  ;;  %v4749_v52 = vmul.f32 %v4747_v60, %v7424_v21 }
 0xeb8   : > { %4776 = vmatpush.msrb.mxu2 %v4751_v15  ;;  %4799 = vmatpush.msrb.mxu3 %v4752_v16  ;;  %v9470_v16 = vld [vmem:[#allocation12_spill] sm:$0xff] }
 0xeba   : > { %4777 = vmatpush.msrb.mxu2 %v4749_v52  ;;  %4800 = vmatpush.msrb.mxu3 %v4750_v39 }
 0xebb   : > { %6806 = vmatmul.msk.f32.gmra.mxu0 %vm938_vm2, %v6804_v32  ;;  %6808 = vmatmul.msk.f32.gmra.mxu1 %vm938_vm2, %v6804_v32  ;;  %v4876_v50 = vpop.permute.xlu1 %4875  ;;  %v5024_v19 = vpop.permute.xlu2 %5023  ;;  %v6828_v32 = vld [vmem:[%s9345_s6 + $0x188] sm:$0xff] }
 0xebc   : > { %6811 = vmatmul.msk.f32.vlgmr.msrb.gmra.mxu2 %vm938_vm2, %v6809_v7  ;;  %6813 = vmatmul.msk.f32.vlgmr.msrb.gmra.mxu3 %vm938_vm2, %v6809_v7  ;;  %v4951_v25 = vpop.permute.xlu0 %4950  ;;  %v4879_v28 = vsel %vm1272_vm5, %v4872_v13, %v4876_v50  ;;  %v4881_v59 = vsel %vm1272_vm5, %v4876_v50, %v4872_v13  ;;  %v6833_v7 = vld [vmem:[%s9345_s6 + $0x190] sm:$0xff] }
 0xebd   : > { %v4883_v38 = vmul.f32 %v4879_v28, %v7447_v34  ;;  %v4884_v44 = vmul.f32 %v4881_v59, %v7449_v35  ;;  %v6834_v59 = vld [vmem:[%s9345_s6 + $0x198] sm:$0xff] }
 0xec3   : > { %6817 = vmatmul.msk.f32.vlgmr.msra.gmra.mxu0 %vm938_vm2, %v6815_v29  ;;  %6819 = vmatmul.msk.f32.vlgmr.msra.gmra.mxu1 %vm938_vm2, %v6815_v29  ;;  %v4874_v23 = vpop.permute.xlu1 %4873  ;;  %v5026_v8 = vpop.permute.xlu2 %5025 }
 0xec4   : > { %6812 = vmatmul.msk.f32.gmra.mxu2 %vm938_vm2, %v6810_v49  ;;  %6814 = vmatmul.msk.f32.gmra.mxu3 %vm938_vm2, %v6810_v49  ;;  %v4878_v51 = vpop.permute.xlu0 %4877  ;;  %v9473_v49 = vld [vmem:[#allocation13_spill] sm:$0xff] }
 0xec5   : > { %v4880_v33 = vsel %vm1272_vm5, %v4874_v23, %v4878_v51  ;;  %v4882_v40 = vsel %vm1272_vm5, %v4878_v51, %v4874_v23  ;;  %v9474_v51 = vld [vmem:[#allocation14_spill] sm:$0xff] }
 0xec6   : > { %v4885_v55 = vmul.f32 %v4880_v33, %v7447_v34  ;;  %v4886_v3 = vmul.f32 %v4882_v40, %v7449_v35 }
 0xec8   : > { %4910 = vmatpush.msra.mxu2 %v4885_v55  ;;  %4933 = vmatpush.msra.mxu3 %v4886_v3 }
 0xeca   : > { %4911 = vmatpush.msra.mxu2 %v4883_v38  ;;  %4934 = vmatpush.msra.mxu3 %v4884_v44 }
 0xecb   : > { %6818 = vmatmul.msk.f32.gmra.mxu0 %vm938_vm2, %v6816_v1  ;;  %6820 = vmatmul.msk.f32.gmra.mxu1 %vm938_vm2, %v6816_v1  ;;  %v4947_v58 = vpop.permute.xlu1 %4946  ;;  %v5097_v33 = vpop.permute.xlu2 %5096  ;;  %v6839_v1 = vld [vmem:[%s9345_s6 + $0x1a0] sm:$0xff] }
 0xecc   : > { %6823 = vmatmul.msk.f32.vlgmr.msra.gmra.mxu2 %vm938_vm2, %v6821_v45  ;;  %6825 = vmatmul.msk.f32.vlgmr.msra.gmra.mxu3 %vm938_vm2, %v6821_v45  ;;  %v4949_v47 = vpop.permute.xlu0 %4948  ;;  %v4954_v31 = vsel %vm1353_vm6, %v4947_v58, %v4951_v25  ;;  %v4956_v63 = vsel %vm1353_vm6, %v4951_v25, %v4947_v58  ;;  %v6840_v45 = vld [vmem:[%s9345_s6 + $0x1a8] sm:$0xff] }
 0xecd   : > { %v4955_v57 = vsel %vm1353_vm6, %v4949_v47, %v4953_v10  ;;  %v4957_v5 = vsel %vm1353_vm6, %v4953_v10, %v4949_v47  ;;  %v4958_v14 = vmul.f32 %v4954_v31, %v7493_v2  ;;  %v4959_v46 = vmul.f32 %v4956_v63, %v7495_v6 }
 0xece   : > { %v4960_v42 = vmul.f32 %v4955_v57, %v7493_v2  ;;  %v4961_v41 = vmul.f32 %v4957_v5, %v7495_v6 }
 0xed0   : > { %4985 = vmatpush.msrb.mxu0 %v4960_v42  ;;  %5008 = vmatpush.msrb.mxu1 %v4961_v41 }
 0xed2   : > { %4986 = vmatpush.msrb.mxu0 %v4958_v14  ;;  %5009 = vmatpush.msrb.mxu1 %v4959_v46 }
 0xed3   : > { %6829 = vmatmul.msk.f32.vlgmr.msrb.gmra.mxu0 %vm938_vm2, %v6827_v54  ;;  %6831 = vmatmul.msk.f32.vlgmr.msrb.gmra.mxu1 %vm938_vm2, %v6827_v54  ;;  %v5028_v56 = vpop.permute.xlu1 %5027 }
 0xed4   : > { %6824 = vmatmul.msk.f32.gmra.mxu2 %vm938_vm2, %v6822_v62  ;;  %6826 = vmatmul.msk.f32.gmra.mxu3 %vm938_vm2, %v6822_v62  ;;  %v5030_v20 = vsel %vm1434_vm7, %v5024_v19, %v5028_v56  ;;  %v5032_v9 = vsel %vm1434_vm7, %v5028_v56, %v5024_v19  ;;  %v5022_v43 = vpop.permute.xlu0 %5021 }
 0xed5   : > { %v5035_v15 = vmul.f32 %v5030_v20, %v7526_v30  ;;  %v5036_v11 = vmul.f32 %v5032_v9, %v9470_v16  ;;  %v5029_v13 = vsel %vm1434_vm7, %v5022_v43, %v5026_v8  ;;  %v5031_v60 = vsel %vm1434_vm7, %v5026_v8, %v5022_v43 }
 0xed6   : > { %v5033_v52 = vmul.f32 %v5029_v13, %v7526_v30  ;;  %v5034_v39 = vmul.f32 %v5031_v60, %v9470_v16 }
 0xed7   : > { %5060 = vmatpush.msrb.mxu2 %v5035_v15  ;;  %5083 = vmatpush.msrb.mxu3 %v5036_v11 }
 0xed9   : > { %5061 = vmatpush.msrb.mxu2 %v5033_v52  ;;  %5084 = vmatpush.msrb.mxu3 %v5034_v39 }
 0xedb   : > { %6830 = vmatmul.msk.f32.gmra.mxu0 %vm938_vm2, %v6828_v32  ;;  %6832 = vmatmul.msk.f32.gmra.mxu1 %vm938_vm2, %v6828_v32  ;;  %v5099_v50 = vpop.permute.xlu1 %5098 }
 0xedc   : > { %6835 = vmatmul.msk.f32.vlgmr.msrb.gmra.mxu2 %vm938_vm2, %v6833_v7  ;;  %6837 = vmatmul.msk.f32.vlgmr.msrb.gmra.mxu3 %vm938_vm2, %v6833_v7  ;;  %v5103_v25 = vpop.permute.xlu0 %5102 }
 0xedd   : > { %v5105_v10 = vsel %vm9471_vm11, %v5099_v50, %v5103_v25  ;;  %v5107_v29 = vsel %vm9472_vm12, %v5103_v25, %v5099_v50 }
 0xede   : > { %v5110_v23 = vmul.f32 %v5105_v10, %v9473_v49  ;;  %v5111_v28 = vmul.f32 %v5107_v29, %v9474_v51 }
 0xee0   : > { %5135 = vmatpush.msra.mxu0 %v5110_v23  ;;  %5158 = vmatpush.msra.mxu1 %v5111_v28 }
 0xee3   : > { %v5101_v40 = vpop.permute.xlu1 %5100 }
 0xee4   : > { %6836 = vmatmul.msk.f32.gmra.mxu2 %vm938_vm2, %v6834_v59  ;;  %6838 = vmatmul.msk.f32.gmra.mxu3 %vm938_vm2, %v6834_v59  ;;  %v5104_v55 = vsel %vm9475_vm8, %v5097_v33, %v5101_v40  ;;  %v5106_v3 = vsel %vm9476_vm0, %v5101_v40, %v5097_v33 }
 0xee5   : > { %v5108_v38 = vmul.f32 %v5104_v55, %v9473_v49  ;;  %v5109_v44 = vmul.f32 %v5106_v3, %v9474_v51 }
 0xee7   : > { %5136 = vmatpush.msra.mxu0 %v5108_v38  ;;  %5159 = vmatpush.msra.mxu1 %v5109_v44 }
 0xee8   : > { %6841 = vmatmul.msk.f32.vlgmr.msra.gmra.mxu0 %vm938_vm2, %v6839_v1  ;;  %6843 = vmatmul.msk.f32.vlgmr.msra.gmra.mxu1 %vm938_vm2, %v6839_v1 }
 0xef0   : > { %6842 = vmatmul.msk.f32.gmra.mxu0 %vm938_vm2, %v6840_v45  ;;  %6844 = vmatmul.msk.f32.gmra.mxu1 %vm938_vm2, %v6840_v45 }
 0xf1f   : > { %v4581_v19 = vpop.f32.mrf.mxu0  ;;  %v4604_v58 = vpop.f32.mrf.mxu1 }
 0xf28   : > { %v4584_v47 = vpop.f32.mrf.mxu0  ;;  %v4607_v31 = vpop.f32.mrf.mxu1 }
 0xf2f   : > { %v4633_v63 = vpop.f32.mrf.mxu2  ;;  %v4656_v57 = vpop.f32.mrf.mxu3 }
 0xf30   : > { %v4704_v5 = vpop.f32.mrf.mxu0  ;;  %v4727_v42 = vpop.f32.mrf.mxu1  ;;  %v4634_v52 = vadd.f32 %v4633_v63, %v4581_v19  ;;  %v4657_v39 = vadd.f32 %v4656_v57, %v4604_v58 }
 0xf32   : > { %v4733_v50 = vadd.f32 %v4704_v5, %v4634_v52  ;;  %v4734_v25 = vadd.f32 %v4727_v42, %v4657_v39 }
 0xf37   : > { %v4636_v41 = vpop.f32.mrf.mxu2  ;;  %v4659_v14 = vpop.f32.mrf.mxu3 }
 0xf38   : > { %v4707_v46 = vpop.f32.mrf.mxu0  ;;  %v4730_v54 = vpop.f32.mrf.mxu1  ;;  %v4637_v59 = vadd.f32 %v4636_v41, %v4584_v47  ;;  %v4660_v33 = vadd.f32 %v4659_v14, %v4607_v31 }
 0xf3a   : > { %v4735_v44 = vadd.f32 %v4707_v46, %v4637_v59  ;;  %v4736_v1 = vadd.f32 %v4730_v54, %v4660_v33  ;;  %v5174_v46 = vpop.permute.xlu2 %5173  ;;  %v5179_v59 = vpop.permute.xlu0 %5178 }
 0xf3f   : > { %v4779_v62 = vpop.f32.mrf.mxu2  ;;  %v4802_v56 = vpop.f32.mrf.mxu3 }
 0xf40   : > { %v4838_v8 = vpop.f32.mrf.mxu0  ;;  %v4861_v20 = vpop.f32.mrf.mxu1  ;;  %v4808_v23 = vadd.f32 %v4779_v62, %v4733_v50  ;;  %v4809_v28 = vadd.f32 %v4802_v56, %v4734_v25 }
 0xf42   : > { %v4867_v40 = vadd.f32 %v4838_v8, %v4808_v23  ;;  %v4868_v55 = vadd.f32 %v4861_v20, %v4809_v28 }
 0xf47   : > { %v4782_v9 = vpop.f32.mrf.mxu2  ;;  %v4805_v43 = vpop.f32.mrf.mxu3 }
 0xf48   : > { %v4841_v15 = vpop.f32.mrf.mxu0  ;;  %v4864_v11 = vpop.f32.mrf.mxu1  ;;  %v4810_v63 = vadd.f32 %v4782_v9, %v4735_v44  ;;  %v4811_v57 = vadd.f32 %v4805_v43, %v4736_v1  ;;  %v6846_v1 = vld [vmem:[%s9348_s9 + $0x28] sm:$0xff] }
 0xf4a   : > { %v4869_v52 = vadd.f32 %v4841_v15, %v4810_v63  ;;  %v4870_v39 = vadd.f32 %v4864_v11, %v4811_v57 }
 0xf4f   : > { %v4913_v13 = vpop.f32.mrf.mxu2  ;;  %v4936_v60 = vpop.f32.mrf.mxu3 }
 0xf50   : > { %v4988_v32 = vpop.f32.mrf.mxu0  ;;  %v5011_v7 = vpop.f32.mrf.mxu1  ;;  %v4942_v45 = vadd.f32 %v4913_v13, %v4867_v40  ;;  %v4943_v53 = vadd.f32 %v4936_v60, %v4868_v55 }
 0xf52   : > { %v5017_v5 = vadd.f32 %v4988_v32, %v4942_v45  ;;  %v5018_v42 = vadd.f32 %v5011_v7, %v4943_v53  ;;  %v6845_v45 = vld [vmem:[%s9348_s9 + $0x20] sm:$0xff] }
 0xf57   : > { %v4916_v10 = vpop.f32.mrf.mxu2  ;;  %v4939_v29 = vpop.f32.mrf.mxu3 }
 0xf58   : > { %v4991_v3 = vpop.f32.mrf.mxu0  ;;  %v5014_v38 = vpop.f32.mrf.mxu1  ;;  %v4944_v41 = vadd.f32 %v4916_v10, %v4869_v52  ;;  %v4945_v14 = vadd.f32 %v4939_v29, %v4870_v39 }
 0xf5a   : > { %v5019_v25 = vadd.f32 %v4991_v3, %v4944_v41  ;;  %v5020_v9 = vadd.f32 %v5014_v38, %v4945_v14 }
 0xf5f   : > { %v5063_v19 = vpop.f32.mrf.mxu2  ;;  %v5086_v58 = vpop.f32.mrf.mxu3 }
 0xf60   : > { %v5092_v62 = vadd.f32 %v5063_v19, %v5017_v5  ;;  %v5093_v56 = vadd.f32 %v5086_v58, %v5018_v42 }
 0xf65   : > { %v5138_v47 = vpop.f32.mrf.mxu0  ;;  %v5161_v31 = vpop.f32.mrf.mxu1 }
 0xf66   : > { %v5167_v8 = vadd.f32 %v5138_v47, %v5092_v62  ;;  %v5168_v20 = vadd.f32 %v5161_v31, %v5093_v56 }
 0xf67   : > { %v5066_v60 = vpop.f32.mrf.mxu2  ;;  %v5089_v50 = vpop.f32.mrf.mxu3 }
 0xf68   : > { %v5181_v54 = vadd.f32 %v5174_v46, %v5167_v8  ;;  %v5182_v13 = vadd.f32 %v5174_v46, %v5168_v20  ;;  %v5094_v53 = vadd.f32 %v5066_v60, %v5019_v25  ;;  %v5095_v15 = vadd.f32 %v5089_v50, %v5020_v9  ;;  %v6849_v46 = vld [vmem:[%s9347_s8 + $0x130] sm:$0xff] }
 0xf6a   : > { %v5185_v43 = vmul.f32 0.2, %v5181_v54  ;;  %v5186_v32 = vmul.f32 0.2, %v5182_v13 }
 0xf6c   : > { %v8922_v11 = vmax.f32 %v5181_v54, %v5185_v43  ;;  %v8924_v7 = vmax.f32 %v5182_v13, %v5186_v32 }
 0xf6d   : > { %v5141_v23 = vpop.f32.mrf.mxu0  ;;  %v5164_v10 = vpop.f32.mrf.mxu1 }
 0xf6e   : > { %v5169_v29 = vadd.f32 %v5141_v23, %v5094_v53  ;;  %v5170_v28 = vadd.f32 %v5164_v10, %v5095_v15  ;;  %5342 = vrot.lane.b32.xlu0 %v8924_v7, %s9449_s1  ;;  %5219 = vrot.lane.b32.xlu1 %v8924_v7, %s9448_s28 }
 0xf6f   : > { %5215 = vrot.lane.b32.xlu2 %v8922_v11, %s9448_s28 }
 0xf70   : > { %v5183_v33 = vadd.f32 %v5179_v59, %v5169_v29  ;;  %v5184_v40 = vadd.f32 %v5179_v59, %v5170_v28 }
 0xf72   : > { %v5187_v55 = vmul.f32 0.2, %v5183_v33  ;;  %v5188_v3 = vmul.f32 0.2, %v5184_v40 }
 0xf74   : > { %v8932_v38 = vmax.f32 %v5183_v33, %v5187_v55  ;;  %v8934_v44 = vmax.f32 %v5184_v40, %v5188_v3 }
 0xf76   : > { %5221 = vrot.lane.b32.xlu0 %v8934_v44, %s9448_s28  ;;  %5217 = vrot.lane.b32.xlu1 %v8932_v38, %s9448_s28 }
 0xf77   : > { %5200 = vrot.lane.b32.xlu2 %v8924_v7, %s9447_s0 }
 0xf7e   : > { %5196 = vrot.lane.b32.xlu0 %v8922_v11, %s9447_s0  ;;  %5338 = vrot.lane.b32.xlu1 %v8922_v11, %s9449_s1 }
 0xf7f   : > { %5344 = vrot.lane.b32.xlu2 %v8934_v44, %s9449_s1 }
 0xf86   : > { %5340 = vrot.lane.b32.xlu0 %v8932_v38, %s9449_s1  ;;  %5202 = vrot.lane.b32.xlu1 %v8934_v44, %s9447_s0 }
 0xf87   : > { %5198 = vrot.lane.b32.xlu2 %v8932_v38, %s9447_s0 }
 0xf8e   : > { %5626 = vrot.lane.b32.xlu0 %v8924_v7, %s9450_s22  ;;  %5417 = vrot.lane.b32.xlu1 %v8924_v7, %s9466_s2 }
 0xf8f   : > { %5413 = vrot.lane.b32.xlu2 %v8922_v11, %s9466_s2 }
 0xf96   : > { %5419 = vrot.lane.b32.xlu0 %v8934_v44, %s9466_s2  ;;  %5415 = vrot.lane.b32.xlu1 %v8932_v38, %s9466_s2 }
 0xf97   : > { %5551 = vrot.lane.b32.xlu2 %v8924_v7, %s9457_s4 }
 0xf9e   : > { %5547 = vrot.lane.b32.xlu0 %v8922_v11, %s9457_s4  ;;  %5622 = vrot.lane.b32.xlu1 %v8922_v11, %s9450_s22 }
 0xf9f   : > { %5628 = vrot.lane.b32.xlu2 %v8934_v44, %s9450_s22 }
 0xfa6   : > { %5624 = vrot.lane.b32.xlu0 %v8932_v38, %s9450_s22  ;;  %5553 = vrot.lane.b32.xlu1 %v8934_v44, %s9457_s4 }
 0xfa7   : > { %5549 = vrot.lane.b32.xlu2 %v8932_v38, %s9457_s4 }
 0xfae   : > { %5778 = vrot.lane.b32.xlu0 %v8934_v44, %s9443_s26  ;;  %5776 = vrot.lane.b32.xlu1 %v8924_v7, %s9443_s26 }
 0xfaf   : > { %5772 = vrot.lane.b32.xlu2 %v8922_v11, %s9443_s26 }
 0xfb6   : > { %5699 = vrot.lane.b32.xlu0 %v8932_v38, %s9444_s27  ;;  %5774 = vrot.lane.b32.xlu1 %v8932_v38, %s9443_s26 }
 0xfb7   : > { %5703 = vrot.lane.b32.xlu2 %v8934_v44, %s9444_s27 }
 0xfbe   : > { %5701 = vrot.lane.b32.xlu0 %v8924_v7, %s9444_s27  ;;  %5697 = vrot.lane.b32.xlu1 %v8922_v11, %s9444_s27 }
 0xfbf   : > { %5854 = vperm.xlu2 %6959, %v6846_v1  }
 0xfc6   : > { %5849 = vperm.xlu1 %6960, %v6845_v45   ;;  %v6847_v45 = vld [vmem:[%s9347_s8 + $0x120] sm:$0xff] }
 0xfc9   : > { %v5216_v19 = vpop.permute.xlu2 %5215 }
 0xfd1   : > { %v5201_v58 = vpop.permute.xlu2 %5200 }
 0xfd9   : > { %v5345_v5 = vpop.permute.xlu2 %5344 }
 0xfe0   : > { %v5220_v63 = vpop.permute.xlu1 %5219  ;;  %v5343_v57 = vpop.permute.xlu0 %5342 }
 0xfe1   : > { %v5223_v39 = vsel %vm921_vm15, %v5216_v19, %v5220_v63  ;;  %v5225_v62 = vsel %vm921_vm15, %v5220_v63, %v5216_v19  ;;  %v5199_v14 = vpop.permute.xlu2 %5198 }
 0xfe2   : > { %v5227_v8 = vmul.f32 %v5225_v62, %v7341_v26  ;;  %v5228_v20 = vmul.f32 %v5223_v39, %v7343_v27 }
 0xfe8   : > { %v5218_v42 = vpop.permute.xlu1 %5217  ;;  %v5222_v52 = vpop.permute.xlu0 %5221 }
 0xfe9   : > { %v5224_v56 = vsel %vm921_vm15, %v5218_v42, %v5222_v52  ;;  %v5226_v47 = vsel %vm921_vm15, %v5222_v52, %v5218_v42  ;;  %v5414_v60 = vpop.permute.xlu2 %5413  ;;  %vm9477_vm15 = vmmov %vm9476_vm0 }
 0xfea   : > { %v5229_v31 = vmul.f32 %v5226_v47, %v7341_v26  ;;  %v5230_v41 = vmul.f32 %v5224_v56, %v7343_v27  ;;  %v6850_v26 = vld [vmem:[%s9347_s8 + $0x138] sm:$0xff]  ;;  %v6865_v56 = vld [vmem:[%s9347_s8 + $0x150] sm:$0xff]  ;;  %v6871_v47 = vld [vmem:[%s9347_s8 + $0x160] sm:$0xff] }
 0xfec   : > { %5254 = vmatpush.msra.mxu2 %v5229_v31  ;;  %5277 = vmatpush.msra.mxu3 %v5230_v41  ;;  %v6866_v41 = vld [vmem:[%s9347_s8 + $0x158] sm:$0xff] }
 0xfee   : > { %5255 = vmatpush.msra.mxu2 %v5227_v8  ;;  %5278 = vmatpush.msra.mxu3 %v5228_v20 }
 0xfef   : > { %6851 = vmatmul.msk.f32.vlgmr.msra.gmra.mxu2 %vm938_vm2, %v6849_v46  ;;  %6853 = vmatmul.msk.f32.vlgmr.msra.gmra.mxu3 %vm938_vm2, %v6849_v46 }
 0xff0   : > { %v5339_v54 = vpop.permute.xlu1 %5338  ;;  %v5197_v13 = vpop.permute.xlu0 %5196 }
 0xff1   : > { %v5346_v27 = vsel %vm1051_vm3, %v5339_v54, %v5343_v57  ;;  %v5348_v50 = vsel %vm1051_vm3, %v5343_v57, %v5339_v54  ;;  %v5204_v25 = vsel %vm897_vm1, %v5197_v13, %v5201_v58  ;;  %v5206_v9 = vsel %vm897_vm1, %v5201_v58, %v5197_v13  ;;  %v5552_v19 = vpop.permute.xlu2 %5551  ;;  %v6860_v58 = vld [vmem:[%s9347_s8 + $0x148] sm:$0xff] }
 0xff2   : > { %v5208_v40 = vmul.f32 %v5206_v9, %v7355_v36  ;;  %v5209_v55 = vmul.f32 %v5204_v25, %v7357_v37  ;;  %v5350_v3 = vmul.f32 %v5348_v50, %v7395_v0  ;;  %v5351_v1 = vmul.f32 %v5346_v27, %v7397_v4 }
 0xff7   : > { %6852 = vmatmul.msk.f32.gmra.mxu2 %vm938_vm2, %v6850_v26  ;;  %6854 = vmatmul.msk.f32.gmra.mxu3 %vm938_vm2, %v6850_v26 }
 0xff8   : > { %v5203_v43 = vpop.permute.xlu1 %5202  ;;  %v5341_v32 = vpop.permute.xlu0 %5340 }
 0xff9   : > { %v5205_v53 = vsel %vm897_vm1, %v5199_v14, %v5203_v43  ;;  %v5207_v15 = vsel %vm897_vm1, %v5203_v43, %v5199_v14  ;;  %v5347_v23 = vsel %vm1051_vm3, %v5341_v32, %v5345_v5  ;;  %v5349_v10 = vsel %vm1051_vm3, %v5345_v5, %v5341_v32  ;;  %v6872_v14 = vld [vmem:[%s9347_s8 + $0x168] sm:$0xff]  ;;  %vm9478_vm1 = vmmov %vm9476_vm0 }
 0xffa   : > { %v5210_v29 = vmul.f32 %v5207_v15, %v7355_v36  ;;  %v5211_v28 = vmul.f32 %v5205_v53, %v7357_v37  ;;  %v5352_v59 = vmul.f32 %v5349_v10, %v7395_v0  ;;  %v5353_v33 = vmul.f32 %v5347_v23, %v7397_v4  ;;  %v6859_v36 = vld [vmem:[%s9347_s8 + $0x140] sm:$0xff]  ;;  %v6848_v4 = vld [vmem:[%s9347_s8 + $0x128] sm:$0xff]  ;;  %vm9479_vm3 = vmmov %vm9476_vm0 }
 0xffc   : > { %5306 = vmatpush.msrb.mxu0 %v5210_v29  ;;  %5329 = vmatpush.msrb.mxu1 %v5211_v28 }
 0xffd   : > { %5377 = vmatpush.msrb.mxu2 %v5352_v59  ;;  %5400 = vmatpush.msrb.mxu3 %v5353_v33  ;;  %v6877_v59 = vld [vmem:[%s9347_s8 + $0x170] sm:$0xff]  ;;  %v6878_v33 = vld [vmem:[%s9347_s8 + $0x178] sm:$0xff] }
 0xffe   : > { %5307 = vmatpush.msrb.mxu0 %v5208_v40  ;;  %5330 = vmatpush.msrb.mxu1 %v5209_v55  ;;  %v6884_v40 = vld [vmem:[%s9347_s8 + $0x188] sm:$0xff] }
 0xfff   : > { %5378 = vmatpush.msrb.mxu2 %v5350_v3  ;;  %5401 = vmatpush.msrb.mxu3 %v5351_v1 }
0x1000   : > { %6855 = vmatmul.msk.f32.vlgmr.msrb.gmra.mxu0 %vm938_vm2, %v6847_v45  ;;  %6857 = vmatmul.msk.f32.vlgmr.msrb.gmra.mxu1 %vm938_vm2, %v6847_v45  ;;  %v5418_v37 = vpop.permute.xlu1 %5417  ;;  %v5627_v0 = vpop.permute.xlu0 %5626 }
0x1001   : > { %6861 = vmatmul.msk.f32.vlgmr.msrb.gmra.mxu2 %vm938_vm2, %v6859_v36  ;;  %6863 = vmatmul.msk.f32.vlgmr.msrb.gmra.mxu3 %vm938_vm2, %v6859_v36  ;;  %v5421_v63 = vsel %vm1132_vm4, %v5414_v60, %v5418_v37 }
0x1002   : > { %5511 = vmatpush.msra.mxu2 %v8932_v38  ;;  %5534 = vmatpush.msra.mxu3 %v8934_v44  ;;  %v5426_v62 = vmul.f32 %v5421_v63, %v7426_v22 }
0x1004   : > { %5512 = vmatpush.msra.mxu2 %v8922_v11  ;;  %5535 = vmatpush.msra.mxu3 %v8924_v7  ;;  %v5629_v11 = vpop.permute.xlu2 %5628  ;;  %v5423_v7 = vsel %vm1132_vm4, %v5418_v37, %v5414_v60 }
0x1005   : > { %v5425_v39 = vmul.f32 %v5423_v7, %v7424_v21 }
0x1008   : > { %6856 = vmatmul.msk.f32.gmra.mxu0 %vm938_vm2, %v6848_v4  ;;  %6858 = vmatmul.msk.f32.gmra.mxu1 %vm938_vm2, %v6848_v4  ;;  %v5416_v38 = vpop.permute.xlu1 %5415  ;;  %v5420_v44 = vpop.permute.xlu0 %5419 }
0x1009   : > { %6862 = vmatmul.msk.f32.gmra.mxu2 %vm938_vm2, %v6860_v58  ;;  %6864 = vmatmul.msk.f32.gmra.mxu3 %vm938_vm2, %v6860_v58  ;;  %v5422_v57 = vsel %vm1132_vm4, %v5416_v38, %v5420_v44  ;;  %v5424_v5 = vsel %vm1132_vm4, %v5420_v44, %v5416_v38  ;;  %vm9480_vm4 = vmmov %vm9476_vm0 }
0x100a   : > { %v5427_v42 = vmul.f32 %v5424_v5, %v7424_v21  ;;  %v5428_v52 = vmul.f32 %v5422_v57, %v7426_v22  ;;  %v6895_v57 = vld [vmem:[%s9347_s8 + $0x1a0] sm:$0xff] }
0x100c   : > { %5452 = vmatpush.msra.mxu0 %v5427_v42  ;;  %5475 = vmatpush.msra.mxu1 %v5428_v52  ;;  %v5550_v22 = vpop.permute.xlu2 %5549 }
0x100e   : > { %5453 = vmatpush.msra.mxu0 %v5425_v39  ;;  %5476 = vmatpush.msra.mxu1 %v5426_v62  ;;  %v6889_v62 = vld [vmem:[%s9347_s8 + $0x190] sm:$0xff] }
0x1010   : > { %6867 = vmatmul.msk.f32.vlgmr.msra.gmra.mxu0 %vm938_vm2, %v6865_v56  ;;  %6869 = vmatmul.msk.f32.vlgmr.msra.gmra.mxu1 %vm938_vm2, %v6865_v56  ;;  %v5623_v31 = vpop.permute.xlu1 %5622  ;;  %v5548_v21 = vpop.permute.xlu0 %5547 }
0x1011   : > { %6873 = vmatmul.msk.f32.vlgmr.msra.gmra.mxu2 %vm938_vm2, %v6871_v47  ;;  %6875 = vmatmul.msk.f32.vlgmr.msra.gmra.mxu3 %vm938_vm2, %v6871_v47  ;;  %v5630_v8 = vsel %vm1353_vm6, %v5623_v31, %v5627_v0  ;;  %v5632_v20 = vsel %vm1353_vm6, %v5627_v0, %v5623_v31  ;;  %v5555_v46 = vsel %vm1272_vm5, %v5548_v21, %v5552_v19 }
0x1012   : > { %v5557_v54 = vsel %vm1272_vm5, %v5552_v19, %v5548_v21  ;;  %v5559_v15 = vmul.f32 %v5555_v46, %v7447_v34  ;;  %v5634_v29 = vmul.f32 %v5630_v8, %v7493_v2  ;;  %v5635_v28 = vmul.f32 %v5632_v20, %v7495_v6 }
0x1013   : > { %v5560_v23 = vmul.f32 %v5557_v54, %v7449_v35 }
0x1014   : > { %v5773_v10 = vpop.permute.xlu2 %5772 }
0x1018   : > { %6868 = vmatmul.msk.f32.gmra.mxu0 %vm938_vm2, %v6866_v41  ;;  %6870 = vmatmul.msk.f32.gmra.mxu1 %vm938_vm2, %v6866_v41  ;;  %v5554_v13 = vpop.permute.xlu1 %5553  ;;  %v5625_v26 = vpop.permute.xlu0 %5624 }
0x1019   : > { %6874 = vmatmul.msk.f32.gmra.mxu2 %vm938_vm2, %v6872_v14  ;;  %6876 = vmatmul.msk.f32.gmra.mxu3 %vm938_vm2, %v6872_v14  ;;  %v5556_v60 = vsel %vm1272_vm5, %v5550_v22, %v5554_v13  ;;  %v5558_v27 = vsel %vm1272_vm5, %v5554_v13, %v5550_v22  ;;  %v5631_v50 = vsel %vm1353_vm6, %v5625_v26, %v5629_v11  ;;  %vm9486_vm5 = vcmask 1043456  }
0x101a   : > { %v5561_v25 = vmul.f32 %v5556_v60, %v7447_v34  ;;  %v5562_v9 = vmul.f32 %v5558_v27, %v7449_v35  ;;  %v5633_v43 = vsel %vm1353_vm6, %v5629_v11, %v5625_v26  ;;  %v5636_v32 = vmul.f32 %v5631_v50, %v7493_v2  ;;  %v6883_v34 = vld [vmem:[%s9347_s8 + $0x180] sm:$0xff]  ;;  %v9135_v35 = vld [vmem:[%s9349_s10 + $0x8] sm:$0xf]  ;;  %vm9487_vm6 = vmmov %vm9486_vm5 }
0x101b   : > { %v5637_v53 = vmul.f32 %v5633_v43, %v7495_v6  ;;  %5884 = vrot.lane.b32.xlu0 %v9135_v35, %s9444_s27 }
0x101c   : > { %5586 = vmatpush.msrb.mxu0 %v5561_v25  ;;  %5609 = vmatpush.msrb.mxu1 %v5562_v9  ;;  %v5704_v55 = vpop.permute.xlu2 %5703 }
0x101d   : > { %5661 = vmatpush.msrb.mxu2 %v5636_v32  ;;  %5684 = vmatpush.msrb.mxu3 %v5637_v53 }
0x101e   : > { %5587 = vmatpush.msrb.mxu0 %v5559_v15  ;;  %5610 = vmatpush.msrb.mxu1 %v5560_v23 }
0x101f   : > { %5662 = vmatpush.msrb.mxu2 %v5634_v29  ;;  %5685 = vmatpush.msrb.mxu3 %v5635_v28 }
0x1020   : > { %6879 = vmatmul.msk.f32.vlgmr.msrb.gmra.mxu0 %vm938_vm2, %v6877_v59  ;;  %6881 = vmatmul.msk.f32.vlgmr.msrb.gmra.mxu1 %vm938_vm2, %v6877_v59  ;;  %v5777_v2 = vpop.permute.xlu1 %5776  ;;  %v5779_v6 = vpop.permute.xlu0 %5778 }
0x1021   : > { %6885 = vmatmul.msk.f32.vlgmr.msrb.gmra.mxu2 %vm938_vm2, %v6883_v34  ;;  %6887 = vmatmul.msk.f32.vlgmr.msrb.gmra.mxu3 %vm938_vm2, %v6883_v34  ;;  %v5780_v3 = vsel %vm9477_vm15, %v5773_v10, %v5777_v2  ;;  %v5782_v1 = vsel %vm9478_vm1, %v5777_v2, %v5773_v10 }
0x1022   : > { %v5784_v11 = vmul.f32 %v5780_v3, %v9473_v49  ;;  %v5785_v7 = vmul.f32 %v5782_v1, %v9474_v51 }
0x1028   : > { %6880 = vmatmul.msk.f32.gmra.mxu0 %vm938_vm2, %v6878_v33  ;;  %6882 = vmatmul.msk.f32.gmra.mxu1 %vm938_vm2, %v6878_v33  ;;  %v5775_v45 = vpop.permute.xlu1 %5774  ;;  %v5700_v36 = vpop.permute.xlu0 %5699 }
0x1029   : > { %6886 = vmatmul.msk.f32.gmra.mxu2 %vm938_vm2, %v6884_v40  ;;  %6888 = vmatmul.msk.f32.gmra.mxu3 %vm938_vm2, %v6884_v40  ;;  %v5781_v19 = vsel %vm9479_vm3, %v5775_v45, %v5779_v6  ;;  %v5783_v37 = vsel %vm9480_vm4, %v5779_v6, %v5775_v45  ;;  %v5706_v0 = vsel %vm1434_vm7, %v5700_v36, %v5704_v55 }
0x102a   : > { %v5786_v4 = vmul.f32 %v5781_v19, %v9473_v49  ;;  %v5787_v58 = vmul.f32 %v5783_v37, %v9474_v51  ;;  %v5708_v63 = vsel %vm1434_vm7, %v5704_v55, %v5700_v36  ;;  %v5711_v38 = vmul.f32 %v5706_v0, %v7526_v30 }
0x102b   : > { %v5712_v44 = vmul.f32 %v5708_v63, %v9470_v16 }
0x102c   : > { %5736 = vmatpush.msra.mxu0 %v5711_v38  ;;  %5811 = vmatpush.msra.mxu2 %v5786_v4 }
0x102d   : > { %5759 = vmatpush.msra.mxu1 %v5712_v44  ;;  %5834 = vmatpush.msra.mxu3 %v5787_v58 }
0x102e   : > { %5812 = vmatpush.msra.mxu2 %v5784_v11 }
0x102f   : > { %5835 = vmatpush.msra.mxu3 %v5785_v7 }
0x1030   : > { %v5698_v5 = vpop.permute.xlu1 %5697  ;;  %v5702_v42 = vpop.permute.xlu0 %5701 }
0x1031   : > { %v5705_v52 = vsel %vm1434_vm7, %v5698_v5, %v5702_v42  ;;  %v5707_v49 = vsel %vm1434_vm7, %v5702_v42, %v5698_v5  ;;  %6897 = vmatmul.msk.f32.vlgmr.msra.gmra.mxu2 %vm938_vm2, %v6895_v57  ;;  %6899 = vmatmul.msk.f32.vlgmr.msra.gmra.mxu3 %vm938_vm2, %v6895_v57 }
0x1032   : > { %v5709_v51 = vmul.f32 %v5705_v52, %v7526_v30  ;;  %v5710_v39 = vmul.f32 %v5707_v49, %v9470_v16  ;;  %v6890_v30 = vld [vmem:[%s9347_s8 + $0x198] sm:$0xff] }
0x1034   : > { %5737 = vmatpush.msra.mxu0 %v5709_v51  ;;  %5760 = vmatpush.msra.mxu1 %v5710_v39 }
0x1035   : > { %6891 = vmatmul.msk.f32.vlgmr.msra.gmra.mxu0 %vm938_vm2, %v6889_v62  ;;  %6893 = vmatmul.msk.f32.vlgmr.msra.gmra.mxu1 %vm938_vm2, %v6889_v62 }
0x1039   : > { %6898 = vmatmul.msk.f32.gmra.mxu2 %vm938_vm2, %v6896_v24  ;;  %6900 = vmatmul.msk.f32.gmra.mxu3 %vm938_vm2, %v6896_v24  ;;  %v5850_v24 = vpop.permute.xlu1 %5849 }
0x103d   : > { %6892 = vmatmul.msk.f32.gmra.mxu0 %vm938_vm2, %v6890_v30  ;;  %6894 = vmatmul.msk.f32.gmra.mxu1 %vm938_vm2, %v6890_v30 }
0x1072   : > { %v5257_v16 = vpop.f32.mrf.mxu2  ;;  %v5280_v56 = vpop.f32.mrf.mxu3 }
0x107a   : > { %v5260_v47 = vpop.f32.mrf.mxu2  ;;  %v5283_v31 = vpop.f32.mrf.mxu3 }
0x107d   : > { %v5309_v21 = vpop.f32.mrf.mxu0  ;;  %v5332_v22 = vpop.f32.mrf.mxu1 }
0x107e   : > { %v5310_v10 = vadd.f32 %v5309_v21, %v5257_v16  ;;  %v5333_v29 = vadd.f32 %v5332_v22, %v5280_v56 }
0x1084   : > { %v5380_v41 = vpop.f32.mrf.mxu2  ;;  %v5403_v14 = vpop.f32.mrf.mxu3 }
0x1085   : > { %v5312_v8 = vpop.f32.mrf.mxu0  ;;  %v5335_v20 = vpop.f32.mrf.mxu1  ;;  %v5409_v28 = vadd.f32 %v5380_v41, %v5310_v10  ;;  %v5410_v59 = vadd.f32 %v5403_v14, %v5333_v29 }
0x1086   : > { %v5313_v45 = vadd.f32 %v5312_v8, %v5260_v47  ;;  %v5336_v36 = vadd.f32 %v5335_v20, %v5283_v31 }
0x108c   : > { %v5383_v46 = vpop.f32.mrf.mxu2  ;;  %v5406_v54 = vpop.f32.mrf.mxu3 }
0x108d   : > { %v5455_v13 = vpop.f32.mrf.mxu0  ;;  %v5478_v26 = vpop.f32.mrf.mxu1  ;;  %v5411_v0 = vadd.f32 %v5383_v46, %v5313_v45  ;;  %v5412_v4 = vadd.f32 %v5406_v54, %v5336_v36 }
0x108e   : > { %v5484_v6 = vadd.f32 %v5455_v13, %v5409_v28  ;;  %v5485_v33 = vadd.f32 %v5478_v26, %v5410_v59  ;;  %v5885_v36 = vpop.permute.xlu0 %5884 }
0x1094   : > { %v5514_v60 = vpop.f32.mrf.mxu2  ;;  %v5537_v27 = vpop.f32.mrf.mxu3 }
0x1095   : > { %v5458_v50 = vpop.f32.mrf.mxu0  ;;  %v5481_v25 = vpop.f32.mrf.mxu1  ;;  %v5543_v3 = vadd.f32 %v5514_v60, %v5484_v6  ;;  %v5544_v1 = vadd.f32 %v5537_v27, %v5485_v33  ;;  %v9483_v33 = vld [vmem:[#allocation10_spill] sm:$0xff] }
0x1096   : > { %v5486_v11 = vadd.f32 %v5458_v50, %v5411_v0  ;;  %v5487_v7 = vadd.f32 %v5481_v25, %v5412_v4  ;;  %v5855_v27 = vpop.permute.xlu2 %5854 }
0x109c   : > { %v5517_v9 = vpop.f32.mrf.mxu2  ;;  %v5540_v43 = vpop.f32.mrf.mxu3 }
0x109d   : > { %v5589_v32 = vpop.f32.mrf.mxu0  ;;  %v5612_v53 = vpop.f32.mrf.mxu1  ;;  %v5545_v49 = vadd.f32 %v5517_v9, %v5486_v11  ;;  %v5546_v51 = vadd.f32 %v5540_v43, %v5487_v7 }
0x109e   : > { %v5618_v19 = vadd.f32 %v5589_v32, %v5543_v3  ;;  %v5619_v37 = vadd.f32 %v5612_v53, %v5544_v1 }
0x10a4   : > { %v5664_v15 = vpop.f32.mrf.mxu2  ;;  %v5687_v23 = vpop.f32.mrf.mxu3 }
0x10a5   : > { %v5592_v34 = vpop.f32.mrf.mxu0  ;;  %v5615_v2 = vpop.f32.mrf.mxu1  ;;  %v5693_v58 = vadd.f32 %v5664_v15, %v5618_v19  ;;  %v5694_v63 = vadd.f32 %v5687_v23, %v5619_v37 }
0x10a6   : > { %v5620_v30 = vadd.f32 %v5592_v34, %v5545_v49  ;;  %v5621_v16 = vadd.f32 %v5615_v2, %v5546_v51  ;;  %v9481_v34 = vld [vmem:[#allocation8_spill] sm:$0xff] }
0x10a7   : > { %v6911_v51 = vld [vmem:[%s9351_s12 + $0x40] sm:$0xff] }
0x10ac   : > { %v5667_v40 = vpop.f32.mrf.mxu2  ;;  %v5690_v55 = vpop.f32.mrf.mxu3 }
0x10ad   : > { %v5695_v31 = vadd.f32 %v5667_v40, %v5620_v30  ;;  %v5696_v21 = vadd.f32 %v5690_v55, %v5621_v16  ;;  %v9484_v40 = vld [vmem:[#allocation11_spill] sm:$0xff]  ;;  %v9485_v55 = vld [vmem:[#allocation6_spill] sm:$0xff] }
0x10ae   : > { %v6914_v30 = vld [vmem:[%s9351_s12 + $0x58] sm:$0xff] }
0x10b2   : > { %v5739_v38 = vpop.f32.mrf.mxu0  ;;  %v5762_v44 = vpop.f32.mrf.mxu1 }
0x10b3   : > { %v5768_v57 = vadd.f32 %v5739_v38, %v5693_v58  ;;  %v5769_v5 = vadd.f32 %v5762_v44, %v5694_v63  ;;  %v6906_v44 = vld [vmem:[%s9350_s11 + $0x8] sm:$0xf] }
0x10b4   : > { %v5814_v42 = vpop.f32.mrf.mxu2  ;;  %v5837_v52 = vpop.f32.mrf.mxu3 }
0x10b5   : > { %v5843_v39 = vadd.f32 %v5814_v42, %v5768_v57  ;;  %v5844_v62 = vadd.f32 %v5837_v52, %v5769_v5 }
0x10b7   : > { %v5857_v56 = vadd.f32 %v5850_v24, %v5843_v39  ;;  %v5858_v47 = vadd.f32 %v5850_v24, %v5844_v62  ;;  %v6912_v39 = vld [vmem:[%s9351_s12 + $0x48] sm:$0xff] }
0x10b9   : > { %v5861_v22 = vmul.f32 0.2, %v5857_v56  ;;  %v5862_v8 = vmul.f32 0.2, %v5858_v47 }
0x10ba   : > { %v5742_v41 = vpop.f32.mrf.mxu0  ;;  %v5765_v14 = vpop.f32.mrf.mxu1 }
0x10bb   : > { %v5770_v20 = vadd.f32 %v5742_v41, %v5695_v31  ;;  %v5771_v46 = vadd.f32 %v5765_v14, %v5696_v21  ;;  %v5865_v50 = vmax.f32 %v5857_v56, %v5861_v22  ;;  %v5866_v25 = vmax.f32 %v5858_v47, %v5862_v8  ;;  %v6913_v8 = vld [vmem:[%s9351_s12 + $0x50] sm:$0xff] }
0x10bc   : > { %v5817_v54 = vpop.f32.mrf.mxu2  ;;  %v5840_v13 = vpop.f32.mrf.mxu3 }
0x10bd   : > { %v5845_v26 = vadd.f32 %v5817_v54, %v5770_v20  ;;  %v5846_v60 = vadd.f32 %v5840_v13, %v5771_v46  ;;  %v9198_v15 = vadd.f32 %v5865_v50, %v8654_v61  ;;  %v9201_v29 = vadd.f32 %v5866_v25, %v8656_v12  ;;  %v9482_v61 = vld [vmem:[#allocation9_spill] sm:$0xff] }
0x10bf   : > { %v5859_v9 = vadd.f32 %v5855_v27, %v5845_v26  ;;  %v5860_v43 = vadd.f32 %v5855_v27, %v5846_v60  ;;  %v5873_v2 = vadd.f32 %v9198_v15, %v9481_v34 }
0x10c1   : > { %v5863_v32 = vmul.f32 0.2, %v5859_v9  ;;  %v5864_v53 = vmul.f32 0.2, %v5860_v43  ;;  %v9234_v1 = vmul.f32 %v5873_v2, %v9445_v48  ;;  %v6907_v2 = vld [vmem:[%s9352_s13 + $0x40] sm:$0xff] }
0x10c3   : > { %v5867_v23 = vmax.f32 %v5859_v9, %v5863_v32  ;;  %v5868_v10 = vmax.f32 %v5860_v43, %v5864_v53  ;;  %v6908_v9 = vld [vmem:[%s9352_s13 + $0x48] sm:$0xff] }
0x10c5   : > { %v9204_v28 = vadd.f32 %v5867_v23, %v8664_v18  ;;  %v9207_v59 = vadd.f32 %v5868_v10, %v8666_v17  ;;  %v5874_v18 = vadd.f32 %v9201_v29, %v9484_v40 }
0x10c7   : > { %5944 = vmatpush.msrb.mxu2 %v9204_v28  ;;  %5964 = vmatpush.msrb.mxu3 %v9207_v59  ;;  %v5875_v6 = vadd.f32 %v9204_v28, %v9482_v61  ;;  %v5876_v12 = vadd.f32 %v9207_v59, %v9483_v33  ;;  %v9237_v45 = vmul.f32 %v5874_v18, %v9485_v55 }
0x10c9   : > { %5945 = vmatpush.msrb.mxu2 %v9198_v15  ;;  %5965 = vmatpush.msrb.mxu3 %v9201_v29  ;;  %v9222_v17 = vmul.f32 %v5875_v6, %v9445_v48  ;;  %v9225_v3 = vmul.f32 %v5876_v12, %v9485_v55 }
0x10ca   : > { %6904 = vmatmul.msk.f32.vlgmr.msrb.gmra.mxu2 %vm938_vm2, %v9135_v35  ;;  %6905 = vmatmul.msk.f32.vlgmr.msrb.gmra.mxu3 %vm938_vm2, %v9135_v35 }
0x10cb   : > { %5902 = vmatpush.msrb.mxu0 %v9222_v17  ;;  %5922 = vmatpush.msrb.mxu1 %v9225_v3 }
0x10cd   : > { %5903 = vmatpush.msrb.mxu0 %v9234_v1  ;;  %5923 = vmatpush.msrb.mxu1 %v9237_v45 }
0x10ce   : > { %6902 = vmatmul.msk.f32.vlgmr.msrb.gmra.mxu0 %vm938_vm2, %v5885_v36  ;;  %6903 = vmatmul.msk.f32.vlgmr.msrb.gmra.mxu1 %vm938_vm2, %v5885_v36 }
0x114b   : > { %v5905_v35 = vpop.f32.mrf.mxu0  ;;  %v5925_v19 = vpop.f32.mrf.mxu1 }
0x114d   : > { %v5947_v37 = vpop.f32.mrf.mxu2  ;;  %v5967_v0 = vpop.f32.mrf.mxu3 }
0x114e   : > { %v5948_v4 = vadd.f32 %v5947_v37, %v5905_v35  ;;  %v5968_v58 = vadd.f32 %v5967_v0, %v5925_v19  ;;  %v6910_v35 = vld [vmem:[%s9352_s13 + $0x58] sm:$0xff] }
0x1150   : > { %v5970_v48 = vsel %vm9486_vm5, %v5948_v4, 0.0  ;;  %v5971_v63 = vsel %vm9487_vm6, %v5968_v58, 0.0 }
0x1151   : > { %v5972_v38 = vadd.f32 %v5971_v63, %v5970_v48 }
0x1153   : > { %5973 = vadd.xlane.f32.xlu2 %v5972_v38 }
0x11c6   : > { %v5974_v11 = vpop.xlane.xlu2 %5973 }
0x11c7   : > { %v5975_v7 = vmul.f32 0.00390625, %v5974_v11 }
0x11c9   : > { %v5978_v57 = vadd.f32 %v6906_v44, %v5975_v7 }
0x11cb   : > { %v5979_v5 = vmax.f32 %v5978_v57, 0.0 }
0x11cd   : > { %v5999_v42 = vperm.slane %v5979_v5, 1  ;;  %v6028_v52 = vperm.slane %v5979_v5, 2  ;;  %v6057_v49 = vperm.slane %v5979_v5, 3  ;;  %v5990_v50 = vperm.slane %v5979_v5, 0 }
0x11cf   : > { %6001 = vrot.lane.b32.xlu1 %v5999_v42, %s9466_s2  ;;  %6030 = vrot.lane.b32.xlu0 %v6028_v52, %s9465_s3  ;;  %v5992_v25 = vmul.f32 %v6912_v39, %v5990_v50  ;;  %v5991_v10 = vmul.f32 %v6911_v51, %v5990_v50  ;;  %v5994_v36 = vmul.f32 %v6914_v30, %v5990_v50  ;;  %v6909_v42 = vld [vmem:[%s9352_s13 + $0x50] sm:$0xff] }
0x11d0   : > { %v5993_v57 = vmul.f32 %v6913_v8, %v5990_v50 }
0x11d1   : > { %v5996_v53 = vadd.f32 %v6908_v9, %v5992_v25  ;;  %v5995_v12 = vadd.f32 %v6907_v2, %v5991_v10  ;;  %v5998_v4 = vadd.f32 %v6910_v35, %v5994_v36 }
0x11d7   : > { %6059 = vrot.lane.b32.xlu1 %v6057_v49, %s9467_s30 }
0x1241   : > { %v6002_v62 = vpop.permute.xlu1 %6001  ;;  %v6031_v24 = vpop.permute.xlu0 %6030 }
0x1242   : > { %v6004_v16 = vmul.f32 %v6911_v51, %v6002_v62  ;;  %v6005_v56 = vmul.f32 %v6912_v39, %v6002_v62  ;;  %v6036_v47 = vmul.f32 %v6914_v30, %v6031_v24  ;;  %v6033_v31 = vmul.f32 %v6911_v51, %v6031_v24 }
0x1243   : > { %v6034_v21 = vmul.f32 %v6912_v39, %v6031_v24  ;;  %v6007_v41 = vmul.f32 %v6914_v30, %v6002_v62  ;;  %v6006_v20 = vmul.f32 %v6913_v8, %v6002_v62  ;;  %v6035_v54 = vmul.f32 %v6913_v8, %v6031_v24 }
0x1244   : > { %6014 = vrot.lane.b32.xlu0 %v6005_v56, %s9457_s4  ;;  %6012 = vrot.lane.b32.xlu1 %v6004_v16, %s9457_s4 }
0x1245   : > { %6047 = vrot.lane.b32.xlu2 %v6036_v47, %s9468_s20 }
0x1249   : > { %v6060_v22 = vpop.permute.xlu1 %6059 }
0x124a   : > { %v6063_v14 = vmul.f32 %v6912_v39, %v6060_v22  ;;  %v6062_v46 = vmul.f32 %v6911_v51, %v6060_v22  ;;  %v6065_v13 = vmul.f32 %v6914_v30, %v6060_v22  ;;  %v6064_v26 = vmul.f32 %v6913_v8, %v6060_v22 }
0x124b   : > { %v5997_v39 = vadd.f32 %v6909_v42, %v5993_v57 }
0x124c   : > { %6043 = vrot.lane.b32.xlu0 %v6034_v21, %s9468_s20  ;;  %6041 = vrot.lane.b32.xlu1 %v6033_v31, %s9468_s20 }
0x1254   : > { %6018 = vrot.lane.b32.xlu1 %v6007_v41, %s9457_s4  ;;  %6072 = vrot.lane.b32.xlu0 %v6063_v14, %s9469_s21 }
0x125c   : > { %6016 = vrot.lane.b32.xlu1 %v6006_v20, %s9457_s4  ;;  %6070 = vrot.lane.b32.xlu0 %v6062_v46, %s9469_s21 }
0x1264   : > { %6076 = vrot.lane.b32.xlu1 %v6065_v13, %s9469_s21  ;;  %6045 = vrot.lane.b32.xlu0 %v6035_v54, %s9468_s20 }
0x126c   : > { %6074 = vrot.lane.b32.xlu0 %v6064_v26, %s9469_s21 }
0x129f   : > { %v6048_v11 = vpop.permute.xlu2 %6047 }
0x12b6   : > { %v6015_v60 = vpop.permute.xlu0 %6014  ;;  %v6013_v27 = vpop.permute.xlu1 %6012 }
0x12b7   : > { %v6025_v23 = vadd.f32 %v6015_v60, %v5996_v53  ;;  %v6024_v18 = vadd.f32 %v6013_v27, %v5995_v12 }
0x12be   : > { %v6044_v43 = vpop.permute.xlu0 %6043  ;;  %v6042_v32 = vpop.permute.xlu1 %6041 }
0x12bf   : > { %v6054_v34 = vadd.f32 %v6044_v43, %v6025_v23  ;;  %v6053_v19 = vadd.f32 %v6042_v32, %v6024_v18 }
0x12c6   : > { %v6073_v61 = vpop.permute.xlu0 %6072  ;;  %v6019_v6 = vpop.permute.xlu1 %6018 }
0x12c7   : > { %v6083_v33 = vadd.f32 %v6073_v61, %v6054_v34  ;;  %v6027_v48 = vadd.f32 %v6019_v6, %v5998_v4 }
0x12c9   : > { %v6087_v40 = vsub.f32 0.0, %v6083_v33  ;;  %v6056_v5 = vadd.f32 %v6048_v11, %v6027_v48  ;;  %v6915_v48 = vld [vmem:[%s9353_s14 + $0x20] sm:$0xff] }
0x12cb   : > { %v6092_v55 = vmul.f32 1.442695, %v6087_v40 }
0x12cd   : > { %7006 = vpow2.f32 %v6092_v55 }
0x12ce   : > { %v6071_v37 = vpop.permute.xlu0 %6070  ;;  %v6017_v0 = vpop.permute.xlu1 %6016 }
0x12cf   : > { %v6082_v58 = vadd.f32 %v6071_v37, %v6053_v19  ;;  %v6026_v30 = vadd.f32 %v6017_v0, %v5997_v39  ;;  %v6926_v39 = vld [vmem:[%s9354_s15 + $0x28] sm:$0xff] }
0x12d1   : > { %v6086_v63 = vsub.f32 0.0, %v6082_v58 }
0x12d3   : > { %v7007_v38 = vpop.eup %7006  ;;  %v6090_v44 = vmul.f32 1.442695, %v6086_v63 }
0x12d4   : > { %v6099_v7 = vadd.f32 1.0, %v7007_v38 }
0x12d5   : > { %7008 = vpow2.f32 %v6090_v44 }
0x12d6   : > { %7010 = vrcp.f32 %v6099_v7  ;;  %v6046_v52 = vpop.permute.xlu0 %6045  ;;  %v6077_v49 = vpop.permute.xlu1 %6076  ;;  %v6128_v8 = vand.u32 2147483648, %v6099_v7  ;;  %v6126_v54 = vand.u32 2147483647, %v6099_v7  ;;  %vm6122_vm9 = vweird.f32 %v6099_v7 }
0x12d7   : > { %v6085_v51 = vadd.f32 %v6077_v49, %v6056_v5  ;;  %v6055_v31 = vadd.f32 %v6046_v52, %v6026_v30  ;;  %v6916_v49 = vld [vmem:[%s9353_s14 + $0x28] sm:$0xff]  ;;  %v6316_v30 = vld [vmem:[%s9355_s16] sm:$0xff] }
0x12d8   : > { %v6129_v25 = vor.u32 1.1754944e-38, %v6128_v8  ;;  %vm6127_vm10 = vcmp.eq.f32.partialorder %v6126_v54, 8.507059e+37 }
0x12d9   : > { %v6089_v62 = vsub.f32 0.0, %v6085_v51 }
0x12db   : > { %v7009_v24 = vpop.eup %7008  ;;  %v6096_v16 = vmul.f32 1.442695, %v6089_v62 }
0x12dc   : > { %v7011_v56 = vpop.eup %7010  ;;  %v6098_v47 = vadd.f32 1.0, %v7009_v24  ;;  %v6925_v24 = vld [vmem:[%s9354_s15 + $0x20] sm:$0xff] }
0x12dd   : > { %7012 = vpow2.f32 %v6096_v16  ;;  %v6118_v21 = vmul.f32 %v7011_v56, %v6099_v7  ;;  %vm6123_vm7 = vweird.f32 %v7011_v56  ;;  %v6346_v16 = vld [vmem:[#allocation2] sm:$0x1] }
0x12de   : > { %7014 = vrcp.f32 %v6098_v47  ;;  %v6075_v22 = vpop.permute.xlu0 %6074  ;;  %vm6124_vm14 = vmor %vm6122_vm9, %vm6123_vm7  ;;  %v6113_v23 = vand.u32 2147483648, %v6098_v47  ;;  %v6111_v34 = vand.u32 2147483647, %v6098_v47  ;;  %vm6107_vm12 = vweird.f32 %v6098_v47 }
0x12df   : > { %v6084_v41 = vadd.f32 %v6075_v22, %v6055_v31  ;;  %v6119_v14 = vsub.f32 1.0, %v6118_v21  ;;  %v9488_v31 = vmov 1  }
0x12e0   : > { %v6114_v12 = vor.u32 1.1754944e-38, %v6113_v23  ;;  %vm6112_vm0 = vcmp.eq.f32.partialorder %v6111_v34, 8.507059e+37 }
0x12e1   : > { %v6088_v20 = vsub.f32 0.0, %v6084_v41  ;;  %v6120_v46 = vmul.f32 %v7011_v56, %v6119_v14 }
0x12e3   : > { %v7013_v13 = vpop.eup %7012  ;;  %v6094_v26 = vmul.f32 1.442695, %v6088_v20  ;;  %v6121_v60 = vadd.f32 %v7011_v56, %v6120_v46 }
0x12e4   : > { %v7015_v27 = vpop.eup %7014  ;;  %v6101_v50 = vadd.f32 1.0, %v7013_v13 }
0x12e5   : > { %7016 = vpow2.f32 %v6094_v26  ;;  %v6125_v9 = vsel %vm6124_vm14, %v7011_v56, %v6121_v60  ;;  %v6103_v43 = vmul.f32 %v7015_v27, %v6098_v47  ;;  %vm6108_vm11 = vweird.f32 %v7015_v27  ;;  %v6317_v56 = vld [vmem:[%s9355_s16 + $0x8] sm:$0xff]  ;;  %v6355_v47 = vld [vmem:[%s9357_s18] sm:$0x1] }
0x12e6   : > { %7018 = vrcp.f32 %v6101_v50  ;;  %v6130_v32 = vsel %vm6127_vm10, %v6129_v25, %v6125_v9  ;;  %vm6109_vm8 = vmor %vm6107_vm12, %vm6108_vm11  ;;  %v6158_v35 = vand.u32 2147483648, %v6101_v50  ;;  %v6156_v37 = vand.u32 2147483647, %v6101_v50 }
0x12e7   : > { %6169 = vperm.xlu1 %6960, %v6130_v32   ;;  %v6104_v53 = vsub.f32 1.0, %v6103_v43  ;;  %vm6152_vm1 = vweird.f32 %v6101_v50 }
0x12e8   : > { %v6159_v58 = vor.u32 1.1754944e-38, %v6158_v35  ;;  %vm6157_vm4 = vcmp.eq.f32.partialorder %v6156_v37, 8.507059e+37 }
0x12e9   : > { %v6105_v10 = vmul.f32 %v7015_v27, %v6104_v53 }
0x12eb   : > { %v7017_v2 = vpop.eup %7016  ;;  %v6106_v61 = vadd.f32 %v7015_v27, %v6105_v10 }
0x12ec   : > { %v7019_v6 = vpop.eup %7018  ;;  %v6100_v33 = vadd.f32 1.0, %v7017_v2 }
0x12ed   : > { %v6110_v40 = vsel %vm6109_vm8, %v7015_v27, %v6106_v61  ;;  %v6148_v18 = vmul.f32 %v7019_v6, %v6101_v50  ;;  %vm6153_vm15 = vweird.f32 %v7019_v6 }
0x12ee   : > { %7020 = vrcp.f32 %v6100_v33  ;;  %v6115_v55 = vsel %vm6112_vm0, %v6114_v12, %v6110_v40  ;;  %vm6154_vm3 = vmor %vm6152_vm1, %vm6153_vm15  ;;  %v6143_v7 = vand.u32 2147483648, %v6100_v33  ;;  %v6141_v5 = vand.u32 2147483647, %v6100_v33 }
0x12ef   : > { %6164 = vperm.xlu0 %6961, %v6115_v55   ;;  %v6149_v36 = vsub.f32 1.0, %v6148_v18  ;;  %vm6137_vm6 = vweird.f32 %v6100_v33  ;;  %vm9491_vm1 = vcmask 1040384  }
0x12f0   : > { %v6144_v52 = vor.u32 1.1754944e-38, %v6143_v7  ;;  %vm6142_vm9 = vcmp.eq.f32.partialorder %v6141_v5, 8.507059e+37 }
0x12f1   : > { %v6150_v19 = vmul.f32 %v7019_v6, %v6149_v36 }
0x12f3   : > { %v6151_v0 = vadd.f32 %v7019_v6, %v6150_v19 }
0x12f4   : > { %v7021_v4 = vpop.eup %7020 }
0x12f5   : > { %v6155_v63 = vsel %vm6154_vm3, %v7019_v6, %v6151_v0  ;;  %v6133_v38 = vmul.f32 %v7021_v4, %v6100_v33  ;;  %vm6138_vm5 = vweird.f32 %v7021_v4 }
0x12f6   : > { %v6160_v44 = vsel %vm6157_vm4, %v6159_v58, %v6155_v63  ;;  %vm6139_vm7 = vmor %vm6137_vm6, %vm6138_vm5 }
0x12f7   : > { %6183 = vperm.xlu1 %6960, %v6160_v44   ;;  %6195 = vrot.lane.b32.xlu0 %v6915_v48, %s9444_s27  ;;  %v6134_v11 = vsub.f32 1.0, %v6133_v38 }
0x12f9   : > { %v6135_v57 = vmul.f32 %v7021_v4, %v6134_v11 }
0x12fb   : > { %v6136_v42 = vadd.f32 %v7021_v4, %v6135_v57 }
0x12fd   : > { %v6140_v51 = vsel %vm6139_vm7, %v7021_v4, %v6136_v42 }
0x12fe   : > { %v6145_v62 = vsel %vm6142_vm9, %v6144_v52, %v6140_v51  ;;  %v9489_v51 = vld [vmem:[#allocation7_spill] sm:$0xff] }
0x12ff   : > { %6178 = vperm.xlu2 %6959, %v6145_v62   ;;  %6197 = vrot.lane.b32.xlu1 %v6916_v49, %s9444_s27 }
0x1300   : > { %6309 = vperm.xlu0 %6961, %v6926_v39  }
0x1307   : > { %6304 = vperm.xlu2 %6959, %v6925_v24   ;;  %6320 = vperm.xlu1 %6960, %v6316_v30  }
0x1308   : > { %6349 = vperm.xlu0 %6961, %v6346_v16  }
0x130f   : > { %6325 = vperm.xlu2 %6959, %v6317_v56   ;;  %6962 = vset.pattern.permute.xlu1 %v9488_v31 }
0x1310   : > { %6365 = vperm.xlu1 %6962, %v6355_v47   ;;  %6963 = vset.pattern.permute.xlu0 %v9488_v31 }
0x1317   : > { %6358 = vperm.xlu2 %6959, %v6355_v47  }
0x1359   : > { %v6170_v21 = vpop.permute.xlu1 %6169  ;;  %v6179_v46 = vpop.permute.xlu2 %6178 }
0x135a   : > { %v6174_v22 = vmul.f32 %v6170_v21, %v9204_v28  ;;  %v6175_v41 = vmul.f32 %v6170_v21, %v9207_v59  ;;  %v6186_v59 = vmul.f32 %v6179_v46, %v9234_v1  ;;  %v6187_v26 = vmul.f32 %v6179_v46, %v9237_v45 }
0x135c   : > { %6267 = vmatpush.msra.mxu2 %v6174_v22  ;;  %6290 = vmatpush.msra.mxu3 %v6175_v41 }
0x1361   : > { %v6165_v14 = vpop.permute.xlu0 %6164  ;;  %v6305_v60 = vpop.permute.xlu2 %6304 }
0x1362   : > { %v6172_v8 = vmul.f32 %v6165_v14, %v9198_v15  ;;  %v6173_v20 = vmul.f32 %v6165_v14, %v9201_v29 }
0x1364   : > { %6268 = vmatpush.msra.mxu2 %v6172_v8  ;;  %6291 = vmatpush.msra.mxu3 %v6173_v20 }
0x1365   : > { %6921 = vmatmul.msk.f32.vlgmr.msra.gmra.mxu2 %vm938_vm2, %v6915_v48  ;;  %6923 = vmatmul.msk.f32.vlgmr.msra.gmra.mxu3 %vm938_vm2, %v6915_v48 }
0x1369   : > { %v6184_v54 = vpop.permute.xlu1 %6183  ;;  %v6196_v15 = vpop.permute.xlu0 %6195 }
0x136a   : > { %v6188_v13 = vmul.f32 %v6184_v54, %v9222_v17  ;;  %v6189_v28 = vmul.f32 %v6184_v54, %v9225_v3  ;;  %v6326_v12 = vpop.permute.xlu2 %6325 }
0x136c   : > { %6217 = vmatpush.msra.mxu0 %v6188_v13  ;;  %6240 = vmatpush.msra.mxu1 %v6189_v28 }
0x136d   : > { %6922 = vmatmul.msk.f32.gmra.mxu2 %vm938_vm2, %v6916_v49  ;;  %6924 = vmatmul.msk.f32.gmra.mxu3 %vm938_vm2, %v6916_v49 }
0x136e   : > { %6218 = vmatpush.msra.mxu0 %v6186_v59  ;;  %6241 = vmatpush.msra.mxu1 %v6187_v26 }
0x136f   : > { %6917 = vmatmul.msk.f32.vlgmr.msra.gmra.mxu0 %vm938_vm2, %v6196_v15  ;;  %6919 = vmatmul.msk.f32.vlgmr.msra.gmra.mxu1 %vm938_vm2, %v6196_v15 }
0x1371   : > { %v6198_v29 = vpop.permute.xlu1 %6197 }
0x1372   : > { %v6310_v2 = vpop.permute.xlu0 %6309  ;;  %v6359_v52 = vpop.permute.xlu2 %6358 }
0x1373   : > { %v6361_v30 = vperm.slane %v6359_v52, 0 }
0x1377   : > { %6918 = vmatmul.msk.f32.gmra.mxu0 %vm938_vm2, %v6198_v29  ;;  %6920 = vmatmul.msk.f32.gmra.mxu1 %vm938_vm2, %v6198_v29 }
0x1379   : > { %v6321_v61 = vpop.permute.xlu1 %6320 }
0x137a   : > { %v6350_v57 = vpop.permute.xlu0 %6349 }
0x137b   : > { %v6352_v49 = vperm.slane %v6350_v57, 0 }
0x1382   : > { %v6366_v48 = vpop.permute.xlu1 %6365 }
0x1383   : > { %v6368_v44 = vperm.slane %v6366_v48, 0 }
0x1385   : > { %v6369_v39 = vmul.f32 %v6368_v44, %v9489_v51 }
0x1387   : > { %v6371_v47 = vperm.slane %v6369_v39, 0  ;;  %v6372_v31 = vperm.slane %v6369_v39, 1 }
0x13e8   : > { %v6270_v17 = vpop.f32.mrf.mxu2  ;;  %v6293_v3 = vpop.f32.mrf.mxu3 }
0x13ec   : > { %v6220_v1 = vpop.f32.mrf.mxu0  ;;  %v6243_v45 = vpop.f32.mrf.mxu1 }
0x13ed   : > { %v6271_v27 = vadd.f32 %v6270_v17, %v6220_v1  ;;  %v6294_v50 = vadd.f32 %v6293_v3, %v6243_v45 }
0x13ef   : > { %v6312_v53 = vadd.f32 %v6305_v60, %v6271_v27  ;;  %v6313_v23 = vadd.f32 %v6305_v60, %v6294_v50 }
0x13f0   : > { %v6273_v25 = vpop.f32.mrf.mxu2  ;;  %v6296_v9 = vpop.f32.mrf.mxu3 }
0x13f1   : > { %v6328_v40 = vmul.f32 %v6321_v61, %v6312_v53  ;;  %v6329_v18 = vmul.f32 %v6321_v61, %v6313_v23 }
0x13f4   : > { %v6223_v43 = vpop.f32.mrf.mxu0  ;;  %v6246_v32 = vpop.f32.mrf.mxu1 }
0x13f5   : > { %v6274_v10 = vadd.f32 %v6273_v25, %v6223_v43  ;;  %v6297_v34 = vadd.f32 %v6296_v9, %v6246_v32 }
0x13f7   : > { %v6314_v6 = vadd.f32 %v6310_v2, %v6274_v10  ;;  %v6315_v33 = vadd.f32 %v6310_v2, %v6297_v34 }
0x13f9   : > { %v6330_v55 = vmul.f32 %v6326_v12, %v6314_v6  ;;  %v6331_v36 = vmul.f32 %v6326_v12, %v6315_v33 }
0x13fb   : > { %v6332_v35 = vadd.f32 %v6330_v55, %v6328_v40  ;;  %v6339_v19 = vadd.f32 %v6331_v36, %v6329_v18 }
0x13fd   : > { %v6333_v37 = vrot.slane %v6332_v35, 4  ;;  %v6340_v0 = vrot.slane %v6339_v19, 4 }
0x13ff   : > { %v6334_v4 = vadd.f32 %v6333_v37, %v6332_v35  ;;  %v6341_v58 = vadd.f32 %v6340_v0, %v6339_v19 }
0x1401   : > { %v6335_v63 = vrot.slane %v6334_v4, 2  ;;  %v6342_v38 = vrot.slane %v6341_v58, 2 }
0x1403   : > { %v6336_v11 = vadd.f32 %v6335_v63, %v6334_v4  ;;  %v6343_v7 = vadd.f32 %v6342_v38, %v6341_v58 }
0x1405   : > { %v6337_v5 = vrot.slane %v6336_v11, 1  ;;  %v6344_v42 = vrot.slane %v6343_v7, 1 }
0x1407   : > { %v6338_v62 = vadd.f32 %v6337_v5, %v6336_v11  ;;  %v6345_v24 = vadd.f32 %v6344_v42, %v6343_v7 }
0x1409   : > { %v6353_v16 = vadd.f32 %v6352_v49, %v6338_v62  ;;  %v6354_v56 = vadd.f32 %v6352_v49, %v6345_v24 }
0x140b   : > { %v6362_v21 = vmul.f32 %v6361_v30, %v6353_v16  ;;  %v6363_v22 = vmul.f32 %v6361_v30, %v6354_v56 }
0x140d   : > { %v6375_v41 = vadd.f32 %v6371_v47, %v6362_v21  ;;  %v6376_v14 = vadd.f32 %v6372_v31, %v6363_v22 }
0x140f   : > { %v6377_v8 = vsub.f32 0.0, %v6375_v41  ;;  %v6378_v20 = vsub.f32 0.0, %v6376_v14 }
0x1411   : > { %v6379_v46 = vmul.f32 1.442695, %v6377_v8  ;;  %v6381_v54 = vmul.f32 1.442695, %v6378_v20 }
0x1413   : > { %7022 = vpow2.f32 %v6379_v46 }
0x1414   : > { %7024 = vpow2.f32 %v6381_v54 }
0x1419   : > { %v7023_v13 = vpop.eup %7022 }
0x141a   : > { %v7025_v28 = vpop.eup %7024  ;;  %v6383_v59 = vadd.f32 1.0, %v7023_v13 }
0x141b   : > { %v6384_v26 = vadd.f32 1.0, %v7025_v28 }
0x141c   : > { %7026 = vrcp.f32 %v6383_v59  ;;  %vm6390_vm10 = vweird.f32 %v6383_v59  ;;  %v6396_v43 = vand.u32 2147483648, %v6383_v59  ;;  %v6394_v32 = vand.u32 2147483647, %v6383_v59 }
0x141d   : > { %7028 = vrcp.f32 %v6384_v26  ;;  %v6411_v27 = vand.u32 2147483648, %v6384_v26  ;;  %v6409_v25 = vand.u32 2147483647, %v6384_v26  ;;  %vm6405_vm12 = vweird.f32 %v6384_v26 }
0x141e   : > { %v6397_v2 = vor.u32 1.1754944e-38, %v6396_v43  ;;  %vm6395_vm15 = vcmp.eq.f32.partialorder %v6394_v32, 8.507059e+37 }
0x141f   : > { %v6412_v23 = vor.u32 1.1754944e-38, %v6411_v27  ;;  %vm6410_vm0 = vcmp.eq.f32.partialorder %v6409_v25, 8.507059e+37 }
0x1422   : > { %v7027_v15 = vpop.eup %7026 }
0x1423   : > { %v7029_v29 = vpop.eup %7028  ;;  %v6386_v17 = vmul.f32 %v7027_v15, %v6383_v59  ;;  %vm6391_vm2 = vweird.f32 %v7027_v15 }
0x1424   : > { %v6401_v3 = vmul.f32 %v7029_v29, %v6384_v26  ;;  %vm6406_vm14 = vweird.f32 %v7029_v29  ;;  %vm6392_vm11 = vmor %vm6390_vm10, %vm6391_vm2 }
0x1425   : > { %v6387_v1 = vsub.f32 1.0, %v6386_v17  ;;  %vm6407_vm8 = vmor %vm6405_vm12, %vm6406_vm14 }
0x1426   : > { %v6402_v45 = vsub.f32 1.0, %v6401_v3 }
0x1427   : > { %v6388_v60 = vmul.f32 %v7027_v15, %v6387_v1 }
0x1428   : > { %v6403_v50 = vmul.f32 %v7029_v29, %v6402_v45 }
0x1429   : > { %v6389_v9 = vadd.f32 %v7027_v15, %v6388_v60 }
0x142a   : > { %v6404_v53 = vadd.f32 %v7029_v29, %v6403_v50 }
0x142b   : > { %v6393_v10 = vsel %vm6392_vm11, %v7027_v15, %v6389_v9 }
0x142c   : > { %v6408_v34 = vsel %vm6407_vm8, %v7029_v29, %v6404_v53  ;;  %v6398_v33 = vsel %vm6395_vm15, %v6397_v2, %v6393_v10 }
0x142d   : > { %v6413_v61 = vsel %vm6410_vm0, %v6412_v23, %v6408_v34 }
0x142e   : > { %v6417_v6 = vrot.slane %v6413_v61, 7 }
0x1430   : > { %v6418_v12 = vsel %vm9491_vm1, %v6398_v33, %v6417_v6 }
0x1431   : > { %6424 = vst.msk [vmem:[%s647_s29] sm:$0x3] %vm7236_vm13, %v6418_v12 }
0x1432 PF: > { %s9493_s24 = sld [smem:[#allocation3_spill]] }
0x1438   : > { %s33_s23 = sadd.s32 1, %s9493_s24  }
0x1439   : > { %p30_p4 = scmp.ge.s32.totalorder %s33_s23, 4  }
0x143b   :  { %32 = sbr.rel (!%p30_p4) target bundleno = 9 (0x9), region = 216 }

</bundles_post_ra>
